<compile_context>
chip_gen: v5e
topology: v5e:2x2
jax: 0.10.0
libtpu: 0.0.40
codegen_flags: <defaults>
</compile_context>

<pallas_src>
import functools

import jax
import jax.numpy as jnp
from jax import lax
from jax.experimental import pallas as pl
from jax.experimental.pallas import tpu as pltpu

TB = 8  # samples per grid step; matches the (8, 128) f32 vreg tile


# ---------------------------------------------------------------------------
# Kernel 1: conv1 + bias + ReLU + 2x2 max-pool as one matmul per TB-sample block
# ---------------------------------------------------------------------------
def _conv1_relu_pool_kernel(p_ref, w_ref, b_ref, o_ref):
    """p_ref: (4*TB*HW, 9) rows ordered (phase, sample, pos); w_ref: (9, 32);
    b_ref: (1, 32); o_ref: (TB*HW, 32) rows ordered (sample, pos)."""
    r = o_ref.shape[0]                                    # TB*HW pooled rows
    z = jnp.dot(p_ref[...], w_ref[...], preferred_element_type=jnp.float32)
    m = jnp.maximum(jnp.maximum(z[0 * r:1 * r], z[1 * r:2 * r]),
                    jnp.maximum(z[2 * r:3 * r], z[3 * r:4 * r]))   # 2x2 max-pool
    # relu(max(z)+b) == max(relu(z+b)): b is phase-constant, relu is monotone.
    o_ref[...] = jnp.maximum(m + b_ref[...], 0.0).astype(o_ref.dtype)


def conv1_relu_pool(p1, w, b, n_blocks, rows_out_per_block):
    c = w.shape[1]
    return pl.pallas_call(
        _conv1_relu_pool_kernel,
        out_shape=jax.ShapeDtypeStruct((n_blocks * rows_out_per_block, c),
                                       jnp.bfloat16),
        grid=(n_blocks,),
        in_specs=[
            pl.BlockSpec((4 * rows_out_per_block, p1.shape[1]), lambda g: (g, 0)),
            pl.BlockSpec(w.shape, lambda g: (0, 0)),
            pl.BlockSpec(b.shape, lambda g: (0, 0)),
        ],
        out_specs=pl.BlockSpec((rows_out_per_block, c), lambda g: (g, 0)),
        compiler_params=pltpu.CompilerParams(dimension_semantics=("parallel",)),
    )(p1, w, b)


# ---------------------------------------------------------------------------
# Kernel 2: conv2 + bias + ReLU + pool + flatten + fc1 + ReLU + fc2, TB samples
# ---------------------------------------------------------------------------
def _conv2_mlp_kernel(p_ref, w2_ref, b2_ref, wfc1_ref, bfc1_ref,
                      wfc2_ref, bfc2_ref, o_ref, feat_ref):
    """Fused second half of the network, TB samples per grid step.

    p_ref:    (4*S*TB, 9*C1) bf16 conv2 patches, rows ordered (phase, pos, sample)
    w2_ref:   (9*C1, C2) bf16;  b2_ref: (1, C2) f32
    wfc1_ref: (S*C2, H) bf16, rows pre-permuted to (pos, channel) order
    wfc2_ref: (H, 128) bf16, zero-padded from the real 2 output columns
    o_ref:    (TB, 128) f32
    feat_ref: (TB, S*C2) f32 VMEM scratch: lane-dense flattened features
    """
    tb = o_ref.shape[0]
    c2 = w2_ref.shape[1]                                  # 64 conv2 channels
    s = p_ref.shape[0] // (4 * tb)                        # 49 pooled positions
    r = s * tb                                            # rows per pooling phase

    # conv2: one (4*S*TB, 288) @ (288, 64) MXU matmul, f32 accumulate.
    z = jnp.dot(p_ref[...], w2_ref[...], preferred_element_type=jnp.float32)
    m = jnp.maximum(jnp.maximum(z[0 * r:1 * r], z[1 * r:2 * r]),
                    jnp.maximum(z[2 * r:3 * r], z[3 * r:4 * r]))   # (S*TB, C2)
    y2 = jnp.maximum(m + b2_ref[...], 0.0)                # rows ordered (pos, sample)

    # Flatten to lane-dense (TB, S*C2): each store is a contiguous,
    # sublane-aligned (TB, C2) slab (pos i -> lane offset i*C2).
    for i in range(s):
        feat_ref[:, i * c2:(i + 1) * c2] = y2[i * tb:(i + 1) * tb, :]

    # fc1: single (TB, 3136) @ (3136, 128) matmul (bf16 operands, f32 acc).
    h = jnp.dot(feat_ref[...].astype(wfc1_ref.dtype), wfc1_ref[...],
                preferred_element_type=jnp.float32)
    h = jnp.maximum(h + bfc1_ref[...], 0.0)
    # TODO(synk): nn.Dropout(0.3) is identity in eval mode; training-mode dropout not implemented.
    o_ref[...] = (jnp.dot(h.astype(wfc2_ref.dtype), wfc2_ref[...],
                          preferred_element_type=jnp.float32)
                  + bfc2_ref[...]).astype(o_ref.dtype)


def conv2_mlp(p2r, w2, b2, wfc1p, bfc1, wfc2p, bfc2p, n_blocks, tb):
    rows = p2r.shape[0] // n_blocks                       # 4*49*TB
    n_out_pad = wfc2p.shape[1]
    feat_dim = wfc1p.shape[0]                             # 3136
    return pl.pallas_call(
        _conv2_mlp_kernel,
        out_shape=jax.ShapeDtypeStruct((n_blocks * tb, n_out_pad), jnp.float32),
        grid=(n_blocks,),
        in_specs=[
            pl.BlockSpec((rows, p2r.shape[1]), lambda g: (g, 0)),
            pl.BlockSpec(w2.shape, lambda g: (0, 0)),
            pl.BlockSpec(b2.shape, lambda g: (0, 0)),
            pl.BlockSpec(wfc1p.shape, lambda g: (0, 0)),
            pl.BlockSpec(bfc1.shape, lambda g: (0, 0)),
            pl.BlockSpec(wfc2p.shape, lambda g: (0, 0)),
            pl.BlockSpec(bfc2p.shape, lambda g: (0, 0)),
        ],
        out_specs=pl.BlockSpec((tb, n_out_pad), lambda g: (g, 0)),
        scratch_shapes=[pltpu.VMEM((tb, feat_dim), jnp.float32)],
        compiler_params=pltpu.CompilerParams(dimension_semantics=("parallel",)),
    )(p2r, w2, b2, wfc1p, bfc1, wfc2p, bfc2p)


# ---------------------------------------------------------------------------
# Plain-JAX glue: im2col + pooling-phase decomposition (pure data movement)
# ---------------------------------------------------------------------------
def _im2col_pool_phases(x):
    """x: (B, H, W, C) NHWC -> (B, 4, (H//2)*(W//2), 9*C) patch tensor."""
    B, H, W, C = x.shape
    xp = jnp.pad(x, ((0, 0), (1, 1), (1, 1), (0, 0)))
    pats = jnp.stack(
        [xp[:, ky:ky + H, kx:kx + W, :] for ky in range(3) for kx in range(3)],
        axis=3,
    ).reshape(B, H, W, 9 * C)                    # feature = (ky*3+kx)*C + ci
    Hh, Wh = H // 2, W // 2
    p4 = jnp.stack(
        [pats[:, dy::2, dx::2, :] for dy in range(2) for dx in range(2)],
        axis=1,
    )                                            # (B, 4, Hh, Wh, 9C)
    return p4.reshape(B, 4, Hh * Wh, 9 * C)


# ---------------------------------------------------------------------------
# One-time parameter preprocessing (hoisted out of the forward pass)
# ---------------------------------------------------------------------------
def preprocess_params(params, n_out_pad=128):
    # conv1 weights stay f32 (tiny; MXU default precision already bf16-rate).
    w1 = params["w_conv1"].reshape(9 * 1, 32).astype(jnp.float32)
    b1 = params["b_conv1"][None, :].astype(jnp.float32)
    w2 = params["w_conv2"].reshape(9 * 32, 64).astype(jnp.bfloat16)
    b2 = params["b_conv2"][None, :].astype(jnp.float32)
    # fc1 rows: PyTorch flatten order (c*49 + pos) -> kernel order (pos*64 + c).
    wfc1p = (params["w_fc1"].reshape(64, 49, 128)
             .transpose(1, 0, 2).reshape(49 * 64, 128).astype(jnp.bfloat16))
    bfc1 = params["b_fc1"][None, :].astype(jnp.float32)
    w_fc2 = params["w_fc2"]
    n_out = w_fc2.shape[1]
    wfc2p = (jnp.zeros((w_fc2.shape[0], n_out_pad), jnp.float32)
             .at[:, :n_out].set(w_fc2).astype(jnp.bfloat16))
    bfc2p = (jnp.zeros((1, n_out_pad), jnp.float32)
             .at[:, :n_out].set(params["b_fc2"][None, :]))
    return {"w1": w1, "b1": b1, "w2": w2, "b2": b2,
            "wfc1p": wfc1p, "bfc1": bfc1, "wfc2p": wfc2p, "bfc2p": bfc2p}


# ---------------------------------------------------------------------------
# Forward pass
# ---------------------------------------------------------------------------
def simple_cnn_forward(x_nchw, pp, n_out=2):
    B = x_nchw.shape[0]
    G = -(-B // TB)                                           # ceil(B / TB)
    B_pad = G * TB
    if B_pad != B:
        x_nchw = jnp.pad(x_nchw, ((0, B_pad - B), (0, 0), (0, 0), (0, 0)))
    x = jnp.transpose(x_nchw, (0, 2, 3, 1))                   # (B_pad,28,28,1)

    # conv1 + ReLU + pool: rows ordered (block, phase, sample, pos).
    p4 = _im2col_pool_phases(x)                               # (B_pad,4,196,9)
    p1 = (p4.reshape(G, TB, 4, 196, 9)
            .transpose(0, 2, 1, 3, 4)                         # (G,4,TB,196,9)
            .reshape(G * 4 * TB * 196, 9))
    y1 = conv1_relu_pool(p1, pp["w1"], pp["b1"], G, TB * 196)  # (B_pad*196,32) bf16
    y1 = y1.reshape(B_pad, 14, 14, 32)

    # conv2 + ReLU + pool + flatten + fc1 + ReLU + fc2 (fused, TB per step).
    p4b = _im2col_pool_phases(y1)                             # (B_pad,4,49,288) bf16
    p2r = (p4b.reshape(G, TB, 4, 49, 288)
              .transpose(0, 2, 3, 1, 4)                       # (G,4,49,TB,288)
              .reshape(G * 4 * 49 * TB, 288))
    out = conv2_mlp(p2r, pp["w2"], pp["b2"], pp["wfc1p"], pp["bfc1"],
                    pp["wfc2p"], pp["bfc2p"], G, TB)          # (B_pad, 128)
    return out[:B, :n_out]


# ---------------------------------------------------------------------------
# Pure-JAX reference (same math via XLA conv/reduce_window) for verification
# ---------------------------------------------------------------------------
def ref_forward(x_nchw, params):
    w1 = jnp.transpose(params["w_conv1"], (3, 2, 0, 1))          # OIHW
    y = lax.conv_general_dilated(x_nchw, w1, (1, 1), "SAME",
                                 dimension_numbers=("NCHW", "OIHW", "NCHW"))
    y = jnp.maximum(y + params["b_conv1"][None, :, None, None], 0.0)
    y = lax.reduce_window(y, -jnp.inf, lax.max, (1, 1, 2, 2), (1, 1, 2, 2), "VALID")
    w2 = jnp.transpose(params["w_conv2"], (3, 2, 0, 1))
    y = lax.conv_general_dilated(y, w2, (1, 1), "SAME",
                                 dimension_numbers=("NCHW", "OIHW", "NCHW"))
    y = jnp.maximum(y + params["b_conv2"][None, :, None, None], 0.0)
    y = lax.reduce_window(y, -jnp.inf, lax.max, (1, 1, 2, 2), (1, 1, 2, 2), "VALID")
    f = y.reshape(y.shape[0], -1)
    h = jnp.maximum(f @ params["w_fc1"] + params["b_fc1"], 0.0)
    return h @ params["w_fc2"] + params["b_fc2"]


def init_params(key):
    ks = jax.random.split(key, 8)
    s = 0.05
    return {
        "w_conv1": s * jax.random.normal(ks[0], (3, 3, 1, 32), jnp.float32),
        "b_conv1": s * jax.random.normal(ks[1], (32,), jnp.float32),
        "w_conv2": s * jax.random.normal(ks[2], (3, 3, 32, 64), jnp.float32),
        "b_conv2": s * jax.random.normal(ks[3], (64,), jnp.float32),
        "w_fc1":   s * jax.random.normal(ks[4], (64 * 7 * 7, 128), jnp.float32),
        "b_fc1":   s * jax.random.normal(ks[5], (128,), jnp.float32),
        "w_fc2":   s * jax.random.normal(ks[6], (128, 2), jnp.float32),
        "b_fc2":   s * jax.random.normal(ks[7], (2,), jnp.float32),
    }


if __name__ == "__main__":
    key = jax.random.PRNGKey(0)
    pkey, xkey = jax.random.split(key)
    params = init_params(pkey)
    # MNIST-shaped input (fc1 requires 28x28 -> 7x7 after two pools); batch = 2.
    x = jax.random.normal(xkey, (2, 1, 28, 28), jnp.float32)     # NCHW like PyTorch

    pp = preprocess_params(params)            # one-time weight relayout / cast
    fwd = jax.jit(simple_cnn_forward, static_argnames=("n_out",))
    out = fwd(x, pp, n_out=2)
    out = jax.block_until_ready(out)
    assert out.shape == (2, 2), out.shape

    ref = ref_forward(x, params)
    err = float(jnp.max(jnp.abs(out - ref)))
    assert err < 2e-2, f"max abs err vs reference: {err}"

    print("KERNEL_OK")
</pallas_src>

<mosaic_0001>
module attributes {stable_mosaic.version = 11 : i64} {
  func.func @_conv1_relu_pool_kernel(%arg0: i32, %arg1: memref<6272x9xf32, #tpu.memory_space<vmem>>, %arg2: memref<9x32xf32, #tpu.memory_space<vmem>>, %arg3: memref<1x32xf32, #tpu.memory_space<vmem>>, %arg4: memref<1568x32xbf16, #tpu.memory_space<vmem>>) attributes {dimension_semantics = [#tpu.dimension_semantics<parallel>], iteration_bounds = array<i64: 1>, scalar_prefetch = 0 : i64, scratch_operands = 0 : i64, tpu.core_type = #tpu.core_type<tc>, window_params = [{transform_indices = @transform_0, window_bounds = array<i64: 6272, 9>}, {pipeline_mode = #tpu.pipeline_mode<synchronous>, transform_indices = @transform_1, window_bounds = array<i64: 9, 32>}, {pipeline_mode = #tpu.pipeline_mode<synchronous>, transform_indices = @transform_2, window_bounds = array<i64: 1, 32>}, {transform_indices = @transform_3, window_bounds = array<i64: 1568, 32>}]} {
    %c0 = arith.constant 0 : index
    %c0_0 = arith.constant 0 : index
    %0 = vector.load %arg1[%c0, %c0_0] : memref<6272x9xf32, #tpu.memory_space<vmem>>, vector<6272x9xf32>
    %c0_1 = arith.constant 0 : index
    %c0_2 = arith.constant 0 : index
    %1 = vector.load %arg2[%c0_1, %c0_2] : memref<9x32xf32, #tpu.memory_space<vmem>>, vector<9x32xf32>
    %cst = arith.constant dense<0.000000e+00> : vector<6272x32xf32>
    %2 = tpu.matmul %0, %1, %cst {dimension_numbers = #tpu.dot_dimension_numbers<[1], [0], [0], [1], [0, 0, 1, 1], [], []>} : vector<6272x9xf32>, vector<9x32xf32>, vector<6272x32xf32> -> vector<6272x32xf32>
    %3 = vector.extract_strided_slice %2 {offsets = [0, 0], sizes = [1568, 32], strides = [1, 1]} : vector<6272x32xf32> to vector<1568x32xf32>
    %4 = vector.extract_strided_slice %2 {offsets = [1568, 0], sizes = [1568, 32], strides = [1, 1]} : vector<6272x32xf32> to vector<1568x32xf32>
    %5 = arith.maximumf %3, %4 : vector<1568x32xf32>
    %6 = vector.extract_strided_slice %2 {offsets = [3136, 0], sizes = [1568, 32], strides = [1, 1]} : vector<6272x32xf32> to vector<1568x32xf32>
    %7 = vector.extract_strided_slice %2 {offsets = [4704, 0], sizes = [1568, 32], strides = [1, 1]} : vector<6272x32xf32> to vector<1568x32xf32>
    %8 = arith.maximumf %6, %7 : vector<1568x32xf32>
    %9 = arith.maximumf %5, %8 : vector<1568x32xf32>
    %c0_3 = arith.constant 0 : index
    %c0_4 = arith.constant 0 : index
    %10 = vector.load %arg3[%c0_3, %c0_4] : memref<1x32xf32, #tpu.memory_space<vmem>>, vector<1x32xf32>
    %11 = vector.broadcast %10 : vector<1x32xf32> to vector<1568x32xf32>
    %12 = arith.addf %9, %11 : vector<1568x32xf32>
    %cst_5 = arith.constant 0.000000e+00 : f32
    %13 = vector.broadcast %cst_5 : f32 to vector<1568x32xf32>
    %14 = arith.maximumf %12, %13 : vector<1568x32xf32>
    %15 = arith.truncf %14 : vector<1568x32xf32> to vector<1568x32xbf16>
    %c0_6 = arith.constant 0 : index
    %c0_7 = arith.constant 0 : index
    %16 = vector.load %arg4[%c0_6, %c0_7] : memref<1568x32xbf16, #tpu.memory_space<vmem>>, vector<1568x32xbf16>
    tpu.vector_store %arg4[%c0_6, %c0_7], %15 {strides = array<i32>} : memref<1568x32xbf16, #tpu.memory_space<vmem>>, vector<1568x32xbf16>,
    return
  }
  func.func @transform_0(%arg0: i32) -> (i32, i32) {
    %c0_i32 = arith.constant 0 : i32
    %c0_i32_0 = arith.constant 0 : i32
    return %arg0, %c0_i32 : i32, i32
  }
  func.func @transform_1(%arg0: i32) -> (i32, i32) {
    %c0_i32 = arith.constant 0 : i32
    %c0_i32_0 = arith.constant 0 : i32
    %c0_i32_1 = arith.constant 0 : i32
    return %c0_i32, %c0_i32_0 : i32, i32
  }
  func.func @transform_2(%arg0: i32) -> (i32, i32) {
    %c0_i32 = arith.constant 0 : i32
    %c0_i32_0 = arith.constant 0 : i32
    %c0_i32_1 = arith.constant 0 : i32
    return %c0_i32, %c0_i32_0 : i32, i32
  }
  func.func @transform_3(%arg0: i32) -> (i32, i32) {
    %c0_i32 = arith.constant 0 : i32
    %c0_i32_0 = arith.constant 0 : i32
    return %arg0, %c0_i32 : i32, i32
  }
}

module attributes {stable_mosaic.version = 11 : i64} {
  func.func @_conv2_mlp_kernel(%arg0: i32, %arg1: memref<1568x288xbf16, #tpu.memory_space<vmem>>, %arg2: memref<288x64xbf16, #tpu.memory_space<vmem>>, %arg3: memref<1x64xf32, #tpu.memory_space<vmem>>, %arg4: memref<3136x128xbf16, #tpu.memory_space<vmem>>, %arg5: memref<1x128xf32, #tpu.memory_space<vmem>>, %arg6: memref<128x128xbf16, #tpu.memory_space<vmem>>, %arg7: memref<1x128xf32, #tpu.memory_space<vmem>>, %arg8: memref<8x128xf32, #tpu.memory_space<vmem>>, %arg9: memref<8x3136xf32, #tpu.memory_space<vmem>>) attributes {dimension_semantics = [#tpu.dimension_semantics<parallel>], iteration_bounds = array<i64: 1>, scalar_prefetch = 0 : i64, scratch_operands = 1 : i64, tpu.core_type = #tpu.core_type<tc>, window_params = [{transform_indices = @transform_0, window_bounds = array<i64: 1568, 288>}, {pipeline_mode = #tpu.pipeline_mode<synchronous>, transform_indices = @transform_1, window_bounds = array<i64: 288, 64>}, {pipeline_mode = #tpu.pipeline_mode<synchronous>, transform_indices = @transform_2, window_bounds = array<i64: 1, 64>}, {pipeline_mode = #tpu.pipeline_mode<synchronous>, transform_indices = @transform_3, window_bounds = array<i64: 3136, 128>}, {pipeline_mode = #tpu.pipeline_mode<synchronous>, transform_indices = @transform_4, window_bounds = array<i64: 1, 128>}, {pipeline_mode = #tpu.pipeline_mode<synchronous>, transform_indices = @transform_5, window_bounds = array<i64: 128, 128>}, {pipeline_mode = #tpu.pipeline_mode<synchronous>, transform_indices = @transform_6, window_bounds = array<i64: 1, 128>}, {transform_indices = @transform_7, window_bounds = array<i64: 8, 128>}]} {
    %c0 = arith.constant 0 : index
    %c0_0 = arith.constant 0 : index
    %0 = vector.load %arg1[%c0, %c0_0] : memref<1568x288xbf16, #tpu.memory_space<vmem>>, vector<1568x288xbf16>
    %c0_1 = arith.constant 0 : index
    %c0_2 = arith.constant 0 : index
    %1 = vector.load %arg2[%c0_1, %c0_2] : memref<288x64xbf16, #tpu.memory_space<vmem>>, vector<288x64xbf16>
    %cst = arith.constant dense<0.000000e+00> : vector<1568x64xf32>
    %2 = tpu.matmul %0, %1, %cst {dimension_numbers = #tpu.dot_dimension_numbers<[1], [0], [0], [1], [0, 0, 1, 1], [], []>} : vector<1568x288xbf16>, vector<288x64xbf16>, vector<1568x64xf32> -> vector<1568x64xf32>
    %3 = vector.extract_strided_slice %2 {offsets = [0, 0], sizes = [392, 64], strides = [1, 1]} : vector<1568x64xf32> to vector<392x64xf32>
    %4 = vector.extract_strided_slice %2 {offsets = [392, 0], sizes = [392, 64], strides = [1, 1]} : vector<1568x64xf32> to vector<392x64xf32>
    %5 = arith.maximumf %3, %4 : vector<392x64xf32>
    %6 = vector.extract_strided_slice %2 {offsets = [784, 0], sizes = [392, 64], strides = [1, 1]} : vector<1568x64xf32> to vector<392x64xf32>
    %7 = vector.extract_strided_slice %2 {offsets = [1176, 0], sizes = [392, 64], strides = [1, 1]} : vector<1568x64xf32> to vector<392x64xf32>
    %8 = arith.maximumf %6, %7 : vector<392x64xf32>
    %9 = arith.maximumf %5, %8 : vector<392x64xf32>
    %c0_3 = arith.constant 0 : index
    %c0_4 = arith.constant 0 : index
    %10 = vector.load %arg3[%c0_3, %c0_4] : memref<1x64xf32, #tpu.memory_space<vmem>>, vector<1x64xf32>
    %11 = vector.broadcast %10 : vector<1x64xf32> to vector<392x64xf32>
    %12 = arith.addf %9, %11 : vector<392x64xf32>
    %cst_5 = arith.constant 0.000000e+00 : f32
    %13 = vector.broadcast %cst_5 : f32 to vector<392x64xf32>
    %14 = arith.maximumf %12, %13 : vector<392x64xf32>
    %15 = vector.extract_strided_slice %14 {offsets = [0, 0], sizes = [8, 64], strides = [1, 1]} : vector<392x64xf32> to vector<8x64xf32>
    %c0_6 = arith.constant 0 : index
    %c0_7 = arith.constant 0 : index
    %16 = vector.load %arg9[%c0_6, %c0_7] : memref<8x3136xf32, #tpu.memory_space<vmem>>, vector<8x64xf32>
    tpu.vector_store %arg9[%c0_6, %c0_7], %15 {strides = array<i32>} : memref<8x3136xf32, #tpu.memory_space<vmem>>, vector<8x64xf32>,
    %17 = vector.extract_strided_slice %14 {offsets = [8, 0], sizes = [8, 64], strides = [1, 1]} : vector<392x64xf32> to vector<8x64xf32>
    %c0_8 = arith.constant 0 : index
    %c64 = arith.constant 64 : index
    %18 = vector.load %arg9[%c0_8, %c64] : memref<8x3136xf32, #tpu.memory_space<vmem>>, vector<8x64xf32>
    tpu.vector_store %arg9[%c0_8, %c64], %17 {strides = array<i32>} : memref<8x3136xf32, #tpu.memory_space<vmem>>, vector<8x64xf32>,
    %19 = vector.extract_strided_slice %14 {offsets = [16, 0], sizes = [8, 64], strides = [1, 1]} : vector<392x64xf32> to vector<8x64xf32>
    %c0_9 = arith.constant 0 : index
    %c128 = arith.constant 128 : index
    %20 = vector.load %arg9[%c0_9, %c128] : memref<8x3136xf32, #tpu.memory_space<vmem>>, vector<8x64xf32>
    tpu.vector_store %arg9[%c0_9, %c128], %19 {strides = array<i32>} : memref<8x3136xf32, #tpu.memory_space<vmem>>, vector<8x64xf32>,
    %21 = vector.extract_strided_slice %14 {offsets = [24, 0], sizes = [8, 64], strides = [1, 1]} : vector<392x64xf32> to vector<8x64xf32>
    %c0_10 = arith.constant 0 : index
    %c192 = arith.constant 192 : index
    %22 = vector.load %arg9[%c0_10, %c192] : memref<8x3136xf32, #tpu.memory_space<vmem>>, vector<8x64xf32>
    tpu.vector_store %arg9[%c0_10, %c192], %21 {strides = array<i32>} : memref<8x3136xf32, #tpu.memory_space<vmem>>, vector<8x64xf32>,
    %23 = vector.extract_strided_slice %14 {offsets = [32, 0], sizes = [8, 64], strides = [1, 1]} : vector<392x64xf32> to vector<8x64xf32>
    %c0_11 = arith.constant 0 : index
    %c256 = arith.constant 256 : index
    %24 = vector.load %arg9[%c0_11, %c256] : memref<8x3136xf32, #tpu.memory_space<vmem>>, vector<8x64xf32>
    tpu.vector_store %arg9[%c0_11, %c256], %23 {strides = array<i32>} : memref<8x3136xf32, #tpu.memory_space<vmem>>, vector<8x64xf32>,
    %25 = vector.extract_strided_slice %14 {offsets = [40, 0], sizes = [8, 64], strides = [1, 1]} : vector<392x64xf32> to vector<8x64xf32>
    %c0_12 = arith.constant 0 : index
    %c320 = arith.constant 320 : index
    %26 = vector.load %arg9[%c0_12, %c320] : memref<8x3136xf32, #tpu.memory_space<vmem>>, vector<8x64xf32>
    tpu.vector_store %arg9[%c0_12, %c320], %25 {strides = array<i32>} : memref<8x3136xf32, #tpu.memory_space<vmem>>, vector<8x64xf32>,
    %27 = vector.extract_strided_slice %14 {offsets = [48, 0], sizes = [8, 64], strides = [1, 1]} : vector<392x64xf32> to vector<8x64xf32>
    %c0_13 = arith.constant 0 : index
    %c384 = arith.constant 384 : index
    %28 = vector.load %arg9[%c0_13, %c384] : memref<8x3136xf32, #tpu.memory_space<vmem>>, vector<8x64xf32>
    tpu.vector_store %arg9[%c0_13, %c384], %27 {strides = array<i32>} : memref<8x3136xf32, #tpu.memory_space<vmem>>, vector<8x64xf32>,
    %29 = vector.extract_strided_slice %14 {offsets = [56, 0], sizes = [8, 64], strides = [1, 1]} : vector<392x64xf32> to vector<8x64xf32>
    %c0_14 = arith.constant 0 : index
    %c448 = arith.constant 448 : index
    %30 = vector.load %arg9[%c0_14, %c448] : memref<8x3136xf32, #tpu.memory_space<vmem>>, vector<8x64xf32>
    tpu.vector_store %arg9[%c0_14, %c448], %29 {strides = array<i32>} : memref<8x3136xf32, #tpu.memory_space<vmem>>, vector<8x64xf32>,
    %31 = vector.extract_strided_slice %14 {offsets = [64, 0], sizes = [8, 64], strides = [1, 1]} : vector<392x64xf32> to vector<8x64xf32>
    %c0_15 = arith.constant 0 : index
    %c512 = arith.constant 512 : index
    %32 = vector.load %arg9[%c0_15, %c512] : memref<8x3136xf32, #tpu.memory_space<vmem>>, vector<8x64xf32>
    tpu.vector_store %arg9[%c0_15, %c512], %31 {strides = array<i32>} : memref<8x3136xf32, #tpu.memory_space<vmem>>, vector<8x64xf32>,
    %33 = vector.extract_strided_slice %14 {offsets = [72, 0], sizes = [8, 64], strides = [1, 1]} : vector<392x64xf32> to vector<8x64xf32>
    %c0_16 = arith.constant 0 : index
    %c576 = arith.constant 576 : index
    %34 = vector.load %arg9[%c0_16, %c576] : memref<8x3136xf32, #tpu.memory_space<vmem>>, vector<8x64xf32>
    tpu.vector_store %arg9[%c0_16, %c576], %33 {strides = array<i32>} : memref<8x3136xf32, #tpu.memory_space<vmem>>, vector<8x64xf32>,
    %35 = vector.extract_strided_slice %14 {offsets = [80, 0], sizes = [8, 64], strides = [1, 1]} : vector<392x64xf32> to vector<8x64xf32>
    %c0_17 = arith.constant 0 : index
    %c640 = arith.constant 640 : index
    %36 = vector.load %arg9[%c0_17, %c640] : memref<8x3136xf32, #tpu.memory_space<vmem>>, vector<8x64xf32>
    tpu.vector_store %arg9[%c0_17, %c640], %35 {strides = array<i32>} : memref<8x3136xf32, #tpu.memory_space<vmem>>, vector<8x64xf32>,
    %37 = vector.extract_strided_slice %14 {offsets = [88, 0], sizes = [8, 64], strides = [1, 1]} : vector<392x64xf32> to vector<8x64xf32>
    %c0_18 = arith.constant 0 : index
    %c704 = arith.constant 704 : index
    %38 = vector.load %arg9[%c0_18, %c704] : memref<8x3136xf32, #tpu.memory_space<vmem>>, vector<8x64xf32>
    tpu.vector_store %arg9[%c0_18, %c704], %37 {strides = array<i32>} : memref<8x3136xf32, #tpu.memory_space<vmem>>, vector<8x64xf32>,
    %39 = vector.extract_strided_slice %14 {offsets = [96, 0], sizes = [8, 64], strides = [1, 1]} : vector<392x64xf32> to vector<8x64xf32>
    %c0_19 = arith.constant 0 : index
    %c768 = arith.constant 768 : index
    %40 = vector.load %arg9[%c0_19, %c768] : memref<8x3136xf32, #tpu.memory_space<vmem>>, vector<8x64xf32>
    tpu.vector_store %arg9[%c0_19, %c768], %39 {strides = array<i32>} : memref<8x3136xf32, #tpu.memory_space<vmem>>, vector<8x64xf32>,
    %41 = vector.extract_strided_slice %14 {offsets = [104, 0], sizes = [8, 64], strides = [1, 1]} : vector<392x64xf32> to vector<8x64xf32>
    %c0_20 = arith.constant 0 : index
    %c832 = arith.constant 832 : index
    %42 = vector.load %arg9[%c0_20, %c832] : memref<8x3136xf32, #tpu.memory_space<vmem>>, vector<8x64xf32>
    tpu.vector_store %arg9[%c0_20, %c832], %41 {strides = array<i32>} : memref<8x3136xf32, #tpu.memory_space<vmem>>, vector<8x64xf32>,
    %43 = vector.extract_strided_slice %14 {offsets = [112, 0], sizes = [8, 64], strides = [1, 1]} : vector<392x64xf32> to vector<8x64xf32>
    %c0_21 = arith.constant 0 : index
    %c896 = arith.constant 896 : index
    %44 = vector.load %arg9[%c0_21, %c896] : memref<8x3136xf32, #tpu.memory_space<vmem>>, vector<8x64xf32>
    tpu.vector_store %arg9[%c0_21, %c896], %43 {strides = array<i32>} : memref<8x3136xf32, #tpu.memory_space<vmem>>, vector<8x64xf32>,
    %45 = vector.extract_strided_slice %14 {offsets = [120, 0], sizes = [8, 64], strides = [1, 1]} : vector<392x64xf32> to vector<8x64xf32>
    %c0_22 = arith.constant 0 : index
    %c960 = arith.constant 960 : index
    %46 = vector.load %arg9[%c0_22, %c960] : memref<8x3136xf32, #tpu.memory_space<vmem>>, vector<8x64xf32>
    tpu.vector_store %arg9[%c0_22, %c960], %45 {strides = array<i32>} : memref<8x3136xf32, #tpu.memory_space<vmem>>, vector<8x64xf32>,
    %47 = vector.extract_strided_slice %14 {offsets = [128, 0], sizes = [8, 64], strides = [1, 1]} : vector<392x64xf32> to vector<8x64xf32>
    %c0_23 = arith.constant 0 : index
    %c1024 = arith.constant 1024 : index
    %48 = vector.load %arg9[%c0_23, %c1024] : memref<8x3136xf32, #tpu.memory_space<vmem>>, vector<8x64xf32>
    tpu.vector_store %arg9[%c0_23, %c1024], %47 {strides = array<i32>} : memref<8x3136xf32, #tpu.memory_space<vmem>>, vector<8x64xf32>,
    %49 = vector.extract_strided_slice %14 {offsets = [136, 0], sizes = [8, 64], strides = [1, 1]} : vector<392x64xf32> to vector<8x64xf32>
    %c0_24 = arith.constant 0 : index
    %c1088 = arith.constant 1088 : index
    %50 = vector.load %arg9[%c0_24, %c1088] : memref<8x3136xf32, #tpu.memory_space<vmem>>, vector<8x64xf32>
    tpu.vector_store %arg9[%c0_24, %c1088], %49 {strides = array<i32>} : memref<8x3136xf32, #tpu.memory_space<vmem>>, vector<8x64xf32>,
    %51 = vector.extract_strided_slice %14 {offsets = [144, 0], sizes = [8, 64], strides = [1, 1]} : vector<392x64xf32> to vector<8x64xf32>
    %c0_25 = arith.constant 0 : index
    %c1152 = arith.constant 1152 : index
    %52 = vector.load %arg9[%c0_25, %c1152] : memref<8x3136xf32, #tpu.memory_space<vmem>>, vector<8x64xf32>
    tpu.vector_store %arg9[%c0_25, %c1152], %51 {strides = array<i32>} : memref<8x3136xf32, #tpu.memory_space<vmem>>, vector<8x64xf32>,
    %53 = vector.extract_strided_slice %14 {offsets = [152, 0], sizes = [8, 64], strides = [1, 1]} : vector<392x64xf32> to vector<8x64xf32>
    %c0_26 = arith.constant 0 : index
    %c1216 = arith.constant 1216 : index
    %54 = vector.load %arg9[%c0_26, %c1216] : memref<8x3136xf32, #tpu.memory_space<vmem>>, vector<8x64xf32>
    tpu.vector_store %arg9[%c0_26, %c1216], %53 {strides = array<i32>} : memref<8x3136xf32, #tpu.memory_space<vmem>>, vector<8x64xf32>,
    %55 = vector.extract_strided_slice %14 {offsets = [160, 0], sizes = [8, 64], strides = [1, 1]} : vector<392x64xf32> to vector<8x64xf32>
    %c0_27 = arith.constant 0 : index
    %c1280 = arith.constant 1280 : index
    %56 = vector.load %arg9[%c0_27, %c1280] : memref<8x3136xf32, #tpu.memory_space<vmem>>, vector<8x64xf32>
    tpu.vector_store %arg9[%c0_27, %c1280], %55 {strides = array<i32>} : memref<8x3136xf32, #tpu.memory_space<vmem>>, vector<8x64xf32>,
    %57 = vector.extract_strided_slice %14 {offsets = [168, 0], sizes = [8, 64], strides = [1, 1]} : vector<392x64xf32> to vector<8x64xf32>
    %c0_28 = arith.constant 0 : index
    %c1344 = arith.constant 1344 : index
    %58 = vector.load %arg9[%c0_28, %c1344] : memref<8x3136xf32, #tpu.memory_space<vmem>>, vector<8x64xf32>
    tpu.vector_store %arg9[%c0_28, %c1344], %57 {strides = array<i32>} : memref<8x3136xf32, #tpu.memory_space<vmem>>, vector<8x64xf32>,
    %59 = vector.extract_strided_slice %14 {offsets = [176, 0], sizes = [8, 64], strides = [1, 1]} : vector<392x64xf32> to vector<8x64xf32>
    %c0_29 = arith.constant 0 : index
    %c1408 = arith.constant 1408 : index
    %60 = vector.load %arg9[%c0_29, %c1408] : memref<8x3136xf32, #tpu.memory_space<vmem>>, vector<8x64xf32>
    tpu.vector_store %arg9[%c0_29, %c1408], %59 {strides = array<i32>} : memref<8x3136xf32, #tpu.memory_space<vmem>>, vector<8x64xf32>,
    %61 = vector.extract_strided_slice %14 {offsets = [184, 0], sizes = [8, 64], strides = [1, 1]} : vector<392x64xf32> to vector<8x64xf32>
    %c0_30 = arith.constant 0 : index
    %c1472 = arith.constant 1472 : index
    %62 = vector.load %arg9[%c0_30, %c1472] : memref<8x3136xf32, #tpu.memory_space<vmem>>, vector<8x64xf32>
    tpu.vector_store %arg9[%c0_30, %c1472], %61 {strides = array<i32>} : memref<8x3136xf32, #tpu.memory_space<vmem>>, vector<8x64xf32>,
    %63 = vector.extract_strided_slice %14 {offsets = [192, 0], sizes = [8, 64], strides = [1, 1]} : vector<392x64xf32> to vector<8x64xf32>
    %c0_31 = arith.constant 0 : index
    %c1536 = arith.constant 1536 : index
    %64 = vector.load %arg9[%c0_31, %c1536] : memref<8x3136xf32, #tpu.memory_space<vmem>>, vector<8x64xf32>
    tpu.vector_store %arg9[%c0_31, %c1536], %63 {strides = array<i32>} : memref<8x3136xf32, #tpu.memory_space<vmem>>, vector<8x64xf32>,
    %65 = vector.extract_strided_slice %14 {offsets = [200, 0], sizes = [8, 64], strides = [1, 1]} : vector<392x64xf32> to vector<8x64xf32>
    %c0_32 = arith.constant 0 : index
    %c1600 = arith.constant 1600 : index
    %66 = vector.load %arg9[%c0_32, %c1600] : memref<8x3136xf32, #tpu.memory_space<vmem>>, vector<8x64xf32>
    tpu.vector_store %arg9[%c0_32, %c1600], %65 {strides = array<i32>} : memref<8x3136xf32, #tpu.memory_space<vmem>>, vector<8x64xf32>,
    %67 = vector.extract_strided_slice %14 {offsets = [208, 0], sizes = [8, 64], strides = [1, 1]} : vector<392x64xf32> to vector<8x64xf32>
    %c0_33 = arith.constant 0 : index
    %c1664 = arith.constant 1664 : index
    %68 = vector.load %arg9[%c0_33, %c1664] : memref<8x3136xf32, #tpu.memory_space<vmem>>, vector<8x64xf32>
    tpu.vector_store %arg9[%c0_33, %c1664], %67 {strides = array<i32>} : memref<8x3136xf32, #tpu.memory_space<vmem>>, vector<8x64xf32>,
    %69 = vector.extract_strided_slice %14 {offsets = [216, 0], sizes = [8, 64], strides = [1, 1]} : vector<392x64xf32> to vector<8x64xf32>
    %c0_34 = arith.constant 0 : index
    %c1728 = arith.constant 1728 : index
    %70 = vector.load %arg9[%c0_34, %c1728] : memref<8x3136xf32, #tpu.memory_space<vmem>>, vector<8x64xf32>
    tpu.vector_store %arg9[%c0_34, %c1728], %69 {strides = array<i32>} : memref<8x3136xf32, #tpu.memory_space<vmem>>, vector<8x64xf32>,
    %71 = vector.extract_strided_slice %14 {offsets = [224, 0], sizes = [8, 64], strides = [1, 1]} : vector<392x64xf32> to vector<8x64xf32>
    %c0_35 = arith.constant 0 : index
    %c1792 = arith.constant 1792 : index
    %72 = vector.load %arg9[%c0_35, %c1792] : memref<8x3136xf32, #tpu.memory_space<vmem>>, vector<8x64xf32>
    tpu.vector_store %arg9[%c0_35, %c1792], %71 {strides = array<i32>} : memref<8x3136xf32, #tpu.memory_space<vmem>>, vector<8x64xf32>,
    %73 = vector.extract_strided_slice %14 {offsets = [232, 0], sizes = [8, 64], strides = [1, 1]} : vector<392x64xf32> to vector<8x64xf32>
    %c0_36 = arith.constant 0 : index
    %c1856 = arith.constant 1856 : index
    %74 = vector.load %arg9[%c0_36, %c1856] : memref<8x3136xf32, #tpu.memory_space<vmem>>, vector<8x64xf32>
    tpu.vector_store %arg9[%c0_36, %c1856], %73 {strides = array<i32>} : memref<8x3136xf32, #tpu.memory_space<vmem>>, vector<8x64xf32>,
    %75 = vector.extract_strided_slice %14 {offsets = [240, 0], sizes = [8, 64], strides = [1, 1]} : vector<392x64xf32> to vector<8x64xf32>
    %c0_37 = arith.constant 0 : index
    %c1920 = arith.constant 1920 : index
    %76 = vector.load %arg9[%c0_37, %c1920] : memref<8x3136xf32, #tpu.memory_space<vmem>>, vector<8x64xf32>
    tpu.vector_store %arg9[%c0_37, %c1920], %75 {strides = array<i32>} : memref<8x3136xf32, #tpu.memory_space<vmem>>, vector<8x64xf32>,
    %77 = vector.extract_strided_slice %14 {offsets = [248, 0], sizes = [8, 64], strides = [1, 1]} : vector<392x64xf32> to vector<8x64xf32>
    %c0_38 = arith.constant 0 : index
    %c1984 = arith.constant 1984 : index
    %78 = vector.load %arg9[%c0_38, %c1984] : memref<8x3136xf32, #tpu.memory_space<vmem>>, vector<8x64xf32>
    tpu.vector_store %arg9[%c0_38, %c1984], %77 {strides = array<i32>} : memref<8x3136xf32, #tpu.memory_space<vmem>>, vector<8x64xf32>,
    %79 = vector.extract_strided_slice %14 {offsets = [256, 0], sizes = [8, 64], strides = [1, 1]} : vector<392x64xf32> to vector<8x64xf32>
    %c0_39 = arith.constant 0 : index
    %c2048 = arith.constant 2048 : index
    %80 = vector.load %arg9[%c0_39, %c2048] : memref<8x3136xf32, #tpu.memory_space<vmem>>, vector<8x64xf32>
    tpu.vector_store %arg9[%c0_39, %c2048], %79 {strides = array<i32>} : memref<8x3136xf32, #tpu.memory_space<vmem>>, vector<8x64xf32>,
    %81 = vector.extract_strided_slice %14 {offsets = [264, 0], sizes = [8, 64], strides = [1, 1]} : vector<392x64xf32> to vector<8x64xf32>
    %c0_40 = arith.constant 0 : index
    %c2112 = arith.constant 2112 : index
    %82 = vector.load %arg9[%c0_40, %c2112] : memref<8x3136xf32, #tpu.memory_space<vmem>>, vector<8x64xf32>
    tpu.vector_store %arg9[%c0_40, %c2112], %81 {strides = array<i32>} : memref<8x3136xf32, #tpu.memory_space<vmem>>, vector<8x64xf32>,
    %83 = vector.extract_strided_slice %14 {offsets = [272, 0], sizes = [8, 64], strides = [1, 1]} : vector<392x64xf32> to vector<8x64xf32>
    %c0_41 = arith.constant 0 : index
    %c2176 = arith.constant 2176 : index
    %84 = vector.load %arg9[%c0_41, %c2176] : memref<8x3136xf32, #tpu.memory_space<vmem>>, vector<8x64xf32>
    tpu.vector_store %arg9[%c0_41, %c2176], %83 {strides = array<i32>} : memref<8x3136xf32, #tpu.memory_space<vmem>>, vector<8x64xf32>,
    %85 = vector.extract_strided_slice %14 {offsets = [280, 0], sizes = [8, 64], strides = [1, 1]} : vector<392x64xf32> to vector<8x64xf32>
    %c0_42 = arith.constant 0 : index
    %c2240 = arith.constant 2240 : index
    %86 = vector.load %arg9[%c0_42, %c2240] : memref<8x3136xf32, #tpu.memory_space<vmem>>, vector<8x64xf32>
    tpu.vector_store %arg9[%c0_42, %c2240], %85 {strides = array<i32>} : memref<8x3136xf32, #tpu.memory_space<vmem>>, vector<8x64xf32>,
    %87 = vector.extract_strided_slice %14 {offsets = [288, 0], sizes = [8, 64], strides = [1, 1]} : vector<392x64xf32> to vector<8x64xf32>
    %c0_43 = arith.constant 0 : index
    %c2304 = arith.constant 2304 : index
    %88 = vector.load %arg9[%c0_43, %c2304] : memref<8x3136xf32, #tpu.memory_space<vmem>>, vector<8x64xf32>
    tpu.vector_store %arg9[%c0_43, %c2304], %87 {strides = array<i32>} : memref<8x3136xf32, #tpu.memory_space<vmem>>, vector<8x64xf32>,
    %89 = vector.extract_strided_slice %14 {offsets = [296, 0], sizes = [8, 64], strides = [1, 1]} : vector<392x64xf32> to vector<8x64xf32>
    %c0_44 = arith.constant 0 : index
    %c2368 = arith.constant 2368 : index
    %90 = vector.load %arg9[%c0_44, %c2368] : memref<8x3136xf32, #tpu.memory_space<vmem>>, vector<8x64xf32>
    tpu.vector_store %arg9[%c0_44, %c2368], %89 {strides = array<i32>} : memref<8x3136xf32, #tpu.memory_space<vmem>>, vector<8x64xf32>,
    %91 = vector.extract_strided_slice %14 {offsets = [304, 0], sizes = [8, 64], strides = [1, 1]} : vector<392x64xf32> to vector<8x64xf32>
    %c0_45 = arith.constant 0 : index
    %c2432 = arith.constant 2432 : index
    %92 = vector.load %arg9[%c0_45, %c2432] : memref<8x3136xf32, #tpu.memory_space<vmem>>, vector<8x64xf32>
    tpu.vector_store %arg9[%c0_45, %c2432], %91 {strides = array<i32>} : memref<8x3136xf32, #tpu.memory_space<vmem>>, vector<8x64xf32>,
    %93 = vector.extract_strided_slice %14 {offsets = [312, 0], sizes = [8, 64], strides = [1, 1]} : vector<392x64xf32> to vector<8x64xf32>
    %c0_46 = arith.constant 0 : index
    %c2496 = arith.constant 2496 : index
    %94 = vector.load %arg9[%c0_46, %c2496] : memref<8x3136xf32, #tpu.memory_space<vmem>>, vector<8x64xf32>
    tpu.vector_store %arg9[%c0_46, %c2496], %93 {strides = array<i32>} : memref<8x3136xf32, #tpu.memory_space<vmem>>, vector<8x64xf32>,
    %95 = vector.extract_strided_slice %14 {offsets = [320, 0], sizes = [8, 64], strides = [1, 1]} : vector<392x64xf32> to vector<8x64xf32>
    %c0_47 = arith.constant 0 : index
    %c2560 = arith.constant 2560 : index
    %96 = vector.load %arg9[%c0_47, %c2560] : memref<8x3136xf32, #tpu.memory_space<vmem>>, vector<8x64xf32>
    tpu.vector_store %arg9[%c0_47, %c2560], %95 {strides = array<i32>} : memref<8x3136xf32, #tpu.memory_space<vmem>>, vector<8x64xf32>,
    %97 = vector.extract_strided_slice %14 {offsets = [328, 0], sizes = [8, 64], strides = [1, 1]} : vector<392x64xf32> to vector<8x64xf32>
    %c0_48 = arith.constant 0 : index
    %c2624 = arith.constant 2624 : index
    %98 = vector.load %arg9[%c0_48, %c2624] : memref<8x3136xf32, #tpu.memory_space<vmem>>, vector<8x64xf32>
    tpu.vector_store %arg9[%c0_48, %c2624], %97 {strides = array<i32>} : memref<8x3136xf32, #tpu.memory_space<vmem>>, vector<8x64xf32>,
    %99 = vector.extract_strided_slice %14 {offsets = [336, 0], sizes = [8, 64], strides = [1, 1]} : vector<392x64xf32> to vector<8x64xf32>
    %c0_49 = arith.constant 0 : index
    %c2688 = arith.constant 2688 : index
    %100 = vector.load %arg9[%c0_49, %c2688] : memref<8x3136xf32, #tpu.memory_space<vmem>>, vector<8x64xf32>
    tpu.vector_store %arg9[%c0_49, %c2688], %99 {strides = array<i32>} : memref<8x3136xf32, #tpu.memory_space<vmem>>, vector<8x64xf32>,
    %101 = vector.extract_strided_slice %14 {offsets = [344, 0], sizes = [8, 64], strides = [1, 1]} : vector<392x64xf32> to vector<8x64xf32>
    %c0_50 = arith.constant 0 : index
    %c2752 = arith.constant 2752 : index
    %102 = vector.load %arg9[%c0_50, %c2752] : memref<8x3136xf32, #tpu.memory_space<vmem>>, vector<8x64xf32>
    tpu.vector_store %arg9[%c0_50, %c2752], %101 {strides = array<i32>} : memref<8x3136xf32, #tpu.memory_space<vmem>>, vector<8x64xf32>,
    %103 = vector.extract_strided_slice %14 {offsets = [352, 0], sizes = [8, 64], strides = [1, 1]} : vector<392x64xf32> to vector<8x64xf32>
    %c0_51 = arith.constant 0 : index
    %c2816 = arith.constant 2816 : index
    %104 = vector.load %arg9[%c0_51, %c2816] : memref<8x3136xf32, #tpu.memory_space<vmem>>, vector<8x64xf32>
    tpu.vector_store %arg9[%c0_51, %c2816], %103 {strides = array<i32>} : memref<8x3136xf32, #tpu.memory_space<vmem>>, vector<8x64xf32>,
    %105 = vector.extract_strided_slice %14 {offsets = [360, 0], sizes = [8, 64], strides = [1, 1]} : vector<392x64xf32> to vector<8x64xf32>
    %c0_52 = arith.constant 0 : index
    %c2880 = arith.constant 2880 : index
    %106 = vector.load %arg9[%c0_52, %c2880] : memref<8x3136xf32, #tpu.memory_space<vmem>>, vector<8x64xf32>
    tpu.vector_store %arg9[%c0_52, %c2880], %105 {strides = array<i32>} : memref<8x3136xf32, #tpu.memory_space<vmem>>, vector<8x64xf32>,
    %107 = vector.extract_strided_slice %14 {offsets = [368, 0], sizes = [8, 64], strides = [1, 1]} : vector<392x64xf32> to vector<8x64xf32>
    %c0_53 = arith.constant 0 : index
    %c2944 = arith.constant 2944 : index
    %108 = vector.load %arg9[%c0_53, %c2944] : memref<8x3136xf32, #tpu.memory_space<vmem>>, vector<8x64xf32>
    tpu.vector_store %arg9[%c0_53, %c2944], %107 {strides = array<i32>} : memref<8x3136xf32, #tpu.memory_space<vmem>>, vector<8x64xf32>,
    %109 = vector.extract_strided_slice %14 {offsets = [376, 0], sizes = [8, 64], strides = [1, 1]} : vector<392x64xf32> to vector<8x64xf32>
    %c0_54 = arith.constant 0 : index
    %c3008 = arith.constant 3008 : index
    %110 = vector.load %arg9[%c0_54, %c3008] : memref<8x3136xf32, #tpu.memory_space<vmem>>, vector<8x64xf32>
    tpu.vector_store %arg9[%c0_54, %c3008], %109 {strides = array<i32>} : memref<8x3136xf32, #tpu.memory_space<vmem>>, vector<8x64xf32>,
    %111 = vector.extract_strided_slice %14 {offsets = [384, 0], sizes = [8, 64], strides = [1, 1]} : vector<392x64xf32> to vector<8x64xf32>
    %c0_55 = arith.constant 0 : index
    %c3072 = arith.constant 3072 : index
    %112 = vector.load %arg9[%c0_55, %c3072] : memref<8x3136xf32, #tpu.memory_space<vmem>>, vector<8x64xf32>
    tpu.vector_store %arg9[%c0_55, %c3072], %111 {strides = array<i32>} : memref<8x3136xf32, #tpu.memory_space<vmem>>, vector<8x64xf32>,
    %c0_56 = arith.constant 0 : index
    %c0_57 = arith.constant 0 : index
    %113 = vector.load %arg9[%c0_56, %c0_57] : memref<8x3136xf32, #tpu.memory_space<vmem>>, vector<8x3136xf32>
    %114 = arith.truncf %113 : vector<8x3136xf32> to vector<8x3136xbf16>
    %c0_58 = arith.constant 0 : index
    %c0_59 = arith.constant 0 : index
    %115 = vector.load %arg4[%c0_58, %c0_59] : memref<3136x128xbf16, #tpu.memory_space<vmem>>, vector<3136x128xbf16>
    %cst_60 = arith.constant dense<0.000000e+00> : vector<8x128xf32>
    %116 = tpu.matmul %114, %115, %cst_60 {dimension_numbers = #tpu.dot_dimension_numbers<[1], [0], [0], [1], [0, 0, 1, 1], [], []>} : vector<8x3136xbf16>, vector<3136x128xbf16>, vector<8x128xf32> -> vector<8x128xf32>
    %c0_61 = arith.constant 0 : index
    %c0_62 = arith.constant 0 : index
    %117 = vector.load %arg5[%c0_61, %c0_62] : memref<1x128xf32, #tpu.memory_space<vmem>>, vector<1x128xf32>
    %118 = vector.broadcast %117 : vector<1x128xf32> to vector<8x128xf32>
    %119 = arith.addf %116, %118 : vector<8x128xf32>
    %cst_63 = arith.constant 0.000000e+00 : f32
    %120 = vector.broadcast %cst_63 : f32 to vector<8x128xf32>
    %121 = arith.maximumf %119, %120 : vector<8x128xf32>
    %122 = arith.truncf %121 : vector<8x128xf32> to vector<8x128xbf16>
    %c0_64 = arith.constant 0 : index
    %c0_65 = arith.constant 0 : index
    %123 = vector.load %arg6[%c0_64, %c0_65] : memref<128x128xbf16, #tpu.memory_space<vmem>>, vector<128x128xbf16>
    %cst_66 = arith.constant dense<0.000000e+00> : vector<8x128xf32>
    %124 = tpu.matmul %122, %123, %cst_66 {dimension_numbers = #tpu.dot_dimension_numbers<[1], [0], [0], [1], [0, 0, 1, 1], [], []>} : vector<8x128xbf16>, vector<128x128xbf16>, vector<8x128xf32> -> vector<8x128xf32>
    %c0_67 = arith.constant 0 : index
    %c0_68 = arith.constant 0 : index
    %125 = vector.load %arg7[%c0_67, %c0_68] : memref<1x128xf32, #tpu.memory_space<vmem>>, vector<1x128xf32>
    %126 = vector.broadcast %125 : vector<1x128xf32> to vector<8x128xf32>
    %127 = arith.addf %124, %126 : vector<8x128xf32>
    %c0_69 = arith.constant 0 : index
    %c0_70 = arith.constant 0 : index
    %128 = vector.load %arg8[%c0_69, %c0_70] : memref<8x128xf32, #tpu.memory_space<vmem>>, vector<8x128xf32>
    tpu.vector_store %arg8[%c0_69, %c0_70], %127 {strides = array<i32>} : memref<8x128xf32, #tpu.memory_space<vmem>>, vector<8x128xf32>,
    return
  }
  func.func @transform_0(%arg0: i32) -> (i32, i32) {
    %c0_i32 = arith.constant 0 : i32
    %c0_i32_0 = arith.constant 0 : i32
    return %arg0, %c0_i32 : i32, i32
  }
  func.func @transform_1(%arg0: i32) -> (i32, i32) {
    %c0_i32 = arith.constant 0 : i32
    %c0_i32_0 = arith.constant 0 : i32
    %c0_i32_1 = arith.constant 0 : i32
    return %c0_i32, %c0_i32_0 : i32, i32
  }
  func.func @transform_2(%arg0: i32) -> (i32, i32) {
    %c0_i32 = arith.constant 0 : i32
    %c0_i32_0 = arith.constant 0 : i32
    %c0_i32_1 = arith.constant 0 : i32
    return %c0_i32, %c0_i32_0 : i32, i32
  }
  func.func @transform_3(%arg0: i32) -> (i32, i32) {
    %c0_i32 = arith.constant 0 : i32
    %c0_i32_0 = arith.constant 0 : i32
    %c0_i32_1 = arith.constant 0 : i32
    return %c0_i32, %c0_i32_0 : i32, i32
  }
  func.func @transform_4(%arg0: i32) -> (i32, i32) {
    %c0_i32 = arith.constant 0 : i32
    %c0_i32_0 = arith.constant 0 : i32
    %c0_i32_1 = arith.constant 0 : i32
    return %c0_i32, %c0_i32_0 : i32, i32
  }
  func.func @transform_5(%arg0: i32) -> (i32, i32) {
    %c0_i32 = arith.constant 0 : i32
    %c0_i32_0 = arith.constant 0 : i32
    %c0_i32_1 = arith.constant 0 : i32
    return %c0_i32, %c0_i32_0 : i32, i32
  }
  func.func @transform_6(%arg0: i32) -> (i32, i32) {
    %c0_i32 = arith.constant 0 : i32
    %c0_i32_0 = arith.constant 0 : i32
    %c0_i32_1 = arith.constant 0 : i32
    return %c0_i32, %c0_i32_0 : i32, i32
  }
  func.func @transform_7(%arg0: i32) -> (i32, i32) {
    %c0_i32 = arith.constant 0 : i32
    %c0_i32_0 = arith.constant 0 : i32
    return %arg0, %c0_i32 : i32, i32
  }
}

</mosaic_0001>

<bundles_post_ra>
// kernel: simple_cnn_forward.2
= control target key start
LH: loop header
LB: loop body
LE: loop exit
PB: predicated region body
PF: predicated region fallthrough
CT: control target
= control target key end

     0   :  { %vm3153_vm0 = vcmask 1040384   ;;  %vm800_vm1 = vcmask 72704   ;;  %vm6706_vm2 = vcmask 257024   ;;  %s11882_s1 = inlined_call_operand.vmem [shape: f32[9,32], index: 1, kind: input, shape index: {}]   ;;  %s11883_s0 = inlined_call_operand.vmem [shape: f32[6272,9], index: 0, kind: input, shape index: {}]   ;;  %s11884_s2 = inlined_call_operand.vmem [shape: f32[1,32], index: 2, kind: input, shape index: {}]   ;;  %s11885_s3 = inlined_call_operand.vmem [shape: bf16[1568,32], index: 3, kind: output, shape index: {}]  }
   0x1   :  { %v799_v0 = vld [vmem:[%s11882_s1 + $0x8] sm:$0x1]  ;;  %v798_v1 = vld [vmem:[%s11882_s1] sm:$0xff]  ;;  %v408_v10 = vld [vmem:[%s11883_s0 + $0xc50] sm:$0xff] }
   0x2   :  { %7693 = vmatpush.msk.msra.mxu2 %vm3153_vm0, %v799_v0  ;;  %7694 = vmatpush.msk.msra.mxu3 %vm3153_vm0, %v799_v0  ;;  %v406_v2 = vld [vmem:[%s11883_s0 + $0xc40] sm:$0xff]  ;;  %v407_v6 = vld [vmem:[%s11883_s0 + $0xc48] sm:$0xff]  ;;  %v604_v11 = vld [vmem:[%s11883_s0 + $0x1270] sm:$0xff] }
   0x3   :  { %v602_v3 = vld [vmem:[%s11883_s0 + $0x1260] sm:$0xff]  ;;  %6907 = vmatpush.msk.msra.mxu0 %vm3153_vm0, %v799_v0  ;;  %7692 = vmatpush.msk.msra.mxu1 %vm3153_vm0, %v799_v0  ;;  %v603_v7 = vld [vmem:[%s11883_s0 + $0x1268] sm:$0xff]  ;;  %v16_v12 = vld [vmem:[%s11883_s0 + $0x10] sm:$0xff] }
   0x4   :  { %7696 = vmatpush.msra.mxu2 %v798_v1  ;;  %7697 = vmatpush.msra.mxu3 %v798_v1  ;;  %v14_v4 = vld [vmem:[%s11883_s0] sm:$0xff]  ;;  %v15_v8 = vld [vmem:[%s11883_s0 + $0x8] sm:$0xff]  ;;  %v212_v13 = vld [vmem:[%s11883_s0 + $0x630] sm:$0xff] }
   0x5   :  { %v210_v5 = vld [vmem:[%s11883_s0 + $0x620] sm:$0xff]  ;;  %7300 = vmatmul.msk.f32.vlgmr.msra.gmra.mxu2 %vm800_vm1, %v406_v2  ;;  %7496 = vmatmul.msk.f32.vlgmr.msra.gmra.mxu3 %vm800_vm1, %v602_v3  ;;  %v211_v9 = vld [vmem:[%s11883_s0 + $0x628] sm:$0xff]  ;;  %v409_v14 = vld [vmem:[%s11883_s0 + $0xc58] sm:$0xff] }
   0x6   :  { %3172 = vmatpush.msra.mxu0 %v798_v1  ;;  %7695 = vmatpush.msra.mxu1 %v798_v1  ;;  %v605_v15 = vld [vmem:[%s11883_s0 + $0x1278] sm:$0xff]  ;;  %v410_v18 = vld [vmem:[%s11883_s0 + $0xc60] sm:$0xff]  ;;  %v411_v22 = vld [vmem:[%s11883_s0 + $0xc68] sm:$0xff] }
   0x7   :  { %6908 = vmatmul.msk.f32.vlgmr.msra.gmra.mxu0 %vm800_vm1, %v14_v4  ;;  %7104 = vmatmul.msk.f32.vlgmr.msra.gmra.mxu1 %vm800_vm1, %v210_v5  ;;  %v17_v16 = vld [vmem:[%s11883_s0 + $0x18] sm:$0xff]  ;;  %v606_v19 = vld [vmem:[%s11883_s0 + $0x1280] sm:$0xff]  ;;  %v607_v23 = vld [vmem:[%s11883_s0 + $0x1288] sm:$0xff] }
   0x8   :  { %v213_v17 = vld [vmem:[%s11883_s0 + $0x638] sm:$0xff]  ;;  %v18_v20 = vld [vmem:[%s11883_s0 + $0x20] sm:$0xff]  ;;  %v19_v24 = vld [vmem:[%s11883_s0 + $0x28] sm:$0xff] }
   0x9   :  { %v214_v21 = vld [vmem:[%s11883_s0 + $0x640] sm:$0xff]  ;;  %v215_v25 = vld [vmem:[%s11883_s0 + $0x648] sm:$0xff]  ;;  %v412_v26 = vld [vmem:[%s11883_s0 + $0xc70] sm:$0xff] }
   0xa   :  { %v608_v27 = vld [vmem:[%s11883_s0 + $0x1290] sm:$0xff]  ;;  %v413_v30 = vld [vmem:[%s11883_s0 + $0xc78] sm:$0xff]  ;;  %v414_v34 = vld [vmem:[%s11883_s0 + $0xc80] sm:$0xff] }
   0xb   :  { %v20_v28 = vld [vmem:[%s11883_s0 + $0x30] sm:$0xff]  ;;  %v609_v31 = vld [vmem:[%s11883_s0 + $0x1298] sm:$0xff]  ;;  %v610_v35 = vld [vmem:[%s11883_s0 + $0x12a0] sm:$0xff] }
   0xc   :  { %v216_v29 = vld [vmem:[%s11883_s0 + $0x650] sm:$0xff]  ;;  %v21_v32 = vld [vmem:[%s11883_s0 + $0x38] sm:$0xff]  ;;  %v22_v36 = vld [vmem:[%s11883_s0 + $0x40] sm:$0xff] }
   0xd   :  { %7301 = vmatmul.msk.f32.gmra.mxu2 %vm800_vm1, %v407_v6  ;;  %7497 = vmatmul.msk.f32.gmra.mxu3 %vm800_vm1, %v603_v7  ;;  %v217_v33 = vld [vmem:[%s11883_s0 + $0x658] sm:$0xff]  ;;  %v218_v37 = vld [vmem:[%s11883_s0 + $0x660] sm:$0xff]  ;;  %v415_v38 = vld [vmem:[%s11883_s0 + $0xc88] sm:$0xff] }
   0xe   :  { %v611_v39 = vld [vmem:[%s11883_s0 + $0x12a8] sm:$0xff]  ;;  %v416_v42 = vld [vmem:[%s11883_s0 + $0xc90] sm:$0xff]  ;;  %v417_v46 = vld [vmem:[%s11883_s0 + $0xc98] sm:$0xff] }
   0xf   :  { %6909 = vmatmul.msk.f32.gmra.mxu0 %vm800_vm1, %v15_v8  ;;  %7105 = vmatmul.msk.f32.gmra.mxu1 %vm800_vm1, %v211_v9  ;;  %v23_v40 = vld [vmem:[%s11883_s0 + $0x48] sm:$0xff]  ;;  %v612_v43 = vld [vmem:[%s11883_s0 + $0x12b0] sm:$0xff]  ;;  %v613_v47 = vld [vmem:[%s11883_s0 + $0x12b8] sm:$0xff] }
  0x10   :  { %v219_v41 = vld [vmem:[%s11883_s0 + $0x668] sm:$0xff]  ;;  %v24_v44 = vld [vmem:[%s11883_s0 + $0x50] sm:$0xff]  ;;  %v25_v48 = vld [vmem:[%s11883_s0 + $0x58] sm:$0xff] }
  0x11   :  { %v220_v45 = vld [vmem:[%s11883_s0 + $0x670] sm:$0xff]  ;;  %v221_v49 = vld [vmem:[%s11883_s0 + $0x678] sm:$0xff]  ;;  %v418_v50 = vld [vmem:[%s11883_s0 + $0xca0] sm:$0xff] }
  0x12   :  { %v614_v51 = vld [vmem:[%s11883_s0 + $0x12c0] sm:$0xff]  ;;  %v419_v54 = vld [vmem:[%s11883_s0 + $0xca8] sm:$0xff]  ;;  %v420_v58 = vld [vmem:[%s11883_s0 + $0xcb0] sm:$0xff] }
  0x13   :  { %v26_v52 = vld [vmem:[%s11883_s0 + $0x60] sm:$0xff]  ;;  %v615_v55 = vld [vmem:[%s11883_s0 + $0x12c8] sm:$0xff]  ;;  %v616_v59 = vld [vmem:[%s11883_s0 + $0x12d0] sm:$0xff] }
  0x14   :  { %v222_v53 = vld [vmem:[%s11883_s0 + $0x680] sm:$0xff]  ;;  %v27_v56 = vld [vmem:[%s11883_s0 + $0x68] sm:$0xff]  ;;  %v28_v60 = vld [vmem:[%s11883_s0 + $0x70] sm:$0xff] }
  0x15   :  { %7302 = vmatmul.msk.f32.gmra.mxu2 %vm800_vm1, %v408_v10  ;;  %7498 = vmatmul.msk.f32.gmra.mxu3 %vm800_vm1, %v604_v11  ;;  %v223_v57 = vld [vmem:[%s11883_s0 + $0x688] sm:$0xff]  ;;  %v224_v61 = vld [vmem:[%s11883_s0 + $0x690] sm:$0xff]  ;;  %v421_v62 = vld [vmem:[%s11883_s0 + $0xcb8] sm:$0xff] }
  0x16   :  { %v617_v63 = vld [vmem:[%s11883_s0 + $0x12d8] sm:$0xff]  ;;  %v422_v2 = vld [vmem:[%s11883_s0 + $0xcc0] sm:$0xff] }
  0x17   :  { %6910 = vmatmul.msk.f32.gmra.mxu0 %vm800_vm1, %v16_v12  ;;  %7106 = vmatmul.msk.f32.gmra.mxu1 %vm800_vm1, %v212_v13  ;;  %v29_v0 = vld [vmem:[%s11883_s0 + $0x78] sm:$0xff]  ;;  %v618_v3 = vld [vmem:[%s11883_s0 + $0x12e0] sm:$0xff]  ;;  %v423_v13 = vld [vmem:[%s11883_s0 + $0xcc8] sm:$0xff] }
  0x18   :  { %v225_v1 = vld [vmem:[%s11883_s0 + $0x698] sm:$0xff]  ;;  %v30_v6 = vld [vmem:[%s11883_s0 + $0x80] sm:$0xff] }
  0x19   :  { %v226_v7 = vld [vmem:[%s11883_s0 + $0x6a0] sm:$0xff] }
  0x1a   :  { %v8006_v12 = vld [vmem:[%s11884_s2] ss:$0 sm:$0xff] }
  0x1d   :  { %7303 = vmatmul.msk.f32.gmra.mxu2 %vm800_vm1, %v409_v14  ;;  %7499 = vmatmul.msk.f32.gmra.mxu3 %vm800_vm1, %v605_v15  ;;  %v619_v14 = vld [vmem:[%s11883_s0 + $0x12e8] sm:$0xff] }
  0x1f   :  { %6911 = vmatmul.msk.f32.gmra.mxu0 %vm800_vm1, %v17_v16  ;;  %7107 = vmatmul.msk.f32.gmra.mxu1 %vm800_vm1, %v213_v17 }
  0x25   :  { %7304 = vmatmul.msk.f32.gmra.mxu2 %vm800_vm1, %v410_v18  ;;  %7500 = vmatmul.msk.f32.gmra.mxu3 %vm800_vm1, %v606_v19  ;;  %v31_v18 = vld [vmem:[%s11883_s0 + $0x88] sm:$0xff] }
  0x26   :  { %v227_v19 = vld [vmem:[%s11883_s0 + $0x6a8] sm:$0xff] }
  0x27   :  { %6912 = vmatmul.msk.f32.gmra.mxu0 %vm800_vm1, %v18_v20  ;;  %7108 = vmatmul.msk.f32.gmra.mxu1 %vm800_vm1, %v214_v21 }
  0x2d   :  { %7305 = vmatmul.msk.f32.gmra.mxu2 %vm800_vm1, %v411_v22  ;;  %7501 = vmatmul.msk.f32.gmra.mxu3 %vm800_vm1, %v607_v23 }
  0x2f   :  { %6913 = vmatmul.msk.f32.gmra.mxu0 %vm800_vm1, %v19_v24  ;;  %7109 = vmatmul.msk.f32.gmra.mxu1 %vm800_vm1, %v215_v25 }
  0x35   :  { %7306 = vmatmul.msk.f32.gmra.mxu2 %vm800_vm1, %v412_v26  ;;  %7502 = vmatmul.msk.f32.gmra.mxu3 %vm800_vm1, %v608_v27  ;;  %v424_v27 = vld [vmem:[%s11883_s0 + $0xcd0] sm:$0xff] }
  0x37   :  { %6914 = vmatmul.msk.f32.gmra.mxu0 %vm800_vm1, %v20_v28  ;;  %7110 = vmatmul.msk.f32.gmra.mxu1 %vm800_vm1, %v216_v29  ;;  %v620_v28 = vld [vmem:[%s11883_s0 + $0x12f0] sm:$0xff] }
  0x3d   :  { %7307 = vmatmul.msk.f32.gmra.mxu2 %vm800_vm1, %v413_v30  ;;  %7503 = vmatmul.msk.f32.gmra.mxu3 %vm800_vm1, %v609_v31 }
  0x3f   :  { %6915 = vmatmul.msk.f32.gmra.mxu0 %vm800_vm1, %v21_v32  ;;  %7111 = vmatmul.msk.f32.gmra.mxu1 %vm800_vm1, %v217_v33  ;;  %v32_v32 = vld [vmem:[%s11883_s0 + $0x90] sm:$0xff] }
  0x40   :  { %v228_v33 = vld [vmem:[%s11883_s0 + $0x6b0] sm:$0xff] }
  0x45   :  { %7308 = vmatmul.msk.f32.gmra.mxu2 %vm800_vm1, %v414_v34  ;;  %7504 = vmatmul.msk.f32.gmra.mxu3 %vm800_vm1, %v610_v35 }
  0x47   :  { %6916 = vmatmul.msk.f32.gmra.mxu0 %vm800_vm1, %v22_v36  ;;  %7112 = vmatmul.msk.f32.gmra.mxu1 %vm800_vm1, %v218_v37 }
  0x4d   :  { %7309 = vmatmul.msk.f32.gmra.mxu2 %vm800_vm1, %v415_v38  ;;  %7505 = vmatmul.msk.f32.gmra.mxu3 %vm800_vm1, %v611_v39 }
  0x4f   :  { %6917 = vmatmul.msk.f32.gmra.mxu0 %vm800_vm1, %v23_v40  ;;  %7113 = vmatmul.msk.f32.gmra.mxu1 %vm800_vm1, %v219_v41  ;;  %v425_v41 = vld [vmem:[%s11883_s0 + $0xcd8] sm:$0xff] }
  0x55   :  { %7310 = vmatmul.msk.f32.gmra.mxu2 %vm800_vm1, %v416_v42  ;;  %7506 = vmatmul.msk.f32.gmra.mxu3 %vm800_vm1, %v612_v43  ;;  %v621_v42 = vld [vmem:[%s11883_s0 + $0x12f8] sm:$0xff] }
  0x57   :  { %6918 = vmatmul.msk.f32.gmra.mxu0 %vm800_vm1, %v24_v44  ;;  %7114 = vmatmul.msk.f32.gmra.mxu1 %vm800_vm1, %v220_v45 }
  0x5d   :  { %7311 = vmatmul.msk.f32.gmra.mxu2 %vm800_vm1, %v417_v46  ;;  %7507 = vmatmul.msk.f32.gmra.mxu3 %vm800_vm1, %v613_v47  ;;  %v33_v46 = vld [vmem:[%s11883_s0 + $0x98] sm:$0xff] }
  0x5e   :  { %v229_v47 = vld [vmem:[%s11883_s0 + $0x6b8] sm:$0xff] }
  0x5f   :  { %6919 = vmatmul.msk.f32.gmra.mxu0 %vm800_vm1, %v25_v48  ;;  %7115 = vmatmul.msk.f32.gmra.mxu1 %vm800_vm1, %v221_v49 }
  0x65   :  { %7312 = vmatmul.msk.f32.gmra.mxu2 %vm800_vm1, %v418_v50  ;;  %7508 = vmatmul.msk.f32.gmra.mxu3 %vm800_vm1, %v614_v51 }
  0x67   :  { %6920 = vmatmul.msk.f32.gmra.mxu0 %vm800_vm1, %v26_v52  ;;  %7116 = vmatmul.msk.f32.gmra.mxu1 %vm800_vm1, %v222_v53 }
  0x6d   :  { %7313 = vmatmul.msk.f32.gmra.mxu2 %vm800_vm1, %v419_v54  ;;  %7509 = vmatmul.msk.f32.gmra.mxu3 %vm800_vm1, %v615_v55  ;;  %v426_v55 = vld [vmem:[%s11883_s0 + $0xce0] sm:$0xff] }
  0x6f   :  { %6921 = vmatmul.msk.f32.gmra.mxu0 %vm800_vm1, %v27_v56  ;;  %7117 = vmatmul.msk.f32.gmra.mxu1 %vm800_vm1, %v223_v57  ;;  %v622_v56 = vld [vmem:[%s11883_s0 + $0x1300] sm:$0xff] }
  0x75   :  { %7314 = vmatmul.msk.f32.gmra.mxu2 %vm800_vm1, %v420_v58  ;;  %7510 = vmatmul.msk.f32.gmra.mxu3 %vm800_vm1, %v616_v59 }
  0x77   :  { %6922 = vmatmul.msk.f32.gmra.mxu0 %vm800_vm1, %v28_v60  ;;  %7118 = vmatmul.msk.f32.gmra.mxu1 %vm800_vm1, %v224_v61  ;;  %v34_v60 = vld [vmem:[%s11883_s0 + $0xa0] sm:$0xff] }
  0x78   :  { %v230_v61 = vld [vmem:[%s11883_s0 + $0x6c0] sm:$0xff] }
  0x7d   :  { %7315 = vmatmul.msk.f32.gmra.mxu2 %vm800_vm1, %v421_v62  ;;  %7511 = vmatmul.msk.f32.gmra.mxu3 %vm800_vm1, %v617_v63 }
  0x7f   :  { %6923 = vmatmul.msk.f32.gmra.mxu0 %vm800_vm1, %v29_v0  ;;  %7119 = vmatmul.msk.f32.gmra.mxu1 %vm800_vm1, %v225_v1 }
  0x84   :  { %v3174_v4 = vpop.f32.mrf.mxu0  ;;  %v3762_v5 = vpop.f32.mrf.mxu1 }
  0x85   :  { %7316 = vmatmul.msk.f32.gmra.mxu2 %vm800_vm1, %v422_v2  ;;  %7512 = vmatmul.msk.f32.gmra.mxu3 %vm800_vm1, %v618_v3  ;;  %v5526_v8 = vmax.f32 %v3174_v4, %v3762_v5  ;;  %v427_v5 = vld [vmem:[%s11883_s0 + $0xce8] sm:$0xff] }
  0x87   :  { %6924 = vmatmul.msk.f32.gmra.mxu0 %vm800_vm1, %v30_v6  ;;  %7120 = vmatmul.msk.f32.gmra.mxu1 %vm800_vm1, %v226_v7  ;;  %v623_v6 = vld [vmem:[%s11883_s0 + $0x1308] sm:$0xff] }
  0x88   :  { %v4350_v9 = vpop.f32.mrf.mxu2  ;;  %v4938_v10 = vpop.f32.mrf.mxu3 }
  0x89   :  { %v5722_v11 = vmax.f32 %v4350_v9, %v4938_v10  ;;  %v35_v10 = vld [vmem:[%s11883_s0 + $0xa8] sm:$0xff] }
  0x8b   :  { %v5918_v15 = vmax.f32 %v5526_v8, %v5722_v11  ;;  %v231_v11 = vld [vmem:[%s11883_s0 + $0x6c8] sm:$0xff] }
  0x8c   :  { %v3177_v16 = vpop.f32.mrf.mxu0  ;;  %v3765_v17 = vpop.f32.mrf.mxu1 }
  0x8d   :  { %v6118_v20 = vadd.f32 %v8006_v12, %v5918_v15  ;;  %7317 = vmatmul.msk.f32.gmra.mxu2 %vm800_vm1, %v423_v13  ;;  %7513 = vmatmul.msk.f32.gmra.mxu3 %vm800_vm1, %v619_v14  ;;  %v5527_v22 = vmax.f32 %v3177_v16, %v3765_v17 }
  0x8f   :  { %v6314_v21 = vmax.f32 %v6118_v20, 0.0  ;;  %6925 = vmatmul.msk.f32.gmra.mxu0 %vm800_vm1, %v31_v18  ;;  %7121 = vmatmul.msk.f32.gmra.mxu1 %vm800_vm1, %v227_v19  ;;  %v428_v20 = vld [vmem:[%s11883_s0 + $0xcf0] sm:$0xff] }
  0x90   :  { %v4353_v23 = vpop.f32.mrf.mxu2  ;;  %v4941_v24 = vpop.f32.mrf.mxu3 }
  0x91   :  { %v6510_v25 = vpack.c.bf16 %v6314_v21, %v6314_v21  ;;  %v5723_v26 = vmax.f32 %v4353_v23, %v4941_v24  ;;  %v624_v21 = vld [vmem:[%s11883_s0 + $0x1310] sm:$0xff] }
  0x93   :  { %6707 = vst.msk [vmem:[%s11885_s3] sm:$0xf] %vm6706_vm2, %v6510_v25  ;;  %v5919_v29 = vmax.f32 %v5527_v22, %v5723_v26  ;;  %v36_v25 = vld [vmem:[%s11883_s0 + $0xb0] sm:$0xff] }
  0x94   :  { %v3180_v30 = vpop.f32.mrf.mxu0  ;;  %v3768_v31 = vpop.f32.mrf.mxu1  ;;  %v232_v26 = vld [vmem:[%s11883_s0 + $0x6d0] sm:$0xff] }
  0x95   :  { %v6119_v34 = vadd.f32 %v8006_v12, %v5919_v29  ;;  %7318 = vmatmul.msk.f32.gmra.mxu2 %vm800_vm1, %v424_v27  ;;  %7514 = vmatmul.msk.f32.gmra.mxu3 %vm800_vm1, %v620_v28  ;;  %v5528_v36 = vmax.f32 %v3180_v30, %v3768_v31 }
  0x97   :  { %v6315_v35 = vmax.f32 %v6119_v34, 0.0  ;;  %6926 = vmatmul.msk.f32.gmra.mxu0 %vm800_vm1, %v32_v32  ;;  %7122 = vmatmul.msk.f32.gmra.mxu1 %vm800_vm1, %v228_v33  ;;  %v429_v34 = vld [vmem:[%s11883_s0 + $0xcf8] sm:$0xff] }
  0x98   :  { %v4356_v37 = vpop.f32.mrf.mxu2  ;;  %v4944_v38 = vpop.f32.mrf.mxu3 }
  0x99   :  { %v6511_v39 = vpack.c.bf16 %v6315_v35, %v6315_v35  ;;  %v5724_v40 = vmax.f32 %v4356_v37, %v4944_v38  ;;  %v625_v35 = vld [vmem:[%s11883_s0 + $0x1318] sm:$0xff] }
  0x9b   :  { %6708 = vst.msk [vmem:[%s11885_s3 + $0x4] sm:$0xf] %vm6706_vm2, %v6511_v39  ;;  %v5920_v43 = vmax.f32 %v5528_v36, %v5724_v40  ;;  %v37_v39 = vld [vmem:[%s11883_s0 + $0xb8] sm:$0xff] }
  0x9c   :  { %v3183_v44 = vpop.f32.mrf.mxu0  ;;  %v3771_v45 = vpop.f32.mrf.mxu1  ;;  %v233_v40 = vld [vmem:[%s11883_s0 + $0x6d8] sm:$0xff] }
  0x9d   :  { %v6120_v48 = vadd.f32 %v8006_v12, %v5920_v43  ;;  %7319 = vmatmul.msk.f32.gmra.mxu2 %vm800_vm1, %v425_v41  ;;  %7515 = vmatmul.msk.f32.gmra.mxu3 %vm800_vm1, %v621_v42  ;;  %v5529_v50 = vmax.f32 %v3183_v44, %v3771_v45 }
  0x9f   :  { %v6316_v49 = vmax.f32 %v6120_v48, 0.0  ;;  %6927 = vmatmul.msk.f32.gmra.mxu0 %vm800_vm1, %v33_v46  ;;  %7123 = vmatmul.msk.f32.gmra.mxu1 %vm800_vm1, %v229_v47  ;;  %v430_v48 = vld [vmem:[%s11883_s0 + $0xd00] sm:$0xff] }
  0xa0   :  { %v4359_v51 = vpop.f32.mrf.mxu2  ;;  %v4947_v52 = vpop.f32.mrf.mxu3 }
  0xa1   :  { %v6512_v53 = vpack.c.bf16 %v6316_v49, %v6316_v49  ;;  %v5725_v54 = vmax.f32 %v4359_v51, %v4947_v52  ;;  %v626_v49 = vld [vmem:[%s11883_s0 + $0x1320] sm:$0xff] }
  0xa3   :  { %6709 = vst.msk [vmem:[%s11885_s3 + $0x8] sm:$0xf] %vm6706_vm2, %v6512_v53  ;;  %v5921_v57 = vmax.f32 %v5529_v50, %v5725_v54  ;;  %v38_v53 = vld [vmem:[%s11883_s0 + $0xc0] sm:$0xff] }
  0xa4   :  { %v3186_v58 = vpop.f32.mrf.mxu0  ;;  %v3774_v59 = vpop.f32.mrf.mxu1  ;;  %v234_v54 = vld [vmem:[%s11883_s0 + $0x6e0] sm:$0xff] }
  0xa5   :  { %v6121_v62 = vadd.f32 %v8006_v12, %v5921_v57  ;;  %7320 = vmatmul.msk.f32.gmra.mxu2 %vm800_vm1, %v426_v55  ;;  %7516 = vmatmul.msk.f32.gmra.mxu3 %vm800_vm1, %v622_v56  ;;  %v5530_v0 = vmax.f32 %v3186_v58, %v3774_v59 }
  0xa7   :  { %v6317_v63 = vmax.f32 %v6121_v62, 0.0  ;;  %6928 = vmatmul.msk.f32.gmra.mxu0 %vm800_vm1, %v34_v60  ;;  %7124 = vmatmul.msk.f32.gmra.mxu1 %vm800_vm1, %v230_v61  ;;  %v431_v62 = vld [vmem:[%s11883_s0 + $0xd08] sm:$0xff] }
  0xa8   :  { %v4362_v1 = vpop.f32.mrf.mxu2  ;;  %v4950_v2 = vpop.f32.mrf.mxu3 }
  0xa9   :  { %v6513_v3 = vpack.c.bf16 %v6317_v63, %v6317_v63  ;;  %v5726_v4 = vmax.f32 %v4362_v1, %v4950_v2  ;;  %v627_v63 = vld [vmem:[%s11883_s0 + $0x1328] sm:$0xff] }
  0xab   :  { %6710 = vst.msk [vmem:[%s11885_s3 + $0xc] sm:$0xf] %vm6706_vm2, %v6513_v3  ;;  %v5922_v7 = vmax.f32 %v5530_v0, %v5726_v4  ;;  %v39_v3 = vld [vmem:[%s11883_s0 + $0xc8] sm:$0xff] }
  0xac   :  { %v3189_v8 = vpop.f32.mrf.mxu0  ;;  %v3777_v9 = vpop.f32.mrf.mxu1  ;;  %v235_v4 = vld [vmem:[%s11883_s0 + $0x6e8] sm:$0xff] }
  0xad   :  { %v6122_v13 = vadd.f32 %v8006_v12, %v5922_v7  ;;  %7321 = vmatmul.msk.f32.gmra.mxu2 %vm800_vm1, %v427_v5  ;;  %7517 = vmatmul.msk.f32.gmra.mxu3 %vm800_vm1, %v623_v6  ;;  %v5531_v15 = vmax.f32 %v3189_v8, %v3777_v9 }
  0xaf   :  { %v6318_v14 = vmax.f32 %v6122_v13, 0.0  ;;  %6929 = vmatmul.msk.f32.gmra.mxu0 %vm800_vm1, %v35_v10  ;;  %7125 = vmatmul.msk.f32.gmra.mxu1 %vm800_vm1, %v231_v11  ;;  %v432_v13 = vld [vmem:[%s11883_s0 + $0xd10] sm:$0xff] }
  0xb0   :  { %v4365_v16 = vpop.f32.mrf.mxu2  ;;  %v4953_v17 = vpop.f32.mrf.mxu3 }
  0xb1   :  { %v6514_v18 = vpack.c.bf16 %v6318_v14, %v6318_v14  ;;  %v5727_v19 = vmax.f32 %v4365_v16, %v4953_v17  ;;  %v628_v14 = vld [vmem:[%s11883_s0 + $0x1330] sm:$0xff] }
  0xb3   :  { %6711 = vst.msk [vmem:[%s11885_s3 + $0x10] sm:$0xf] %vm6706_vm2, %v6514_v18  ;;  %v5923_v22 = vmax.f32 %v5531_v15, %v5727_v19  ;;  %v40_v18 = vld [vmem:[%s11883_s0 + $0xd0] sm:$0xff] }
  0xb4   :  { %v3192_v23 = vpop.f32.mrf.mxu0  ;;  %v3780_v24 = vpop.f32.mrf.mxu1  ;;  %v236_v19 = vld [vmem:[%s11883_s0 + $0x6f0] sm:$0xff] }
  0xb5   :  { %v6123_v27 = vadd.f32 %v8006_v12, %v5923_v22  ;;  %7322 = vmatmul.msk.f32.gmra.mxu2 %vm800_vm1, %v428_v20  ;;  %7518 = vmatmul.msk.f32.gmra.mxu3 %vm800_vm1, %v624_v21  ;;  %v5532_v29 = vmax.f32 %v3192_v23, %v3780_v24 }
  0xb7   :  { %v6319_v28 = vmax.f32 %v6123_v27, 0.0  ;;  %6930 = vmatmul.msk.f32.gmra.mxu0 %vm800_vm1, %v36_v25  ;;  %7126 = vmatmul.msk.f32.gmra.mxu1 %vm800_vm1, %v232_v26  ;;  %v433_v27 = vld [vmem:[%s11883_s0 + $0xd18] sm:$0xff] }
  0xb8   :  { %v4368_v30 = vpop.f32.mrf.mxu2  ;;  %v4956_v31 = vpop.f32.mrf.mxu3 }
  0xb9   :  { %v6515_v32 = vpack.c.bf16 %v6319_v28, %v6319_v28  ;;  %v5728_v33 = vmax.f32 %v4368_v30, %v4956_v31  ;;  %v629_v28 = vld [vmem:[%s11883_s0 + $0x1338] sm:$0xff] }
  0xbb   :  { %6712 = vst.msk [vmem:[%s11885_s3 + $0x14] sm:$0xf] %vm6706_vm2, %v6515_v32  ;;  %v5924_v36 = vmax.f32 %v5532_v29, %v5728_v33  ;;  %v41_v32 = vld [vmem:[%s11883_s0 + $0xd8] sm:$0xff] }
  0xbc   :  { %v3195_v37 = vpop.f32.mrf.mxu0  ;;  %v3783_v38 = vpop.f32.mrf.mxu1  ;;  %v237_v33 = vld [vmem:[%s11883_s0 + $0x6f8] sm:$0xff] }
  0xbd   :  { %v6124_v41 = vadd.f32 %v8006_v12, %v5924_v36  ;;  %7323 = vmatmul.msk.f32.gmra.mxu2 %vm800_vm1, %v429_v34  ;;  %7519 = vmatmul.msk.f32.gmra.mxu3 %vm800_vm1, %v625_v35  ;;  %v5533_v43 = vmax.f32 %v3195_v37, %v3783_v38 }
  0xbf   :  { %v6320_v42 = vmax.f32 %v6124_v41, 0.0  ;;  %6931 = vmatmul.msk.f32.gmra.mxu0 %vm800_vm1, %v37_v39  ;;  %7127 = vmatmul.msk.f32.gmra.mxu1 %vm800_vm1, %v233_v40  ;;  %v434_v41 = vld [vmem:[%s11883_s0 + $0xd20] sm:$0xff] }
  0xc0   :  { %v4371_v44 = vpop.f32.mrf.mxu2  ;;  %v4959_v45 = vpop.f32.mrf.mxu3 }
  0xc1   :  { %v6516_v46 = vpack.c.bf16 %v6320_v42, %v6320_v42  ;;  %v5729_v47 = vmax.f32 %v4371_v44, %v4959_v45  ;;  %v630_v42 = vld [vmem:[%s11883_s0 + $0x1340] sm:$0xff] }
  0xc3   :  { %6713 = vst.msk [vmem:[%s11885_s3 + $0x18] sm:$0xf] %vm6706_vm2, %v6516_v46  ;;  %v5925_v50 = vmax.f32 %v5533_v43, %v5729_v47  ;;  %v42_v46 = vld [vmem:[%s11883_s0 + $0xe0] sm:$0xff] }
  0xc4   :  { %v3198_v51 = vpop.f32.mrf.mxu0  ;;  %v3786_v52 = vpop.f32.mrf.mxu1  ;;  %v238_v47 = vld [vmem:[%s11883_s0 + $0x700] sm:$0xff] }
  0xc5   :  { %v6125_v55 = vadd.f32 %v8006_v12, %v5925_v50  ;;  %7324 = vmatmul.msk.f32.gmra.mxu2 %vm800_vm1, %v430_v48  ;;  %7520 = vmatmul.msk.f32.gmra.mxu3 %vm800_vm1, %v626_v49  ;;  %v5534_v57 = vmax.f32 %v3198_v51, %v3786_v52 }
  0xc7   :  { %v6321_v56 = vmax.f32 %v6125_v55, 0.0  ;;  %6932 = vmatmul.msk.f32.gmra.mxu0 %vm800_vm1, %v38_v53  ;;  %7128 = vmatmul.msk.f32.gmra.mxu1 %vm800_vm1, %v234_v54  ;;  %v435_v55 = vld [vmem:[%s11883_s0 + $0xd28] sm:$0xff] }
  0xc8   :  { %v4374_v58 = vpop.f32.mrf.mxu2  ;;  %v4962_v59 = vpop.f32.mrf.mxu3 }
  0xc9   :  { %v6517_v60 = vpack.c.bf16 %v6321_v56, %v6321_v56  ;;  %v5730_v61 = vmax.f32 %v4374_v58, %v4962_v59  ;;  %v631_v56 = vld [vmem:[%s11883_s0 + $0x1348] sm:$0xff] }
  0xcb   :  { %6714 = vst.msk [vmem:[%s11885_s3 + $0x1c] sm:$0xf] %vm6706_vm2, %v6517_v60  ;;  %v5926_v0 = vmax.f32 %v5534_v57, %v5730_v61  ;;  %v43_v60 = vld [vmem:[%s11883_s0 + $0xe8] sm:$0xff] }
  0xcc   :  { %v3201_v1 = vpop.f32.mrf.mxu0  ;;  %v3789_v2 = vpop.f32.mrf.mxu1  ;;  %v239_v61 = vld [vmem:[%s11883_s0 + $0x708] sm:$0xff] }
  0xcd   :  { %v6126_v5 = vadd.f32 %v8006_v12, %v5926_v0  ;;  %7325 = vmatmul.msk.f32.gmra.mxu2 %vm800_vm1, %v431_v62  ;;  %7521 = vmatmul.msk.f32.gmra.mxu3 %vm800_vm1, %v627_v63  ;;  %v5535_v7 = vmax.f32 %v3201_v1, %v3789_v2 }
  0xcf   :  { %v6322_v6 = vmax.f32 %v6126_v5, 0.0  ;;  %6933 = vmatmul.msk.f32.gmra.mxu0 %vm800_vm1, %v39_v3  ;;  %7129 = vmatmul.msk.f32.gmra.mxu1 %vm800_vm1, %v235_v4  ;;  %v436_v5 = vld [vmem:[%s11883_s0 + $0xd30] sm:$0xff] }
  0xd0   :  { %v4377_v8 = vpop.f32.mrf.mxu2  ;;  %v4965_v9 = vpop.f32.mrf.mxu3 }
  0xd1   :  { %v6518_v10 = vpack.c.bf16 %v6322_v6, %v6322_v6  ;;  %v5731_v11 = vmax.f32 %v4377_v8, %v4965_v9  ;;  %v632_v6 = vld [vmem:[%s11883_s0 + $0x1350] sm:$0xff] }
  0xd3   :  { %6715 = vst.msk [vmem:[%s11885_s3 + $0x20] sm:$0xf] %vm6706_vm2, %v6518_v10  ;;  %v5927_v15 = vmax.f32 %v5535_v7, %v5731_v11  ;;  %v44_v10 = vld [vmem:[%s11883_s0 + $0xf0] sm:$0xff] }
  0xd4   :  { %v3204_v16 = vpop.f32.mrf.mxu0  ;;  %v3792_v17 = vpop.f32.mrf.mxu1  ;;  %v240_v11 = vld [vmem:[%s11883_s0 + $0x710] sm:$0xff] }
  0xd5   :  { %v6127_v20 = vadd.f32 %v8006_v12, %v5927_v15  ;;  %7326 = vmatmul.msk.f32.gmra.mxu2 %vm800_vm1, %v432_v13  ;;  %7522 = vmatmul.msk.f32.gmra.mxu3 %vm800_vm1, %v628_v14  ;;  %v5536_v22 = vmax.f32 %v3204_v16, %v3792_v17 }
  0xd7   :  { %v6323_v21 = vmax.f32 %v6127_v20, 0.0  ;;  %6934 = vmatmul.msk.f32.gmra.mxu0 %vm800_vm1, %v40_v18  ;;  %7130 = vmatmul.msk.f32.gmra.mxu1 %vm800_vm1, %v236_v19  ;;  %v437_v20 = vld [vmem:[%s11883_s0 + $0xd38] sm:$0xff] }
  0xd8   :  { %v4380_v23 = vpop.f32.mrf.mxu2  ;;  %v4968_v24 = vpop.f32.mrf.mxu3 }
  0xd9   :  { %v6519_v25 = vpack.c.bf16 %v6323_v21, %v6323_v21  ;;  %v5732_v26 = vmax.f32 %v4380_v23, %v4968_v24  ;;  %v633_v21 = vld [vmem:[%s11883_s0 + $0x1358] sm:$0xff] }
  0xdb   :  { %6716 = vst.msk [vmem:[%s11885_s3 + $0x24] sm:$0xf] %vm6706_vm2, %v6519_v25  ;;  %v5928_v29 = vmax.f32 %v5536_v22, %v5732_v26  ;;  %v45_v25 = vld [vmem:[%s11883_s0 + $0xf8] sm:$0xff] }
  0xdc   :  { %v3207_v30 = vpop.f32.mrf.mxu0  ;;  %v3795_v31 = vpop.f32.mrf.mxu1  ;;  %v241_v26 = vld [vmem:[%s11883_s0 + $0x718] sm:$0xff] }
  0xdd   :  { %v6128_v34 = vadd.f32 %v8006_v12, %v5928_v29  ;;  %7327 = vmatmul.msk.f32.gmra.mxu2 %vm800_vm1, %v433_v27  ;;  %7523 = vmatmul.msk.f32.gmra.mxu3 %vm800_vm1, %v629_v28  ;;  %v5537_v36 = vmax.f32 %v3207_v30, %v3795_v31 }
  0xdf   :  { %v6324_v35 = vmax.f32 %v6128_v34, 0.0  ;;  %6935 = vmatmul.msk.f32.gmra.mxu0 %vm800_vm1, %v41_v32  ;;  %7131 = vmatmul.msk.f32.gmra.mxu1 %vm800_vm1, %v237_v33  ;;  %v438_v34 = vld [vmem:[%s11883_s0 + $0xd40] sm:$0xff] }
  0xe0   :  { %v4383_v37 = vpop.f32.mrf.mxu2  ;;  %v4971_v38 = vpop.f32.mrf.mxu3 }
  0xe1   :  { %v6520_v39 = vpack.c.bf16 %v6324_v35, %v6324_v35  ;;  %v5733_v40 = vmax.f32 %v4383_v37, %v4971_v38  ;;  %v634_v35 = vld [vmem:[%s11883_s0 + $0x1360] sm:$0xff] }
  0xe3   :  { %6717 = vst.msk [vmem:[%s11885_s3 + $0x28] sm:$0xf] %vm6706_vm2, %v6520_v39  ;;  %v5929_v43 = vmax.f32 %v5537_v36, %v5733_v40  ;;  %v46_v39 = vld [vmem:[%s11883_s0 + $0x100] sm:$0xff] }
  0xe4   :  { %v3210_v44 = vpop.f32.mrf.mxu0  ;;  %v3798_v45 = vpop.f32.mrf.mxu1  ;;  %v242_v40 = vld [vmem:[%s11883_s0 + $0x720] sm:$0xff] }
  0xe5   :  { %v6129_v48 = vadd.f32 %v8006_v12, %v5929_v43  ;;  %7328 = vmatmul.msk.f32.gmra.mxu2 %vm800_vm1, %v434_v41  ;;  %7524 = vmatmul.msk.f32.gmra.mxu3 %vm800_vm1, %v630_v42  ;;  %v5538_v50 = vmax.f32 %v3210_v44, %v3798_v45 }
  0xe7   :  { %v6325_v49 = vmax.f32 %v6129_v48, 0.0  ;;  %6936 = vmatmul.msk.f32.gmra.mxu0 %vm800_vm1, %v42_v46  ;;  %7132 = vmatmul.msk.f32.gmra.mxu1 %vm800_vm1, %v238_v47  ;;  %v439_v48 = vld [vmem:[%s11883_s0 + $0xd48] sm:$0xff] }
  0xe8   :  { %v4386_v51 = vpop.f32.mrf.mxu2  ;;  %v4974_v52 = vpop.f32.mrf.mxu3 }
  0xe9   :  { %v6521_v53 = vpack.c.bf16 %v6325_v49, %v6325_v49  ;;  %v5734_v54 = vmax.f32 %v4386_v51, %v4974_v52  ;;  %v635_v49 = vld [vmem:[%s11883_s0 + $0x1368] sm:$0xff] }
  0xeb   :  { %6718 = vst.msk [vmem:[%s11885_s3 + $0x2c] sm:$0xf] %vm6706_vm2, %v6521_v53  ;;  %v5930_v57 = vmax.f32 %v5538_v50, %v5734_v54  ;;  %v47_v53 = vld [vmem:[%s11883_s0 + $0x108] sm:$0xff] }
  0xec   :  { %v3213_v58 = vpop.f32.mrf.mxu0  ;;  %v3801_v59 = vpop.f32.mrf.mxu1  ;;  %v243_v54 = vld [vmem:[%s11883_s0 + $0x728] sm:$0xff] }
  0xed   :  { %v6130_v62 = vadd.f32 %v8006_v12, %v5930_v57  ;;  %7329 = vmatmul.msk.f32.gmra.mxu2 %vm800_vm1, %v435_v55  ;;  %7525 = vmatmul.msk.f32.gmra.mxu3 %vm800_vm1, %v631_v56  ;;  %v5539_v0 = vmax.f32 %v3213_v58, %v3801_v59 }
  0xef   :  { %v6326_v63 = vmax.f32 %v6130_v62, 0.0  ;;  %6937 = vmatmul.msk.f32.gmra.mxu0 %vm800_vm1, %v43_v60  ;;  %7133 = vmatmul.msk.f32.gmra.mxu1 %vm800_vm1, %v239_v61  ;;  %v440_v62 = vld [vmem:[%s11883_s0 + $0xd50] sm:$0xff] }
  0xf0   :  { %v4389_v1 = vpop.f32.mrf.mxu2  ;;  %v4977_v2 = vpop.f32.mrf.mxu3 }
  0xf1   :  { %v6522_v3 = vpack.c.bf16 %v6326_v63, %v6326_v63  ;;  %v5735_v4 = vmax.f32 %v4389_v1, %v4977_v2  ;;  %v636_v63 = vld [vmem:[%s11883_s0 + $0x1370] sm:$0xff] }
  0xf3   :  { %6719 = vst.msk [vmem:[%s11885_s3 + $0x30] sm:$0xf] %vm6706_vm2, %v6522_v3  ;;  %v5931_v7 = vmax.f32 %v5539_v0, %v5735_v4  ;;  %v48_v3 = vld [vmem:[%s11883_s0 + $0x110] sm:$0xff] }
  0xf4   :  { %v3216_v8 = vpop.f32.mrf.mxu0  ;;  %v3804_v9 = vpop.f32.mrf.mxu1  ;;  %v244_v4 = vld [vmem:[%s11883_s0 + $0x730] sm:$0xff] }
  0xf5   :  { %v6131_v13 = vadd.f32 %v8006_v12, %v5931_v7  ;;  %7330 = vmatmul.msk.f32.gmra.mxu2 %vm800_vm1, %v436_v5  ;;  %7526 = vmatmul.msk.f32.gmra.mxu3 %vm800_vm1, %v632_v6  ;;  %v5540_v15 = vmax.f32 %v3216_v8, %v3804_v9 }
  0xf7   :  { %v6327_v14 = vmax.f32 %v6131_v13, 0.0  ;;  %6938 = vmatmul.msk.f32.gmra.mxu0 %vm800_vm1, %v44_v10  ;;  %7134 = vmatmul.msk.f32.gmra.mxu1 %vm800_vm1, %v240_v11  ;;  %v441_v13 = vld [vmem:[%s11883_s0 + $0xd58] sm:$0xff] }
  0xf8   :  { %v4392_v16 = vpop.f32.mrf.mxu2  ;;  %v4980_v17 = vpop.f32.mrf.mxu3 }
  0xf9   :  { %v6523_v18 = vpack.c.bf16 %v6327_v14, %v6327_v14  ;;  %v5736_v19 = vmax.f32 %v4392_v16, %v4980_v17  ;;  %v637_v14 = vld [vmem:[%s11883_s0 + $0x1378] sm:$0xff] }
  0xfb   :  { %6720 = vst.msk [vmem:[%s11885_s3 + $0x34] sm:$0xf] %vm6706_vm2, %v6523_v18  ;;  %v5932_v22 = vmax.f32 %v5540_v15, %v5736_v19  ;;  %v49_v18 = vld [vmem:[%s11883_s0 + $0x118] sm:$0xff] }
  0xfc   :  { %v3219_v23 = vpop.f32.mrf.mxu0  ;;  %v3807_v24 = vpop.f32.mrf.mxu1  ;;  %v245_v19 = vld [vmem:[%s11883_s0 + $0x738] sm:$0xff] }
  0xfd   :  { %v6132_v27 = vadd.f32 %v8006_v12, %v5932_v22  ;;  %7331 = vmatmul.msk.f32.gmra.mxu2 %vm800_vm1, %v437_v20  ;;  %7527 = vmatmul.msk.f32.gmra.mxu3 %vm800_vm1, %v633_v21  ;;  %v5541_v29 = vmax.f32 %v3219_v23, %v3807_v24 }
  0xff   :  { %v6328_v28 = vmax.f32 %v6132_v27, 0.0  ;;  %6939 = vmatmul.msk.f32.gmra.mxu0 %vm800_vm1, %v45_v25  ;;  %7135 = vmatmul.msk.f32.gmra.mxu1 %vm800_vm1, %v241_v26  ;;  %v442_v27 = vld [vmem:[%s11883_s0 + $0xd60] sm:$0xff] }
 0x100   :  { %v4395_v30 = vpop.f32.mrf.mxu2  ;;  %v4983_v31 = vpop.f32.mrf.mxu3 }
 0x101   :  { %v6524_v32 = vpack.c.bf16 %v6328_v28, %v6328_v28  ;;  %v5737_v33 = vmax.f32 %v4395_v30, %v4983_v31  ;;  %v638_v28 = vld [vmem:[%s11883_s0 + $0x1380] sm:$0xff] }
 0x103   :  { %6721 = vst.msk [vmem:[%s11885_s3 + $0x38] sm:$0xf] %vm6706_vm2, %v6524_v32  ;;  %v5933_v36 = vmax.f32 %v5541_v29, %v5737_v33  ;;  %v50_v32 = vld [vmem:[%s11883_s0 + $0x120] sm:$0xff] }
 0x104   :  { %v3222_v37 = vpop.f32.mrf.mxu0  ;;  %v3810_v38 = vpop.f32.mrf.mxu1  ;;  %v246_v33 = vld [vmem:[%s11883_s0 + $0x740] sm:$0xff] }
 0x105   :  { %v6133_v41 = vadd.f32 %v8006_v12, %v5933_v36  ;;  %7332 = vmatmul.msk.f32.gmra.mxu2 %vm800_vm1, %v438_v34  ;;  %7528 = vmatmul.msk.f32.gmra.mxu3 %vm800_vm1, %v634_v35  ;;  %v5542_v43 = vmax.f32 %v3222_v37, %v3810_v38 }
 0x107   :  { %v6329_v42 = vmax.f32 %v6133_v41, 0.0  ;;  %6940 = vmatmul.msk.f32.gmra.mxu0 %vm800_vm1, %v46_v39  ;;  %7136 = vmatmul.msk.f32.gmra.mxu1 %vm800_vm1, %v242_v40  ;;  %v443_v41 = vld [vmem:[%s11883_s0 + $0xd68] sm:$0xff] }
 0x108   :  { %v4398_v44 = vpop.f32.mrf.mxu2  ;;  %v4986_v45 = vpop.f32.mrf.mxu3 }
 0x109   :  { %v6525_v46 = vpack.c.bf16 %v6329_v42, %v6329_v42  ;;  %v5738_v47 = vmax.f32 %v4398_v44, %v4986_v45  ;;  %v639_v42 = vld [vmem:[%s11883_s0 + $0x1388] sm:$0xff] }
 0x10b   :  { %6722 = vst.msk [vmem:[%s11885_s3 + $0x3c] sm:$0xf] %vm6706_vm2, %v6525_v46  ;;  %v5934_v50 = vmax.f32 %v5542_v43, %v5738_v47  ;;  %v51_v46 = vld [vmem:[%s11883_s0 + $0x128] sm:$0xff] }
 0x10c   :  { %v3225_v51 = vpop.f32.mrf.mxu0  ;;  %v3813_v52 = vpop.f32.mrf.mxu1  ;;  %v247_v47 = vld [vmem:[%s11883_s0 + $0x748] sm:$0xff] }
 0x10d   :  { %v6134_v55 = vadd.f32 %v8006_v12, %v5934_v50  ;;  %7333 = vmatmul.msk.f32.gmra.mxu2 %vm800_vm1, %v439_v48  ;;  %7529 = vmatmul.msk.f32.gmra.mxu3 %vm800_vm1, %v635_v49  ;;  %v5543_v57 = vmax.f32 %v3225_v51, %v3813_v52 }
 0x10f   :  { %v6330_v56 = vmax.f32 %v6134_v55, 0.0  ;;  %6941 = vmatmul.msk.f32.gmra.mxu0 %vm800_vm1, %v47_v53  ;;  %7137 = vmatmul.msk.f32.gmra.mxu1 %vm800_vm1, %v243_v54  ;;  %v444_v55 = vld [vmem:[%s11883_s0 + $0xd70] sm:$0xff] }
 0x110   :  { %v4401_v58 = vpop.f32.mrf.mxu2  ;;  %v4989_v59 = vpop.f32.mrf.mxu3 }
 0x111   :  { %v6526_v60 = vpack.c.bf16 %v6330_v56, %v6330_v56  ;;  %v5739_v61 = vmax.f32 %v4401_v58, %v4989_v59  ;;  %v640_v56 = vld [vmem:[%s11883_s0 + $0x1390] sm:$0xff] }
 0x113   :  { %6723 = vst.msk [vmem:[%s11885_s3 + $0x40] sm:$0xf] %vm6706_vm2, %v6526_v60  ;;  %v5935_v0 = vmax.f32 %v5543_v57, %v5739_v61  ;;  %v52_v60 = vld [vmem:[%s11883_s0 + $0x130] sm:$0xff] }
 0x114   :  { %v3228_v1 = vpop.f32.mrf.mxu0  ;;  %v3816_v2 = vpop.f32.mrf.mxu1  ;;  %v248_v61 = vld [vmem:[%s11883_s0 + $0x750] sm:$0xff] }
 0x115   :  { %v6135_v5 = vadd.f32 %v8006_v12, %v5935_v0  ;;  %7334 = vmatmul.msk.f32.gmra.mxu2 %vm800_vm1, %v440_v62  ;;  %7530 = vmatmul.msk.f32.gmra.mxu3 %vm800_vm1, %v636_v63  ;;  %v5544_v7 = vmax.f32 %v3228_v1, %v3816_v2 }
 0x117   :  { %v6331_v6 = vmax.f32 %v6135_v5, 0.0  ;;  %6942 = vmatmul.msk.f32.gmra.mxu0 %vm800_vm1, %v48_v3  ;;  %7138 = vmatmul.msk.f32.gmra.mxu1 %vm800_vm1, %v244_v4  ;;  %v445_v5 = vld [vmem:[%s11883_s0 + $0xd78] sm:$0xff] }
 0x118   :  { %v4404_v8 = vpop.f32.mrf.mxu2  ;;  %v4992_v9 = vpop.f32.mrf.mxu3 }
 0x119   :  { %v6527_v10 = vpack.c.bf16 %v6331_v6, %v6331_v6  ;;  %v5740_v11 = vmax.f32 %v4404_v8, %v4992_v9  ;;  %v641_v6 = vld [vmem:[%s11883_s0 + $0x1398] sm:$0xff] }
 0x11b   :  { %6724 = vst.msk [vmem:[%s11885_s3 + $0x44] sm:$0xf] %vm6706_vm2, %v6527_v10  ;;  %v5936_v15 = vmax.f32 %v5544_v7, %v5740_v11  ;;  %v53_v10 = vld [vmem:[%s11883_s0 + $0x138] sm:$0xff] }
 0x11c   :  { %v3231_v16 = vpop.f32.mrf.mxu0  ;;  %v3819_v17 = vpop.f32.mrf.mxu1  ;;  %v249_v11 = vld [vmem:[%s11883_s0 + $0x758] sm:$0xff] }
 0x11d   :  { %v6136_v20 = vadd.f32 %v8006_v12, %v5936_v15  ;;  %7335 = vmatmul.msk.f32.gmra.mxu2 %vm800_vm1, %v441_v13  ;;  %7531 = vmatmul.msk.f32.gmra.mxu3 %vm800_vm1, %v637_v14  ;;  %v5545_v22 = vmax.f32 %v3231_v16, %v3819_v17 }
 0x11f   :  { %v6332_v21 = vmax.f32 %v6136_v20, 0.0  ;;  %6943 = vmatmul.msk.f32.gmra.mxu0 %vm800_vm1, %v49_v18  ;;  %7139 = vmatmul.msk.f32.gmra.mxu1 %vm800_vm1, %v245_v19  ;;  %v446_v20 = vld [vmem:[%s11883_s0 + $0xd80] sm:$0xff] }
 0x120   :  { %v4407_v23 = vpop.f32.mrf.mxu2  ;;  %v4995_v24 = vpop.f32.mrf.mxu3 }
 0x121   :  { %v6528_v25 = vpack.c.bf16 %v6332_v21, %v6332_v21  ;;  %v5741_v26 = vmax.f32 %v4407_v23, %v4995_v24  ;;  %v642_v21 = vld [vmem:[%s11883_s0 + $0x13a0] sm:$0xff] }
 0x123   :  { %6725 = vst.msk [vmem:[%s11885_s3 + $0x48] sm:$0xf] %vm6706_vm2, %v6528_v25  ;;  %v5937_v29 = vmax.f32 %v5545_v22, %v5741_v26  ;;  %v54_v25 = vld [vmem:[%s11883_s0 + $0x140] sm:$0xff] }
 0x124   :  { %v3234_v30 = vpop.f32.mrf.mxu0  ;;  %v3822_v31 = vpop.f32.mrf.mxu1  ;;  %v250_v26 = vld [vmem:[%s11883_s0 + $0x760] sm:$0xff] }
 0x125   :  { %v6137_v34 = vadd.f32 %v8006_v12, %v5937_v29  ;;  %7336 = vmatmul.msk.f32.gmra.mxu2 %vm800_vm1, %v442_v27  ;;  %7532 = vmatmul.msk.f32.gmra.mxu3 %vm800_vm1, %v638_v28  ;;  %v5546_v36 = vmax.f32 %v3234_v30, %v3822_v31 }
 0x127   :  { %v6333_v35 = vmax.f32 %v6137_v34, 0.0  ;;  %6944 = vmatmul.msk.f32.gmra.mxu0 %vm800_vm1, %v50_v32  ;;  %7140 = vmatmul.msk.f32.gmra.mxu1 %vm800_vm1, %v246_v33  ;;  %v447_v34 = vld [vmem:[%s11883_s0 + $0xd88] sm:$0xff] }
 0x128   :  { %v4410_v37 = vpop.f32.mrf.mxu2  ;;  %v4998_v38 = vpop.f32.mrf.mxu3 }
 0x129   :  { %v6529_v39 = vpack.c.bf16 %v6333_v35, %v6333_v35  ;;  %v5742_v40 = vmax.f32 %v4410_v37, %v4998_v38  ;;  %v643_v35 = vld [vmem:[%s11883_s0 + $0x13a8] sm:$0xff] }
 0x12b   :  { %6726 = vst.msk [vmem:[%s11885_s3 + $0x4c] sm:$0xf] %vm6706_vm2, %v6529_v39  ;;  %v5938_v43 = vmax.f32 %v5546_v36, %v5742_v40  ;;  %v55_v39 = vld [vmem:[%s11883_s0 + $0x148] sm:$0xff] }
 0x12c   :  { %v3237_v44 = vpop.f32.mrf.mxu0  ;;  %v3825_v45 = vpop.f32.mrf.mxu1  ;;  %v251_v40 = vld [vmem:[%s11883_s0 + $0x768] sm:$0xff] }
 0x12d   :  { %v6138_v48 = vadd.f32 %v8006_v12, %v5938_v43  ;;  %7337 = vmatmul.msk.f32.gmra.mxu2 %vm800_vm1, %v443_v41  ;;  %7533 = vmatmul.msk.f32.gmra.mxu3 %vm800_vm1, %v639_v42  ;;  %v5547_v50 = vmax.f32 %v3237_v44, %v3825_v45 }
 0x12f   :  { %v6334_v49 = vmax.f32 %v6138_v48, 0.0  ;;  %6945 = vmatmul.msk.f32.gmra.mxu0 %vm800_vm1, %v51_v46  ;;  %7141 = vmatmul.msk.f32.gmra.mxu1 %vm800_vm1, %v247_v47  ;;  %v448_v48 = vld [vmem:[%s11883_s0 + $0xd90] sm:$0xff] }
 0x130   :  { %v4413_v51 = vpop.f32.mrf.mxu2  ;;  %v5001_v52 = vpop.f32.mrf.mxu3 }
 0x131   :  { %v6530_v53 = vpack.c.bf16 %v6334_v49, %v6334_v49  ;;  %v5743_v54 = vmax.f32 %v4413_v51, %v5001_v52  ;;  %v644_v49 = vld [vmem:[%s11883_s0 + $0x13b0] sm:$0xff] }
 0x133   :  { %6727 = vst.msk [vmem:[%s11885_s3 + $0x50] sm:$0xf] %vm6706_vm2, %v6530_v53  ;;  %v5939_v57 = vmax.f32 %v5547_v50, %v5743_v54  ;;  %v56_v53 = vld [vmem:[%s11883_s0 + $0x150] sm:$0xff] }
 0x134   :  { %v3240_v58 = vpop.f32.mrf.mxu0  ;;  %v3828_v59 = vpop.f32.mrf.mxu1  ;;  %v252_v54 = vld [vmem:[%s11883_s0 + $0x770] sm:$0xff] }
 0x135   :  { %v6139_v62 = vadd.f32 %v8006_v12, %v5939_v57  ;;  %7338 = vmatmul.msk.f32.gmra.mxu2 %vm800_vm1, %v444_v55  ;;  %7534 = vmatmul.msk.f32.gmra.mxu3 %vm800_vm1, %v640_v56  ;;  %v5548_v0 = vmax.f32 %v3240_v58, %v3828_v59 }
 0x137   :  { %v6335_v63 = vmax.f32 %v6139_v62, 0.0  ;;  %6946 = vmatmul.msk.f32.gmra.mxu0 %vm800_vm1, %v52_v60  ;;  %7142 = vmatmul.msk.f32.gmra.mxu1 %vm800_vm1, %v248_v61  ;;  %v449_v62 = vld [vmem:[%s11883_s0 + $0xd98] sm:$0xff] }
 0x138   :  { %v4416_v1 = vpop.f32.mrf.mxu2  ;;  %v5004_v2 = vpop.f32.mrf.mxu3 }
 0x139   :  { %v6531_v3 = vpack.c.bf16 %v6335_v63, %v6335_v63  ;;  %v5744_v4 = vmax.f32 %v4416_v1, %v5004_v2  ;;  %v645_v63 = vld [vmem:[%s11883_s0 + $0x13b8] sm:$0xff] }
 0x13b   :  { %6728 = vst.msk [vmem:[%s11885_s3 + $0x54] sm:$0xf] %vm6706_vm2, %v6531_v3  ;;  %v5940_v7 = vmax.f32 %v5548_v0, %v5744_v4  ;;  %v57_v3 = vld [vmem:[%s11883_s0 + $0x158] sm:$0xff] }
 0x13c   :  { %v3243_v8 = vpop.f32.mrf.mxu0  ;;  %v3831_v9 = vpop.f32.mrf.mxu1  ;;  %v253_v4 = vld [vmem:[%s11883_s0 + $0x778] sm:$0xff] }
 0x13d   :  { %v6140_v13 = vadd.f32 %v8006_v12, %v5940_v7  ;;  %7339 = vmatmul.msk.f32.gmra.mxu2 %vm800_vm1, %v445_v5  ;;  %7535 = vmatmul.msk.f32.gmra.mxu3 %vm800_vm1, %v641_v6  ;;  %v5549_v15 = vmax.f32 %v3243_v8, %v3831_v9 }
 0x13f   :  { %v6336_v14 = vmax.f32 %v6140_v13, 0.0  ;;  %6947 = vmatmul.msk.f32.gmra.mxu0 %vm800_vm1, %v53_v10  ;;  %7143 = vmatmul.msk.f32.gmra.mxu1 %vm800_vm1, %v249_v11  ;;  %v450_v13 = vld [vmem:[%s11883_s0 + $0xda0] sm:$0xff] }
 0x140   :  { %v4419_v16 = vpop.f32.mrf.mxu2  ;;  %v5007_v17 = vpop.f32.mrf.mxu3 }
 0x141   :  { %v6532_v18 = vpack.c.bf16 %v6336_v14, %v6336_v14  ;;  %v5745_v19 = vmax.f32 %v4419_v16, %v5007_v17  ;;  %v58_v17 = vld [vmem:[%s11883_s0 + $0x160] sm:$0xff] }
 0x143   :  { %6729 = vst.msk [vmem:[%s11885_s3 + $0x58] sm:$0xf] %vm6706_vm2, %v6532_v18  ;;  %v5941_v22 = vmax.f32 %v5549_v15, %v5745_v19  ;;  %v254_v18 = vld [vmem:[%s11883_s0 + $0x780] sm:$0xff] }
 0x144   :  { %v3246_v23 = vpop.f32.mrf.mxu0  ;;  %v3834_v24 = vpop.f32.mrf.mxu1  ;;  %v8590_v19 = vld [vmem:[%s11884_s2] ss:$0 sm:$0xff] }
 0x145   :  { %v6141_v27 = vadd.f32 %v8006_v12, %v5941_v22  ;;  %7340 = vmatmul.msk.f32.gmra.mxu2 %vm800_vm1, %v446_v20  ;;  %7536 = vmatmul.msk.f32.gmra.mxu3 %vm800_vm1, %v642_v21  ;;  %v5550_v29 = vmax.f32 %v3246_v23, %v3834_v24 }
 0x147   :  { %v6337_v28 = vmax.f32 %v6141_v27, 0.0  ;;  %6948 = vmatmul.msk.f32.gmra.mxu0 %vm800_vm1, %v54_v25  ;;  %7144 = vmatmul.msk.f32.gmra.mxu1 %vm800_vm1, %v250_v26  ;;  %v451_v27 = vld [vmem:[%s11883_s0 + $0xda8] sm:$0xff] }
 0x148   :  { %v4422_v30 = vpop.f32.mrf.mxu2  ;;  %v5010_v31 = vpop.f32.mrf.mxu3 }
 0x149   :  { %v6533_v32 = vpack.c.bf16 %v6337_v28, %v6337_v28  ;;  %v5746_v33 = vmax.f32 %v4422_v30, %v5010_v31  ;;  %v647_v28 = vld [vmem:[%s11883_s0 + $0x13c8] sm:$0xff] }
 0x14b   :  { %6730 = vst.msk [vmem:[%s11885_s3 + $0x5c] sm:$0xf] %vm6706_vm2, %v6533_v32  ;;  %v5942_v36 = vmax.f32 %v5550_v29, %v5746_v33  ;;  %v59_v32 = vld [vmem:[%s11883_s0 + $0x168] sm:$0xff] }
 0x14c   :  { %v3249_v37 = vpop.f32.mrf.mxu0  ;;  %v3837_v38 = vpop.f32.mrf.mxu1  ;;  %v255_v33 = vld [vmem:[%s11883_s0 + $0x788] sm:$0xff] }
 0x14d   :  { %v6142_v41 = vadd.f32 %v8006_v12, %v5942_v36  ;;  %7341 = vmatmul.msk.f32.gmra.mxu2 %vm800_vm1, %v447_v34  ;;  %7537 = vmatmul.msk.f32.gmra.mxu3 %vm800_vm1, %v643_v35  ;;  %v5551_v43 = vmax.f32 %v3249_v37, %v3837_v38 }
 0x14f   :  { %v6338_v42 = vmax.f32 %v6142_v41, 0.0  ;;  %6949 = vmatmul.msk.f32.gmra.mxu0 %vm800_vm1, %v55_v39  ;;  %7145 = vmatmul.msk.f32.gmra.mxu1 %vm800_vm1, %v251_v40  ;;  %v452_v41 = vld [vmem:[%s11883_s0 + $0xdb0] sm:$0xff] }
 0x150   :  { %v4425_v44 = vpop.f32.mrf.mxu2  ;;  %v5013_v45 = vpop.f32.mrf.mxu3 }
 0x151   :  { %v6534_v46 = vpack.c.bf16 %v6338_v42, %v6338_v42  ;;  %v5747_v47 = vmax.f32 %v4425_v44, %v5013_v45  ;;  %v648_v42 = vld [vmem:[%s11883_s0 + $0x13d0] sm:$0xff] }
 0x153   :  { %6731 = vst.msk [vmem:[%s11885_s3 + $0x60] sm:$0xf] %vm6706_vm2, %v6534_v46  ;;  %v5943_v50 = vmax.f32 %v5551_v43, %v5747_v47  ;;  %v60_v46 = vld [vmem:[%s11883_s0 + $0x170] sm:$0xff] }
 0x154   :  { %v3252_v51 = vpop.f32.mrf.mxu0  ;;  %v3840_v52 = vpop.f32.mrf.mxu1  ;;  %v256_v47 = vld [vmem:[%s11883_s0 + $0x790] sm:$0xff] }
 0x155   :  { %v6143_v55 = vadd.f32 %v8006_v12, %v5943_v50  ;;  %7342 = vmatmul.msk.f32.gmra.mxu2 %vm800_vm1, %v448_v48  ;;  %7538 = vmatmul.msk.f32.gmra.mxu3 %vm800_vm1, %v644_v49  ;;  %v5552_v57 = vmax.f32 %v3252_v51, %v3840_v52 }
 0x157   :  { %v6339_v56 = vmax.f32 %v6143_v55, 0.0  ;;  %6950 = vmatmul.msk.f32.gmra.mxu0 %vm800_vm1, %v56_v53  ;;  %7146 = vmatmul.msk.f32.gmra.mxu1 %vm800_vm1, %v252_v54  ;;  %v453_v55 = vld [vmem:[%s11883_s0 + $0xdb8] sm:$0xff] }
 0x158   :  { %v4428_v58 = vpop.f32.mrf.mxu2  ;;  %v5016_v59 = vpop.f32.mrf.mxu3 }
 0x159   :  { %v6535_v60 = vpack.c.bf16 %v6339_v56, %v6339_v56  ;;  %v5748_v61 = vmax.f32 %v4428_v58, %v5016_v59  ;;  %v649_v56 = vld [vmem:[%s11883_s0 + $0x13d8] sm:$0xff] }
 0x15b   :  { %6732 = vst.msk [vmem:[%s11885_s3 + $0x64] sm:$0xf] %vm6706_vm2, %v6535_v60  ;;  %v5944_v0 = vmax.f32 %v5552_v57, %v5748_v61  ;;  %v61_v60 = vld [vmem:[%s11883_s0 + $0x178] sm:$0xff] }
 0x15c   :  { %v3255_v1 = vpop.f32.mrf.mxu0  ;;  %v3843_v2 = vpop.f32.mrf.mxu1  ;;  %v257_v61 = vld [vmem:[%s11883_s0 + $0x798] sm:$0xff] }
 0x15d   :  { %v6144_v5 = vadd.f32 %v8006_v12, %v5944_v0  ;;  %7343 = vmatmul.msk.f32.gmra.mxu2 %vm800_vm1, %v449_v62  ;;  %7539 = vmatmul.msk.f32.gmra.mxu3 %vm800_vm1, %v645_v63  ;;  %v5553_v7 = vmax.f32 %v3255_v1, %v3843_v2  ;;  %v646_v12 = vld [vmem:[%s11883_s0 + $0x13c0] sm:$0xff] }
 0x15f   :  { %v6340_v6 = vmax.f32 %v6144_v5, 0.0  ;;  %6951 = vmatmul.msk.f32.gmra.mxu0 %vm800_vm1, %v57_v3  ;;  %7147 = vmatmul.msk.f32.gmra.mxu1 %vm800_vm1, %v253_v4  ;;  %v454_v5 = vld [vmem:[%s11883_s0 + $0xdc0] sm:$0xff] }
 0x160   :  { %v4431_v8 = vpop.f32.mrf.mxu2  ;;  %v5019_v9 = vpop.f32.mrf.mxu3 }
 0x161   :  { %v6536_v10 = vpack.c.bf16 %v6340_v6, %v6340_v6  ;;  %v5749_v11 = vmax.f32 %v4431_v8, %v5019_v9  ;;  %v650_v6 = vld [vmem:[%s11883_s0 + $0x13e0] sm:$0xff] }
 0x163   :  { %6733 = vst.msk [vmem:[%s11885_s3 + $0x68] sm:$0xf] %vm6706_vm2, %v6536_v10  ;;  %v5945_v14 = vmax.f32 %v5553_v7, %v5749_v11  ;;  %v62_v10 = vld [vmem:[%s11883_s0 + $0x180] sm:$0xff] }
 0x164   :  { %v3258_v15 = vpop.f32.mrf.mxu0  ;;  %v3846_v16 = vpop.f32.mrf.mxu1  ;;  %v258_v11 = vld [vmem:[%s11883_s0 + $0x7a0] sm:$0xff] }
 0x165   :  { %v6145_v20 = vadd.f32 %v8590_v19, %v5945_v14  ;;  %7344 = vmatmul.msk.f32.gmra.mxu2 %vm800_vm1, %v450_v13  ;;  %7540 = vmatmul.msk.f32.gmra.mxu3 %vm800_vm1, %v646_v12  ;;  %v5554_v22 = vmax.f32 %v3258_v15, %v3846_v16 }
 0x167   :  { %v6341_v21 = vmax.f32 %v6145_v20, 0.0  ;;  %6952 = vmatmul.msk.f32.gmra.mxu0 %vm800_vm1, %v58_v17  ;;  %7148 = vmatmul.msk.f32.gmra.mxu1 %vm800_vm1, %v254_v18  ;;  %v455_v20 = vld [vmem:[%s11883_s0 + $0xdc8] sm:$0xff] }
 0x168   :  { %v4434_v23 = vpop.f32.mrf.mxu2  ;;  %v5022_v24 = vpop.f32.mrf.mxu3 }
 0x169   :  { %v6537_v25 = vpack.c.bf16 %v6341_v21, %v6341_v21  ;;  %v5750_v26 = vmax.f32 %v4434_v23, %v5022_v24  ;;  %v651_v21 = vld [vmem:[%s11883_s0 + $0x13e8] sm:$0xff] }
 0x16b   :  { %6734 = vst.msk [vmem:[%s11885_s3 + $0x6c] sm:$0xf] %vm6706_vm2, %v6537_v25  ;;  %v5946_v29 = vmax.f32 %v5554_v22, %v5750_v26  ;;  %v63_v25 = vld [vmem:[%s11883_s0 + $0x188] sm:$0xff] }
 0x16c   :  { %v3261_v30 = vpop.f32.mrf.mxu0  ;;  %v3849_v31 = vpop.f32.mrf.mxu1  ;;  %v259_v26 = vld [vmem:[%s11883_s0 + $0x7a8] sm:$0xff] }
 0x16d   :  { %v6146_v34 = vadd.f32 %v8590_v19, %v5946_v29  ;;  %7345 = vmatmul.msk.f32.gmra.mxu2 %vm800_vm1, %v451_v27  ;;  %7541 = vmatmul.msk.f32.gmra.mxu3 %vm800_vm1, %v647_v28  ;;  %v5555_v36 = vmax.f32 %v3261_v30, %v3849_v31 }
 0x16f   :  { %v6342_v35 = vmax.f32 %v6146_v34, 0.0  ;;  %6953 = vmatmul.msk.f32.gmra.mxu0 %vm800_vm1, %v59_v32  ;;  %7149 = vmatmul.msk.f32.gmra.mxu1 %vm800_vm1, %v255_v33  ;;  %v456_v34 = vld [vmem:[%s11883_s0 + $0xdd0] sm:$0xff] }
 0x170   :  { %v4437_v37 = vpop.f32.mrf.mxu2  ;;  %v5025_v38 = vpop.f32.mrf.mxu3 }
 0x171   :  { %v6538_v39 = vpack.c.bf16 %v6342_v35, %v6342_v35  ;;  %v5751_v40 = vmax.f32 %v4437_v37, %v5025_v38  ;;  %v652_v35 = vld [vmem:[%s11883_s0 + $0x13f0] sm:$0xff] }
 0x173   :  { %6735 = vst.msk [vmem:[%s11885_s3 + $0x70] sm:$0xf] %vm6706_vm2, %v6538_v39  ;;  %v5947_v43 = vmax.f32 %v5555_v36, %v5751_v40  ;;  %v64_v39 = vld [vmem:[%s11883_s0 + $0x190] sm:$0xff] }
 0x174   :  { %v3264_v44 = vpop.f32.mrf.mxu0  ;;  %v3852_v45 = vpop.f32.mrf.mxu1  ;;  %v260_v40 = vld [vmem:[%s11883_s0 + $0x7b0] sm:$0xff] }
 0x175   :  { %v6147_v48 = vadd.f32 %v8590_v19, %v5947_v43  ;;  %7346 = vmatmul.msk.f32.gmra.mxu2 %vm800_vm1, %v452_v41  ;;  %7542 = vmatmul.msk.f32.gmra.mxu3 %vm800_vm1, %v648_v42  ;;  %v5556_v50 = vmax.f32 %v3264_v44, %v3852_v45 }
 0x177   :  { %v6343_v49 = vmax.f32 %v6147_v48, 0.0  ;;  %6954 = vmatmul.msk.f32.gmra.mxu0 %vm800_vm1, %v60_v46  ;;  %7150 = vmatmul.msk.f32.gmra.mxu1 %vm800_vm1, %v256_v47  ;;  %v457_v48 = vld [vmem:[%s11883_s0 + $0xdd8] sm:$0xff] }
 0x178   :  { %v4440_v51 = vpop.f32.mrf.mxu2  ;;  %v5028_v52 = vpop.f32.mrf.mxu3 }
 0x179   :  { %v6539_v53 = vpack.c.bf16 %v6343_v49, %v6343_v49  ;;  %v5752_v54 = vmax.f32 %v4440_v51, %v5028_v52  ;;  %v653_v49 = vld [vmem:[%s11883_s0 + $0x13f8] sm:$0xff] }
 0x17b   :  { %6736 = vst.msk [vmem:[%s11885_s3 + $0x74] sm:$0xf] %vm6706_vm2, %v6539_v53  ;;  %v5948_v57 = vmax.f32 %v5556_v50, %v5752_v54  ;;  %v65_v53 = vld [vmem:[%s11883_s0 + $0x198] sm:$0xff] }
 0x17c   :  { %v3267_v58 = vpop.f32.mrf.mxu0  ;;  %v3855_v59 = vpop.f32.mrf.mxu1  ;;  %v261_v54 = vld [vmem:[%s11883_s0 + $0x7b8] sm:$0xff] }
 0x17d   :  { %v6148_v62 = vadd.f32 %v8590_v19, %v5948_v57  ;;  %7347 = vmatmul.msk.f32.gmra.mxu2 %vm800_vm1, %v453_v55  ;;  %7543 = vmatmul.msk.f32.gmra.mxu3 %vm800_vm1, %v649_v56  ;;  %v5557_v0 = vmax.f32 %v3267_v58, %v3855_v59 }
 0x17f   :  { %v6344_v63 = vmax.f32 %v6148_v62, 0.0  ;;  %6955 = vmatmul.msk.f32.gmra.mxu0 %vm800_vm1, %v61_v60  ;;  %7151 = vmatmul.msk.f32.gmra.mxu1 %vm800_vm1, %v257_v61  ;;  %v458_v62 = vld [vmem:[%s11883_s0 + $0xde0] sm:$0xff] }
 0x180   :  { %v4443_v1 = vpop.f32.mrf.mxu2  ;;  %v5031_v2 = vpop.f32.mrf.mxu3 }
 0x181   :  { %v6540_v3 = vpack.c.bf16 %v6344_v63, %v6344_v63  ;;  %v5753_v4 = vmax.f32 %v4443_v1, %v5031_v2  ;;  %v654_v63 = vld [vmem:[%s11883_s0 + $0x1400] sm:$0xff] }
 0x183   :  { %6737 = vst.msk [vmem:[%s11885_s3 + $0x78] sm:$0xf] %vm6706_vm2, %v6540_v3  ;;  %v5949_v7 = vmax.f32 %v5557_v0, %v5753_v4  ;;  %v66_v3 = vld [vmem:[%s11883_s0 + $0x1a0] sm:$0xff] }
 0x184   :  { %v3270_v8 = vpop.f32.mrf.mxu0  ;;  %v3858_v9 = vpop.f32.mrf.mxu1  ;;  %v262_v4 = vld [vmem:[%s11883_s0 + $0x7c0] sm:$0xff] }
 0x185   :  { %v6149_v13 = vadd.f32 %v8590_v19, %v5949_v7  ;;  %7348 = vmatmul.msk.f32.gmra.mxu2 %vm800_vm1, %v454_v5  ;;  %7544 = vmatmul.msk.f32.gmra.mxu3 %vm800_vm1, %v650_v6  ;;  %v5558_v14 = vmax.f32 %v3270_v8, %v3858_v9 }
 0x187   :  { %v6345_v12 = vmax.f32 %v6149_v13, 0.0  ;;  %6956 = vmatmul.msk.f32.gmra.mxu0 %vm800_vm1, %v62_v10  ;;  %7152 = vmatmul.msk.f32.gmra.mxu1 %vm800_vm1, %v258_v11  ;;  %v459_v13 = vld [vmem:[%s11883_s0 + $0xde8] sm:$0xff] }
 0x188   :  { %v4446_v15 = vpop.f32.mrf.mxu2  ;;  %v5034_v16 = vpop.f32.mrf.mxu3 }
 0x189   :  { %v6541_v17 = vpack.c.bf16 %v6345_v12, %v6345_v12  ;;  %v5754_v18 = vmax.f32 %v4446_v15, %v5034_v16  ;;  %v655_v12 = vld [vmem:[%s11883_s0 + $0x1408] sm:$0xff] }
 0x18b   :  { %6738 = vst.msk [vmem:[%s11885_s3 + $0x7c] sm:$0xf] %vm6706_vm2, %v6541_v17  ;;  %v5950_v22 = vmax.f32 %v5558_v14, %v5754_v18  ;;  %v67_v17 = vld [vmem:[%s11883_s0 + $0x1a8] sm:$0xff] }
 0x18c   :  { %v3273_v23 = vpop.f32.mrf.mxu0  ;;  %v3861_v24 = vpop.f32.mrf.mxu1  ;;  %v263_v18 = vld [vmem:[%s11883_s0 + $0x7c8] sm:$0xff] }
 0x18d   :  { %v6150_v27 = vadd.f32 %v8590_v19, %v5950_v22  ;;  %7349 = vmatmul.msk.f32.gmra.mxu2 %vm800_vm1, %v455_v20  ;;  %7545 = vmatmul.msk.f32.gmra.mxu3 %vm800_vm1, %v651_v21  ;;  %v5559_v29 = vmax.f32 %v3273_v23, %v3861_v24 }
 0x18f   :  { %v6346_v28 = vmax.f32 %v6150_v27, 0.0  ;;  %6957 = vmatmul.msk.f32.gmra.mxu0 %vm800_vm1, %v63_v25  ;;  %7153 = vmatmul.msk.f32.gmra.mxu1 %vm800_vm1, %v259_v26  ;;  %v460_v27 = vld [vmem:[%s11883_s0 + $0xdf0] sm:$0xff] }
 0x190   :  { %v4449_v30 = vpop.f32.mrf.mxu2  ;;  %v5037_v31 = vpop.f32.mrf.mxu3 }
 0x191   :  { %v6542_v32 = vpack.c.bf16 %v6346_v28, %v6346_v28  ;;  %v5755_v33 = vmax.f32 %v4449_v30, %v5037_v31  ;;  %v656_v28 = vld [vmem:[%s11883_s0 + $0x1410] sm:$0xff] }
 0x193   :  { %6739 = vst.msk [vmem:[%s11885_s3 + $0x80] sm:$0xf] %vm6706_vm2, %v6542_v32  ;;  %v5951_v36 = vmax.f32 %v5559_v29, %v5755_v33  ;;  %v68_v32 = vld [vmem:[%s11883_s0 + $0x1b0] sm:$0xff] }
 0x194   :  { %v3276_v37 = vpop.f32.mrf.mxu0  ;;  %v3864_v38 = vpop.f32.mrf.mxu1  ;;  %v264_v33 = vld [vmem:[%s11883_s0 + $0x7d0] sm:$0xff] }
 0x195   :  { %v6151_v41 = vadd.f32 %v8590_v19, %v5951_v36  ;;  %7350 = vmatmul.msk.f32.gmra.mxu2 %vm800_vm1, %v456_v34  ;;  %7546 = vmatmul.msk.f32.gmra.mxu3 %vm800_vm1, %v652_v35  ;;  %v5560_v43 = vmax.f32 %v3276_v37, %v3864_v38 }
 0x197   :  { %v6347_v42 = vmax.f32 %v6151_v41, 0.0  ;;  %6958 = vmatmul.msk.f32.gmra.mxu0 %vm800_vm1, %v64_v39  ;;  %7154 = vmatmul.msk.f32.gmra.mxu1 %vm800_vm1, %v260_v40  ;;  %v461_v41 = vld [vmem:[%s11883_s0 + $0xdf8] sm:$0xff] }
 0x198   :  { %v4452_v44 = vpop.f32.mrf.mxu2  ;;  %v5040_v45 = vpop.f32.mrf.mxu3 }
 0x199   :  { %v6543_v46 = vpack.c.bf16 %v6347_v42, %v6347_v42  ;;  %v5756_v47 = vmax.f32 %v4452_v44, %v5040_v45  ;;  %v657_v42 = vld [vmem:[%s11883_s0 + $0x1418] sm:$0xff] }
 0x19b   :  { %6740 = vst.msk [vmem:[%s11885_s3 + $0x84] sm:$0xf] %vm6706_vm2, %v6543_v46  ;;  %v5952_v50 = vmax.f32 %v5560_v43, %v5756_v47  ;;  %v69_v46 = vld [vmem:[%s11883_s0 + $0x1b8] sm:$0xff] }
 0x19c   :  { %v3279_v51 = vpop.f32.mrf.mxu0  ;;  %v3867_v52 = vpop.f32.mrf.mxu1  ;;  %v265_v47 = vld [vmem:[%s11883_s0 + $0x7d8] sm:$0xff] }
 0x19d   :  { %v6152_v55 = vadd.f32 %v8590_v19, %v5952_v50  ;;  %7351 = vmatmul.msk.f32.gmra.mxu2 %vm800_vm1, %v457_v48  ;;  %7547 = vmatmul.msk.f32.gmra.mxu3 %vm800_vm1, %v653_v49  ;;  %v5561_v57 = vmax.f32 %v3279_v51, %v3867_v52 }
 0x19f   :  { %v6348_v56 = vmax.f32 %v6152_v55, 0.0  ;;  %6959 = vmatmul.msk.f32.gmra.mxu0 %vm800_vm1, %v65_v53  ;;  %7155 = vmatmul.msk.f32.gmra.mxu1 %vm800_vm1, %v261_v54  ;;  %v462_v55 = vld [vmem:[%s11883_s0 + $0xe00] sm:$0xff] }
 0x1a0   :  { %v4455_v58 = vpop.f32.mrf.mxu2  ;;  %v5043_v59 = vpop.f32.mrf.mxu3 }
 0x1a1   :  { %v6544_v60 = vpack.c.bf16 %v6348_v56, %v6348_v56  ;;  %v5757_v61 = vmax.f32 %v4455_v58, %v5043_v59  ;;  %v658_v56 = vld [vmem:[%s11883_s0 + $0x1420] sm:$0xff] }
 0x1a3   :  { %6741 = vst.msk [vmem:[%s11885_s3 + $0x88] sm:$0xf] %vm6706_vm2, %v6544_v60  ;;  %v5953_v0 = vmax.f32 %v5561_v57, %v5757_v61  ;;  %v70_v60 = vld [vmem:[%s11883_s0 + $0x1c0] sm:$0xff] }
 0x1a4   :  { %v3282_v1 = vpop.f32.mrf.mxu0  ;;  %v3870_v2 = vpop.f32.mrf.mxu1  ;;  %v266_v61 = vld [vmem:[%s11883_s0 + $0x7e0] sm:$0xff] }
 0x1a5   :  { %v6153_v5 = vadd.f32 %v8590_v19, %v5953_v0  ;;  %7352 = vmatmul.msk.f32.gmra.mxu2 %vm800_vm1, %v458_v62  ;;  %7548 = vmatmul.msk.f32.gmra.mxu3 %vm800_vm1, %v654_v63  ;;  %v5562_v7 = vmax.f32 %v3282_v1, %v3870_v2 }
 0x1a7   :  { %v6349_v6 = vmax.f32 %v6153_v5, 0.0  ;;  %6960 = vmatmul.msk.f32.gmra.mxu0 %vm800_vm1, %v66_v3  ;;  %7156 = vmatmul.msk.f32.gmra.mxu1 %vm800_vm1, %v262_v4  ;;  %v463_v5 = vld [vmem:[%s11883_s0 + $0xe08] sm:$0xff] }
 0x1a8   :  { %v4458_v8 = vpop.f32.mrf.mxu2  ;;  %v5046_v9 = vpop.f32.mrf.mxu3 }
 0x1a9   :  { %v6545_v10 = vpack.c.bf16 %v6349_v6, %v6349_v6  ;;  %v5758_v11 = vmax.f32 %v4458_v8, %v5046_v9  ;;  %v659_v6 = vld [vmem:[%s11883_s0 + $0x1428] sm:$0xff] }
 0x1ab   :  { %6742 = vst.msk [vmem:[%s11885_s3 + $0x8c] sm:$0xf] %vm6706_vm2, %v6545_v10  ;;  %v5954_v14 = vmax.f32 %v5562_v7, %v5758_v11  ;;  %v71_v10 = vld [vmem:[%s11883_s0 + $0x1c8] sm:$0xff] }
 0x1ac   :  { %v3285_v15 = vpop.f32.mrf.mxu0  ;;  %v3873_v16 = vpop.f32.mrf.mxu1  ;;  %v267_v11 = vld [vmem:[%s11883_s0 + $0x7e8] sm:$0xff] }
 0x1ad   :  { %v6154_v20 = vadd.f32 %v8590_v19, %v5954_v14  ;;  %7353 = vmatmul.msk.f32.gmra.mxu2 %vm800_vm1, %v459_v13  ;;  %7549 = vmatmul.msk.f32.gmra.mxu3 %vm800_vm1, %v655_v12  ;;  %v5563_v22 = vmax.f32 %v3285_v15, %v3873_v16 }
 0x1af   :  { %v6350_v21 = vmax.f32 %v6154_v20, 0.0  ;;  %6961 = vmatmul.msk.f32.gmra.mxu0 %vm800_vm1, %v67_v17  ;;  %7157 = vmatmul.msk.f32.gmra.mxu1 %vm800_vm1, %v263_v18  ;;  %v464_v20 = vld [vmem:[%s11883_s0 + $0xe10] sm:$0xff] }
 0x1b0   :  { %v4461_v23 = vpop.f32.mrf.mxu2  ;;  %v5049_v24 = vpop.f32.mrf.mxu3 }
 0x1b1   :  { %v6546_v25 = vpack.c.bf16 %v6350_v21, %v6350_v21  ;;  %v5759_v26 = vmax.f32 %v4461_v23, %v5049_v24  ;;  %v660_v21 = vld [vmem:[%s11883_s0 + $0x1430] sm:$0xff] }
 0x1b3   :  { %6743 = vst.msk [vmem:[%s11885_s3 + $0x90] sm:$0xf] %vm6706_vm2, %v6546_v25  ;;  %v5955_v29 = vmax.f32 %v5563_v22, %v5759_v26  ;;  %v72_v25 = vld [vmem:[%s11883_s0 + $0x1d0] sm:$0xff] }
 0x1b4   :  { %v3288_v30 = vpop.f32.mrf.mxu0  ;;  %v3876_v31 = vpop.f32.mrf.mxu1  ;;  %v268_v26 = vld [vmem:[%s11883_s0 + $0x7f0] sm:$0xff] }
 0x1b5   :  { %v6155_v34 = vadd.f32 %v8590_v19, %v5955_v29  ;;  %7354 = vmatmul.msk.f32.gmra.mxu2 %vm800_vm1, %v460_v27  ;;  %7550 = vmatmul.msk.f32.gmra.mxu3 %vm800_vm1, %v656_v28  ;;  %v5564_v36 = vmax.f32 %v3288_v30, %v3876_v31 }
 0x1b7   :  { %v6351_v35 = vmax.f32 %v6155_v34, 0.0  ;;  %6962 = vmatmul.msk.f32.gmra.mxu0 %vm800_vm1, %v68_v32  ;;  %7158 = vmatmul.msk.f32.gmra.mxu1 %vm800_vm1, %v264_v33  ;;  %v465_v34 = vld [vmem:[%s11883_s0 + $0xe18] sm:$0xff] }
 0x1b8   :  { %v4464_v37 = vpop.f32.mrf.mxu2  ;;  %v5052_v38 = vpop.f32.mrf.mxu3 }
 0x1b9   :  { %v6547_v39 = vpack.c.bf16 %v6351_v35, %v6351_v35  ;;  %v5760_v40 = vmax.f32 %v4464_v37, %v5052_v38  ;;  %v661_v35 = vld [vmem:[%s11883_s0 + $0x1438] sm:$0xff] }
 0x1bb   :  { %6744 = vst.msk [vmem:[%s11885_s3 + $0x94] sm:$0xf] %vm6706_vm2, %v6547_v39  ;;  %v5956_v43 = vmax.f32 %v5564_v36, %v5760_v40  ;;  %v73_v39 = vld [vmem:[%s11883_s0 + $0x1d8] sm:$0xff] }
 0x1bc   :  { %v3291_v44 = vpop.f32.mrf.mxu0  ;;  %v3879_v45 = vpop.f32.mrf.mxu1  ;;  %v269_v40 = vld [vmem:[%s11883_s0 + $0x7f8] sm:$0xff] }
 0x1bd   :  { %v6156_v48 = vadd.f32 %v8590_v19, %v5956_v43  ;;  %7355 = vmatmul.msk.f32.gmra.mxu2 %vm800_vm1, %v461_v41  ;;  %7551 = vmatmul.msk.f32.gmra.mxu3 %vm800_vm1, %v657_v42  ;;  %v5565_v50 = vmax.f32 %v3291_v44, %v3879_v45 }
 0x1bf   :  { %v6352_v49 = vmax.f32 %v6156_v48, 0.0  ;;  %6963 = vmatmul.msk.f32.gmra.mxu0 %vm800_vm1, %v69_v46  ;;  %7159 = vmatmul.msk.f32.gmra.mxu1 %vm800_vm1, %v265_v47  ;;  %v466_v48 = vld [vmem:[%s11883_s0 + $0xe20] sm:$0xff] }
 0x1c0   :  { %v4467_v51 = vpop.f32.mrf.mxu2  ;;  %v5055_v52 = vpop.f32.mrf.mxu3 }
 0x1c1   :  { %v6548_v53 = vpack.c.bf16 %v6352_v49, %v6352_v49  ;;  %v5761_v54 = vmax.f32 %v4467_v51, %v5055_v52  ;;  %v662_v49 = vld [vmem:[%s11883_s0 + $0x1440] sm:$0xff] }
 0x1c3   :  { %6745 = vst.msk [vmem:[%s11885_s3 + $0x98] sm:$0xf] %vm6706_vm2, %v6548_v53  ;;  %v5957_v57 = vmax.f32 %v5565_v50, %v5761_v54  ;;  %v74_v53 = vld [vmem:[%s11883_s0 + $0x1e0] sm:$0xff] }
 0x1c4   :  { %v3294_v58 = vpop.f32.mrf.mxu0  ;;  %v3882_v59 = vpop.f32.mrf.mxu1  ;;  %v270_v54 = vld [vmem:[%s11883_s0 + $0x800] sm:$0xff] }
 0x1c5   :  { %v6157_v62 = vadd.f32 %v8590_v19, %v5957_v57  ;;  %7356 = vmatmul.msk.f32.gmra.mxu2 %vm800_vm1, %v462_v55  ;;  %7552 = vmatmul.msk.f32.gmra.mxu3 %vm800_vm1, %v658_v56  ;;  %v5566_v0 = vmax.f32 %v3294_v58, %v3882_v59 }
 0x1c7   :  { %v6353_v63 = vmax.f32 %v6157_v62, 0.0  ;;  %6964 = vmatmul.msk.f32.gmra.mxu0 %vm800_vm1, %v70_v60  ;;  %7160 = vmatmul.msk.f32.gmra.mxu1 %vm800_vm1, %v266_v61  ;;  %v467_v62 = vld [vmem:[%s11883_s0 + $0xe28] sm:$0xff] }
 0x1c8   :  { %v4470_v1 = vpop.f32.mrf.mxu2  ;;  %v5058_v2 = vpop.f32.mrf.mxu3 }
 0x1c9   :  { %v6549_v3 = vpack.c.bf16 %v6353_v63, %v6353_v63  ;;  %v5762_v4 = vmax.f32 %v4470_v1, %v5058_v2  ;;  %v663_v63 = vld [vmem:[%s11883_s0 + $0x1448] sm:$0xff] }
 0x1cb   :  { %6746 = vst.msk [vmem:[%s11885_s3 + $0x9c] sm:$0xf] %vm6706_vm2, %v6549_v3  ;;  %v5958_v7 = vmax.f32 %v5566_v0, %v5762_v4  ;;  %v75_v3 = vld [vmem:[%s11883_s0 + $0x1e8] sm:$0xff] }
 0x1cc   :  { %v3297_v8 = vpop.f32.mrf.mxu0  ;;  %v3885_v9 = vpop.f32.mrf.mxu1  ;;  %v271_v4 = vld [vmem:[%s11883_s0 + $0x808] sm:$0xff] }
 0x1cd   :  { %v6158_v13 = vadd.f32 %v8590_v19, %v5958_v7  ;;  %7357 = vmatmul.msk.f32.gmra.mxu2 %vm800_vm1, %v463_v5  ;;  %7553 = vmatmul.msk.f32.gmra.mxu3 %vm800_vm1, %v659_v6  ;;  %v5567_v14 = vmax.f32 %v3297_v8, %v3885_v9 }
 0x1cf   :  { %v6354_v12 = vmax.f32 %v6158_v13, 0.0  ;;  %6965 = vmatmul.msk.f32.gmra.mxu0 %vm800_vm1, %v71_v10  ;;  %7161 = vmatmul.msk.f32.gmra.mxu1 %vm800_vm1, %v267_v11  ;;  %v468_v13 = vld [vmem:[%s11883_s0 + $0xe30] sm:$0xff] }
 0x1d0   :  { %v4473_v15 = vpop.f32.mrf.mxu2  ;;  %v5061_v16 = vpop.f32.mrf.mxu3 }
 0x1d1   :  { %v6550_v17 = vpack.c.bf16 %v6354_v12, %v6354_v12  ;;  %v5763_v18 = vmax.f32 %v4473_v15, %v5061_v16  ;;  %v664_v12 = vld [vmem:[%s11883_s0 + $0x1450] sm:$0xff] }
 0x1d3   :  { %6747 = vst.msk [vmem:[%s11885_s3 + $0xa0] sm:$0xf] %vm6706_vm2, %v6550_v17  ;;  %v5959_v22 = vmax.f32 %v5567_v14, %v5763_v18  ;;  %v76_v17 = vld [vmem:[%s11883_s0 + $0x1f0] sm:$0xff] }
 0x1d4   :  { %v3300_v23 = vpop.f32.mrf.mxu0  ;;  %v3888_v24 = vpop.f32.mrf.mxu1  ;;  %v272_v18 = vld [vmem:[%s11883_s0 + $0x810] sm:$0xff] }
 0x1d5   :  { %v6159_v27 = vadd.f32 %v8590_v19, %v5959_v22  ;;  %7358 = vmatmul.msk.f32.gmra.mxu2 %vm800_vm1, %v464_v20  ;;  %7554 = vmatmul.msk.f32.gmra.mxu3 %vm800_vm1, %v660_v21  ;;  %v5568_v29 = vmax.f32 %v3300_v23, %v3888_v24 }
 0x1d7   :  { %v6355_v28 = vmax.f32 %v6159_v27, 0.0  ;;  %6966 = vmatmul.msk.f32.gmra.mxu0 %vm800_vm1, %v72_v25  ;;  %7162 = vmatmul.msk.f32.gmra.mxu1 %vm800_vm1, %v268_v26  ;;  %v469_v27 = vld [vmem:[%s11883_s0 + $0xe38] sm:$0xff] }
 0x1d8   :  { %v4476_v30 = vpop.f32.mrf.mxu2  ;;  %v5064_v31 = vpop.f32.mrf.mxu3 }
 0x1d9   :  { %v6551_v32 = vpack.c.bf16 %v6355_v28, %v6355_v28  ;;  %v5764_v33 = vmax.f32 %v4476_v30, %v5064_v31  ;;  %v665_v28 = vld [vmem:[%s11883_s0 + $0x1458] sm:$0xff] }
 0x1db   :  { %6748 = vst.msk [vmem:[%s11885_s3 + $0xa4] sm:$0xf] %vm6706_vm2, %v6551_v32  ;;  %v5960_v36 = vmax.f32 %v5568_v29, %v5764_v33  ;;  %v77_v32 = vld [vmem:[%s11883_s0 + $0x1f8] sm:$0xff] }
 0x1dc   :  { %v3303_v37 = vpop.f32.mrf.mxu0  ;;  %v3891_v38 = vpop.f32.mrf.mxu1  ;;  %v273_v33 = vld [vmem:[%s11883_s0 + $0x818] sm:$0xff] }
 0x1dd   :  { %v6160_v41 = vadd.f32 %v8590_v19, %v5960_v36  ;;  %7359 = vmatmul.msk.f32.gmra.mxu2 %vm800_vm1, %v465_v34  ;;  %7555 = vmatmul.msk.f32.gmra.mxu3 %vm800_vm1, %v661_v35  ;;  %v5569_v43 = vmax.f32 %v3303_v37, %v3891_v38 }
 0x1df   :  { %v6356_v42 = vmax.f32 %v6160_v41, 0.0  ;;  %6967 = vmatmul.msk.f32.gmra.mxu0 %vm800_vm1, %v73_v39  ;;  %7163 = vmatmul.msk.f32.gmra.mxu1 %vm800_vm1, %v269_v40  ;;  %v470_v41 = vld [vmem:[%s11883_s0 + $0xe40] sm:$0xff] }
 0x1e0   :  { %v4479_v44 = vpop.f32.mrf.mxu2  ;;  %v5067_v45 = vpop.f32.mrf.mxu3 }
 0x1e1   :  { %v6552_v46 = vpack.c.bf16 %v6356_v42, %v6356_v42  ;;  %v5765_v47 = vmax.f32 %v4479_v44, %v5067_v45  ;;  %v666_v42 = vld [vmem:[%s11883_s0 + $0x1460] sm:$0xff] }
 0x1e3   :  { %6749 = vst.msk [vmem:[%s11885_s3 + $0xa8] sm:$0xf] %vm6706_vm2, %v6552_v46  ;;  %v5961_v50 = vmax.f32 %v5569_v43, %v5765_v47  ;;  %v78_v46 = vld [vmem:[%s11883_s0 + $0x200] sm:$0xff] }
 0x1e4   :  { %v3306_v51 = vpop.f32.mrf.mxu0  ;;  %v3894_v52 = vpop.f32.mrf.mxu1  ;;  %v274_v47 = vld [vmem:[%s11883_s0 + $0x820] sm:$0xff] }
 0x1e5   :  { %v6161_v55 = vadd.f32 %v8590_v19, %v5961_v50  ;;  %7360 = vmatmul.msk.f32.gmra.mxu2 %vm800_vm1, %v466_v48  ;;  %7556 = vmatmul.msk.f32.gmra.mxu3 %vm800_vm1, %v662_v49  ;;  %v5570_v57 = vmax.f32 %v3306_v51, %v3894_v52 }
 0x1e7   :  { %v6357_v56 = vmax.f32 %v6161_v55, 0.0  ;;  %6968 = vmatmul.msk.f32.gmra.mxu0 %vm800_vm1, %v74_v53  ;;  %7164 = vmatmul.msk.f32.gmra.mxu1 %vm800_vm1, %v270_v54  ;;  %v471_v55 = vld [vmem:[%s11883_s0 + $0xe48] sm:$0xff] }
 0x1e8   :  { %v4482_v58 = vpop.f32.mrf.mxu2  ;;  %v5070_v59 = vpop.f32.mrf.mxu3 }
 0x1e9   :  { %v6553_v60 = vpack.c.bf16 %v6357_v56, %v6357_v56  ;;  %v5766_v61 = vmax.f32 %v4482_v58, %v5070_v59  ;;  %v667_v56 = vld [vmem:[%s11883_s0 + $0x1468] sm:$0xff] }
 0x1eb   :  { %6750 = vst.msk [vmem:[%s11885_s3 + $0xac] sm:$0xf] %vm6706_vm2, %v6553_v60  ;;  %v5962_v0 = vmax.f32 %v5570_v57, %v5766_v61  ;;  %v79_v60 = vld [vmem:[%s11883_s0 + $0x208] sm:$0xff] }
 0x1ec   :  { %v3309_v1 = vpop.f32.mrf.mxu0  ;;  %v3897_v2 = vpop.f32.mrf.mxu1  ;;  %v275_v61 = vld [vmem:[%s11883_s0 + $0x828] sm:$0xff] }
 0x1ed   :  { %v6162_v5 = vadd.f32 %v8590_v19, %v5962_v0  ;;  %7361 = vmatmul.msk.f32.gmra.mxu2 %vm800_vm1, %v467_v62  ;;  %7557 = vmatmul.msk.f32.gmra.mxu3 %vm800_vm1, %v663_v63  ;;  %v5571_v7 = vmax.f32 %v3309_v1, %v3897_v2 }
 0x1ef   :  { %v6358_v6 = vmax.f32 %v6162_v5, 0.0  ;;  %6969 = vmatmul.msk.f32.gmra.mxu0 %vm800_vm1, %v75_v3  ;;  %7165 = vmatmul.msk.f32.gmra.mxu1 %vm800_vm1, %v271_v4  ;;  %v472_v5 = vld [vmem:[%s11883_s0 + $0xe50] sm:$0xff] }
 0x1f0   :  { %v4485_v8 = vpop.f32.mrf.mxu2  ;;  %v5073_v9 = vpop.f32.mrf.mxu3 }
 0x1f1   :  { %v6554_v10 = vpack.c.bf16 %v6358_v6, %v6358_v6  ;;  %v5767_v11 = vmax.f32 %v4485_v8, %v5073_v9  ;;  %v668_v6 = vld [vmem:[%s11883_s0 + $0x1470] sm:$0xff] }
 0x1f3   :  { %6751 = vst.msk [vmem:[%s11885_s3 + $0xb0] sm:$0xf] %vm6706_vm2, %v6554_v10  ;;  %v5963_v14 = vmax.f32 %v5571_v7, %v5767_v11  ;;  %v80_v10 = vld [vmem:[%s11883_s0 + $0x210] sm:$0xff] }
 0x1f4   :  { %v3312_v15 = vpop.f32.mrf.mxu0  ;;  %v3900_v16 = vpop.f32.mrf.mxu1  ;;  %v276_v11 = vld [vmem:[%s11883_s0 + $0x830] sm:$0xff] }
 0x1f5   :  { %v6163_v20 = vadd.f32 %v8590_v19, %v5963_v14  ;;  %7362 = vmatmul.msk.f32.gmra.mxu2 %vm800_vm1, %v468_v13  ;;  %7558 = vmatmul.msk.f32.gmra.mxu3 %vm800_vm1, %v664_v12  ;;  %v5572_v22 = vmax.f32 %v3312_v15, %v3900_v16 }
 0x1f7   :  { %v6359_v21 = vmax.f32 %v6163_v20, 0.0  ;;  %6970 = vmatmul.msk.f32.gmra.mxu0 %vm800_vm1, %v76_v17  ;;  %7166 = vmatmul.msk.f32.gmra.mxu1 %vm800_vm1, %v272_v18  ;;  %v473_v20 = vld [vmem:[%s11883_s0 + $0xe58] sm:$0xff] }
 0x1f8   :  { %v4488_v23 = vpop.f32.mrf.mxu2  ;;  %v5076_v24 = vpop.f32.mrf.mxu3 }
 0x1f9   :  { %v6555_v25 = vpack.c.bf16 %v6359_v21, %v6359_v21  ;;  %v5768_v26 = vmax.f32 %v4488_v23, %v5076_v24  ;;  %v669_v21 = vld [vmem:[%s11883_s0 + $0x1478] sm:$0xff] }
 0x1fb   :  { %6752 = vst.msk [vmem:[%s11885_s3 + $0xb4] sm:$0xf] %vm6706_vm2, %v6555_v25  ;;  %v5964_v29 = vmax.f32 %v5572_v22, %v5768_v26  ;;  %v81_v25 = vld [vmem:[%s11883_s0 + $0x218] sm:$0xff] }
 0x1fc   :  { %v3315_v30 = vpop.f32.mrf.mxu0  ;;  %v3903_v31 = vpop.f32.mrf.mxu1  ;;  %v277_v26 = vld [vmem:[%s11883_s0 + $0x838] sm:$0xff] }
 0x1fd   :  { %v6164_v34 = vadd.f32 %v8590_v19, %v5964_v29  ;;  %7363 = vmatmul.msk.f32.gmra.mxu2 %vm800_vm1, %v469_v27  ;;  %7559 = vmatmul.msk.f32.gmra.mxu3 %vm800_vm1, %v665_v28  ;;  %v5573_v36 = vmax.f32 %v3315_v30, %v3903_v31 }
 0x1ff   :  { %v6360_v35 = vmax.f32 %v6164_v34, 0.0  ;;  %6971 = vmatmul.msk.f32.gmra.mxu0 %vm800_vm1, %v77_v32  ;;  %7167 = vmatmul.msk.f32.gmra.mxu1 %vm800_vm1, %v273_v33  ;;  %v474_v34 = vld [vmem:[%s11883_s0 + $0xe60] sm:$0xff] }
 0x200   :  { %v4491_v37 = vpop.f32.mrf.mxu2  ;;  %v5079_v38 = vpop.f32.mrf.mxu3 }
 0x201   :  { %v6556_v39 = vpack.c.bf16 %v6360_v35, %v6360_v35  ;;  %v5769_v40 = vmax.f32 %v4491_v37, %v5079_v38  ;;  %v670_v35 = vld [vmem:[%s11883_s0 + $0x1480] sm:$0xff] }
 0x203   :  { %6753 = vst.msk [vmem:[%s11885_s3 + $0xb8] sm:$0xf] %vm6706_vm2, %v6556_v39  ;;  %v5965_v43 = vmax.f32 %v5573_v36, %v5769_v40  ;;  %v82_v39 = vld [vmem:[%s11883_s0 + $0x220] sm:$0xff] }
 0x204   :  { %v3318_v44 = vpop.f32.mrf.mxu0  ;;  %v3906_v45 = vpop.f32.mrf.mxu1  ;;  %v278_v40 = vld [vmem:[%s11883_s0 + $0x840] sm:$0xff] }
 0x205   :  { %v6165_v48 = vadd.f32 %v8590_v19, %v5965_v43  ;;  %7364 = vmatmul.msk.f32.gmra.mxu2 %vm800_vm1, %v470_v41  ;;  %7560 = vmatmul.msk.f32.gmra.mxu3 %vm800_vm1, %v666_v42  ;;  %v5574_v50 = vmax.f32 %v3318_v44, %v3906_v45 }
 0x207   :  { %v6361_v49 = vmax.f32 %v6165_v48, 0.0  ;;  %6972 = vmatmul.msk.f32.gmra.mxu0 %vm800_vm1, %v78_v46  ;;  %7168 = vmatmul.msk.f32.gmra.mxu1 %vm800_vm1, %v274_v47  ;;  %v475_v48 = vld [vmem:[%s11883_s0 + $0xe68] sm:$0xff] }
 0x208   :  { %v4494_v51 = vpop.f32.mrf.mxu2  ;;  %v5082_v52 = vpop.f32.mrf.mxu3 }
 0x209   :  { %v6557_v53 = vpack.c.bf16 %v6361_v49, %v6361_v49  ;;  %v5770_v54 = vmax.f32 %v4494_v51, %v5082_v52  ;;  %v671_v49 = vld [vmem:[%s11883_s0 + $0x1488] sm:$0xff] }
 0x20b   :  { %6754 = vst.msk [vmem:[%s11885_s3 + $0xbc] sm:$0xf] %vm6706_vm2, %v6557_v53  ;;  %v5966_v57 = vmax.f32 %v5574_v50, %v5770_v54  ;;  %v83_v53 = vld [vmem:[%s11883_s0 + $0x228] sm:$0xff] }
 0x20c   :  { %v3321_v58 = vpop.f32.mrf.mxu0  ;;  %v3909_v59 = vpop.f32.mrf.mxu1  ;;  %v279_v54 = vld [vmem:[%s11883_s0 + $0x848] sm:$0xff] }
 0x20d   :  { %v6166_v62 = vadd.f32 %v8590_v19, %v5966_v57  ;;  %7365 = vmatmul.msk.f32.gmra.mxu2 %vm800_vm1, %v471_v55  ;;  %7561 = vmatmul.msk.f32.gmra.mxu3 %vm800_vm1, %v667_v56  ;;  %v5575_v0 = vmax.f32 %v3321_v58, %v3909_v59 }
 0x20f   :  { %v6362_v63 = vmax.f32 %v6166_v62, 0.0  ;;  %6973 = vmatmul.msk.f32.gmra.mxu0 %vm800_vm1, %v79_v60  ;;  %7169 = vmatmul.msk.f32.gmra.mxu1 %vm800_vm1, %v275_v61  ;;  %v476_v62 = vld [vmem:[%s11883_s0 + $0xe70] sm:$0xff] }
 0x210   :  { %v4497_v1 = vpop.f32.mrf.mxu2  ;;  %v5085_v2 = vpop.f32.mrf.mxu3 }
 0x211   :  { %v6558_v3 = vpack.c.bf16 %v6362_v63, %v6362_v63  ;;  %v5771_v4 = vmax.f32 %v4497_v1, %v5085_v2  ;;  %v672_v63 = vld [vmem:[%s11883_s0 + $0x1490] sm:$0xff] }
 0x213   :  { %6755 = vst.msk [vmem:[%s11885_s3 + $0xc0] sm:$0xf] %vm6706_vm2, %v6558_v3  ;;  %v5967_v7 = vmax.f32 %v5575_v0, %v5771_v4  ;;  %v84_v3 = vld [vmem:[%s11883_s0 + $0x230] sm:$0xff] }
 0x214   :  { %v3324_v8 = vpop.f32.mrf.mxu0  ;;  %v3912_v9 = vpop.f32.mrf.mxu1  ;;  %v280_v4 = vld [vmem:[%s11883_s0 + $0x850] sm:$0xff] }
 0x215   :  { %v6167_v13 = vadd.f32 %v8590_v19, %v5967_v7  ;;  %7366 = vmatmul.msk.f32.gmra.mxu2 %vm800_vm1, %v472_v5  ;;  %7562 = vmatmul.msk.f32.gmra.mxu3 %vm800_vm1, %v668_v6  ;;  %v5576_v14 = vmax.f32 %v3324_v8, %v3912_v9 }
 0x217   :  { %v6363_v12 = vmax.f32 %v6167_v13, 0.0  ;;  %6974 = vmatmul.msk.f32.gmra.mxu0 %vm800_vm1, %v80_v10  ;;  %7170 = vmatmul.msk.f32.gmra.mxu1 %vm800_vm1, %v276_v11  ;;  %v477_v13 = vld [vmem:[%s11883_s0 + $0xe78] sm:$0xff] }
 0x218   :  { %v4500_v15 = vpop.f32.mrf.mxu2  ;;  %v5088_v16 = vpop.f32.mrf.mxu3 }
 0x219   :  { %v6559_v17 = vpack.c.bf16 %v6363_v12, %v6363_v12  ;;  %v5772_v18 = vmax.f32 %v4500_v15, %v5088_v16  ;;  %v85_v16 = vld [vmem:[%s11883_s0 + $0x238] sm:$0xff] }
 0x21b   :  { %6756 = vst.msk [vmem:[%s11885_s3 + $0xc4] sm:$0xf] %vm6706_vm2, %v6559_v17  ;;  %v5968_v22 = vmax.f32 %v5576_v14, %v5772_v18  ;;  %v281_v17 = vld [vmem:[%s11883_s0 + $0x858] sm:$0xff]  ;;  %v9162_v18 = vld [vmem:[%s11884_s2] ss:$0 sm:$0xff] }
 0x21c   :  { %v3327_v23 = vpop.f32.mrf.mxu0  ;;  %v3915_v24 = vpop.f32.mrf.mxu1 }
 0x21d   :  { %v6168_v27 = vadd.f32 %v8590_v19, %v5968_v22  ;;  %7367 = vmatmul.msk.f32.gmra.mxu2 %vm800_vm1, %v473_v20  ;;  %7563 = vmatmul.msk.f32.gmra.mxu3 %vm800_vm1, %v669_v21  ;;  %v5577_v29 = vmax.f32 %v3327_v23, %v3915_v24 }
 0x21f   :  { %v6364_v28 = vmax.f32 %v6168_v27, 0.0  ;;  %6975 = vmatmul.msk.f32.gmra.mxu0 %vm800_vm1, %v81_v25  ;;  %7171 = vmatmul.msk.f32.gmra.mxu1 %vm800_vm1, %v277_v26  ;;  %v478_v27 = vld [vmem:[%s11883_s0 + $0xe80] sm:$0xff] }
 0x220   :  { %v4503_v30 = vpop.f32.mrf.mxu2  ;;  %v5091_v31 = vpop.f32.mrf.mxu3 }
 0x221   :  { %v6560_v32 = vpack.c.bf16 %v6364_v28, %v6364_v28  ;;  %v5773_v33 = vmax.f32 %v4503_v30, %v5091_v31  ;;  %v674_v28 = vld [vmem:[%s11883_s0 + $0x14a0] sm:$0xff] }
 0x223   :  { %6757 = vst.msk [vmem:[%s11885_s3 + $0xc8] sm:$0xf] %vm6706_vm2, %v6560_v32  ;;  %v5969_v36 = vmax.f32 %v5577_v29, %v5773_v33  ;;  %v86_v32 = vld [vmem:[%s11883_s0 + $0x240] sm:$0xff] }
 0x224   :  { %v3330_v37 = vpop.f32.mrf.mxu0  ;;  %v3918_v38 = vpop.f32.mrf.mxu1  ;;  %v282_v33 = vld [vmem:[%s11883_s0 + $0x860] sm:$0xff] }
 0x225   :  { %v6169_v41 = vadd.f32 %v8590_v19, %v5969_v36  ;;  %7368 = vmatmul.msk.f32.gmra.mxu2 %vm800_vm1, %v474_v34  ;;  %7564 = vmatmul.msk.f32.gmra.mxu3 %vm800_vm1, %v670_v35  ;;  %v5578_v43 = vmax.f32 %v3330_v37, %v3918_v38 }
 0x227   :  { %v6365_v42 = vmax.f32 %v6169_v41, 0.0  ;;  %6976 = vmatmul.msk.f32.gmra.mxu0 %vm800_vm1, %v82_v39  ;;  %7172 = vmatmul.msk.f32.gmra.mxu1 %vm800_vm1, %v278_v40  ;;  %v479_v41 = vld [vmem:[%s11883_s0 + $0xe88] sm:$0xff] }
 0x228   :  { %v4506_v44 = vpop.f32.mrf.mxu2  ;;  %v5094_v45 = vpop.f32.mrf.mxu3 }
 0x229   :  { %v6561_v46 = vpack.c.bf16 %v6365_v42, %v6365_v42  ;;  %v5774_v47 = vmax.f32 %v4506_v44, %v5094_v45  ;;  %v675_v42 = vld [vmem:[%s11883_s0 + $0x14a8] sm:$0xff] }
 0x22b   :  { %6758 = vst.msk [vmem:[%s11885_s3 + $0xcc] sm:$0xf] %vm6706_vm2, %v6561_v46  ;;  %v5970_v50 = vmax.f32 %v5578_v43, %v5774_v47  ;;  %v87_v46 = vld [vmem:[%s11883_s0 + $0x248] sm:$0xff] }
 0x22c   :  { %v3333_v51 = vpop.f32.mrf.mxu0  ;;  %v3921_v52 = vpop.f32.mrf.mxu1  ;;  %v283_v47 = vld [vmem:[%s11883_s0 + $0x868] sm:$0xff] }
 0x22d   :  { %v6170_v55 = vadd.f32 %v8590_v19, %v5970_v50  ;;  %7369 = vmatmul.msk.f32.gmra.mxu2 %vm800_vm1, %v475_v48  ;;  %7565 = vmatmul.msk.f32.gmra.mxu3 %vm800_vm1, %v671_v49  ;;  %v5579_v57 = vmax.f32 %v3333_v51, %v3921_v52 }
 0x22f   :  { %v6366_v56 = vmax.f32 %v6170_v55, 0.0  ;;  %6977 = vmatmul.msk.f32.gmra.mxu0 %vm800_vm1, %v83_v53  ;;  %7173 = vmatmul.msk.f32.gmra.mxu1 %vm800_vm1, %v279_v54  ;;  %v480_v55 = vld [vmem:[%s11883_s0 + $0xe90] sm:$0xff] }
 0x230   :  { %v4509_v58 = vpop.f32.mrf.mxu2  ;;  %v5097_v59 = vpop.f32.mrf.mxu3 }
 0x231   :  { %v6562_v60 = vpack.c.bf16 %v6366_v56, %v6366_v56  ;;  %v5775_v61 = vmax.f32 %v4509_v58, %v5097_v59  ;;  %v676_v56 = vld [vmem:[%s11883_s0 + $0x14b0] sm:$0xff] }
 0x233   :  { %6759 = vst.msk [vmem:[%s11885_s3 + $0xd0] sm:$0xf] %vm6706_vm2, %v6562_v60  ;;  %v5971_v0 = vmax.f32 %v5579_v57, %v5775_v61  ;;  %v88_v60 = vld [vmem:[%s11883_s0 + $0x250] sm:$0xff] }
 0x234   :  { %v3336_v1 = vpop.f32.mrf.mxu0  ;;  %v3924_v2 = vpop.f32.mrf.mxu1  ;;  %v284_v61 = vld [vmem:[%s11883_s0 + $0x870] sm:$0xff] }
 0x235   :  { %v6171_v5 = vadd.f32 %v8590_v19, %v5971_v0  ;;  %7370 = vmatmul.msk.f32.gmra.mxu2 %vm800_vm1, %v476_v62  ;;  %7566 = vmatmul.msk.f32.gmra.mxu3 %vm800_vm1, %v672_v63  ;;  %v5580_v7 = vmax.f32 %v3336_v1, %v3924_v2  ;;  %v673_v19 = vld [vmem:[%s11883_s0 + $0x1498] sm:$0xff] }
 0x237   :  { %v6367_v6 = vmax.f32 %v6171_v5, 0.0  ;;  %6978 = vmatmul.msk.f32.gmra.mxu0 %vm800_vm1, %v84_v3  ;;  %7174 = vmatmul.msk.f32.gmra.mxu1 %vm800_vm1, %v280_v4  ;;  %v481_v5 = vld [vmem:[%s11883_s0 + $0xe98] sm:$0xff] }
 0x238   :  { %v4512_v8 = vpop.f32.mrf.mxu2  ;;  %v5100_v9 = vpop.f32.mrf.mxu3 }
 0x239   :  { %v6563_v10 = vpack.c.bf16 %v6367_v6, %v6367_v6  ;;  %v5776_v11 = vmax.f32 %v4512_v8, %v5100_v9  ;;  %v677_v6 = vld [vmem:[%s11883_s0 + $0x14b8] sm:$0xff] }
 0x23b   :  { %6760 = vst.msk [vmem:[%s11885_s3 + $0xd4] sm:$0xf] %vm6706_vm2, %v6563_v10  ;;  %v5972_v12 = vmax.f32 %v5580_v7, %v5776_v11  ;;  %v89_v10 = vld [vmem:[%s11883_s0 + $0x258] sm:$0xff] }
 0x23c   :  { %v3339_v14 = vpop.f32.mrf.mxu0  ;;  %v3927_v15 = vpop.f32.mrf.mxu1  ;;  %v285_v11 = vld [vmem:[%s11883_s0 + $0x878] sm:$0xff] }
 0x23d   :  { %v6172_v20 = vadd.f32 %v9162_v18, %v5972_v12  ;;  %7371 = vmatmul.msk.f32.gmra.mxu2 %vm800_vm1, %v477_v13  ;;  %7567 = vmatmul.msk.f32.gmra.mxu3 %vm800_vm1, %v673_v19  ;;  %v5581_v22 = vmax.f32 %v3339_v14, %v3927_v15 }
 0x23f   :  { %v6368_v21 = vmax.f32 %v6172_v20, 0.0  ;;  %6979 = vmatmul.msk.f32.gmra.mxu0 %vm800_vm1, %v85_v16  ;;  %7175 = vmatmul.msk.f32.gmra.mxu1 %vm800_vm1, %v281_v17  ;;  %v482_v20 = vld [vmem:[%s11883_s0 + $0xea0] sm:$0xff] }
 0x240   :  { %v4515_v23 = vpop.f32.mrf.mxu2  ;;  %v5103_v24 = vpop.f32.mrf.mxu3 }
 0x241   :  { %v6564_v25 = vpack.c.bf16 %v6368_v21, %v6368_v21  ;;  %v5777_v26 = vmax.f32 %v4515_v23, %v5103_v24  ;;  %v678_v21 = vld [vmem:[%s11883_s0 + $0x14c0] sm:$0xff] }
 0x243   :  { %6761 = vst.msk [vmem:[%s11885_s3 + $0xd8] sm:$0xf] %vm6706_vm2, %v6564_v25  ;;  %v5973_v29 = vmax.f32 %v5581_v22, %v5777_v26  ;;  %v90_v25 = vld [vmem:[%s11883_s0 + $0x260] sm:$0xff] }
 0x244   :  { %v3342_v30 = vpop.f32.mrf.mxu0  ;;  %v3930_v31 = vpop.f32.mrf.mxu1  ;;  %v286_v26 = vld [vmem:[%s11883_s0 + $0x880] sm:$0xff] }
 0x245   :  { %v6173_v34 = vadd.f32 %v9162_v18, %v5973_v29  ;;  %7372 = vmatmul.msk.f32.gmra.mxu2 %vm800_vm1, %v478_v27  ;;  %7568 = vmatmul.msk.f32.gmra.mxu3 %vm800_vm1, %v674_v28  ;;  %v5582_v36 = vmax.f32 %v3342_v30, %v3930_v31 }
 0x247   :  { %v6369_v35 = vmax.f32 %v6173_v34, 0.0  ;;  %6980 = vmatmul.msk.f32.gmra.mxu0 %vm800_vm1, %v86_v32  ;;  %7176 = vmatmul.msk.f32.gmra.mxu1 %vm800_vm1, %v282_v33  ;;  %v483_v34 = vld [vmem:[%s11883_s0 + $0xea8] sm:$0xff] }
 0x248   :  { %v4518_v37 = vpop.f32.mrf.mxu2  ;;  %v5106_v38 = vpop.f32.mrf.mxu3 }
 0x249   :  { %v6565_v39 = vpack.c.bf16 %v6369_v35, %v6369_v35  ;;  %v5778_v40 = vmax.f32 %v4518_v37, %v5106_v38  ;;  %v679_v35 = vld [vmem:[%s11883_s0 + $0x14c8] sm:$0xff] }
 0x24b   :  { %6762 = vst.msk [vmem:[%s11885_s3 + $0xdc] sm:$0xf] %vm6706_vm2, %v6565_v39  ;;  %v5974_v43 = vmax.f32 %v5582_v36, %v5778_v40  ;;  %v91_v39 = vld [vmem:[%s11883_s0 + $0x268] sm:$0xff] }
 0x24c   :  { %v3345_v44 = vpop.f32.mrf.mxu0  ;;  %v3933_v45 = vpop.f32.mrf.mxu1  ;;  %v287_v40 = vld [vmem:[%s11883_s0 + $0x888] sm:$0xff] }
 0x24d   :  { %v6174_v48 = vadd.f32 %v9162_v18, %v5974_v43  ;;  %7373 = vmatmul.msk.f32.gmra.mxu2 %vm800_vm1, %v479_v41  ;;  %7569 = vmatmul.msk.f32.gmra.mxu3 %vm800_vm1, %v675_v42  ;;  %v5583_v50 = vmax.f32 %v3345_v44, %v3933_v45 }
 0x24f   :  { %v6370_v49 = vmax.f32 %v6174_v48, 0.0  ;;  %6981 = vmatmul.msk.f32.gmra.mxu0 %vm800_vm1, %v87_v46  ;;  %7177 = vmatmul.msk.f32.gmra.mxu1 %vm800_vm1, %v283_v47  ;;  %v484_v48 = vld [vmem:[%s11883_s0 + $0xeb0] sm:$0xff] }
 0x250   :  { %v4521_v51 = vpop.f32.mrf.mxu2  ;;  %v5109_v52 = vpop.f32.mrf.mxu3 }
 0x251   :  { %v6566_v53 = vpack.c.bf16 %v6370_v49, %v6370_v49  ;;  %v5779_v54 = vmax.f32 %v4521_v51, %v5109_v52  ;;  %v680_v49 = vld [vmem:[%s11883_s0 + $0x14d0] sm:$0xff] }
 0x253   :  { %6763 = vst.msk [vmem:[%s11885_s3 + $0xe0] sm:$0xf] %vm6706_vm2, %v6566_v53  ;;  %v5975_v57 = vmax.f32 %v5583_v50, %v5779_v54  ;;  %v92_v53 = vld [vmem:[%s11883_s0 + $0x270] sm:$0xff] }
 0x254   :  { %v3348_v58 = vpop.f32.mrf.mxu0  ;;  %v3936_v59 = vpop.f32.mrf.mxu1  ;;  %v288_v54 = vld [vmem:[%s11883_s0 + $0x890] sm:$0xff] }
 0x255   :  { %v6175_v62 = vadd.f32 %v9162_v18, %v5975_v57  ;;  %7374 = vmatmul.msk.f32.gmra.mxu2 %vm800_vm1, %v480_v55  ;;  %7570 = vmatmul.msk.f32.gmra.mxu3 %vm800_vm1, %v676_v56  ;;  %v5584_v0 = vmax.f32 %v3348_v58, %v3936_v59 }
 0x257   :  { %v6371_v63 = vmax.f32 %v6175_v62, 0.0  ;;  %6982 = vmatmul.msk.f32.gmra.mxu0 %vm800_vm1, %v88_v60  ;;  %7178 = vmatmul.msk.f32.gmra.mxu1 %vm800_vm1, %v284_v61  ;;  %v485_v62 = vld [vmem:[%s11883_s0 + $0xeb8] sm:$0xff] }
 0x258   :  { %v4524_v1 = vpop.f32.mrf.mxu2  ;;  %v5112_v2 = vpop.f32.mrf.mxu3 }
 0x259   :  { %v6567_v3 = vpack.c.bf16 %v6371_v63, %v6371_v63  ;;  %v5780_v4 = vmax.f32 %v4524_v1, %v5112_v2  ;;  %v681_v63 = vld [vmem:[%s11883_s0 + $0x14d8] sm:$0xff] }
 0x25b   :  { %6764 = vst.msk [vmem:[%s11885_s3 + $0xe4] sm:$0xf] %vm6706_vm2, %v6567_v3  ;;  %v5976_v7 = vmax.f32 %v5584_v0, %v5780_v4  ;;  %v93_v3 = vld [vmem:[%s11883_s0 + $0x278] sm:$0xff] }
 0x25c   :  { %v3351_v8 = vpop.f32.mrf.mxu0  ;;  %v3939_v9 = vpop.f32.mrf.mxu1  ;;  %v289_v4 = vld [vmem:[%s11883_s0 + $0x898] sm:$0xff] }
 0x25d   :  { %v6176_v13 = vadd.f32 %v9162_v18, %v5976_v7  ;;  %7375 = vmatmul.msk.f32.gmra.mxu2 %vm800_vm1, %v481_v5  ;;  %7571 = vmatmul.msk.f32.gmra.mxu3 %vm800_vm1, %v677_v6  ;;  %v5585_v12 = vmax.f32 %v3351_v8, %v3939_v9 }
 0x25f   :  { %v6372_v19 = vmax.f32 %v6176_v13, 0.0  ;;  %6983 = vmatmul.msk.f32.gmra.mxu0 %vm800_vm1, %v89_v10  ;;  %7179 = vmatmul.msk.f32.gmra.mxu1 %vm800_vm1, %v285_v11  ;;  %v486_v13 = vld [vmem:[%s11883_s0 + $0xec0] sm:$0xff] }
 0x260   :  { %v4527_v14 = vpop.f32.mrf.mxu2  ;;  %v5115_v15 = vpop.f32.mrf.mxu3 }
 0x261   :  { %v6568_v16 = vpack.c.bf16 %v6372_v19, %v6372_v19  ;;  %v5781_v17 = vmax.f32 %v4527_v14, %v5115_v15  ;;  %v682_v19 = vld [vmem:[%s11883_s0 + $0x14e0] sm:$0xff] }
 0x263   :  { %6765 = vst.msk [vmem:[%s11885_s3 + $0xe8] sm:$0xf] %vm6706_vm2, %v6568_v16  ;;  %v5977_v22 = vmax.f32 %v5585_v12, %v5781_v17  ;;  %v94_v16 = vld [vmem:[%s11883_s0 + $0x280] sm:$0xff] }
 0x264   :  { %v3354_v23 = vpop.f32.mrf.mxu0  ;;  %v3942_v24 = vpop.f32.mrf.mxu1  ;;  %v290_v17 = vld [vmem:[%s11883_s0 + $0x8a0] sm:$0xff] }
 0x265   :  { %v6177_v27 = vadd.f32 %v9162_v18, %v5977_v22  ;;  %7376 = vmatmul.msk.f32.gmra.mxu2 %vm800_vm1, %v482_v20  ;;  %7572 = vmatmul.msk.f32.gmra.mxu3 %vm800_vm1, %v678_v21  ;;  %v5586_v29 = vmax.f32 %v3354_v23, %v3942_v24 }
 0x267   :  { %v6373_v28 = vmax.f32 %v6177_v27, 0.0  ;;  %6984 = vmatmul.msk.f32.gmra.mxu0 %vm800_vm1, %v90_v25  ;;  %7180 = vmatmul.msk.f32.gmra.mxu1 %vm800_vm1, %v286_v26  ;;  %v487_v27 = vld [vmem:[%s11883_s0 + $0xec8] sm:$0xff] }
 0x268   :  { %v4530_v30 = vpop.f32.mrf.mxu2  ;;  %v5118_v31 = vpop.f32.mrf.mxu3 }
 0x269   :  { %v6569_v32 = vpack.c.bf16 %v6373_v28, %v6373_v28  ;;  %v5782_v33 = vmax.f32 %v4530_v30, %v5118_v31  ;;  %v683_v28 = vld [vmem:[%s11883_s0 + $0x14e8] sm:$0xff] }
 0x26b   :  { %6766 = vst.msk [vmem:[%s11885_s3 + $0xec] sm:$0xf] %vm6706_vm2, %v6569_v32  ;;  %v5978_v36 = vmax.f32 %v5586_v29, %v5782_v33  ;;  %v95_v32 = vld [vmem:[%s11883_s0 + $0x288] sm:$0xff] }
 0x26c   :  { %v3357_v37 = vpop.f32.mrf.mxu0  ;;  %v3945_v38 = vpop.f32.mrf.mxu1  ;;  %v291_v33 = vld [vmem:[%s11883_s0 + $0x8a8] sm:$0xff] }
 0x26d   :  { %v6178_v41 = vadd.f32 %v9162_v18, %v5978_v36  ;;  %7377 = vmatmul.msk.f32.gmra.mxu2 %vm800_vm1, %v483_v34  ;;  %7573 = vmatmul.msk.f32.gmra.mxu3 %vm800_vm1, %v679_v35  ;;  %v5587_v43 = vmax.f32 %v3357_v37, %v3945_v38 }
 0x26f   :  { %v6374_v42 = vmax.f32 %v6178_v41, 0.0  ;;  %6985 = vmatmul.msk.f32.gmra.mxu0 %vm800_vm1, %v91_v39  ;;  %7181 = vmatmul.msk.f32.gmra.mxu1 %vm800_vm1, %v287_v40  ;;  %v488_v41 = vld [vmem:[%s11883_s0 + $0xed0] sm:$0xff] }
 0x270   :  { %v4533_v44 = vpop.f32.mrf.mxu2  ;;  %v5121_v45 = vpop.f32.mrf.mxu3 }
 0x271   :  { %v6570_v46 = vpack.c.bf16 %v6374_v42, %v6374_v42  ;;  %v5783_v47 = vmax.f32 %v4533_v44, %v5121_v45  ;;  %v684_v42 = vld [vmem:[%s11883_s0 + $0x14f0] sm:$0xff] }
 0x273   :  { %6767 = vst.msk [vmem:[%s11885_s3 + $0xf0] sm:$0xf] %vm6706_vm2, %v6570_v46  ;;  %v5979_v50 = vmax.f32 %v5587_v43, %v5783_v47  ;;  %v96_v46 = vld [vmem:[%s11883_s0 + $0x290] sm:$0xff] }
 0x274   :  { %v3360_v51 = vpop.f32.mrf.mxu0  ;;  %v3948_v52 = vpop.f32.mrf.mxu1  ;;  %v292_v47 = vld [vmem:[%s11883_s0 + $0x8b0] sm:$0xff] }
 0x275   :  { %v6179_v55 = vadd.f32 %v9162_v18, %v5979_v50  ;;  %7378 = vmatmul.msk.f32.gmra.mxu2 %vm800_vm1, %v484_v48  ;;  %7574 = vmatmul.msk.f32.gmra.mxu3 %vm800_vm1, %v680_v49  ;;  %v5588_v57 = vmax.f32 %v3360_v51, %v3948_v52 }
 0x277   :  { %v6375_v56 = vmax.f32 %v6179_v55, 0.0  ;;  %6986 = vmatmul.msk.f32.gmra.mxu0 %vm800_vm1, %v92_v53  ;;  %7182 = vmatmul.msk.f32.gmra.mxu1 %vm800_vm1, %v288_v54  ;;  %v489_v55 = vld [vmem:[%s11883_s0 + $0xed8] sm:$0xff] }
 0x278   :  { %v4536_v58 = vpop.f32.mrf.mxu2  ;;  %v5124_v59 = vpop.f32.mrf.mxu3 }
 0x279   :  { %v6571_v60 = vpack.c.bf16 %v6375_v56, %v6375_v56  ;;  %v5784_v61 = vmax.f32 %v4536_v58, %v5124_v59  ;;  %v685_v56 = vld [vmem:[%s11883_s0 + $0x14f8] sm:$0xff] }
 0x27b   :  { %6768 = vst.msk [vmem:[%s11885_s3 + $0xf4] sm:$0xf] %vm6706_vm2, %v6571_v60  ;;  %v5980_v0 = vmax.f32 %v5588_v57, %v5784_v61  ;;  %v97_v60 = vld [vmem:[%s11883_s0 + $0x298] sm:$0xff] }
 0x27c   :  { %v3363_v1 = vpop.f32.mrf.mxu0  ;;  %v3951_v2 = vpop.f32.mrf.mxu1  ;;  %v293_v61 = vld [vmem:[%s11883_s0 + $0x8b8] sm:$0xff] }
 0x27d   :  { %v6180_v5 = vadd.f32 %v9162_v18, %v5980_v0  ;;  %7379 = vmatmul.msk.f32.gmra.mxu2 %vm800_vm1, %v485_v62  ;;  %7575 = vmatmul.msk.f32.gmra.mxu3 %vm800_vm1, %v681_v63  ;;  %v5589_v7 = vmax.f32 %v3363_v1, %v3951_v2 }
 0x27f   :  { %v6376_v6 = vmax.f32 %v6180_v5, 0.0  ;;  %6987 = vmatmul.msk.f32.gmra.mxu0 %vm800_vm1, %v93_v3  ;;  %7183 = vmatmul.msk.f32.gmra.mxu1 %vm800_vm1, %v289_v4  ;;  %v490_v5 = vld [vmem:[%s11883_s0 + $0xee0] sm:$0xff] }
 0x280   :  { %v4539_v8 = vpop.f32.mrf.mxu2  ;;  %v5127_v9 = vpop.f32.mrf.mxu3 }
 0x281   :  { %v6572_v10 = vpack.c.bf16 %v6376_v6, %v6376_v6  ;;  %v5785_v11 = vmax.f32 %v4539_v8, %v5127_v9  ;;  %v686_v6 = vld [vmem:[%s11883_s0 + $0x1500] sm:$0xff] }
 0x283   :  { %6769 = vst.msk [vmem:[%s11885_s3 + $0xf8] sm:$0xf] %vm6706_vm2, %v6572_v10  ;;  %v5981_v12 = vmax.f32 %v5589_v7, %v5785_v11  ;;  %v98_v10 = vld [vmem:[%s11883_s0 + $0x2a0] sm:$0xff] }
 0x284   :  { %v3366_v14 = vpop.f32.mrf.mxu0  ;;  %v3954_v15 = vpop.f32.mrf.mxu1  ;;  %v294_v11 = vld [vmem:[%s11883_s0 + $0x8c0] sm:$0xff] }
 0x285   :  { %v6181_v20 = vadd.f32 %v9162_v18, %v5981_v12  ;;  %7380 = vmatmul.msk.f32.gmra.mxu2 %vm800_vm1, %v486_v13  ;;  %7576 = vmatmul.msk.f32.gmra.mxu3 %vm800_vm1, %v682_v19  ;;  %v5590_v22 = vmax.f32 %v3366_v14, %v3954_v15 }
 0x287   :  { %v6377_v21 = vmax.f32 %v6181_v20, 0.0  ;;  %6988 = vmatmul.msk.f32.gmra.mxu0 %vm800_vm1, %v94_v16  ;;  %7184 = vmatmul.msk.f32.gmra.mxu1 %vm800_vm1, %v290_v17  ;;  %v491_v20 = vld [vmem:[%s11883_s0 + $0xee8] sm:$0xff] }
 0x288   :  { %v4542_v23 = vpop.f32.mrf.mxu2  ;;  %v5130_v24 = vpop.f32.mrf.mxu3 }
 0x289   :  { %v6573_v25 = vpack.c.bf16 %v6377_v21, %v6377_v21  ;;  %v5786_v26 = vmax.f32 %v4542_v23, %v5130_v24  ;;  %v687_v21 = vld [vmem:[%s11883_s0 + $0x1508] sm:$0xff] }
 0x28b   :  { %6770 = vst.msk [vmem:[%s11885_s3 + $0xfc] sm:$0xf] %vm6706_vm2, %v6573_v25  ;;  %v5982_v29 = vmax.f32 %v5590_v22, %v5786_v26  ;;  %v99_v25 = vld [vmem:[%s11883_s0 + $0x2a8] sm:$0xff] }
 0x28c   :  { %v3369_v30 = vpop.f32.mrf.mxu0  ;;  %v3957_v31 = vpop.f32.mrf.mxu1  ;;  %v295_v26 = vld [vmem:[%s11883_s0 + $0x8c8] sm:$0xff] }
 0x28d   :  { %v6182_v34 = vadd.f32 %v9162_v18, %v5982_v29  ;;  %7381 = vmatmul.msk.f32.gmra.mxu2 %vm800_vm1, %v487_v27  ;;  %7577 = vmatmul.msk.f32.gmra.mxu3 %vm800_vm1, %v683_v28  ;;  %v5591_v36 = vmax.f32 %v3369_v30, %v3957_v31 }
 0x28f   :  { %v6378_v35 = vmax.f32 %v6182_v34, 0.0  ;;  %6989 = vmatmul.msk.f32.gmra.mxu0 %vm800_vm1, %v95_v32  ;;  %7185 = vmatmul.msk.f32.gmra.mxu1 %vm800_vm1, %v291_v33  ;;  %v492_v34 = vld [vmem:[%s11883_s0 + $0xef0] sm:$0xff] }
 0x290   :  { %v4545_v37 = vpop.f32.mrf.mxu2  ;;  %v5133_v38 = vpop.f32.mrf.mxu3 }
 0x291   :  { %v6574_v39 = vpack.c.bf16 %v6378_v35, %v6378_v35  ;;  %v5787_v40 = vmax.f32 %v4545_v37, %v5133_v38  ;;  %v688_v35 = vld [vmem:[%s11883_s0 + $0x1510] sm:$0xff] }
 0x293   :  { %6771 = vst.msk [vmem:[%s11885_s3 + $0x100] sm:$0xf] %vm6706_vm2, %v6574_v39  ;;  %v5983_v43 = vmax.f32 %v5591_v36, %v5787_v40  ;;  %v100_v39 = vld [vmem:[%s11883_s0 + $0x2b0] sm:$0xff] }
 0x294   :  { %v3372_v44 = vpop.f32.mrf.mxu0  ;;  %v3960_v45 = vpop.f32.mrf.mxu1  ;;  %v296_v40 = vld [vmem:[%s11883_s0 + $0x8d0] sm:$0xff] }
 0x295   :  { %v6183_v48 = vadd.f32 %v9162_v18, %v5983_v43  ;;  %7382 = vmatmul.msk.f32.gmra.mxu2 %vm800_vm1, %v488_v41  ;;  %7578 = vmatmul.msk.f32.gmra.mxu3 %vm800_vm1, %v684_v42  ;;  %v5592_v50 = vmax.f32 %v3372_v44, %v3960_v45 }
 0x297   :  { %v6379_v49 = vmax.f32 %v6183_v48, 0.0  ;;  %6990 = vmatmul.msk.f32.gmra.mxu0 %vm800_vm1, %v96_v46  ;;  %7186 = vmatmul.msk.f32.gmra.mxu1 %vm800_vm1, %v292_v47  ;;  %v493_v48 = vld [vmem:[%s11883_s0 + $0xef8] sm:$0xff] }
 0x298   :  { %v4548_v51 = vpop.f32.mrf.mxu2  ;;  %v5136_v52 = vpop.f32.mrf.mxu3 }
 0x299   :  { %v6575_v53 = vpack.c.bf16 %v6379_v49, %v6379_v49  ;;  %v5788_v54 = vmax.f32 %v4548_v51, %v5136_v52  ;;  %v689_v49 = vld [vmem:[%s11883_s0 + $0x1518] sm:$0xff] }
 0x29b   :  { %6772 = vst.msk [vmem:[%s11885_s3 + $0x104] sm:$0xf] %vm6706_vm2, %v6575_v53  ;;  %v5984_v57 = vmax.f32 %v5592_v50, %v5788_v54  ;;  %v101_v53 = vld [vmem:[%s11883_s0 + $0x2b8] sm:$0xff] }
 0x29c   :  { %v3375_v58 = vpop.f32.mrf.mxu0  ;;  %v3963_v59 = vpop.f32.mrf.mxu1  ;;  %v297_v54 = vld [vmem:[%s11883_s0 + $0x8d8] sm:$0xff] }
 0x29d   :  { %v6184_v62 = vadd.f32 %v9162_v18, %v5984_v57  ;;  %7383 = vmatmul.msk.f32.gmra.mxu2 %vm800_vm1, %v489_v55  ;;  %7579 = vmatmul.msk.f32.gmra.mxu3 %vm800_vm1, %v685_v56  ;;  %v5593_v0 = vmax.f32 %v3375_v58, %v3963_v59 }
 0x29f   :  { %v6380_v63 = vmax.f32 %v6184_v62, 0.0  ;;  %6991 = vmatmul.msk.f32.gmra.mxu0 %vm800_vm1, %v97_v60  ;;  %7187 = vmatmul.msk.f32.gmra.mxu1 %vm800_vm1, %v293_v61  ;;  %v494_v62 = vld [vmem:[%s11883_s0 + $0xf00] sm:$0xff] }
 0x2a0   :  { %v4551_v1 = vpop.f32.mrf.mxu2  ;;  %v5139_v2 = vpop.f32.mrf.mxu3 }
 0x2a1   :  { %v6576_v3 = vpack.c.bf16 %v6380_v63, %v6380_v63  ;;  %v5789_v4 = vmax.f32 %v4551_v1, %v5139_v2  ;;  %v690_v63 = vld [vmem:[%s11883_s0 + $0x1520] sm:$0xff] }
 0x2a3   :  { %6773 = vst.msk [vmem:[%s11885_s3 + $0x108] sm:$0xf] %vm6706_vm2, %v6576_v3  ;;  %v5985_v7 = vmax.f32 %v5593_v0, %v5789_v4  ;;  %v102_v3 = vld [vmem:[%s11883_s0 + $0x2c0] sm:$0xff] }
 0x2a4   :  { %v3378_v8 = vpop.f32.mrf.mxu0  ;;  %v3966_v9 = vpop.f32.mrf.mxu1  ;;  %v298_v4 = vld [vmem:[%s11883_s0 + $0x8e0] sm:$0xff] }
 0x2a5   :  { %v6185_v13 = vadd.f32 %v9162_v18, %v5985_v7  ;;  %7384 = vmatmul.msk.f32.gmra.mxu2 %vm800_vm1, %v490_v5  ;;  %7580 = vmatmul.msk.f32.gmra.mxu3 %vm800_vm1, %v686_v6  ;;  %v5594_v12 = vmax.f32 %v3378_v8, %v3966_v9 }
 0x2a7   :  { %v6381_v19 = vmax.f32 %v6185_v13, 0.0  ;;  %6992 = vmatmul.msk.f32.gmra.mxu0 %vm800_vm1, %v98_v10  ;;  %7188 = vmatmul.msk.f32.gmra.mxu1 %vm800_vm1, %v294_v11  ;;  %v495_v13 = vld [vmem:[%s11883_s0 + $0xf08] sm:$0xff] }
 0x2a8   :  { %v4554_v14 = vpop.f32.mrf.mxu2  ;;  %v5142_v15 = vpop.f32.mrf.mxu3 }
 0x2a9   :  { %v6577_v16 = vpack.c.bf16 %v6381_v19, %v6381_v19  ;;  %v5790_v17 = vmax.f32 %v4554_v14, %v5142_v15  ;;  %v691_v19 = vld [vmem:[%s11883_s0 + $0x1528] sm:$0xff] }
 0x2ab   :  { %6774 = vst.msk [vmem:[%s11885_s3 + $0x10c] sm:$0xf] %vm6706_vm2, %v6577_v16  ;;  %v5986_v22 = vmax.f32 %v5594_v12, %v5790_v17  ;;  %v103_v16 = vld [vmem:[%s11883_s0 + $0x2c8] sm:$0xff] }
 0x2ac   :  { %v3381_v23 = vpop.f32.mrf.mxu0  ;;  %v3969_v24 = vpop.f32.mrf.mxu1  ;;  %v299_v17 = vld [vmem:[%s11883_s0 + $0x8e8] sm:$0xff] }
 0x2ad   :  { %v6186_v27 = vadd.f32 %v9162_v18, %v5986_v22  ;;  %7385 = vmatmul.msk.f32.gmra.mxu2 %vm800_vm1, %v491_v20  ;;  %7581 = vmatmul.msk.f32.gmra.mxu3 %vm800_vm1, %v687_v21  ;;  %v5595_v29 = vmax.f32 %v3381_v23, %v3969_v24 }
 0x2af   :  { %v6382_v28 = vmax.f32 %v6186_v27, 0.0  ;;  %6993 = vmatmul.msk.f32.gmra.mxu0 %vm800_vm1, %v99_v25  ;;  %7189 = vmatmul.msk.f32.gmra.mxu1 %vm800_vm1, %v295_v26  ;;  %v496_v27 = vld [vmem:[%s11883_s0 + $0xf10] sm:$0xff] }
 0x2b0   :  { %v4557_v30 = vpop.f32.mrf.mxu2  ;;  %v5145_v31 = vpop.f32.mrf.mxu3 }
 0x2b1   :  { %v6578_v32 = vpack.c.bf16 %v6382_v28, %v6382_v28  ;;  %v5791_v33 = vmax.f32 %v4557_v30, %v5145_v31  ;;  %v692_v28 = vld [vmem:[%s11883_s0 + $0x1530] sm:$0xff] }
 0x2b3   :  { %6775 = vst.msk [vmem:[%s11885_s3 + $0x110] sm:$0xf] %vm6706_vm2, %v6578_v32  ;;  %v5987_v36 = vmax.f32 %v5595_v29, %v5791_v33  ;;  %v104_v32 = vld [vmem:[%s11883_s0 + $0x2d0] sm:$0xff] }
 0x2b4   :  { %v3384_v37 = vpop.f32.mrf.mxu0  ;;  %v3972_v38 = vpop.f32.mrf.mxu1  ;;  %v300_v33 = vld [vmem:[%s11883_s0 + $0x8f0] sm:$0xff] }
 0x2b5   :  { %v6187_v41 = vadd.f32 %v9162_v18, %v5987_v36  ;;  %7386 = vmatmul.msk.f32.gmra.mxu2 %vm800_vm1, %v492_v34  ;;  %7582 = vmatmul.msk.f32.gmra.mxu3 %vm800_vm1, %v688_v35  ;;  %v5596_v43 = vmax.f32 %v3384_v37, %v3972_v38 }
 0x2b7   :  { %v6383_v42 = vmax.f32 %v6187_v41, 0.0  ;;  %6994 = vmatmul.msk.f32.gmra.mxu0 %vm800_vm1, %v100_v39  ;;  %7190 = vmatmul.msk.f32.gmra.mxu1 %vm800_vm1, %v296_v40  ;;  %v497_v41 = vld [vmem:[%s11883_s0 + $0xf18] sm:$0xff] }
 0x2b8   :  { %v4560_v44 = vpop.f32.mrf.mxu2  ;;  %v5148_v45 = vpop.f32.mrf.mxu3 }
 0x2b9   :  { %v6579_v46 = vpack.c.bf16 %v6383_v42, %v6383_v42  ;;  %v5792_v47 = vmax.f32 %v4560_v44, %v5148_v45  ;;  %v693_v42 = vld [vmem:[%s11883_s0 + $0x1538] sm:$0xff] }
 0x2bb   :  { %6776 = vst.msk [vmem:[%s11885_s3 + $0x114] sm:$0xf] %vm6706_vm2, %v6579_v46  ;;  %v5988_v50 = vmax.f32 %v5596_v43, %v5792_v47  ;;  %v105_v46 = vld [vmem:[%s11883_s0 + $0x2d8] sm:$0xff] }
 0x2bc   :  { %v3387_v51 = vpop.f32.mrf.mxu0  ;;  %v3975_v52 = vpop.f32.mrf.mxu1  ;;  %v301_v47 = vld [vmem:[%s11883_s0 + $0x8f8] sm:$0xff] }
 0x2bd   :  { %v6188_v55 = vadd.f32 %v9162_v18, %v5988_v50  ;;  %7387 = vmatmul.msk.f32.gmra.mxu2 %vm800_vm1, %v493_v48  ;;  %7583 = vmatmul.msk.f32.gmra.mxu3 %vm800_vm1, %v689_v49  ;;  %v5597_v57 = vmax.f32 %v3387_v51, %v3975_v52 }
 0x2bf   :  { %v6384_v56 = vmax.f32 %v6188_v55, 0.0  ;;  %6995 = vmatmul.msk.f32.gmra.mxu0 %vm800_vm1, %v101_v53  ;;  %7191 = vmatmul.msk.f32.gmra.mxu1 %vm800_vm1, %v297_v54  ;;  %v498_v55 = vld [vmem:[%s11883_s0 + $0xf20] sm:$0xff] }
 0x2c0   :  { %v4563_v58 = vpop.f32.mrf.mxu2  ;;  %v5151_v59 = vpop.f32.mrf.mxu3 }
 0x2c1   :  { %v6580_v60 = vpack.c.bf16 %v6384_v56, %v6384_v56  ;;  %v5793_v61 = vmax.f32 %v4563_v58, %v5151_v59  ;;  %v694_v56 = vld [vmem:[%s11883_s0 + $0x1540] sm:$0xff] }
 0x2c3   :  { %6777 = vst.msk [vmem:[%s11885_s3 + $0x118] sm:$0xf] %vm6706_vm2, %v6580_v60  ;;  %v5989_v0 = vmax.f32 %v5597_v57, %v5793_v61  ;;  %v106_v60 = vld [vmem:[%s11883_s0 + $0x2e0] sm:$0xff] }
 0x2c4   :  { %v3390_v1 = vpop.f32.mrf.mxu0  ;;  %v3978_v2 = vpop.f32.mrf.mxu1  ;;  %v302_v61 = vld [vmem:[%s11883_s0 + $0x900] sm:$0xff] }
 0x2c5   :  { %v6189_v5 = vadd.f32 %v9162_v18, %v5989_v0  ;;  %7388 = vmatmul.msk.f32.gmra.mxu2 %vm800_vm1, %v494_v62  ;;  %7584 = vmatmul.msk.f32.gmra.mxu3 %vm800_vm1, %v690_v63  ;;  %v5598_v7 = vmax.f32 %v3390_v1, %v3978_v2 }
 0x2c7   :  { %v6385_v6 = vmax.f32 %v6189_v5, 0.0  ;;  %6996 = vmatmul.msk.f32.gmra.mxu0 %vm800_vm1, %v102_v3  ;;  %7192 = vmatmul.msk.f32.gmra.mxu1 %vm800_vm1, %v298_v4  ;;  %v499_v5 = vld [vmem:[%s11883_s0 + $0xf28] sm:$0xff] }
 0x2c8   :  { %v4566_v8 = vpop.f32.mrf.mxu2  ;;  %v5154_v9 = vpop.f32.mrf.mxu3 }
 0x2c9   :  { %v6581_v10 = vpack.c.bf16 %v6385_v6, %v6385_v6  ;;  %v5794_v11 = vmax.f32 %v4566_v8, %v5154_v9  ;;  %v695_v6 = vld [vmem:[%s11883_s0 + $0x1548] sm:$0xff] }
 0x2cb   :  { %6778 = vst.msk [vmem:[%s11885_s3 + $0x11c] sm:$0xf] %vm6706_vm2, %v6581_v10  ;;  %v5990_v12 = vmax.f32 %v5598_v7, %v5794_v11  ;;  %v107_v10 = vld [vmem:[%s11883_s0 + $0x2e8] sm:$0xff] }
 0x2cc   :  { %v3393_v14 = vpop.f32.mrf.mxu0  ;;  %v3981_v15 = vpop.f32.mrf.mxu1  ;;  %v303_v11 = vld [vmem:[%s11883_s0 + $0x908] sm:$0xff] }
 0x2cd   :  { %v6190_v20 = vadd.f32 %v9162_v18, %v5990_v12  ;;  %7389 = vmatmul.msk.f32.gmra.mxu2 %vm800_vm1, %v495_v13  ;;  %7585 = vmatmul.msk.f32.gmra.mxu3 %vm800_vm1, %v691_v19  ;;  %v5599_v22 = vmax.f32 %v3393_v14, %v3981_v15 }
 0x2cf   :  { %v6386_v21 = vmax.f32 %v6190_v20, 0.0  ;;  %6997 = vmatmul.msk.f32.gmra.mxu0 %vm800_vm1, %v103_v16  ;;  %7193 = vmatmul.msk.f32.gmra.mxu1 %vm800_vm1, %v299_v17  ;;  %v500_v20 = vld [vmem:[%s11883_s0 + $0xf30] sm:$0xff] }
 0x2d0   :  { %v4569_v23 = vpop.f32.mrf.mxu2  ;;  %v5157_v24 = vpop.f32.mrf.mxu3 }
 0x2d1   :  { %v6582_v25 = vpack.c.bf16 %v6386_v21, %v6386_v21  ;;  %v5795_v26 = vmax.f32 %v4569_v23, %v5157_v24  ;;  %v696_v21 = vld [vmem:[%s11883_s0 + $0x1550] sm:$0xff] }
 0x2d3   :  { %6779 = vst.msk [vmem:[%s11885_s3 + $0x120] sm:$0xf] %vm6706_vm2, %v6582_v25  ;;  %v5991_v29 = vmax.f32 %v5599_v22, %v5795_v26  ;;  %v108_v25 = vld [vmem:[%s11883_s0 + $0x2f0] sm:$0xff] }
 0x2d4   :  { %v3396_v30 = vpop.f32.mrf.mxu0  ;;  %v3984_v31 = vpop.f32.mrf.mxu1  ;;  %v304_v26 = vld [vmem:[%s11883_s0 + $0x910] sm:$0xff] }
 0x2d5   :  { %v6191_v34 = vadd.f32 %v9162_v18, %v5991_v29  ;;  %7390 = vmatmul.msk.f32.gmra.mxu2 %vm800_vm1, %v496_v27  ;;  %7586 = vmatmul.msk.f32.gmra.mxu3 %vm800_vm1, %v692_v28  ;;  %v5600_v36 = vmax.f32 %v3396_v30, %v3984_v31 }
 0x2d7   :  { %v6387_v35 = vmax.f32 %v6191_v34, 0.0  ;;  %6998 = vmatmul.msk.f32.gmra.mxu0 %vm800_vm1, %v104_v32  ;;  %7194 = vmatmul.msk.f32.gmra.mxu1 %vm800_vm1, %v300_v33  ;;  %v501_v34 = vld [vmem:[%s11883_s0 + $0xf38] sm:$0xff] }
 0x2d8   :  { %v4572_v37 = vpop.f32.mrf.mxu2  ;;  %v5160_v38 = vpop.f32.mrf.mxu3 }
 0x2d9   :  { %v6583_v39 = vpack.c.bf16 %v6387_v35, %v6387_v35  ;;  %v5796_v40 = vmax.f32 %v4572_v37, %v5160_v38  ;;  %v697_v35 = vld [vmem:[%s11883_s0 + $0x1558] sm:$0xff] }
 0x2db   :  { %6780 = vst.msk [vmem:[%s11885_s3 + $0x124] sm:$0xf] %vm6706_vm2, %v6583_v39  ;;  %v5992_v43 = vmax.f32 %v5600_v36, %v5796_v40  ;;  %v109_v39 = vld [vmem:[%s11883_s0 + $0x2f8] sm:$0xff] }
 0x2dc   :  { %v3399_v44 = vpop.f32.mrf.mxu0  ;;  %v3987_v45 = vpop.f32.mrf.mxu1  ;;  %v305_v40 = vld [vmem:[%s11883_s0 + $0x918] sm:$0xff] }
 0x2dd   :  { %v6192_v48 = vadd.f32 %v9162_v18, %v5992_v43  ;;  %7391 = vmatmul.msk.f32.gmra.mxu2 %vm800_vm1, %v497_v41  ;;  %7587 = vmatmul.msk.f32.gmra.mxu3 %vm800_vm1, %v693_v42  ;;  %v5601_v50 = vmax.f32 %v3399_v44, %v3987_v45 }
 0x2df   :  { %v6388_v49 = vmax.f32 %v6192_v48, 0.0  ;;  %6999 = vmatmul.msk.f32.gmra.mxu0 %vm800_vm1, %v105_v46  ;;  %7195 = vmatmul.msk.f32.gmra.mxu1 %vm800_vm1, %v301_v47  ;;  %v502_v48 = vld [vmem:[%s11883_s0 + $0xf40] sm:$0xff] }
 0x2e0   :  { %v4575_v51 = vpop.f32.mrf.mxu2  ;;  %v5163_v52 = vpop.f32.mrf.mxu3 }
 0x2e1   :  { %v6584_v53 = vpack.c.bf16 %v6388_v49, %v6388_v49  ;;  %v5797_v54 = vmax.f32 %v4575_v51, %v5163_v52  ;;  %v698_v49 = vld [vmem:[%s11883_s0 + $0x1560] sm:$0xff] }
 0x2e3   :  { %6781 = vst.msk [vmem:[%s11885_s3 + $0x128] sm:$0xf] %vm6706_vm2, %v6584_v53  ;;  %v5993_v57 = vmax.f32 %v5601_v50, %v5797_v54  ;;  %v110_v53 = vld [vmem:[%s11883_s0 + $0x300] sm:$0xff] }
 0x2e4   :  { %v3402_v58 = vpop.f32.mrf.mxu0  ;;  %v3990_v59 = vpop.f32.mrf.mxu1  ;;  %v306_v54 = vld [vmem:[%s11883_s0 + $0x920] sm:$0xff] }
 0x2e5   :  { %v6193_v62 = vadd.f32 %v9162_v18, %v5993_v57  ;;  %7392 = vmatmul.msk.f32.gmra.mxu2 %vm800_vm1, %v498_v55  ;;  %7588 = vmatmul.msk.f32.gmra.mxu3 %vm800_vm1, %v694_v56  ;;  %v5602_v0 = vmax.f32 %v3402_v58, %v3990_v59 }
 0x2e7   :  { %v6389_v63 = vmax.f32 %v6193_v62, 0.0  ;;  %7000 = vmatmul.msk.f32.gmra.mxu0 %vm800_vm1, %v106_v60  ;;  %7196 = vmatmul.msk.f32.gmra.mxu1 %vm800_vm1, %v302_v61  ;;  %v503_v62 = vld [vmem:[%s11883_s0 + $0xf48] sm:$0xff] }
 0x2e8   :  { %v4578_v1 = vpop.f32.mrf.mxu2  ;;  %v5166_v2 = vpop.f32.mrf.mxu3 }
 0x2e9   :  { %v6585_v3 = vpack.c.bf16 %v6389_v63, %v6389_v63  ;;  %v5798_v4 = vmax.f32 %v4578_v1, %v5166_v2  ;;  %v699_v63 = vld [vmem:[%s11883_s0 + $0x1568] sm:$0xff] }
 0x2eb   :  { %6782 = vst.msk [vmem:[%s11885_s3 + $0x12c] sm:$0xf] %vm6706_vm2, %v6585_v3  ;;  %v5994_v7 = vmax.f32 %v5602_v0, %v5798_v4  ;;  %v111_v3 = vld [vmem:[%s11883_s0 + $0x308] sm:$0xff] }
 0x2ec   :  { %v3405_v8 = vpop.f32.mrf.mxu0  ;;  %v3993_v9 = vpop.f32.mrf.mxu1  ;;  %v307_v4 = vld [vmem:[%s11883_s0 + $0x928] sm:$0xff] }
 0x2ed   :  { %v6194_v13 = vadd.f32 %v9162_v18, %v5994_v7  ;;  %7393 = vmatmul.msk.f32.gmra.mxu2 %vm800_vm1, %v499_v5  ;;  %7589 = vmatmul.msk.f32.gmra.mxu3 %vm800_vm1, %v695_v6  ;;  %v5603_v12 = vmax.f32 %v3405_v8, %v3993_v9 }
 0x2ef   :  { %v6390_v19 = vmax.f32 %v6194_v13, 0.0  ;;  %7001 = vmatmul.msk.f32.gmra.mxu0 %vm800_vm1, %v107_v10  ;;  %7197 = vmatmul.msk.f32.gmra.mxu1 %vm800_vm1, %v303_v11  ;;  %v504_v13 = vld [vmem:[%s11883_s0 + $0xf50] sm:$0xff] }
 0x2f0   :  { %v4581_v14 = vpop.f32.mrf.mxu2  ;;  %v5169_v15 = vpop.f32.mrf.mxu3 }
 0x2f1   :  { %v6586_v16 = vpack.c.bf16 %v6390_v19, %v6390_v19  ;;  %v5799_v17 = vmax.f32 %v4581_v14, %v5169_v15  ;;  %v112_v15 = vld [vmem:[%s11883_s0 + $0x310] sm:$0xff] }
 0x2f3   :  { %6783 = vst.msk [vmem:[%s11885_s3 + $0x130] sm:$0xf] %vm6706_vm2, %v6586_v16  ;;  %v5995_v22 = vmax.f32 %v5603_v12, %v5799_v17  ;;  %v308_v16 = vld [vmem:[%s11883_s0 + $0x930] sm:$0xff]  ;;  %v9734_v17 = vld [vmem:[%s11884_s2] ss:$0 sm:$0xff] }
 0x2f4   :  { %v3408_v23 = vpop.f32.mrf.mxu0  ;;  %v3996_v24 = vpop.f32.mrf.mxu1 }
 0x2f5   :  { %v6195_v27 = vadd.f32 %v9162_v18, %v5995_v22  ;;  %7394 = vmatmul.msk.f32.gmra.mxu2 %vm800_vm1, %v500_v20  ;;  %7590 = vmatmul.msk.f32.gmra.mxu3 %vm800_vm1, %v696_v21  ;;  %v5604_v29 = vmax.f32 %v3408_v23, %v3996_v24 }
 0x2f7   :  { %v6391_v28 = vmax.f32 %v6195_v27, 0.0  ;;  %7002 = vmatmul.msk.f32.gmra.mxu0 %vm800_vm1, %v108_v25  ;;  %7198 = vmatmul.msk.f32.gmra.mxu1 %vm800_vm1, %v304_v26  ;;  %v505_v27 = vld [vmem:[%s11883_s0 + $0xf58] sm:$0xff] }
 0x2f8   :  { %v4584_v30 = vpop.f32.mrf.mxu2  ;;  %v5172_v31 = vpop.f32.mrf.mxu3 }
 0x2f9   :  { %v6587_v32 = vpack.c.bf16 %v6391_v28, %v6391_v28  ;;  %v5800_v33 = vmax.f32 %v4584_v30, %v5172_v31  ;;  %v701_v28 = vld [vmem:[%s11883_s0 + $0x1578] sm:$0xff] }
 0x2fb   :  { %6784 = vst.msk [vmem:[%s11885_s3 + $0x134] sm:$0xf] %vm6706_vm2, %v6587_v32  ;;  %v5996_v36 = vmax.f32 %v5604_v29, %v5800_v33  ;;  %v113_v32 = vld [vmem:[%s11883_s0 + $0x318] sm:$0xff] }
 0x2fc   :  { %v3411_v37 = vpop.f32.mrf.mxu0  ;;  %v3999_v38 = vpop.f32.mrf.mxu1  ;;  %v309_v33 = vld [vmem:[%s11883_s0 + $0x938] sm:$0xff] }
 0x2fd   :  { %v6196_v41 = vadd.f32 %v9162_v18, %v5996_v36  ;;  %7395 = vmatmul.msk.f32.gmra.mxu2 %vm800_vm1, %v501_v34  ;;  %7591 = vmatmul.msk.f32.gmra.mxu3 %vm800_vm1, %v697_v35  ;;  %v5605_v43 = vmax.f32 %v3411_v37, %v3999_v38 }
 0x2ff   :  { %v6392_v42 = vmax.f32 %v6196_v41, 0.0  ;;  %7003 = vmatmul.msk.f32.gmra.mxu0 %vm800_vm1, %v109_v39  ;;  %7199 = vmatmul.msk.f32.gmra.mxu1 %vm800_vm1, %v305_v40  ;;  %v506_v41 = vld [vmem:[%s11883_s0 + $0xf60] sm:$0xff] }
 0x300   :  { %v4587_v44 = vpop.f32.mrf.mxu2  ;;  %v5175_v45 = vpop.f32.mrf.mxu3 }
 0x301   :  { %v6588_v46 = vpack.c.bf16 %v6392_v42, %v6392_v42  ;;  %v5801_v47 = vmax.f32 %v4587_v44, %v5175_v45  ;;  %v702_v42 = vld [vmem:[%s11883_s0 + $0x1580] sm:$0xff] }
 0x303   :  { %6785 = vst.msk [vmem:[%s11885_s3 + $0x138] sm:$0xf] %vm6706_vm2, %v6588_v46  ;;  %v5997_v50 = vmax.f32 %v5605_v43, %v5801_v47  ;;  %v114_v46 = vld [vmem:[%s11883_s0 + $0x320] sm:$0xff] }
 0x304   :  { %v3414_v51 = vpop.f32.mrf.mxu0  ;;  %v4002_v52 = vpop.f32.mrf.mxu1  ;;  %v310_v47 = vld [vmem:[%s11883_s0 + $0x940] sm:$0xff] }
 0x305   :  { %v6197_v55 = vadd.f32 %v9162_v18, %v5997_v50  ;;  %7396 = vmatmul.msk.f32.gmra.mxu2 %vm800_vm1, %v502_v48  ;;  %7592 = vmatmul.msk.f32.gmra.mxu3 %vm800_vm1, %v698_v49  ;;  %v5606_v57 = vmax.f32 %v3414_v51, %v4002_v52 }
 0x307   :  { %v6393_v56 = vmax.f32 %v6197_v55, 0.0  ;;  %7004 = vmatmul.msk.f32.gmra.mxu0 %vm800_vm1, %v110_v53  ;;  %7200 = vmatmul.msk.f32.gmra.mxu1 %vm800_vm1, %v306_v54  ;;  %v507_v55 = vld [vmem:[%s11883_s0 + $0xf68] sm:$0xff] }
 0x308   :  { %v4590_v58 = vpop.f32.mrf.mxu2  ;;  %v5178_v59 = vpop.f32.mrf.mxu3 }
 0x309   :  { %v6589_v60 = vpack.c.bf16 %v6393_v56, %v6393_v56  ;;  %v5802_v61 = vmax.f32 %v4590_v58, %v5178_v59  ;;  %v703_v56 = vld [vmem:[%s11883_s0 + $0x1588] sm:$0xff] }
 0x30b   :  { %6786 = vst.msk [vmem:[%s11885_s3 + $0x13c] sm:$0xf] %vm6706_vm2, %v6589_v60  ;;  %v5998_v0 = vmax.f32 %v5606_v57, %v5802_v61  ;;  %v115_v60 = vld [vmem:[%s11883_s0 + $0x328] sm:$0xff] }
 0x30c   :  { %v3417_v1 = vpop.f32.mrf.mxu0  ;;  %v4005_v2 = vpop.f32.mrf.mxu1  ;;  %v311_v61 = vld [vmem:[%s11883_s0 + $0x948] sm:$0xff] }
 0x30d   :  { %v6198_v5 = vadd.f32 %v9162_v18, %v5998_v0  ;;  %7397 = vmatmul.msk.f32.gmra.mxu2 %vm800_vm1, %v503_v62  ;;  %7593 = vmatmul.msk.f32.gmra.mxu3 %vm800_vm1, %v699_v63  ;;  %v5607_v7 = vmax.f32 %v3417_v1, %v4005_v2  ;;  %v700_v18 = vld [vmem:[%s11883_s0 + $0x1570] sm:$0xff] }
 0x30f   :  { %v6394_v6 = vmax.f32 %v6198_v5, 0.0  ;;  %7005 = vmatmul.msk.f32.gmra.mxu0 %vm800_vm1, %v111_v3  ;;  %7201 = vmatmul.msk.f32.gmra.mxu1 %vm800_vm1, %v307_v4  ;;  %v508_v5 = vld [vmem:[%s11883_s0 + $0xf70] sm:$0xff] }
 0x310   :  { %v4593_v8 = vpop.f32.mrf.mxu2  ;;  %v5181_v9 = vpop.f32.mrf.mxu3 }
 0x311   :  { %v6590_v10 = vpack.c.bf16 %v6394_v6, %v6394_v6  ;;  %v5803_v11 = vmax.f32 %v4593_v8, %v5181_v9  ;;  %v704_v6 = vld [vmem:[%s11883_s0 + $0x1590] sm:$0xff] }
 0x313   :  { %6787 = vst.msk [vmem:[%s11885_s3 + $0x140] sm:$0xf] %vm6706_vm2, %v6590_v10  ;;  %v5999_v19 = vmax.f32 %v5607_v7, %v5803_v11  ;;  %v116_v10 = vld [vmem:[%s11883_s0 + $0x330] sm:$0xff] }
 0x314   :  { %v3420_v12 = vpop.f32.mrf.mxu0  ;;  %v4008_v14 = vpop.f32.mrf.mxu1  ;;  %v312_v11 = vld [vmem:[%s11883_s0 + $0x950] sm:$0xff] }
 0x315   :  { %v6199_v20 = vadd.f32 %v9734_v17, %v5999_v19  ;;  %7398 = vmatmul.msk.f32.gmra.mxu2 %vm800_vm1, %v504_v13  ;;  %7594 = vmatmul.msk.f32.gmra.mxu3 %vm800_vm1, %v700_v18  ;;  %v5608_v22 = vmax.f32 %v3420_v12, %v4008_v14 }
 0x317   :  { %v6395_v21 = vmax.f32 %v6199_v20, 0.0  ;;  %7006 = vmatmul.msk.f32.gmra.mxu0 %vm800_vm1, %v112_v15  ;;  %7202 = vmatmul.msk.f32.gmra.mxu1 %vm800_vm1, %v308_v16  ;;  %v509_v20 = vld [vmem:[%s11883_s0 + $0xf78] sm:$0xff] }
 0x318   :  { %v4596_v23 = vpop.f32.mrf.mxu2  ;;  %v5184_v24 = vpop.f32.mrf.mxu3 }
 0x319   :  { %v6591_v25 = vpack.c.bf16 %v6395_v21, %v6395_v21  ;;  %v5804_v26 = vmax.f32 %v4596_v23, %v5184_v24  ;;  %v705_v21 = vld [vmem:[%s11883_s0 + $0x1598] sm:$0xff] }
 0x31b   :  { %6788 = vst.msk [vmem:[%s11885_s3 + $0x144] sm:$0xf] %vm6706_vm2, %v6591_v25  ;;  %v6000_v29 = vmax.f32 %v5608_v22, %v5804_v26  ;;  %v117_v25 = vld [vmem:[%s11883_s0 + $0x338] sm:$0xff] }
 0x31c   :  { %v3423_v30 = vpop.f32.mrf.mxu0  ;;  %v4011_v31 = vpop.f32.mrf.mxu1  ;;  %v313_v26 = vld [vmem:[%s11883_s0 + $0x958] sm:$0xff] }
 0x31d   :  { %v6200_v34 = vadd.f32 %v9734_v17, %v6000_v29  ;;  %7399 = vmatmul.msk.f32.gmra.mxu2 %vm800_vm1, %v505_v27  ;;  %7595 = vmatmul.msk.f32.gmra.mxu3 %vm800_vm1, %v701_v28  ;;  %v5609_v36 = vmax.f32 %v3423_v30, %v4011_v31 }
 0x31f   :  { %v6396_v35 = vmax.f32 %v6200_v34, 0.0  ;;  %7007 = vmatmul.msk.f32.gmra.mxu0 %vm800_vm1, %v113_v32  ;;  %7203 = vmatmul.msk.f32.gmra.mxu1 %vm800_vm1, %v309_v33  ;;  %v510_v34 = vld [vmem:[%s11883_s0 + $0xf80] sm:$0xff] }
 0x320   :  { %v4599_v37 = vpop.f32.mrf.mxu2  ;;  %v5187_v38 = vpop.f32.mrf.mxu3 }
 0x321   :  { %v6592_v39 = vpack.c.bf16 %v6396_v35, %v6396_v35  ;;  %v5805_v40 = vmax.f32 %v4599_v37, %v5187_v38  ;;  %v706_v35 = vld [vmem:[%s11883_s0 + $0x15a0] sm:$0xff] }
 0x323   :  { %6789 = vst.msk [vmem:[%s11885_s3 + $0x148] sm:$0xf] %vm6706_vm2, %v6592_v39  ;;  %v6001_v43 = vmax.f32 %v5609_v36, %v5805_v40  ;;  %v118_v39 = vld [vmem:[%s11883_s0 + $0x340] sm:$0xff] }
 0x324   :  { %v3426_v44 = vpop.f32.mrf.mxu0  ;;  %v4014_v45 = vpop.f32.mrf.mxu1  ;;  %v314_v40 = vld [vmem:[%s11883_s0 + $0x960] sm:$0xff] }
 0x325   :  { %v6201_v48 = vadd.f32 %v9734_v17, %v6001_v43  ;;  %7400 = vmatmul.msk.f32.gmra.mxu2 %vm800_vm1, %v506_v41  ;;  %7596 = vmatmul.msk.f32.gmra.mxu3 %vm800_vm1, %v702_v42  ;;  %v5610_v50 = vmax.f32 %v3426_v44, %v4014_v45 }
 0x327   :  { %v6397_v49 = vmax.f32 %v6201_v48, 0.0  ;;  %7008 = vmatmul.msk.f32.gmra.mxu0 %vm800_vm1, %v114_v46  ;;  %7204 = vmatmul.msk.f32.gmra.mxu1 %vm800_vm1, %v310_v47  ;;  %v511_v48 = vld [vmem:[%s11883_s0 + $0xf88] sm:$0xff] }
 0x328   :  { %v4602_v51 = vpop.f32.mrf.mxu2  ;;  %v5190_v52 = vpop.f32.mrf.mxu3 }
 0x329   :  { %v6593_v53 = vpack.c.bf16 %v6397_v49, %v6397_v49  ;;  %v5806_v54 = vmax.f32 %v4602_v51, %v5190_v52  ;;  %v707_v49 = vld [vmem:[%s11883_s0 + $0x15a8] sm:$0xff] }
 0x32b   :  { %6790 = vst.msk [vmem:[%s11885_s3 + $0x14c] sm:$0xf] %vm6706_vm2, %v6593_v53  ;;  %v6002_v57 = vmax.f32 %v5610_v50, %v5806_v54  ;;  %v119_v53 = vld [vmem:[%s11883_s0 + $0x348] sm:$0xff] }
 0x32c   :  { %v3429_v58 = vpop.f32.mrf.mxu0  ;;  %v4017_v59 = vpop.f32.mrf.mxu1  ;;  %v315_v54 = vld [vmem:[%s11883_s0 + $0x968] sm:$0xff] }
 0x32d   :  { %v6202_v62 = vadd.f32 %v9734_v17, %v6002_v57  ;;  %7401 = vmatmul.msk.f32.gmra.mxu2 %vm800_vm1, %v507_v55  ;;  %7597 = vmatmul.msk.f32.gmra.mxu3 %vm800_vm1, %v703_v56  ;;  %v5611_v0 = vmax.f32 %v3429_v58, %v4017_v59 }
 0x32f   :  { %v6398_v63 = vmax.f32 %v6202_v62, 0.0  ;;  %7009 = vmatmul.msk.f32.gmra.mxu0 %vm800_vm1, %v115_v60  ;;  %7205 = vmatmul.msk.f32.gmra.mxu1 %vm800_vm1, %v311_v61  ;;  %v512_v62 = vld [vmem:[%s11883_s0 + $0xf90] sm:$0xff] }
 0x330   :  { %v4605_v1 = vpop.f32.mrf.mxu2  ;;  %v5193_v2 = vpop.f32.mrf.mxu3 }
 0x331   :  { %v6594_v3 = vpack.c.bf16 %v6398_v63, %v6398_v63  ;;  %v5807_v4 = vmax.f32 %v4605_v1, %v5193_v2  ;;  %v708_v63 = vld [vmem:[%s11883_s0 + $0x15b0] sm:$0xff] }
 0x333   :  { %6791 = vst.msk [vmem:[%s11885_s3 + $0x150] sm:$0xf] %vm6706_vm2, %v6594_v3  ;;  %v6003_v7 = vmax.f32 %v5611_v0, %v5807_v4  ;;  %v120_v3 = vld [vmem:[%s11883_s0 + $0x350] sm:$0xff] }
 0x334   :  { %v3432_v8 = vpop.f32.mrf.mxu0  ;;  %v4020_v9 = vpop.f32.mrf.mxu1  ;;  %v316_v4 = vld [vmem:[%s11883_s0 + $0x970] sm:$0xff] }
 0x335   :  { %v6203_v13 = vadd.f32 %v9734_v17, %v6003_v7  ;;  %7402 = vmatmul.msk.f32.gmra.mxu2 %vm800_vm1, %v508_v5  ;;  %7598 = vmatmul.msk.f32.gmra.mxu3 %vm800_vm1, %v704_v6  ;;  %v5612_v19 = vmax.f32 %v3432_v8, %v4020_v9 }
 0x337   :  { %v6399_v18 = vmax.f32 %v6203_v13, 0.0  ;;  %7010 = vmatmul.msk.f32.gmra.mxu0 %vm800_vm1, %v116_v10  ;;  %7206 = vmatmul.msk.f32.gmra.mxu1 %vm800_vm1, %v312_v11  ;;  %v513_v13 = vld [vmem:[%s11883_s0 + $0xf98] sm:$0xff] }
 0x338   :  { %v4608_v12 = vpop.f32.mrf.mxu2  ;;  %v5196_v14 = vpop.f32.mrf.mxu3 }
 0x339   :  { %v6595_v15 = vpack.c.bf16 %v6399_v18, %v6399_v18  ;;  %v5808_v16 = vmax.f32 %v4608_v12, %v5196_v14  ;;  %v709_v18 = vld [vmem:[%s11883_s0 + $0x15b8] sm:$0xff] }
 0x33b   :  { %6792 = vst.msk [vmem:[%s11885_s3 + $0x154] sm:$0xf] %vm6706_vm2, %v6595_v15  ;;  %v6004_v22 = vmax.f32 %v5612_v19, %v5808_v16  ;;  %v121_v15 = vld [vmem:[%s11883_s0 + $0x358] sm:$0xff] }
 0x33c   :  { %v3435_v23 = vpop.f32.mrf.mxu0  ;;  %v4023_v24 = vpop.f32.mrf.mxu1  ;;  %v317_v16 = vld [vmem:[%s11883_s0 + $0x978] sm:$0xff] }
 0x33d   :  { %v6204_v27 = vadd.f32 %v9734_v17, %v6004_v22  ;;  %7403 = vmatmul.msk.f32.gmra.mxu2 %vm800_vm1, %v509_v20  ;;  %7599 = vmatmul.msk.f32.gmra.mxu3 %vm800_vm1, %v705_v21  ;;  %v5613_v29 = vmax.f32 %v3435_v23, %v4023_v24 }
 0x33f   :  { %v6400_v28 = vmax.f32 %v6204_v27, 0.0  ;;  %7011 = vmatmul.msk.f32.gmra.mxu0 %vm800_vm1, %v117_v25  ;;  %7207 = vmatmul.msk.f32.gmra.mxu1 %vm800_vm1, %v313_v26  ;;  %v514_v27 = vld [vmem:[%s11883_s0 + $0xfa0] sm:$0xff] }
 0x340   :  { %v4611_v30 = vpop.f32.mrf.mxu2  ;;  %v5199_v31 = vpop.f32.mrf.mxu3 }
 0x341   :  { %v6596_v32 = vpack.c.bf16 %v6400_v28, %v6400_v28  ;;  %v5809_v33 = vmax.f32 %v4611_v30, %v5199_v31  ;;  %v710_v28 = vld [vmem:[%s11883_s0 + $0x15c0] sm:$0xff] }
 0x343   :  { %6793 = vst.msk [vmem:[%s11885_s3 + $0x158] sm:$0xf] %vm6706_vm2, %v6596_v32  ;;  %v6005_v36 = vmax.f32 %v5613_v29, %v5809_v33  ;;  %v122_v32 = vld [vmem:[%s11883_s0 + $0x360] sm:$0xff] }
 0x344   :  { %v3438_v37 = vpop.f32.mrf.mxu0  ;;  %v4026_v38 = vpop.f32.mrf.mxu1  ;;  %v318_v33 = vld [vmem:[%s11883_s0 + $0x980] sm:$0xff] }
 0x345   :  { %v6205_v41 = vadd.f32 %v9734_v17, %v6005_v36  ;;  %7404 = vmatmul.msk.f32.gmra.mxu2 %vm800_vm1, %v510_v34  ;;  %7600 = vmatmul.msk.f32.gmra.mxu3 %vm800_vm1, %v706_v35  ;;  %v5614_v43 = vmax.f32 %v3438_v37, %v4026_v38 }
 0x347   :  { %v6401_v42 = vmax.f32 %v6205_v41, 0.0  ;;  %7012 = vmatmul.msk.f32.gmra.mxu0 %vm800_vm1, %v118_v39  ;;  %7208 = vmatmul.msk.f32.gmra.mxu1 %vm800_vm1, %v314_v40  ;;  %v515_v41 = vld [vmem:[%s11883_s0 + $0xfa8] sm:$0xff] }
 0x348   :  { %v4614_v44 = vpop.f32.mrf.mxu2  ;;  %v5202_v45 = vpop.f32.mrf.mxu3 }
 0x349   :  { %v6597_v46 = vpack.c.bf16 %v6401_v42, %v6401_v42  ;;  %v5810_v47 = vmax.f32 %v4614_v44, %v5202_v45  ;;  %v711_v42 = vld [vmem:[%s11883_s0 + $0x15c8] sm:$0xff] }
 0x34b   :  { %6794 = vst.msk [vmem:[%s11885_s3 + $0x15c] sm:$0xf] %vm6706_vm2, %v6597_v46  ;;  %v6006_v50 = vmax.f32 %v5614_v43, %v5810_v47  ;;  %v123_v46 = vld [vmem:[%s11883_s0 + $0x368] sm:$0xff] }
 0x34c   :  { %v3441_v51 = vpop.f32.mrf.mxu0  ;;  %v4029_v52 = vpop.f32.mrf.mxu1  ;;  %v319_v47 = vld [vmem:[%s11883_s0 + $0x988] sm:$0xff] }
 0x34d   :  { %v6206_v55 = vadd.f32 %v9734_v17, %v6006_v50  ;;  %7405 = vmatmul.msk.f32.gmra.mxu2 %vm800_vm1, %v511_v48  ;;  %7601 = vmatmul.msk.f32.gmra.mxu3 %vm800_vm1, %v707_v49  ;;  %v5615_v57 = vmax.f32 %v3441_v51, %v4029_v52 }
 0x34f   :  { %v6402_v56 = vmax.f32 %v6206_v55, 0.0  ;;  %7013 = vmatmul.msk.f32.gmra.mxu0 %vm800_vm1, %v119_v53  ;;  %7209 = vmatmul.msk.f32.gmra.mxu1 %vm800_vm1, %v315_v54  ;;  %v516_v55 = vld [vmem:[%s11883_s0 + $0xfb0] sm:$0xff] }
 0x350   :  { %v4617_v58 = vpop.f32.mrf.mxu2  ;;  %v5205_v59 = vpop.f32.mrf.mxu3 }
 0x351   :  { %v6598_v60 = vpack.c.bf16 %v6402_v56, %v6402_v56  ;;  %v5811_v61 = vmax.f32 %v4617_v58, %v5205_v59  ;;  %v712_v56 = vld [vmem:[%s11883_s0 + $0x15d0] sm:$0xff] }
 0x353   :  { %6795 = vst.msk [vmem:[%s11885_s3 + $0x160] sm:$0xf] %vm6706_vm2, %v6598_v60  ;;  %v6007_v0 = vmax.f32 %v5615_v57, %v5811_v61  ;;  %v124_v60 = vld [vmem:[%s11883_s0 + $0x370] sm:$0xff] }
 0x354   :  { %v3444_v1 = vpop.f32.mrf.mxu0  ;;  %v4032_v2 = vpop.f32.mrf.mxu1  ;;  %v320_v61 = vld [vmem:[%s11883_s0 + $0x990] sm:$0xff] }
 0x355   :  { %v6207_v5 = vadd.f32 %v9734_v17, %v6007_v0  ;;  %7406 = vmatmul.msk.f32.gmra.mxu2 %vm800_vm1, %v512_v62  ;;  %7602 = vmatmul.msk.f32.gmra.mxu3 %vm800_vm1, %v708_v63  ;;  %v5616_v7 = vmax.f32 %v3444_v1, %v4032_v2 }
 0x357   :  { %v6403_v6 = vmax.f32 %v6207_v5, 0.0  ;;  %7014 = vmatmul.msk.f32.gmra.mxu0 %vm800_vm1, %v120_v3  ;;  %7210 = vmatmul.msk.f32.gmra.mxu1 %vm800_vm1, %v316_v4  ;;  %v517_v5 = vld [vmem:[%s11883_s0 + $0xfb8] sm:$0xff] }
 0x358   :  { %v4620_v8 = vpop.f32.mrf.mxu2  ;;  %v5208_v9 = vpop.f32.mrf.mxu3 }
 0x359   :  { %v6599_v10 = vpack.c.bf16 %v6403_v6, %v6403_v6  ;;  %v5812_v11 = vmax.f32 %v4620_v8, %v5208_v9  ;;  %v713_v6 = vld [vmem:[%s11883_s0 + $0x15d8] sm:$0xff] }
 0x35b   :  { %6796 = vst.msk [vmem:[%s11885_s3 + $0x164] sm:$0xf] %vm6706_vm2, %v6599_v10  ;;  %v6008_v19 = vmax.f32 %v5616_v7, %v5812_v11  ;;  %v125_v10 = vld [vmem:[%s11883_s0 + $0x378] sm:$0xff] }
 0x35c   :  { %v3447_v12 = vpop.f32.mrf.mxu0  ;;  %v4035_v14 = vpop.f32.mrf.mxu1  ;;  %v321_v11 = vld [vmem:[%s11883_s0 + $0x998] sm:$0xff] }
 0x35d   :  { %v6208_v20 = vadd.f32 %v9734_v17, %v6008_v19  ;;  %7407 = vmatmul.msk.f32.gmra.mxu2 %vm800_vm1, %v513_v13  ;;  %7603 = vmatmul.msk.f32.gmra.mxu3 %vm800_vm1, %v709_v18  ;;  %v5617_v22 = vmax.f32 %v3447_v12, %v4035_v14 }
 0x35f   :  { %v6404_v21 = vmax.f32 %v6208_v20, 0.0  ;;  %7015 = vmatmul.msk.f32.gmra.mxu0 %vm800_vm1, %v121_v15  ;;  %7211 = vmatmul.msk.f32.gmra.mxu1 %vm800_vm1, %v317_v16  ;;  %v518_v20 = vld [vmem:[%s11883_s0 + $0xfc0] sm:$0xff] }
 0x360   :  { %v4623_v23 = vpop.f32.mrf.mxu2  ;;  %v5211_v24 = vpop.f32.mrf.mxu3 }
 0x361   :  { %v6600_v25 = vpack.c.bf16 %v6404_v21, %v6404_v21  ;;  %v5813_v26 = vmax.f32 %v4623_v23, %v5211_v24  ;;  %v714_v21 = vld [vmem:[%s11883_s0 + $0x15e0] sm:$0xff] }
 0x363   :  { %6797 = vst.msk [vmem:[%s11885_s3 + $0x168] sm:$0xf] %vm6706_vm2, %v6600_v25  ;;  %v6009_v29 = vmax.f32 %v5617_v22, %v5813_v26  ;;  %v126_v25 = vld [vmem:[%s11883_s0 + $0x380] sm:$0xff] }
 0x364   :  { %v3450_v30 = vpop.f32.mrf.mxu0  ;;  %v4038_v31 = vpop.f32.mrf.mxu1  ;;  %v322_v26 = vld [vmem:[%s11883_s0 + $0x9a0] sm:$0xff] }
 0x365   :  { %v6209_v34 = vadd.f32 %v9734_v17, %v6009_v29  ;;  %7408 = vmatmul.msk.f32.gmra.mxu2 %vm800_vm1, %v514_v27  ;;  %7604 = vmatmul.msk.f32.gmra.mxu3 %vm800_vm1, %v710_v28  ;;  %v5618_v36 = vmax.f32 %v3450_v30, %v4038_v31 }
 0x367   :  { %v6405_v35 = vmax.f32 %v6209_v34, 0.0  ;;  %7016 = vmatmul.msk.f32.gmra.mxu0 %vm800_vm1, %v122_v32  ;;  %7212 = vmatmul.msk.f32.gmra.mxu1 %vm800_vm1, %v318_v33  ;;  %v519_v34 = vld [vmem:[%s11883_s0 + $0xfc8] sm:$0xff] }
 0x368   :  { %v4626_v37 = vpop.f32.mrf.mxu2  ;;  %v5214_v38 = vpop.f32.mrf.mxu3 }
 0x369   :  { %v6601_v39 = vpack.c.bf16 %v6405_v35, %v6405_v35  ;;  %v5814_v40 = vmax.f32 %v4626_v37, %v5214_v38  ;;  %v715_v35 = vld [vmem:[%s11883_s0 + $0x15e8] sm:$0xff] }
 0x36b   :  { %6798 = vst.msk [vmem:[%s11885_s3 + $0x16c] sm:$0xf] %vm6706_vm2, %v6601_v39  ;;  %v6010_v43 = vmax.f32 %v5618_v36, %v5814_v40  ;;  %v127_v39 = vld [vmem:[%s11883_s0 + $0x388] sm:$0xff] }
 0x36c   :  { %v3453_v44 = vpop.f32.mrf.mxu0  ;;  %v4041_v45 = vpop.f32.mrf.mxu1  ;;  %v323_v40 = vld [vmem:[%s11883_s0 + $0x9a8] sm:$0xff] }
 0x36d   :  { %v6210_v48 = vadd.f32 %v9734_v17, %v6010_v43  ;;  %7409 = vmatmul.msk.f32.gmra.mxu2 %vm800_vm1, %v515_v41  ;;  %7605 = vmatmul.msk.f32.gmra.mxu3 %vm800_vm1, %v711_v42  ;;  %v5619_v50 = vmax.f32 %v3453_v44, %v4041_v45 }
 0x36f   :  { %v6406_v49 = vmax.f32 %v6210_v48, 0.0  ;;  %7017 = vmatmul.msk.f32.gmra.mxu0 %vm800_vm1, %v123_v46  ;;  %7213 = vmatmul.msk.f32.gmra.mxu1 %vm800_vm1, %v319_v47  ;;  %v520_v48 = vld [vmem:[%s11883_s0 + $0xfd0] sm:$0xff] }
 0x370   :  { %v4629_v51 = vpop.f32.mrf.mxu2  ;;  %v5217_v52 = vpop.f32.mrf.mxu3 }
 0x371   :  { %v6602_v53 = vpack.c.bf16 %v6406_v49, %v6406_v49  ;;  %v5815_v54 = vmax.f32 %v4629_v51, %v5217_v52  ;;  %v716_v49 = vld [vmem:[%s11883_s0 + $0x15f0] sm:$0xff] }
 0x373   :  { %6799 = vst.msk [vmem:[%s11885_s3 + $0x170] sm:$0xf] %vm6706_vm2, %v6602_v53  ;;  %v6011_v57 = vmax.f32 %v5619_v50, %v5815_v54  ;;  %v128_v53 = vld [vmem:[%s11883_s0 + $0x390] sm:$0xff] }
 0x374   :  { %v3456_v58 = vpop.f32.mrf.mxu0  ;;  %v4044_v59 = vpop.f32.mrf.mxu1  ;;  %v324_v54 = vld [vmem:[%s11883_s0 + $0x9b0] sm:$0xff] }
 0x375   :  { %v6211_v62 = vadd.f32 %v9734_v17, %v6011_v57  ;;  %7410 = vmatmul.msk.f32.gmra.mxu2 %vm800_vm1, %v516_v55  ;;  %7606 = vmatmul.msk.f32.gmra.mxu3 %vm800_vm1, %v712_v56  ;;  %v5620_v0 = vmax.f32 %v3456_v58, %v4044_v59 }
 0x377   :  { %v6407_v63 = vmax.f32 %v6211_v62, 0.0  ;;  %7018 = vmatmul.msk.f32.gmra.mxu0 %vm800_vm1, %v124_v60  ;;  %7214 = vmatmul.msk.f32.gmra.mxu1 %vm800_vm1, %v320_v61  ;;  %v521_v62 = vld [vmem:[%s11883_s0 + $0xfd8] sm:$0xff] }
 0x378   :  { %v4632_v1 = vpop.f32.mrf.mxu2  ;;  %v5220_v2 = vpop.f32.mrf.mxu3 }
 0x379   :  { %v6603_v3 = vpack.c.bf16 %v6407_v63, %v6407_v63  ;;  %v5816_v4 = vmax.f32 %v4632_v1, %v5220_v2  ;;  %v717_v63 = vld [vmem:[%s11883_s0 + $0x15f8] sm:$0xff] }
 0x37b   :  { %6800 = vst.msk [vmem:[%s11885_s3 + $0x174] sm:$0xf] %vm6706_vm2, %v6603_v3  ;;  %v6012_v7 = vmax.f32 %v5620_v0, %v5816_v4  ;;  %v129_v3 = vld [vmem:[%s11883_s0 + $0x398] sm:$0xff] }
 0x37c   :  { %v3459_v8 = vpop.f32.mrf.mxu0  ;;  %v4047_v9 = vpop.f32.mrf.mxu1  ;;  %v325_v4 = vld [vmem:[%s11883_s0 + $0x9b8] sm:$0xff] }
 0x37d   :  { %v6212_v13 = vadd.f32 %v9734_v17, %v6012_v7  ;;  %7411 = vmatmul.msk.f32.gmra.mxu2 %vm800_vm1, %v517_v5  ;;  %7607 = vmatmul.msk.f32.gmra.mxu3 %vm800_vm1, %v713_v6  ;;  %v5621_v19 = vmax.f32 %v3459_v8, %v4047_v9 }
 0x37f   :  { %v6408_v18 = vmax.f32 %v6212_v13, 0.0  ;;  %7019 = vmatmul.msk.f32.gmra.mxu0 %vm800_vm1, %v125_v10  ;;  %7215 = vmatmul.msk.f32.gmra.mxu1 %vm800_vm1, %v321_v11  ;;  %v522_v13 = vld [vmem:[%s11883_s0 + $0xfe0] sm:$0xff] }
 0x380   :  { %v4635_v12 = vpop.f32.mrf.mxu2  ;;  %v5223_v14 = vpop.f32.mrf.mxu3 }
 0x381   :  { %v6604_v15 = vpack.c.bf16 %v6408_v18, %v6408_v18  ;;  %v5817_v16 = vmax.f32 %v4635_v12, %v5223_v14  ;;  %v718_v18 = vld [vmem:[%s11883_s0 + $0x1600] sm:$0xff] }
 0x383   :  { %6801 = vst.msk [vmem:[%s11885_s3 + $0x178] sm:$0xf] %vm6706_vm2, %v6604_v15  ;;  %v6013_v22 = vmax.f32 %v5621_v19, %v5817_v16  ;;  %v130_v15 = vld [vmem:[%s11883_s0 + $0x3a0] sm:$0xff] }
 0x384   :  { %v3462_v23 = vpop.f32.mrf.mxu0  ;;  %v4050_v24 = vpop.f32.mrf.mxu1  ;;  %v326_v16 = vld [vmem:[%s11883_s0 + $0x9c0] sm:$0xff] }
 0x385   :  { %v6213_v27 = vadd.f32 %v9734_v17, %v6013_v22  ;;  %7412 = vmatmul.msk.f32.gmra.mxu2 %vm800_vm1, %v518_v20  ;;  %7608 = vmatmul.msk.f32.gmra.mxu3 %vm800_vm1, %v714_v21  ;;  %v5622_v29 = vmax.f32 %v3462_v23, %v4050_v24 }
 0x387   :  { %v6409_v28 = vmax.f32 %v6213_v27, 0.0  ;;  %7020 = vmatmul.msk.f32.gmra.mxu0 %vm800_vm1, %v126_v25  ;;  %7216 = vmatmul.msk.f32.gmra.mxu1 %vm800_vm1, %v322_v26  ;;  %v523_v27 = vld [vmem:[%s11883_s0 + $0xfe8] sm:$0xff] }
 0x388   :  { %v4638_v30 = vpop.f32.mrf.mxu2  ;;  %v5226_v31 = vpop.f32.mrf.mxu3 }
 0x389   :  { %v6605_v32 = vpack.c.bf16 %v6409_v28, %v6409_v28  ;;  %v5818_v33 = vmax.f32 %v4638_v30, %v5226_v31  ;;  %v719_v28 = vld [vmem:[%s11883_s0 + $0x1608] sm:$0xff] }
 0x38b   :  { %6802 = vst.msk [vmem:[%s11885_s3 + $0x17c] sm:$0xf] %vm6706_vm2, %v6605_v32  ;;  %v6014_v36 = vmax.f32 %v5622_v29, %v5818_v33  ;;  %v131_v32 = vld [vmem:[%s11883_s0 + $0x3a8] sm:$0xff] }
 0x38c   :  { %v3465_v37 = vpop.f32.mrf.mxu0  ;;  %v4053_v38 = vpop.f32.mrf.mxu1  ;;  %v327_v33 = vld [vmem:[%s11883_s0 + $0x9c8] sm:$0xff] }
 0x38d   :  { %v6214_v41 = vadd.f32 %v9734_v17, %v6014_v36  ;;  %7413 = vmatmul.msk.f32.gmra.mxu2 %vm800_vm1, %v519_v34  ;;  %7609 = vmatmul.msk.f32.gmra.mxu3 %vm800_vm1, %v715_v35  ;;  %v5623_v43 = vmax.f32 %v3465_v37, %v4053_v38 }
 0x38f   :  { %v6410_v42 = vmax.f32 %v6214_v41, 0.0  ;;  %7021 = vmatmul.msk.f32.gmra.mxu0 %vm800_vm1, %v127_v39  ;;  %7217 = vmatmul.msk.f32.gmra.mxu1 %vm800_vm1, %v323_v40  ;;  %v524_v41 = vld [vmem:[%s11883_s0 + $0xff0] sm:$0xff] }
 0x390   :  { %v4641_v44 = vpop.f32.mrf.mxu2  ;;  %v5229_v45 = vpop.f32.mrf.mxu3 }
 0x391   :  { %v6606_v46 = vpack.c.bf16 %v6410_v42, %v6410_v42  ;;  %v5819_v47 = vmax.f32 %v4641_v44, %v5229_v45  ;;  %v720_v42 = vld [vmem:[%s11883_s0 + $0x1610] sm:$0xff] }
 0x393   :  { %6803 = vst.msk [vmem:[%s11885_s3 + $0x180] sm:$0xf] %vm6706_vm2, %v6606_v46  ;;  %v6015_v50 = vmax.f32 %v5623_v43, %v5819_v47  ;;  %v132_v46 = vld [vmem:[%s11883_s0 + $0x3b0] sm:$0xff] }
 0x394   :  { %v3468_v51 = vpop.f32.mrf.mxu0  ;;  %v4056_v52 = vpop.f32.mrf.mxu1  ;;  %v328_v47 = vld [vmem:[%s11883_s0 + $0x9d0] sm:$0xff] }
 0x395   :  { %v6215_v55 = vadd.f32 %v9734_v17, %v6015_v50  ;;  %7414 = vmatmul.msk.f32.gmra.mxu2 %vm800_vm1, %v520_v48  ;;  %7610 = vmatmul.msk.f32.gmra.mxu3 %vm800_vm1, %v716_v49  ;;  %v5624_v57 = vmax.f32 %v3468_v51, %v4056_v52 }
 0x397   :  { %v6411_v56 = vmax.f32 %v6215_v55, 0.0  ;;  %7022 = vmatmul.msk.f32.gmra.mxu0 %vm800_vm1, %v128_v53  ;;  %7218 = vmatmul.msk.f32.gmra.mxu1 %vm800_vm1, %v324_v54  ;;  %v525_v55 = vld [vmem:[%s11883_s0 + $0xff8] sm:$0xff] }
 0x398   :  { %v4644_v58 = vpop.f32.mrf.mxu2  ;;  %v5232_v59 = vpop.f32.mrf.mxu3 }
 0x399   :  { %v6607_v60 = vpack.c.bf16 %v6411_v56, %v6411_v56  ;;  %v5820_v61 = vmax.f32 %v4644_v58, %v5232_v59  ;;  %v721_v56 = vld [vmem:[%s11883_s0 + $0x1618] sm:$0xff] }
 0x39b   :  { %6804 = vst.msk [vmem:[%s11885_s3 + $0x184] sm:$0xf] %vm6706_vm2, %v6607_v60  ;;  %v6016_v0 = vmax.f32 %v5624_v57, %v5820_v61  ;;  %v133_v60 = vld [vmem:[%s11883_s0 + $0x3b8] sm:$0xff] }
 0x39c   :  { %v3471_v1 = vpop.f32.mrf.mxu0  ;;  %v4059_v2 = vpop.f32.mrf.mxu1  ;;  %v329_v61 = vld [vmem:[%s11883_s0 + $0x9d8] sm:$0xff] }
 0x39d   :  { %v6216_v5 = vadd.f32 %v9734_v17, %v6016_v0  ;;  %7415 = vmatmul.msk.f32.gmra.mxu2 %vm800_vm1, %v521_v62  ;;  %7611 = vmatmul.msk.f32.gmra.mxu3 %vm800_vm1, %v717_v63  ;;  %v5625_v7 = vmax.f32 %v3471_v1, %v4059_v2 }
 0x39f   :  { %v6412_v6 = vmax.f32 %v6216_v5, 0.0  ;;  %7023 = vmatmul.msk.f32.gmra.mxu0 %vm800_vm1, %v129_v3  ;;  %7219 = vmatmul.msk.f32.gmra.mxu1 %vm800_vm1, %v325_v4  ;;  %v526_v5 = vld [vmem:[%s11883_s0 + $0x1000] sm:$0xff] }
 0x3a0   :  { %v4647_v8 = vpop.f32.mrf.mxu2  ;;  %v5235_v9 = vpop.f32.mrf.mxu3 }
 0x3a1   :  { %v6608_v10 = vpack.c.bf16 %v6412_v6, %v6412_v6  ;;  %v5821_v11 = vmax.f32 %v4647_v8, %v5235_v9  ;;  %v722_v6 = vld [vmem:[%s11883_s0 + $0x1620] sm:$0xff] }
 0x3a3   :  { %6805 = vst.msk [vmem:[%s11885_s3 + $0x188] sm:$0xf] %vm6706_vm2, %v6608_v10  ;;  %v6017_v19 = vmax.f32 %v5625_v7, %v5821_v11  ;;  %v134_v10 = vld [vmem:[%s11883_s0 + $0x3c0] sm:$0xff] }
 0x3a4   :  { %v3474_v12 = vpop.f32.mrf.mxu0  ;;  %v4062_v14 = vpop.f32.mrf.mxu1  ;;  %v330_v11 = vld [vmem:[%s11883_s0 + $0x9e0] sm:$0xff] }
 0x3a5   :  { %v6217_v20 = vadd.f32 %v9734_v17, %v6017_v19  ;;  %7416 = vmatmul.msk.f32.gmra.mxu2 %vm800_vm1, %v522_v13  ;;  %7612 = vmatmul.msk.f32.gmra.mxu3 %vm800_vm1, %v718_v18  ;;  %v5626_v22 = vmax.f32 %v3474_v12, %v4062_v14 }
 0x3a7   :  { %v6413_v21 = vmax.f32 %v6217_v20, 0.0  ;;  %7024 = vmatmul.msk.f32.gmra.mxu0 %vm800_vm1, %v130_v15  ;;  %7220 = vmatmul.msk.f32.gmra.mxu1 %vm800_vm1, %v326_v16  ;;  %v527_v20 = vld [vmem:[%s11883_s0 + $0x1008] sm:$0xff] }
 0x3a8   :  { %v4650_v23 = vpop.f32.mrf.mxu2  ;;  %v5238_v24 = vpop.f32.mrf.mxu3 }
 0x3a9   :  { %v6609_v25 = vpack.c.bf16 %v6413_v21, %v6413_v21  ;;  %v5822_v26 = vmax.f32 %v4650_v23, %v5238_v24  ;;  %v723_v21 = vld [vmem:[%s11883_s0 + $0x1628] sm:$0xff] }
 0x3ab   :  { %6806 = vst.msk [vmem:[%s11885_s3 + $0x18c] sm:$0xf] %vm6706_vm2, %v6609_v25  ;;  %v6018_v29 = vmax.f32 %v5626_v22, %v5822_v26  ;;  %v135_v25 = vld [vmem:[%s11883_s0 + $0x3c8] sm:$0xff] }
 0x3ac   :  { %v3477_v30 = vpop.f32.mrf.mxu0  ;;  %v4065_v31 = vpop.f32.mrf.mxu1  ;;  %v331_v26 = vld [vmem:[%s11883_s0 + $0x9e8] sm:$0xff] }
 0x3ad   :  { %v6218_v34 = vadd.f32 %v9734_v17, %v6018_v29  ;;  %7417 = vmatmul.msk.f32.gmra.mxu2 %vm800_vm1, %v523_v27  ;;  %7613 = vmatmul.msk.f32.gmra.mxu3 %vm800_vm1, %v719_v28  ;;  %v5627_v36 = vmax.f32 %v3477_v30, %v4065_v31 }
 0x3af   :  { %v6414_v35 = vmax.f32 %v6218_v34, 0.0  ;;  %7025 = vmatmul.msk.f32.gmra.mxu0 %vm800_vm1, %v131_v32  ;;  %7221 = vmatmul.msk.f32.gmra.mxu1 %vm800_vm1, %v327_v33  ;;  %v528_v34 = vld [vmem:[%s11883_s0 + $0x1010] sm:$0xff] }
 0x3b0   :  { %v4653_v37 = vpop.f32.mrf.mxu2  ;;  %v5241_v38 = vpop.f32.mrf.mxu3 }
 0x3b1   :  { %v6610_v39 = vpack.c.bf16 %v6414_v35, %v6414_v35  ;;  %v5823_v40 = vmax.f32 %v4653_v37, %v5241_v38  ;;  %v724_v35 = vld [vmem:[%s11883_s0 + $0x1630] sm:$0xff] }
 0x3b3   :  { %6807 = vst.msk [vmem:[%s11885_s3 + $0x190] sm:$0xf] %vm6706_vm2, %v6610_v39  ;;  %v6019_v43 = vmax.f32 %v5627_v36, %v5823_v40  ;;  %v136_v39 = vld [vmem:[%s11883_s0 + $0x3d0] sm:$0xff] }
 0x3b4   :  { %v3480_v44 = vpop.f32.mrf.mxu0  ;;  %v4068_v45 = vpop.f32.mrf.mxu1  ;;  %v332_v40 = vld [vmem:[%s11883_s0 + $0x9f0] sm:$0xff] }
 0x3b5   :  { %v6219_v48 = vadd.f32 %v9734_v17, %v6019_v43  ;;  %7418 = vmatmul.msk.f32.gmra.mxu2 %vm800_vm1, %v524_v41  ;;  %7614 = vmatmul.msk.f32.gmra.mxu3 %vm800_vm1, %v720_v42  ;;  %v5628_v50 = vmax.f32 %v3480_v44, %v4068_v45 }
 0x3b7   :  { %v6415_v49 = vmax.f32 %v6219_v48, 0.0  ;;  %7026 = vmatmul.msk.f32.gmra.mxu0 %vm800_vm1, %v132_v46  ;;  %7222 = vmatmul.msk.f32.gmra.mxu1 %vm800_vm1, %v328_v47  ;;  %v529_v48 = vld [vmem:[%s11883_s0 + $0x1018] sm:$0xff] }
 0x3b8   :  { %v4656_v51 = vpop.f32.mrf.mxu2  ;;  %v5244_v52 = vpop.f32.mrf.mxu3 }
 0x3b9   :  { %v6611_v53 = vpack.c.bf16 %v6415_v49, %v6415_v49  ;;  %v5824_v54 = vmax.f32 %v4656_v51, %v5244_v52  ;;  %v725_v49 = vld [vmem:[%s11883_s0 + $0x1638] sm:$0xff] }
 0x3bb   :  { %6808 = vst.msk [vmem:[%s11885_s3 + $0x194] sm:$0xf] %vm6706_vm2, %v6611_v53  ;;  %v6020_v57 = vmax.f32 %v5628_v50, %v5824_v54  ;;  %v137_v53 = vld [vmem:[%s11883_s0 + $0x3d8] sm:$0xff] }
 0x3bc   :  { %v3483_v58 = vpop.f32.mrf.mxu0  ;;  %v4071_v59 = vpop.f32.mrf.mxu1  ;;  %v333_v54 = vld [vmem:[%s11883_s0 + $0x9f8] sm:$0xff] }
 0x3bd   :  { %v6220_v62 = vadd.f32 %v9734_v17, %v6020_v57  ;;  %7419 = vmatmul.msk.f32.gmra.mxu2 %vm800_vm1, %v525_v55  ;;  %7615 = vmatmul.msk.f32.gmra.mxu3 %vm800_vm1, %v721_v56  ;;  %v5629_v0 = vmax.f32 %v3483_v58, %v4071_v59 }
 0x3bf   :  { %v6416_v63 = vmax.f32 %v6220_v62, 0.0  ;;  %7027 = vmatmul.msk.f32.gmra.mxu0 %vm800_vm1, %v133_v60  ;;  %7223 = vmatmul.msk.f32.gmra.mxu1 %vm800_vm1, %v329_v61  ;;  %v530_v62 = vld [vmem:[%s11883_s0 + $0x1020] sm:$0xff] }
 0x3c0   :  { %v4659_v1 = vpop.f32.mrf.mxu2  ;;  %v5247_v2 = vpop.f32.mrf.mxu3 }
 0x3c1   :  { %v6612_v3 = vpack.c.bf16 %v6416_v63, %v6416_v63  ;;  %v5825_v4 = vmax.f32 %v4659_v1, %v5247_v2  ;;  %v726_v63 = vld [vmem:[%s11883_s0 + $0x1640] sm:$0xff] }
 0x3c3   :  { %6809 = vst.msk [vmem:[%s11885_s3 + $0x198] sm:$0xf] %vm6706_vm2, %v6612_v3  ;;  %v6021_v7 = vmax.f32 %v5629_v0, %v5825_v4  ;;  %v138_v3 = vld [vmem:[%s11883_s0 + $0x3e0] sm:$0xff] }
 0x3c4   :  { %v3486_v8 = vpop.f32.mrf.mxu0  ;;  %v4074_v9 = vpop.f32.mrf.mxu1  ;;  %v334_v4 = vld [vmem:[%s11883_s0 + $0xa00] sm:$0xff] }
 0x3c5   :  { %v6221_v13 = vadd.f32 %v9734_v17, %v6021_v7  ;;  %7420 = vmatmul.msk.f32.gmra.mxu2 %vm800_vm1, %v526_v5  ;;  %7616 = vmatmul.msk.f32.gmra.mxu3 %vm800_vm1, %v722_v6  ;;  %v5630_v19 = vmax.f32 %v3486_v8, %v4074_v9 }
 0x3c7   :  { %v6417_v18 = vmax.f32 %v6221_v13, 0.0  ;;  %7028 = vmatmul.msk.f32.gmra.mxu0 %vm800_vm1, %v134_v10  ;;  %7224 = vmatmul.msk.f32.gmra.mxu1 %vm800_vm1, %v330_v11  ;;  %v531_v13 = vld [vmem:[%s11883_s0 + $0x1028] sm:$0xff] }
 0x3c8   :  { %v4662_v12 = vpop.f32.mrf.mxu2  ;;  %v5250_v14 = vpop.f32.mrf.mxu3 }
 0x3c9   :  { %v6613_v15 = vpack.c.bf16 %v6417_v18, %v6417_v18  ;;  %v5826_v16 = vmax.f32 %v4662_v12, %v5250_v14  ;;  %v139_v14 = vld [vmem:[%s11883_s0 + $0x3e8] sm:$0xff] }
 0x3cb   :  { %6810 = vst.msk [vmem:[%s11885_s3 + $0x19c] sm:$0xf] %vm6706_vm2, %v6613_v15  ;;  %v6022_v22 = vmax.f32 %v5630_v19, %v5826_v16  ;;  %v335_v15 = vld [vmem:[%s11883_s0 + $0xa08] sm:$0xff]  ;;  %v10306_v16 = vld [vmem:[%s11884_s2] ss:$0 sm:$0xff] }
 0x3cc   :  { %v3489_v23 = vpop.f32.mrf.mxu0  ;;  %v4077_v24 = vpop.f32.mrf.mxu1 }
 0x3cd   :  { %v6222_v27 = vadd.f32 %v9734_v17, %v6022_v22  ;;  %7421 = vmatmul.msk.f32.gmra.mxu2 %vm800_vm1, %v527_v20  ;;  %7617 = vmatmul.msk.f32.gmra.mxu3 %vm800_vm1, %v723_v21  ;;  %v5631_v29 = vmax.f32 %v3489_v23, %v4077_v24 }
 0x3cf   :  { %v6418_v28 = vmax.f32 %v6222_v27, 0.0  ;;  %7029 = vmatmul.msk.f32.gmra.mxu0 %vm800_vm1, %v135_v25  ;;  %7225 = vmatmul.msk.f32.gmra.mxu1 %vm800_vm1, %v331_v26  ;;  %v532_v27 = vld [vmem:[%s11883_s0 + $0x1030] sm:$0xff] }
 0x3d0   :  { %v4665_v30 = vpop.f32.mrf.mxu2  ;;  %v5253_v31 = vpop.f32.mrf.mxu3 }
 0x3d1   :  { %v6614_v32 = vpack.c.bf16 %v6418_v28, %v6418_v28  ;;  %v5827_v33 = vmax.f32 %v4665_v30, %v5253_v31  ;;  %v728_v28 = vld [vmem:[%s11883_s0 + $0x1650] sm:$0xff] }
 0x3d3   :  { %6811 = vst.msk [vmem:[%s11885_s3 + $0x1a0] sm:$0xf] %vm6706_vm2, %v6614_v32  ;;  %v6023_v36 = vmax.f32 %v5631_v29, %v5827_v33  ;;  %v140_v32 = vld [vmem:[%s11883_s0 + $0x3f0] sm:$0xff] }
 0x3d4   :  { %v3492_v37 = vpop.f32.mrf.mxu0  ;;  %v4080_v38 = vpop.f32.mrf.mxu1  ;;  %v336_v33 = vld [vmem:[%s11883_s0 + $0xa10] sm:$0xff] }
 0x3d5   :  { %v6223_v41 = vadd.f32 %v9734_v17, %v6023_v36  ;;  %7422 = vmatmul.msk.f32.gmra.mxu2 %vm800_vm1, %v528_v34  ;;  %7618 = vmatmul.msk.f32.gmra.mxu3 %vm800_vm1, %v724_v35  ;;  %v5632_v43 = vmax.f32 %v3492_v37, %v4080_v38 }
 0x3d7   :  { %v6419_v42 = vmax.f32 %v6223_v41, 0.0  ;;  %7030 = vmatmul.msk.f32.gmra.mxu0 %vm800_vm1, %v136_v39  ;;  %7226 = vmatmul.msk.f32.gmra.mxu1 %vm800_vm1, %v332_v40  ;;  %v533_v41 = vld [vmem:[%s11883_s0 + $0x1038] sm:$0xff] }
 0x3d8   :  { %v4668_v44 = vpop.f32.mrf.mxu2  ;;  %v5256_v45 = vpop.f32.mrf.mxu3 }
 0x3d9   :  { %v6615_v46 = vpack.c.bf16 %v6419_v42, %v6419_v42  ;;  %v5828_v47 = vmax.f32 %v4668_v44, %v5256_v45  ;;  %v729_v42 = vld [vmem:[%s11883_s0 + $0x1658] sm:$0xff] }
 0x3db   :  { %6812 = vst.msk [vmem:[%s11885_s3 + $0x1a4] sm:$0xf] %vm6706_vm2, %v6615_v46  ;;  %v6024_v50 = vmax.f32 %v5632_v43, %v5828_v47  ;;  %v141_v46 = vld [vmem:[%s11883_s0 + $0x3f8] sm:$0xff] }
 0x3dc   :  { %v3495_v51 = vpop.f32.mrf.mxu0  ;;  %v4083_v52 = vpop.f32.mrf.mxu1  ;;  %v337_v47 = vld [vmem:[%s11883_s0 + $0xa18] sm:$0xff] }
 0x3dd   :  { %v6224_v55 = vadd.f32 %v9734_v17, %v6024_v50  ;;  %7423 = vmatmul.msk.f32.gmra.mxu2 %vm800_vm1, %v529_v48  ;;  %7619 = vmatmul.msk.f32.gmra.mxu3 %vm800_vm1, %v725_v49  ;;  %v5633_v57 = vmax.f32 %v3495_v51, %v4083_v52 }
 0x3df   :  { %v6420_v56 = vmax.f32 %v6224_v55, 0.0  ;;  %7031 = vmatmul.msk.f32.gmra.mxu0 %vm800_vm1, %v137_v53  ;;  %7227 = vmatmul.msk.f32.gmra.mxu1 %vm800_vm1, %v333_v54  ;;  %v534_v55 = vld [vmem:[%s11883_s0 + $0x1040] sm:$0xff] }
 0x3e0   :  { %v4671_v58 = vpop.f32.mrf.mxu2  ;;  %v5259_v59 = vpop.f32.mrf.mxu3 }
 0x3e1   :  { %v6616_v60 = vpack.c.bf16 %v6420_v56, %v6420_v56  ;;  %v5829_v61 = vmax.f32 %v4671_v58, %v5259_v59  ;;  %v730_v56 = vld [vmem:[%s11883_s0 + $0x1660] sm:$0xff] }
 0x3e3   :  { %6813 = vst.msk [vmem:[%s11885_s3 + $0x1a8] sm:$0xf] %vm6706_vm2, %v6616_v60  ;;  %v6025_v0 = vmax.f32 %v5633_v57, %v5829_v61  ;;  %v142_v60 = vld [vmem:[%s11883_s0 + $0x400] sm:$0xff] }
 0x3e4   :  { %v3498_v1 = vpop.f32.mrf.mxu0  ;;  %v4086_v2 = vpop.f32.mrf.mxu1  ;;  %v338_v61 = vld [vmem:[%s11883_s0 + $0xa20] sm:$0xff] }
 0x3e5   :  { %v6225_v5 = vadd.f32 %v9734_v17, %v6025_v0  ;;  %7424 = vmatmul.msk.f32.gmra.mxu2 %vm800_vm1, %v530_v62  ;;  %7620 = vmatmul.msk.f32.gmra.mxu3 %vm800_vm1, %v726_v63  ;;  %v5634_v7 = vmax.f32 %v3498_v1, %v4086_v2  ;;  %v727_v17 = vld [vmem:[%s11883_s0 + $0x1648] sm:$0xff] }
 0x3e7   :  { %v6421_v6 = vmax.f32 %v6225_v5, 0.0  ;;  %7032 = vmatmul.msk.f32.gmra.mxu0 %vm800_vm1, %v138_v3  ;;  %7228 = vmatmul.msk.f32.gmra.mxu1 %vm800_vm1, %v334_v4  ;;  %v535_v5 = vld [vmem:[%s11883_s0 + $0x1048] sm:$0xff] }
 0x3e8   :  { %v4674_v8 = vpop.f32.mrf.mxu2  ;;  %v5262_v9 = vpop.f32.mrf.mxu3 }
 0x3e9   :  { %v6617_v10 = vpack.c.bf16 %v6421_v6, %v6421_v6  ;;  %v5830_v11 = vmax.f32 %v4674_v8, %v5262_v9  ;;  %v731_v6 = vld [vmem:[%s11883_s0 + $0x1668] sm:$0xff] }
 0x3eb   :  { %6814 = vst.msk [vmem:[%s11885_s3 + $0x1ac] sm:$0xf] %vm6706_vm2, %v6617_v10  ;;  %v6026_v18 = vmax.f32 %v5634_v7, %v5830_v11  ;;  %v143_v10 = vld [vmem:[%s11883_s0 + $0x408] sm:$0xff] }
 0x3ec   :  { %v3501_v19 = vpop.f32.mrf.mxu0  ;;  %v4089_v12 = vpop.f32.mrf.mxu1  ;;  %v339_v11 = vld [vmem:[%s11883_s0 + $0xa28] sm:$0xff] }
 0x3ed   :  { %v6226_v20 = vadd.f32 %v10306_v16, %v6026_v18  ;;  %7425 = vmatmul.msk.f32.gmra.mxu2 %vm800_vm1, %v531_v13  ;;  %7621 = vmatmul.msk.f32.gmra.mxu3 %vm800_vm1, %v727_v17  ;;  %v5635_v22 = vmax.f32 %v3501_v19, %v4089_v12 }
 0x3ef   :  { %v6422_v21 = vmax.f32 %v6226_v20, 0.0  ;;  %7033 = vmatmul.msk.f32.gmra.mxu0 %vm800_vm1, %v139_v14  ;;  %7229 = vmatmul.msk.f32.gmra.mxu1 %vm800_vm1, %v335_v15  ;;  %v536_v20 = vld [vmem:[%s11883_s0 + $0x1050] sm:$0xff] }
 0x3f0   :  { %v4677_v23 = vpop.f32.mrf.mxu2  ;;  %v5265_v24 = vpop.f32.mrf.mxu3 }
 0x3f1   :  { %v6618_v25 = vpack.c.bf16 %v6422_v21, %v6422_v21  ;;  %v5831_v26 = vmax.f32 %v4677_v23, %v5265_v24  ;;  %v732_v21 = vld [vmem:[%s11883_s0 + $0x1670] sm:$0xff] }
 0x3f3   :  { %6815 = vst.msk [vmem:[%s11885_s3 + $0x1b0] sm:$0xf] %vm6706_vm2, %v6618_v25  ;;  %v6027_v29 = vmax.f32 %v5635_v22, %v5831_v26  ;;  %v144_v25 = vld [vmem:[%s11883_s0 + $0x410] sm:$0xff] }
 0x3f4   :  { %v3504_v30 = vpop.f32.mrf.mxu0  ;;  %v4092_v31 = vpop.f32.mrf.mxu1  ;;  %v340_v26 = vld [vmem:[%s11883_s0 + $0xa30] sm:$0xff] }
 0x3f5   :  { %v6227_v34 = vadd.f32 %v10306_v16, %v6027_v29  ;;  %7426 = vmatmul.msk.f32.gmra.mxu2 %vm800_vm1, %v532_v27  ;;  %7622 = vmatmul.msk.f32.gmra.mxu3 %vm800_vm1, %v728_v28  ;;  %v5636_v36 = vmax.f32 %v3504_v30, %v4092_v31 }
 0x3f7   :  { %v6423_v35 = vmax.f32 %v6227_v34, 0.0  ;;  %7034 = vmatmul.msk.f32.gmra.mxu0 %vm800_vm1, %v140_v32  ;;  %7230 = vmatmul.msk.f32.gmra.mxu1 %vm800_vm1, %v336_v33  ;;  %v537_v34 = vld [vmem:[%s11883_s0 + $0x1058] sm:$0xff] }
 0x3f8   :  { %v4680_v37 = vpop.f32.mrf.mxu2  ;;  %v5268_v38 = vpop.f32.mrf.mxu3 }
 0x3f9   :  { %v6619_v39 = vpack.c.bf16 %v6423_v35, %v6423_v35  ;;  %v5832_v40 = vmax.f32 %v4680_v37, %v5268_v38  ;;  %v733_v35 = vld [vmem:[%s11883_s0 + $0x1678] sm:$0xff] }
 0x3fb   :  { %6816 = vst.msk [vmem:[%s11885_s3 + $0x1b4] sm:$0xf] %vm6706_vm2, %v6619_v39  ;;  %v6028_v43 = vmax.f32 %v5636_v36, %v5832_v40  ;;  %v145_v39 = vld [vmem:[%s11883_s0 + $0x418] sm:$0xff] }
 0x3fc   :  { %v3507_v44 = vpop.f32.mrf.mxu0  ;;  %v4095_v45 = vpop.f32.mrf.mxu1  ;;  %v341_v40 = vld [vmem:[%s11883_s0 + $0xa38] sm:$0xff] }
 0x3fd   :  { %v6228_v48 = vadd.f32 %v10306_v16, %v6028_v43  ;;  %7427 = vmatmul.msk.f32.gmra.mxu2 %vm800_vm1, %v533_v41  ;;  %7623 = vmatmul.msk.f32.gmra.mxu3 %vm800_vm1, %v729_v42  ;;  %v5637_v50 = vmax.f32 %v3507_v44, %v4095_v45 }
 0x3ff   :  { %v6424_v49 = vmax.f32 %v6228_v48, 0.0  ;;  %7035 = vmatmul.msk.f32.gmra.mxu0 %vm800_vm1, %v141_v46  ;;  %7231 = vmatmul.msk.f32.gmra.mxu1 %vm800_vm1, %v337_v47  ;;  %v538_v48 = vld [vmem:[%s11883_s0 + $0x1060] sm:$0xff] }
 0x400   :  { %v4683_v51 = vpop.f32.mrf.mxu2  ;;  %v5271_v52 = vpop.f32.mrf.mxu3 }
 0x401   :  { %v6620_v53 = vpack.c.bf16 %v6424_v49, %v6424_v49  ;;  %v5833_v54 = vmax.f32 %v4683_v51, %v5271_v52  ;;  %v734_v49 = vld [vmem:[%s11883_s0 + $0x1680] sm:$0xff] }
 0x403   :  { %6817 = vst.msk [vmem:[%s11885_s3 + $0x1b8] sm:$0xf] %vm6706_vm2, %v6620_v53  ;;  %v6029_v57 = vmax.f32 %v5637_v50, %v5833_v54  ;;  %v146_v53 = vld [vmem:[%s11883_s0 + $0x420] sm:$0xff] }
 0x404   :  { %v3510_v58 = vpop.f32.mrf.mxu0  ;;  %v4098_v59 = vpop.f32.mrf.mxu1  ;;  %v342_v54 = vld [vmem:[%s11883_s0 + $0xa40] sm:$0xff] }
 0x405   :  { %v6229_v62 = vadd.f32 %v10306_v16, %v6029_v57  ;;  %7428 = vmatmul.msk.f32.gmra.mxu2 %vm800_vm1, %v534_v55  ;;  %7624 = vmatmul.msk.f32.gmra.mxu3 %vm800_vm1, %v730_v56  ;;  %v5638_v0 = vmax.f32 %v3510_v58, %v4098_v59 }
 0x407   :  { %v6425_v63 = vmax.f32 %v6229_v62, 0.0  ;;  %7036 = vmatmul.msk.f32.gmra.mxu0 %vm800_vm1, %v142_v60  ;;  %7232 = vmatmul.msk.f32.gmra.mxu1 %vm800_vm1, %v338_v61  ;;  %v539_v62 = vld [vmem:[%s11883_s0 + $0x1068] sm:$0xff] }
 0x408   :  { %v4686_v1 = vpop.f32.mrf.mxu2  ;;  %v5274_v2 = vpop.f32.mrf.mxu3 }
 0x409   :  { %v6621_v3 = vpack.c.bf16 %v6425_v63, %v6425_v63  ;;  %v5834_v4 = vmax.f32 %v4686_v1, %v5274_v2  ;;  %v735_v63 = vld [vmem:[%s11883_s0 + $0x1688] sm:$0xff] }
 0x40b   :  { %6818 = vst.msk [vmem:[%s11885_s3 + $0x1bc] sm:$0xf] %vm6706_vm2, %v6621_v3  ;;  %v6030_v7 = vmax.f32 %v5638_v0, %v5834_v4  ;;  %v147_v3 = vld [vmem:[%s11883_s0 + $0x428] sm:$0xff] }
 0x40c   :  { %v3513_v8 = vpop.f32.mrf.mxu0  ;;  %v4101_v9 = vpop.f32.mrf.mxu1  ;;  %v343_v4 = vld [vmem:[%s11883_s0 + $0xa48] sm:$0xff] }
 0x40d   :  { %v6230_v13 = vadd.f32 %v10306_v16, %v6030_v7  ;;  %7429 = vmatmul.msk.f32.gmra.mxu2 %vm800_vm1, %v535_v5  ;;  %7625 = vmatmul.msk.f32.gmra.mxu3 %vm800_vm1, %v731_v6  ;;  %v5639_v18 = vmax.f32 %v3513_v8, %v4101_v9 }
 0x40f   :  { %v6426_v17 = vmax.f32 %v6230_v13, 0.0  ;;  %7037 = vmatmul.msk.f32.gmra.mxu0 %vm800_vm1, %v143_v10  ;;  %7233 = vmatmul.msk.f32.gmra.mxu1 %vm800_vm1, %v339_v11  ;;  %v540_v13 = vld [vmem:[%s11883_s0 + $0x1070] sm:$0xff] }
 0x410   :  { %v4689_v19 = vpop.f32.mrf.mxu2  ;;  %v5277_v12 = vpop.f32.mrf.mxu3 }
 0x411   :  { %v6622_v14 = vpack.c.bf16 %v6426_v17, %v6426_v17  ;;  %v5835_v15 = vmax.f32 %v4689_v19, %v5277_v12  ;;  %v736_v17 = vld [vmem:[%s11883_s0 + $0x1690] sm:$0xff] }
 0x413   :  { %6819 = vst.msk [vmem:[%s11885_s3 + $0x1c0] sm:$0xf] %vm6706_vm2, %v6622_v14  ;;  %v6031_v22 = vmax.f32 %v5639_v18, %v5835_v15  ;;  %v148_v14 = vld [vmem:[%s11883_s0 + $0x430] sm:$0xff] }
 0x414   :  { %v3516_v23 = vpop.f32.mrf.mxu0  ;;  %v4104_v24 = vpop.f32.mrf.mxu1  ;;  %v344_v15 = vld [vmem:[%s11883_s0 + $0xa50] sm:$0xff] }
 0x415   :  { %v6231_v27 = vadd.f32 %v10306_v16, %v6031_v22  ;;  %7430 = vmatmul.msk.f32.gmra.mxu2 %vm800_vm1, %v536_v20  ;;  %7626 = vmatmul.msk.f32.gmra.mxu3 %vm800_vm1, %v732_v21  ;;  %v5640_v29 = vmax.f32 %v3516_v23, %v4104_v24 }
 0x417   :  { %v6427_v28 = vmax.f32 %v6231_v27, 0.0  ;;  %7038 = vmatmul.msk.f32.gmra.mxu0 %vm800_vm1, %v144_v25  ;;  %7234 = vmatmul.msk.f32.gmra.mxu1 %vm800_vm1, %v340_v26  ;;  %v541_v27 = vld [vmem:[%s11883_s0 + $0x1078] sm:$0xff] }
 0x418   :  { %v4692_v30 = vpop.f32.mrf.mxu2  ;;  %v5280_v31 = vpop.f32.mrf.mxu3 }
 0x419   :  { %v6623_v32 = vpack.c.bf16 %v6427_v28, %v6427_v28  ;;  %v5836_v33 = vmax.f32 %v4692_v30, %v5280_v31  ;;  %v737_v28 = vld [vmem:[%s11883_s0 + $0x1698] sm:$0xff] }
 0x41b   :  { %6820 = vst.msk [vmem:[%s11885_s3 + $0x1c4] sm:$0xf] %vm6706_vm2, %v6623_v32  ;;  %v6032_v36 = vmax.f32 %v5640_v29, %v5836_v33  ;;  %v149_v32 = vld [vmem:[%s11883_s0 + $0x438] sm:$0xff] }
 0x41c   :  { %v3519_v37 = vpop.f32.mrf.mxu0  ;;  %v4107_v38 = vpop.f32.mrf.mxu1  ;;  %v345_v33 = vld [vmem:[%s11883_s0 + $0xa58] sm:$0xff] }
 0x41d   :  { %v6232_v41 = vadd.f32 %v10306_v16, %v6032_v36  ;;  %7431 = vmatmul.msk.f32.gmra.mxu2 %vm800_vm1, %v537_v34  ;;  %7627 = vmatmul.msk.f32.gmra.mxu3 %vm800_vm1, %v733_v35  ;;  %v5641_v43 = vmax.f32 %v3519_v37, %v4107_v38 }
 0x41f   :  { %v6428_v42 = vmax.f32 %v6232_v41, 0.0  ;;  %7039 = vmatmul.msk.f32.gmra.mxu0 %vm800_vm1, %v145_v39  ;;  %7235 = vmatmul.msk.f32.gmra.mxu1 %vm800_vm1, %v341_v40  ;;  %v542_v41 = vld [vmem:[%s11883_s0 + $0x1080] sm:$0xff] }
 0x420   :  { %v4695_v44 = vpop.f32.mrf.mxu2  ;;  %v5283_v45 = vpop.f32.mrf.mxu3 }
 0x421   :  { %v6624_v46 = vpack.c.bf16 %v6428_v42, %v6428_v42  ;;  %v5837_v47 = vmax.f32 %v4695_v44, %v5283_v45  ;;  %v738_v42 = vld [vmem:[%s11883_s0 + $0x16a0] sm:$0xff] }
 0x423   :  { %6821 = vst.msk [vmem:[%s11885_s3 + $0x1c8] sm:$0xf] %vm6706_vm2, %v6624_v46  ;;  %v6033_v50 = vmax.f32 %v5641_v43, %v5837_v47  ;;  %v150_v46 = vld [vmem:[%s11883_s0 + $0x440] sm:$0xff] }
 0x424   :  { %v3522_v51 = vpop.f32.mrf.mxu0  ;;  %v4110_v52 = vpop.f32.mrf.mxu1  ;;  %v346_v47 = vld [vmem:[%s11883_s0 + $0xa60] sm:$0xff] }
 0x425   :  { %v6233_v55 = vadd.f32 %v10306_v16, %v6033_v50  ;;  %7432 = vmatmul.msk.f32.gmra.mxu2 %vm800_vm1, %v538_v48  ;;  %7628 = vmatmul.msk.f32.gmra.mxu3 %vm800_vm1, %v734_v49  ;;  %v5642_v57 = vmax.f32 %v3522_v51, %v4110_v52 }
 0x427   :  { %v6429_v56 = vmax.f32 %v6233_v55, 0.0  ;;  %7040 = vmatmul.msk.f32.gmra.mxu0 %vm800_vm1, %v146_v53  ;;  %7236 = vmatmul.msk.f32.gmra.mxu1 %vm800_vm1, %v342_v54  ;;  %v543_v55 = vld [vmem:[%s11883_s0 + $0x1088] sm:$0xff] }
 0x428   :  { %v4698_v58 = vpop.f32.mrf.mxu2  ;;  %v5286_v59 = vpop.f32.mrf.mxu3 }
 0x429   :  { %v6625_v60 = vpack.c.bf16 %v6429_v56, %v6429_v56  ;;  %v5838_v61 = vmax.f32 %v4698_v58, %v5286_v59  ;;  %v739_v56 = vld [vmem:[%s11883_s0 + $0x16a8] sm:$0xff] }
 0x42b   :  { %6822 = vst.msk [vmem:[%s11885_s3 + $0x1cc] sm:$0xf] %vm6706_vm2, %v6625_v60  ;;  %v6034_v0 = vmax.f32 %v5642_v57, %v5838_v61  ;;  %v151_v60 = vld [vmem:[%s11883_s0 + $0x448] sm:$0xff] }
 0x42c   :  { %v3525_v1 = vpop.f32.mrf.mxu0  ;;  %v4113_v2 = vpop.f32.mrf.mxu1  ;;  %v347_v61 = vld [vmem:[%s11883_s0 + $0xa68] sm:$0xff] }
 0x42d   :  { %v6234_v5 = vadd.f32 %v10306_v16, %v6034_v0  ;;  %7433 = vmatmul.msk.f32.gmra.mxu2 %vm800_vm1, %v539_v62  ;;  %7629 = vmatmul.msk.f32.gmra.mxu3 %vm800_vm1, %v735_v63  ;;  %v5643_v7 = vmax.f32 %v3525_v1, %v4113_v2 }
 0x42f   :  { %v6430_v6 = vmax.f32 %v6234_v5, 0.0  ;;  %7041 = vmatmul.msk.f32.gmra.mxu0 %vm800_vm1, %v147_v3  ;;  %7237 = vmatmul.msk.f32.gmra.mxu1 %vm800_vm1, %v343_v4  ;;  %v544_v5 = vld [vmem:[%s11883_s0 + $0x1090] sm:$0xff] }
 0x430   :  { %v4701_v8 = vpop.f32.mrf.mxu2  ;;  %v5289_v9 = vpop.f32.mrf.mxu3 }
 0x431   :  { %v6626_v10 = vpack.c.bf16 %v6430_v6, %v6430_v6  ;;  %v5839_v11 = vmax.f32 %v4701_v8, %v5289_v9  ;;  %v740_v6 = vld [vmem:[%s11883_s0 + $0x16b0] sm:$0xff] }
 0x433   :  { %6823 = vst.msk [vmem:[%s11885_s3 + $0x1d0] sm:$0xf] %vm6706_vm2, %v6626_v10  ;;  %v6035_v18 = vmax.f32 %v5643_v7, %v5839_v11  ;;  %v152_v10 = vld [vmem:[%s11883_s0 + $0x450] sm:$0xff] }
 0x434   :  { %v3528_v19 = vpop.f32.mrf.mxu0  ;;  %v4116_v12 = vpop.f32.mrf.mxu1  ;;  %v348_v11 = vld [vmem:[%s11883_s0 + $0xa70] sm:$0xff] }
 0x435   :  { %v6235_v20 = vadd.f32 %v10306_v16, %v6035_v18  ;;  %7434 = vmatmul.msk.f32.gmra.mxu2 %vm800_vm1, %v540_v13  ;;  %7630 = vmatmul.msk.f32.gmra.mxu3 %vm800_vm1, %v736_v17  ;;  %v5644_v22 = vmax.f32 %v3528_v19, %v4116_v12 }
 0x437   :  { %v6431_v21 = vmax.f32 %v6235_v20, 0.0  ;;  %7042 = vmatmul.msk.f32.gmra.mxu0 %vm800_vm1, %v148_v14  ;;  %7238 = vmatmul.msk.f32.gmra.mxu1 %vm800_vm1, %v344_v15  ;;  %v545_v20 = vld [vmem:[%s11883_s0 + $0x1098] sm:$0xff] }
 0x438   :  { %v4704_v23 = vpop.f32.mrf.mxu2  ;;  %v5292_v24 = vpop.f32.mrf.mxu3 }
 0x439   :  { %v6627_v25 = vpack.c.bf16 %v6431_v21, %v6431_v21  ;;  %v5840_v26 = vmax.f32 %v4704_v23, %v5292_v24  ;;  %v741_v21 = vld [vmem:[%s11883_s0 + $0x16b8] sm:$0xff] }
 0x43b   :  { %6824 = vst.msk [vmem:[%s11885_s3 + $0x1d4] sm:$0xf] %vm6706_vm2, %v6627_v25  ;;  %v6036_v29 = vmax.f32 %v5644_v22, %v5840_v26  ;;  %v153_v25 = vld [vmem:[%s11883_s0 + $0x458] sm:$0xff] }
 0x43c   :  { %v3531_v30 = vpop.f32.mrf.mxu0  ;;  %v4119_v31 = vpop.f32.mrf.mxu1  ;;  %v349_v26 = vld [vmem:[%s11883_s0 + $0xa78] sm:$0xff] }
 0x43d   :  { %v6236_v34 = vadd.f32 %v10306_v16, %v6036_v29  ;;  %7435 = vmatmul.msk.f32.gmra.mxu2 %vm800_vm1, %v541_v27  ;;  %7631 = vmatmul.msk.f32.gmra.mxu3 %vm800_vm1, %v737_v28  ;;  %v5645_v36 = vmax.f32 %v3531_v30, %v4119_v31 }
 0x43f   :  { %v6432_v35 = vmax.f32 %v6236_v34, 0.0  ;;  %7043 = vmatmul.msk.f32.gmra.mxu0 %vm800_vm1, %v149_v32  ;;  %7239 = vmatmul.msk.f32.gmra.mxu1 %vm800_vm1, %v345_v33  ;;  %v546_v34 = vld [vmem:[%s11883_s0 + $0x10a0] sm:$0xff] }
 0x440   :  { %v4707_v37 = vpop.f32.mrf.mxu2  ;;  %v5295_v38 = vpop.f32.mrf.mxu3 }
 0x441   :  { %v6628_v39 = vpack.c.bf16 %v6432_v35, %v6432_v35  ;;  %v5841_v40 = vmax.f32 %v4707_v37, %v5295_v38  ;;  %v742_v35 = vld [vmem:[%s11883_s0 + $0x16c0] sm:$0xff] }
 0x443   :  { %6825 = vst.msk [vmem:[%s11885_s3 + $0x1d8] sm:$0xf] %vm6706_vm2, %v6628_v39  ;;  %v6037_v43 = vmax.f32 %v5645_v36, %v5841_v40  ;;  %v154_v39 = vld [vmem:[%s11883_s0 + $0x460] sm:$0xff] }
 0x444   :  { %v3534_v44 = vpop.f32.mrf.mxu0  ;;  %v4122_v45 = vpop.f32.mrf.mxu1  ;;  %v350_v40 = vld [vmem:[%s11883_s0 + $0xa80] sm:$0xff] }
 0x445   :  { %v6237_v48 = vadd.f32 %v10306_v16, %v6037_v43  ;;  %7436 = vmatmul.msk.f32.gmra.mxu2 %vm800_vm1, %v542_v41  ;;  %7632 = vmatmul.msk.f32.gmra.mxu3 %vm800_vm1, %v738_v42  ;;  %v5646_v50 = vmax.f32 %v3534_v44, %v4122_v45 }
 0x447   :  { %v6433_v49 = vmax.f32 %v6237_v48, 0.0  ;;  %7044 = vmatmul.msk.f32.gmra.mxu0 %vm800_vm1, %v150_v46  ;;  %7240 = vmatmul.msk.f32.gmra.mxu1 %vm800_vm1, %v346_v47  ;;  %v547_v48 = vld [vmem:[%s11883_s0 + $0x10a8] sm:$0xff] }
 0x448   :  { %v4710_v51 = vpop.f32.mrf.mxu2  ;;  %v5298_v52 = vpop.f32.mrf.mxu3 }
 0x449   :  { %v6629_v53 = vpack.c.bf16 %v6433_v49, %v6433_v49  ;;  %v5842_v54 = vmax.f32 %v4710_v51, %v5298_v52  ;;  %v743_v49 = vld [vmem:[%s11883_s0 + $0x16c8] sm:$0xff] }
 0x44b   :  { %6826 = vst.msk [vmem:[%s11885_s3 + $0x1dc] sm:$0xf] %vm6706_vm2, %v6629_v53  ;;  %v6038_v57 = vmax.f32 %v5646_v50, %v5842_v54  ;;  %v155_v53 = vld [vmem:[%s11883_s0 + $0x468] sm:$0xff] }
 0x44c   :  { %v3537_v58 = vpop.f32.mrf.mxu0  ;;  %v4125_v59 = vpop.f32.mrf.mxu1  ;;  %v351_v54 = vld [vmem:[%s11883_s0 + $0xa88] sm:$0xff] }
 0x44d   :  { %v6238_v62 = vadd.f32 %v10306_v16, %v6038_v57  ;;  %7437 = vmatmul.msk.f32.gmra.mxu2 %vm800_vm1, %v543_v55  ;;  %7633 = vmatmul.msk.f32.gmra.mxu3 %vm800_vm1, %v739_v56  ;;  %v5647_v0 = vmax.f32 %v3537_v58, %v4125_v59 }
 0x44f   :  { %v6434_v63 = vmax.f32 %v6238_v62, 0.0  ;;  %7045 = vmatmul.msk.f32.gmra.mxu0 %vm800_vm1, %v151_v60  ;;  %7241 = vmatmul.msk.f32.gmra.mxu1 %vm800_vm1, %v347_v61  ;;  %v548_v62 = vld [vmem:[%s11883_s0 + $0x10b0] sm:$0xff] }
 0x450   :  { %v4713_v1 = vpop.f32.mrf.mxu2  ;;  %v5301_v2 = vpop.f32.mrf.mxu3 }
 0x451   :  { %v6630_v3 = vpack.c.bf16 %v6434_v63, %v6434_v63  ;;  %v5843_v4 = vmax.f32 %v4713_v1, %v5301_v2  ;;  %v744_v63 = vld [vmem:[%s11883_s0 + $0x16d0] sm:$0xff] }
 0x453   :  { %6827 = vst.msk [vmem:[%s11885_s3 + $0x1e0] sm:$0xf] %vm6706_vm2, %v6630_v3  ;;  %v6039_v7 = vmax.f32 %v5647_v0, %v5843_v4  ;;  %v156_v3 = vld [vmem:[%s11883_s0 + $0x470] sm:$0xff] }
 0x454   :  { %v3540_v8 = vpop.f32.mrf.mxu0  ;;  %v4128_v9 = vpop.f32.mrf.mxu1  ;;  %v352_v4 = vld [vmem:[%s11883_s0 + $0xa90] sm:$0xff] }
 0x455   :  { %v6239_v13 = vadd.f32 %v10306_v16, %v6039_v7  ;;  %7438 = vmatmul.msk.f32.gmra.mxu2 %vm800_vm1, %v544_v5  ;;  %7634 = vmatmul.msk.f32.gmra.mxu3 %vm800_vm1, %v740_v6  ;;  %v5648_v18 = vmax.f32 %v3540_v8, %v4128_v9 }
 0x457   :  { %v6435_v17 = vmax.f32 %v6239_v13, 0.0  ;;  %7046 = vmatmul.msk.f32.gmra.mxu0 %vm800_vm1, %v152_v10  ;;  %7242 = vmatmul.msk.f32.gmra.mxu1 %vm800_vm1, %v348_v11  ;;  %v549_v13 = vld [vmem:[%s11883_s0 + $0x10b8] sm:$0xff] }
 0x458   :  { %v4716_v19 = vpop.f32.mrf.mxu2  ;;  %v5304_v12 = vpop.f32.mrf.mxu3 }
 0x459   :  { %v6631_v14 = vpack.c.bf16 %v6435_v17, %v6435_v17  ;;  %v5844_v15 = vmax.f32 %v4716_v19, %v5304_v12  ;;  %v745_v17 = vld [vmem:[%s11883_s0 + $0x16d8] sm:$0xff] }
 0x45b   :  { %6828 = vst.msk [vmem:[%s11885_s3 + $0x1e4] sm:$0xf] %vm6706_vm2, %v6631_v14  ;;  %v6040_v22 = vmax.f32 %v5648_v18, %v5844_v15  ;;  %v157_v14 = vld [vmem:[%s11883_s0 + $0x478] sm:$0xff] }
 0x45c   :  { %v3543_v23 = vpop.f32.mrf.mxu0  ;;  %v4131_v24 = vpop.f32.mrf.mxu1  ;;  %v353_v15 = vld [vmem:[%s11883_s0 + $0xa98] sm:$0xff] }
 0x45d   :  { %v6240_v27 = vadd.f32 %v10306_v16, %v6040_v22  ;;  %7439 = vmatmul.msk.f32.gmra.mxu2 %vm800_vm1, %v545_v20  ;;  %7635 = vmatmul.msk.f32.gmra.mxu3 %vm800_vm1, %v741_v21  ;;  %v5649_v29 = vmax.f32 %v3543_v23, %v4131_v24 }
 0x45f   :  { %v6436_v28 = vmax.f32 %v6240_v27, 0.0  ;;  %7047 = vmatmul.msk.f32.gmra.mxu0 %vm800_vm1, %v153_v25  ;;  %7243 = vmatmul.msk.f32.gmra.mxu1 %vm800_vm1, %v349_v26  ;;  %v550_v27 = vld [vmem:[%s11883_s0 + $0x10c0] sm:$0xff] }
 0x460   :  { %v4719_v30 = vpop.f32.mrf.mxu2  ;;  %v5307_v31 = vpop.f32.mrf.mxu3 }
 0x461   :  { %v6632_v32 = vpack.c.bf16 %v6436_v28, %v6436_v28  ;;  %v5845_v33 = vmax.f32 %v4719_v30, %v5307_v31  ;;  %v746_v28 = vld [vmem:[%s11883_s0 + $0x16e0] sm:$0xff] }
 0x463   :  { %6829 = vst.msk [vmem:[%s11885_s3 + $0x1e8] sm:$0xf] %vm6706_vm2, %v6632_v32  ;;  %v6041_v36 = vmax.f32 %v5649_v29, %v5845_v33  ;;  %v158_v32 = vld [vmem:[%s11883_s0 + $0x480] sm:$0xff] }
 0x464   :  { %v3546_v37 = vpop.f32.mrf.mxu0  ;;  %v4134_v38 = vpop.f32.mrf.mxu1  ;;  %v354_v33 = vld [vmem:[%s11883_s0 + $0xaa0] sm:$0xff] }
 0x465   :  { %v6241_v41 = vadd.f32 %v10306_v16, %v6041_v36  ;;  %7440 = vmatmul.msk.f32.gmra.mxu2 %vm800_vm1, %v546_v34  ;;  %7636 = vmatmul.msk.f32.gmra.mxu3 %vm800_vm1, %v742_v35  ;;  %v5650_v43 = vmax.f32 %v3546_v37, %v4134_v38 }
 0x467   :  { %v6437_v42 = vmax.f32 %v6241_v41, 0.0  ;;  %7048 = vmatmul.msk.f32.gmra.mxu0 %vm800_vm1, %v154_v39  ;;  %7244 = vmatmul.msk.f32.gmra.mxu1 %vm800_vm1, %v350_v40  ;;  %v551_v41 = vld [vmem:[%s11883_s0 + $0x10c8] sm:$0xff] }
 0x468   :  { %v4722_v44 = vpop.f32.mrf.mxu2  ;;  %v5310_v45 = vpop.f32.mrf.mxu3 }
 0x469   :  { %v6633_v46 = vpack.c.bf16 %v6437_v42, %v6437_v42  ;;  %v5846_v47 = vmax.f32 %v4722_v44, %v5310_v45  ;;  %v747_v42 = vld [vmem:[%s11883_s0 + $0x16e8] sm:$0xff] }
 0x46b   :  { %6830 = vst.msk [vmem:[%s11885_s3 + $0x1ec] sm:$0xf] %vm6706_vm2, %v6633_v46  ;;  %v6042_v50 = vmax.f32 %v5650_v43, %v5846_v47  ;;  %v159_v46 = vld [vmem:[%s11883_s0 + $0x488] sm:$0xff] }
 0x46c   :  { %v3549_v51 = vpop.f32.mrf.mxu0  ;;  %v4137_v52 = vpop.f32.mrf.mxu1  ;;  %v355_v47 = vld [vmem:[%s11883_s0 + $0xaa8] sm:$0xff] }
 0x46d   :  { %v6242_v55 = vadd.f32 %v10306_v16, %v6042_v50  ;;  %7441 = vmatmul.msk.f32.gmra.mxu2 %vm800_vm1, %v547_v48  ;;  %7637 = vmatmul.msk.f32.gmra.mxu3 %vm800_vm1, %v743_v49  ;;  %v5651_v57 = vmax.f32 %v3549_v51, %v4137_v52 }
 0x46f   :  { %v6438_v56 = vmax.f32 %v6242_v55, 0.0  ;;  %7049 = vmatmul.msk.f32.gmra.mxu0 %vm800_vm1, %v155_v53  ;;  %7245 = vmatmul.msk.f32.gmra.mxu1 %vm800_vm1, %v351_v54  ;;  %v552_v55 = vld [vmem:[%s11883_s0 + $0x10d0] sm:$0xff] }
 0x470   :  { %v4725_v58 = vpop.f32.mrf.mxu2  ;;  %v5313_v59 = vpop.f32.mrf.mxu3 }
 0x471   :  { %v6634_v60 = vpack.c.bf16 %v6438_v56, %v6438_v56  ;;  %v5847_v61 = vmax.f32 %v4725_v58, %v5313_v59  ;;  %v748_v56 = vld [vmem:[%s11883_s0 + $0x16f0] sm:$0xff] }
 0x473   :  { %6831 = vst.msk [vmem:[%s11885_s3 + $0x1f0] sm:$0xf] %vm6706_vm2, %v6634_v60  ;;  %v6043_v0 = vmax.f32 %v5651_v57, %v5847_v61  ;;  %v160_v60 = vld [vmem:[%s11883_s0 + $0x490] sm:$0xff] }
 0x474   :  { %v3552_v1 = vpop.f32.mrf.mxu0  ;;  %v4140_v2 = vpop.f32.mrf.mxu1  ;;  %v356_v61 = vld [vmem:[%s11883_s0 + $0xab0] sm:$0xff] }
 0x475   :  { %v6243_v5 = vadd.f32 %v10306_v16, %v6043_v0  ;;  %7442 = vmatmul.msk.f32.gmra.mxu2 %vm800_vm1, %v548_v62  ;;  %7638 = vmatmul.msk.f32.gmra.mxu3 %vm800_vm1, %v744_v63  ;;  %v5652_v7 = vmax.f32 %v3552_v1, %v4140_v2 }
 0x477   :  { %v6439_v6 = vmax.f32 %v6243_v5, 0.0  ;;  %7050 = vmatmul.msk.f32.gmra.mxu0 %vm800_vm1, %v156_v3  ;;  %7246 = vmatmul.msk.f32.gmra.mxu1 %vm800_vm1, %v352_v4  ;;  %v553_v5 = vld [vmem:[%s11883_s0 + $0x10d8] sm:$0xff] }
 0x478   :  { %v4728_v8 = vpop.f32.mrf.mxu2  ;;  %v5316_v9 = vpop.f32.mrf.mxu3 }
 0x479   :  { %v6635_v10 = vpack.c.bf16 %v6439_v6, %v6439_v6  ;;  %v5848_v11 = vmax.f32 %v4728_v8, %v5316_v9  ;;  %v749_v6 = vld [vmem:[%s11883_s0 + $0x16f8] sm:$0xff] }
 0x47b   :  { %6832 = vst.msk [vmem:[%s11885_s3 + $0x1f4] sm:$0xf] %vm6706_vm2, %v6635_v10  ;;  %v6044_v18 = vmax.f32 %v5652_v7, %v5848_v11  ;;  %v161_v10 = vld [vmem:[%s11883_s0 + $0x498] sm:$0xff] }
 0x47c   :  { %v3555_v19 = vpop.f32.mrf.mxu0  ;;  %v4143_v12 = vpop.f32.mrf.mxu1  ;;  %v357_v11 = vld [vmem:[%s11883_s0 + $0xab8] sm:$0xff] }
 0x47d   :  { %v6244_v20 = vadd.f32 %v10306_v16, %v6044_v18  ;;  %7443 = vmatmul.msk.f32.gmra.mxu2 %vm800_vm1, %v549_v13  ;;  %7639 = vmatmul.msk.f32.gmra.mxu3 %vm800_vm1, %v745_v17  ;;  %v5653_v22 = vmax.f32 %v3555_v19, %v4143_v12 }
 0x47f   :  { %v6440_v21 = vmax.f32 %v6244_v20, 0.0  ;;  %7051 = vmatmul.msk.f32.gmra.mxu0 %vm800_vm1, %v157_v14  ;;  %7247 = vmatmul.msk.f32.gmra.mxu1 %vm800_vm1, %v353_v15  ;;  %v554_v20 = vld [vmem:[%s11883_s0 + $0x10e0] sm:$0xff] }
 0x480   :  { %v4731_v23 = vpop.f32.mrf.mxu2  ;;  %v5319_v24 = vpop.f32.mrf.mxu3 }
 0x481   :  { %v6636_v25 = vpack.c.bf16 %v6440_v21, %v6440_v21  ;;  %v5849_v26 = vmax.f32 %v4731_v23, %v5319_v24  ;;  %v750_v21 = vld [vmem:[%s11883_s0 + $0x1700] sm:$0xff] }
 0x483   :  { %6833 = vst.msk [vmem:[%s11885_s3 + $0x1f8] sm:$0xf] %vm6706_vm2, %v6636_v25  ;;  %v6045_v29 = vmax.f32 %v5653_v22, %v5849_v26  ;;  %v162_v25 = vld [vmem:[%s11883_s0 + $0x4a0] sm:$0xff] }
 0x484   :  { %v3558_v30 = vpop.f32.mrf.mxu0  ;;  %v4146_v31 = vpop.f32.mrf.mxu1  ;;  %v358_v26 = vld [vmem:[%s11883_s0 + $0xac0] sm:$0xff] }
 0x485   :  { %v6245_v34 = vadd.f32 %v10306_v16, %v6045_v29  ;;  %7444 = vmatmul.msk.f32.gmra.mxu2 %vm800_vm1, %v550_v27  ;;  %7640 = vmatmul.msk.f32.gmra.mxu3 %vm800_vm1, %v746_v28  ;;  %v5654_v36 = vmax.f32 %v3558_v30, %v4146_v31 }
 0x487   :  { %v6441_v35 = vmax.f32 %v6245_v34, 0.0  ;;  %7052 = vmatmul.msk.f32.gmra.mxu0 %vm800_vm1, %v158_v32  ;;  %7248 = vmatmul.msk.f32.gmra.mxu1 %vm800_vm1, %v354_v33  ;;  %v555_v34 = vld [vmem:[%s11883_s0 + $0x10e8] sm:$0xff] }
 0x488   :  { %v4734_v37 = vpop.f32.mrf.mxu2  ;;  %v5322_v38 = vpop.f32.mrf.mxu3 }
 0x489   :  { %v6637_v39 = vpack.c.bf16 %v6441_v35, %v6441_v35  ;;  %v5850_v40 = vmax.f32 %v4734_v37, %v5322_v38  ;;  %v751_v35 = vld [vmem:[%s11883_s0 + $0x1708] sm:$0xff] }
 0x48b   :  { %6834 = vst.msk [vmem:[%s11885_s3 + $0x1fc] sm:$0xf] %vm6706_vm2, %v6637_v39  ;;  %v6046_v43 = vmax.f32 %v5654_v36, %v5850_v40  ;;  %v163_v39 = vld [vmem:[%s11883_s0 + $0x4a8] sm:$0xff] }
 0x48c   :  { %v3561_v44 = vpop.f32.mrf.mxu0  ;;  %v4149_v45 = vpop.f32.mrf.mxu1  ;;  %v359_v40 = vld [vmem:[%s11883_s0 + $0xac8] sm:$0xff] }
 0x48d   :  { %v6246_v48 = vadd.f32 %v10306_v16, %v6046_v43  ;;  %7445 = vmatmul.msk.f32.gmra.mxu2 %vm800_vm1, %v551_v41  ;;  %7641 = vmatmul.msk.f32.gmra.mxu3 %vm800_vm1, %v747_v42  ;;  %v5655_v50 = vmax.f32 %v3561_v44, %v4149_v45 }
 0x48f   :  { %v6442_v49 = vmax.f32 %v6246_v48, 0.0  ;;  %7053 = vmatmul.msk.f32.gmra.mxu0 %vm800_vm1, %v159_v46  ;;  %7249 = vmatmul.msk.f32.gmra.mxu1 %vm800_vm1, %v355_v47  ;;  %v556_v48 = vld [vmem:[%s11883_s0 + $0x10f0] sm:$0xff] }
 0x490   :  { %v4737_v51 = vpop.f32.mrf.mxu2  ;;  %v5325_v52 = vpop.f32.mrf.mxu3 }
 0x491   :  { %v6638_v53 = vpack.c.bf16 %v6442_v49, %v6442_v49  ;;  %v5851_v54 = vmax.f32 %v4737_v51, %v5325_v52  ;;  %v752_v49 = vld [vmem:[%s11883_s0 + $0x1710] sm:$0xff] }
 0x493   :  { %6835 = vst.msk [vmem:[%s11885_s3 + $0x200] sm:$0xf] %vm6706_vm2, %v6638_v53  ;;  %v6047_v57 = vmax.f32 %v5655_v50, %v5851_v54  ;;  %v164_v53 = vld [vmem:[%s11883_s0 + $0x4b0] sm:$0xff] }
 0x494   :  { %v3564_v58 = vpop.f32.mrf.mxu0  ;;  %v4152_v59 = vpop.f32.mrf.mxu1  ;;  %v360_v54 = vld [vmem:[%s11883_s0 + $0xad0] sm:$0xff] }
 0x495   :  { %v6247_v62 = vadd.f32 %v10306_v16, %v6047_v57  ;;  %7446 = vmatmul.msk.f32.gmra.mxu2 %vm800_vm1, %v552_v55  ;;  %7642 = vmatmul.msk.f32.gmra.mxu3 %vm800_vm1, %v748_v56  ;;  %v5656_v0 = vmax.f32 %v3564_v58, %v4152_v59 }
 0x497   :  { %v6443_v63 = vmax.f32 %v6247_v62, 0.0  ;;  %7054 = vmatmul.msk.f32.gmra.mxu0 %vm800_vm1, %v160_v60  ;;  %7250 = vmatmul.msk.f32.gmra.mxu1 %vm800_vm1, %v356_v61  ;;  %v557_v62 = vld [vmem:[%s11883_s0 + $0x10f8] sm:$0xff] }
 0x498   :  { %v4740_v1 = vpop.f32.mrf.mxu2  ;;  %v5328_v2 = vpop.f32.mrf.mxu3 }
 0x499   :  { %v6639_v3 = vpack.c.bf16 %v6443_v63, %v6443_v63  ;;  %v5852_v4 = vmax.f32 %v4740_v1, %v5328_v2  ;;  %v753_v63 = vld [vmem:[%s11883_s0 + $0x1718] sm:$0xff] }
 0x49b   :  { %6836 = vst.msk [vmem:[%s11885_s3 + $0x204] sm:$0xf] %vm6706_vm2, %v6639_v3  ;;  %v6048_v7 = vmax.f32 %v5656_v0, %v5852_v4  ;;  %v165_v3 = vld [vmem:[%s11883_s0 + $0x4b8] sm:$0xff] }
 0x49c   :  { %v3567_v8 = vpop.f32.mrf.mxu0  ;;  %v4155_v9 = vpop.f32.mrf.mxu1  ;;  %v361_v4 = vld [vmem:[%s11883_s0 + $0xad8] sm:$0xff] }
 0x49d   :  { %v6248_v13 = vadd.f32 %v10306_v16, %v6048_v7  ;;  %7447 = vmatmul.msk.f32.gmra.mxu2 %vm800_vm1, %v553_v5  ;;  %7643 = vmatmul.msk.f32.gmra.mxu3 %vm800_vm1, %v749_v6  ;;  %v5657_v18 = vmax.f32 %v3567_v8, %v4155_v9 }
 0x49f   :  { %v6444_v17 = vmax.f32 %v6248_v13, 0.0  ;;  %7055 = vmatmul.msk.f32.gmra.mxu0 %vm800_vm1, %v161_v10  ;;  %7251 = vmatmul.msk.f32.gmra.mxu1 %vm800_vm1, %v357_v11  ;;  %v558_v13 = vld [vmem:[%s11883_s0 + $0x1100] sm:$0xff] }
 0x4a0   :  { %v4743_v19 = vpop.f32.mrf.mxu2  ;;  %v5331_v12 = vpop.f32.mrf.mxu3 }
 0x4a1   :  { %v6640_v14 = vpack.c.bf16 %v6444_v17, %v6444_v17  ;;  %v5853_v15 = vmax.f32 %v4743_v19, %v5331_v12  ;;  %v166_v12 = vld [vmem:[%s11883_s0 + $0x4c0] sm:$0xff] }
 0x4a3   :  { %6837 = vst.msk [vmem:[%s11885_s3 + $0x208] sm:$0xf] %vm6706_vm2, %v6640_v14  ;;  %v6049_v22 = vmax.f32 %v5657_v18, %v5853_v15  ;;  %v362_v14 = vld [vmem:[%s11883_s0 + $0xae0] sm:$0xff] }
 0x4a4   :  { %v3570_v23 = vpop.f32.mrf.mxu0  ;;  %v4158_v24 = vpop.f32.mrf.mxu1  ;;  %v10878_v15 = vld [vmem:[%s11884_s2] ss:$0 sm:$0xff] }
 0x4a5   :  { %v6249_v27 = vadd.f32 %v10306_v16, %v6049_v22  ;;  %7448 = vmatmul.msk.f32.gmra.mxu2 %vm800_vm1, %v554_v20  ;;  %7644 = vmatmul.msk.f32.gmra.mxu3 %vm800_vm1, %v750_v21  ;;  %v5658_v29 = vmax.f32 %v3570_v23, %v4158_v24 }
 0x4a7   :  { %v6445_v28 = vmax.f32 %v6249_v27, 0.0  ;;  %7056 = vmatmul.msk.f32.gmra.mxu0 %vm800_vm1, %v162_v25  ;;  %7252 = vmatmul.msk.f32.gmra.mxu1 %vm800_vm1, %v358_v26  ;;  %v559_v27 = vld [vmem:[%s11883_s0 + $0x1108] sm:$0xff] }
 0x4a8   :  { %v4746_v30 = vpop.f32.mrf.mxu2  ;;  %v5334_v31 = vpop.f32.mrf.mxu3 }
 0x4a9   :  { %v6641_v32 = vpack.c.bf16 %v6445_v28, %v6445_v28  ;;  %v5854_v33 = vmax.f32 %v4746_v30, %v5334_v31  ;;  %v755_v28 = vld [vmem:[%s11883_s0 + $0x1728] sm:$0xff] }
 0x4ab   :  { %6838 = vst.msk [vmem:[%s11885_s3 + $0x20c] sm:$0xf] %vm6706_vm2, %v6641_v32  ;;  %v6050_v36 = vmax.f32 %v5658_v29, %v5854_v33  ;;  %v167_v32 = vld [vmem:[%s11883_s0 + $0x4c8] sm:$0xff] }
 0x4ac   :  { %v3573_v37 = vpop.f32.mrf.mxu0  ;;  %v4161_v38 = vpop.f32.mrf.mxu1  ;;  %v363_v33 = vld [vmem:[%s11883_s0 + $0xae8] sm:$0xff] }
 0x4ad   :  { %v6250_v41 = vadd.f32 %v10306_v16, %v6050_v36  ;;  %7449 = vmatmul.msk.f32.gmra.mxu2 %vm800_vm1, %v555_v34  ;;  %7645 = vmatmul.msk.f32.gmra.mxu3 %vm800_vm1, %v751_v35  ;;  %v5659_v43 = vmax.f32 %v3573_v37, %v4161_v38 }
 0x4af   :  { %v6446_v42 = vmax.f32 %v6250_v41, 0.0  ;;  %7057 = vmatmul.msk.f32.gmra.mxu0 %vm800_vm1, %v163_v39  ;;  %7253 = vmatmul.msk.f32.gmra.mxu1 %vm800_vm1, %v359_v40  ;;  %v560_v41 = vld [vmem:[%s11883_s0 + $0x1110] sm:$0xff] }
 0x4b0   :  { %v4749_v44 = vpop.f32.mrf.mxu2  ;;  %v5337_v45 = vpop.f32.mrf.mxu3 }
 0x4b1   :  { %v6642_v46 = vpack.c.bf16 %v6446_v42, %v6446_v42  ;;  %v5855_v47 = vmax.f32 %v4749_v44, %v5337_v45  ;;  %v756_v42 = vld [vmem:[%s11883_s0 + $0x1730] sm:$0xff] }
 0x4b3   :  { %6839 = vst.msk [vmem:[%s11885_s3 + $0x210] sm:$0xf] %vm6706_vm2, %v6642_v46  ;;  %v6051_v50 = vmax.f32 %v5659_v43, %v5855_v47  ;;  %v168_v46 = vld [vmem:[%s11883_s0 + $0x4d0] sm:$0xff] }
 0x4b4   :  { %v3576_v51 = vpop.f32.mrf.mxu0  ;;  %v4164_v52 = vpop.f32.mrf.mxu1  ;;  %v364_v47 = vld [vmem:[%s11883_s0 + $0xaf0] sm:$0xff] }
 0x4b5   :  { %v6251_v55 = vadd.f32 %v10306_v16, %v6051_v50  ;;  %7450 = vmatmul.msk.f32.gmra.mxu2 %vm800_vm1, %v556_v48  ;;  %7646 = vmatmul.msk.f32.gmra.mxu3 %vm800_vm1, %v752_v49  ;;  %v5660_v57 = vmax.f32 %v3576_v51, %v4164_v52 }
 0x4b7   :  { %v6447_v56 = vmax.f32 %v6251_v55, 0.0  ;;  %7058 = vmatmul.msk.f32.gmra.mxu0 %vm800_vm1, %v164_v53  ;;  %7254 = vmatmul.msk.f32.gmra.mxu1 %vm800_vm1, %v360_v54  ;;  %v561_v55 = vld [vmem:[%s11883_s0 + $0x1118] sm:$0xff] }
 0x4b8   :  { %v4752_v58 = vpop.f32.mrf.mxu2  ;;  %v5340_v59 = vpop.f32.mrf.mxu3 }
 0x4b9   :  { %v6643_v60 = vpack.c.bf16 %v6447_v56, %v6447_v56  ;;  %v5856_v61 = vmax.f32 %v4752_v58, %v5340_v59  ;;  %v757_v56 = vld [vmem:[%s11883_s0 + $0x1738] sm:$0xff] }
 0x4bb   :  { %6840 = vst.msk [vmem:[%s11885_s3 + $0x214] sm:$0xf] %vm6706_vm2, %v6643_v60  ;;  %v6052_v0 = vmax.f32 %v5660_v57, %v5856_v61  ;;  %v169_v60 = vld [vmem:[%s11883_s0 + $0x4d8] sm:$0xff] }
 0x4bc   :  { %v3579_v1 = vpop.f32.mrf.mxu0  ;;  %v4167_v2 = vpop.f32.mrf.mxu1  ;;  %v365_v61 = vld [vmem:[%s11883_s0 + $0xaf8] sm:$0xff] }
 0x4bd   :  { %v6252_v5 = vadd.f32 %v10306_v16, %v6052_v0  ;;  %7451 = vmatmul.msk.f32.gmra.mxu2 %vm800_vm1, %v557_v62  ;;  %7647 = vmatmul.msk.f32.gmra.mxu3 %vm800_vm1, %v753_v63  ;;  %v5661_v7 = vmax.f32 %v3579_v1, %v4167_v2  ;;  %v754_v16 = vld [vmem:[%s11883_s0 + $0x1720] sm:$0xff] }
 0x4bf   :  { %v6448_v6 = vmax.f32 %v6252_v5, 0.0  ;;  %7059 = vmatmul.msk.f32.gmra.mxu0 %vm800_vm1, %v165_v3  ;;  %7255 = vmatmul.msk.f32.gmra.mxu1 %vm800_vm1, %v361_v4  ;;  %v562_v5 = vld [vmem:[%s11883_s0 + $0x1120] sm:$0xff] }
 0x4c0   :  { %v4755_v8 = vpop.f32.mrf.mxu2  ;;  %v5343_v9 = vpop.f32.mrf.mxu3 }
 0x4c1   :  { %v6644_v10 = vpack.c.bf16 %v6448_v6, %v6448_v6  ;;  %v5857_v11 = vmax.f32 %v4755_v8, %v5343_v9  ;;  %v758_v6 = vld [vmem:[%s11883_s0 + $0x1740] sm:$0xff] }
 0x4c3   :  { %6841 = vst.msk [vmem:[%s11885_s3 + $0x218] sm:$0xf] %vm6706_vm2, %v6644_v10  ;;  %v6053_v17 = vmax.f32 %v5661_v7, %v5857_v11  ;;  %v170_v10 = vld [vmem:[%s11883_s0 + $0x4e0] sm:$0xff] }
 0x4c4   :  { %v3582_v18 = vpop.f32.mrf.mxu0  ;;  %v4170_v19 = vpop.f32.mrf.mxu1  ;;  %v366_v11 = vld [vmem:[%s11883_s0 + $0xb00] sm:$0xff] }
 0x4c5   :  { %v6253_v20 = vadd.f32 %v10878_v15, %v6053_v17  ;;  %7452 = vmatmul.msk.f32.gmra.mxu2 %vm800_vm1, %v558_v13  ;;  %7648 = vmatmul.msk.f32.gmra.mxu3 %vm800_vm1, %v754_v16  ;;  %v5662_v22 = vmax.f32 %v3582_v18, %v4170_v19 }
 0x4c7   :  { %v6449_v21 = vmax.f32 %v6253_v20, 0.0  ;;  %7060 = vmatmul.msk.f32.gmra.mxu0 %vm800_vm1, %v166_v12  ;;  %7256 = vmatmul.msk.f32.gmra.mxu1 %vm800_vm1, %v362_v14  ;;  %v563_v20 = vld [vmem:[%s11883_s0 + $0x1128] sm:$0xff] }
 0x4c8   :  { %v4758_v23 = vpop.f32.mrf.mxu2  ;;  %v5346_v24 = vpop.f32.mrf.mxu3 }
 0x4c9   :  { %v6645_v25 = vpack.c.bf16 %v6449_v21, %v6449_v21  ;;  %v5858_v26 = vmax.f32 %v4758_v23, %v5346_v24  ;;  %v759_v21 = vld [vmem:[%s11883_s0 + $0x1748] sm:$0xff] }
 0x4cb   :  { %6842 = vst.msk [vmem:[%s11885_s3 + $0x21c] sm:$0xf] %vm6706_vm2, %v6645_v25  ;;  %v6054_v29 = vmax.f32 %v5662_v22, %v5858_v26  ;;  %v171_v25 = vld [vmem:[%s11883_s0 + $0x4e8] sm:$0xff] }
 0x4cc   :  { %v3585_v30 = vpop.f32.mrf.mxu0  ;;  %v4173_v31 = vpop.f32.mrf.mxu1  ;;  %v367_v26 = vld [vmem:[%s11883_s0 + $0xb08] sm:$0xff] }
 0x4cd   :  { %v6254_v34 = vadd.f32 %v10878_v15, %v6054_v29  ;;  %7453 = vmatmul.msk.f32.gmra.mxu2 %vm800_vm1, %v559_v27  ;;  %7649 = vmatmul.msk.f32.gmra.mxu3 %vm800_vm1, %v755_v28  ;;  %v5663_v36 = vmax.f32 %v3585_v30, %v4173_v31 }
 0x4cf   :  { %v6450_v35 = vmax.f32 %v6254_v34, 0.0  ;;  %7061 = vmatmul.msk.f32.gmra.mxu0 %vm800_vm1, %v167_v32  ;;  %7257 = vmatmul.msk.f32.gmra.mxu1 %vm800_vm1, %v363_v33  ;;  %v564_v34 = vld [vmem:[%s11883_s0 + $0x1130] sm:$0xff] }
 0x4d0   :  { %v4761_v37 = vpop.f32.mrf.mxu2  ;;  %v5349_v38 = vpop.f32.mrf.mxu3 }
 0x4d1   :  { %v6646_v39 = vpack.c.bf16 %v6450_v35, %v6450_v35  ;;  %v5859_v40 = vmax.f32 %v4761_v37, %v5349_v38  ;;  %v760_v35 = vld [vmem:[%s11883_s0 + $0x1750] sm:$0xff] }
 0x4d3   :  { %6843 = vst.msk [vmem:[%s11885_s3 + $0x220] sm:$0xf] %vm6706_vm2, %v6646_v39  ;;  %v6055_v43 = vmax.f32 %v5663_v36, %v5859_v40  ;;  %v172_v39 = vld [vmem:[%s11883_s0 + $0x4f0] sm:$0xff] }
 0x4d4   :  { %v3588_v44 = vpop.f32.mrf.mxu0  ;;  %v4176_v45 = vpop.f32.mrf.mxu1  ;;  %v368_v40 = vld [vmem:[%s11883_s0 + $0xb10] sm:$0xff] }
 0x4d5   :  { %v6255_v48 = vadd.f32 %v10878_v15, %v6055_v43  ;;  %7454 = vmatmul.msk.f32.gmra.mxu2 %vm800_vm1, %v560_v41  ;;  %7650 = vmatmul.msk.f32.gmra.mxu3 %vm800_vm1, %v756_v42  ;;  %v5664_v50 = vmax.f32 %v3588_v44, %v4176_v45 }
 0x4d7   :  { %v6451_v49 = vmax.f32 %v6255_v48, 0.0  ;;  %7062 = vmatmul.msk.f32.gmra.mxu0 %vm800_vm1, %v168_v46  ;;  %7258 = vmatmul.msk.f32.gmra.mxu1 %vm800_vm1, %v364_v47  ;;  %v565_v48 = vld [vmem:[%s11883_s0 + $0x1138] sm:$0xff] }
 0x4d8   :  { %v4764_v51 = vpop.f32.mrf.mxu2  ;;  %v5352_v52 = vpop.f32.mrf.mxu3 }
 0x4d9   :  { %v6647_v53 = vpack.c.bf16 %v6451_v49, %v6451_v49  ;;  %v5860_v54 = vmax.f32 %v4764_v51, %v5352_v52  ;;  %v761_v49 = vld [vmem:[%s11883_s0 + $0x1758] sm:$0xff] }
 0x4db   :  { %6844 = vst.msk [vmem:[%s11885_s3 + $0x224] sm:$0xf] %vm6706_vm2, %v6647_v53  ;;  %v6056_v57 = vmax.f32 %v5664_v50, %v5860_v54  ;;  %v173_v53 = vld [vmem:[%s11883_s0 + $0x4f8] sm:$0xff] }
 0x4dc   :  { %v3591_v58 = vpop.f32.mrf.mxu0  ;;  %v4179_v59 = vpop.f32.mrf.mxu1  ;;  %v369_v54 = vld [vmem:[%s11883_s0 + $0xb18] sm:$0xff] }
 0x4dd   :  { %v6256_v62 = vadd.f32 %v10878_v15, %v6056_v57  ;;  %7455 = vmatmul.msk.f32.gmra.mxu2 %vm800_vm1, %v561_v55  ;;  %7651 = vmatmul.msk.f32.gmra.mxu3 %vm800_vm1, %v757_v56  ;;  %v5665_v0 = vmax.f32 %v3591_v58, %v4179_v59 }
 0x4df   :  { %v6452_v63 = vmax.f32 %v6256_v62, 0.0  ;;  %7063 = vmatmul.msk.f32.gmra.mxu0 %vm800_vm1, %v169_v60  ;;  %7259 = vmatmul.msk.f32.gmra.mxu1 %vm800_vm1, %v365_v61  ;;  %v566_v62 = vld [vmem:[%s11883_s0 + $0x1140] sm:$0xff] }
 0x4e0   :  { %v4767_v1 = vpop.f32.mrf.mxu2  ;;  %v5355_v2 = vpop.f32.mrf.mxu3 }
 0x4e1   :  { %v6648_v3 = vpack.c.bf16 %v6452_v63, %v6452_v63  ;;  %v5861_v4 = vmax.f32 %v4767_v1, %v5355_v2  ;;  %v762_v63 = vld [vmem:[%s11883_s0 + $0x1760] sm:$0xff] }
 0x4e3   :  { %6845 = vst.msk [vmem:[%s11885_s3 + $0x228] sm:$0xf] %vm6706_vm2, %v6648_v3  ;;  %v6057_v7 = vmax.f32 %v5665_v0, %v5861_v4  ;;  %v174_v3 = vld [vmem:[%s11883_s0 + $0x500] sm:$0xff] }
 0x4e4   :  { %v3594_v8 = vpop.f32.mrf.mxu0  ;;  %v4182_v9 = vpop.f32.mrf.mxu1  ;;  %v370_v4 = vld [vmem:[%s11883_s0 + $0xb20] sm:$0xff] }
 0x4e5   :  { %v6257_v13 = vadd.f32 %v10878_v15, %v6057_v7  ;;  %7456 = vmatmul.msk.f32.gmra.mxu2 %vm800_vm1, %v562_v5  ;;  %7652 = vmatmul.msk.f32.gmra.mxu3 %vm800_vm1, %v758_v6  ;;  %v5666_v17 = vmax.f32 %v3594_v8, %v4182_v9 }
 0x4e7   :  { %v6453_v16 = vmax.f32 %v6257_v13, 0.0  ;;  %7064 = vmatmul.msk.f32.gmra.mxu0 %vm800_vm1, %v170_v10  ;;  %7260 = vmatmul.msk.f32.gmra.mxu1 %vm800_vm1, %v366_v11  ;;  %v567_v13 = vld [vmem:[%s11883_s0 + $0x1148] sm:$0xff] }
 0x4e8   :  { %v4770_v18 = vpop.f32.mrf.mxu2  ;;  %v5358_v19 = vpop.f32.mrf.mxu3 }
 0x4e9   :  { %v6649_v12 = vpack.c.bf16 %v6453_v16, %v6453_v16  ;;  %v5862_v14 = vmax.f32 %v4770_v18, %v5358_v19  ;;  %v763_v16 = vld [vmem:[%s11883_s0 + $0x1768] sm:$0xff] }
 0x4eb   :  { %6846 = vst.msk [vmem:[%s11885_s3 + $0x22c] sm:$0xf] %vm6706_vm2, %v6649_v12  ;;  %v6058_v22 = vmax.f32 %v5666_v17, %v5862_v14  ;;  %v175_v12 = vld [vmem:[%s11883_s0 + $0x508] sm:$0xff] }
 0x4ec   :  { %v3597_v23 = vpop.f32.mrf.mxu0  ;;  %v4185_v24 = vpop.f32.mrf.mxu1  ;;  %v371_v14 = vld [vmem:[%s11883_s0 + $0xb28] sm:$0xff] }
 0x4ed   :  { %v6258_v27 = vadd.f32 %v10878_v15, %v6058_v22  ;;  %7457 = vmatmul.msk.f32.gmra.mxu2 %vm800_vm1, %v563_v20  ;;  %7653 = vmatmul.msk.f32.gmra.mxu3 %vm800_vm1, %v759_v21  ;;  %v5667_v29 = vmax.f32 %v3597_v23, %v4185_v24 }
 0x4ef   :  { %v6454_v28 = vmax.f32 %v6258_v27, 0.0  ;;  %7065 = vmatmul.msk.f32.gmra.mxu0 %vm800_vm1, %v171_v25  ;;  %7261 = vmatmul.msk.f32.gmra.mxu1 %vm800_vm1, %v367_v26  ;;  %v568_v27 = vld [vmem:[%s11883_s0 + $0x1150] sm:$0xff] }
 0x4f0   :  { %v4773_v30 = vpop.f32.mrf.mxu2  ;;  %v5361_v31 = vpop.f32.mrf.mxu3 }
 0x4f1   :  { %v6650_v32 = vpack.c.bf16 %v6454_v28, %v6454_v28  ;;  %v5863_v33 = vmax.f32 %v4773_v30, %v5361_v31  ;;  %v764_v28 = vld [vmem:[%s11883_s0 + $0x1770] sm:$0xff] }
 0x4f3   :  { %6847 = vst.msk [vmem:[%s11885_s3 + $0x230] sm:$0xf] %vm6706_vm2, %v6650_v32  ;;  %v6059_v36 = vmax.f32 %v5667_v29, %v5863_v33  ;;  %v176_v32 = vld [vmem:[%s11883_s0 + $0x510] sm:$0xff] }
 0x4f4   :  { %v3600_v37 = vpop.f32.mrf.mxu0  ;;  %v4188_v38 = vpop.f32.mrf.mxu1  ;;  %v372_v33 = vld [vmem:[%s11883_s0 + $0xb30] sm:$0xff] }
 0x4f5   :  { %v6259_v41 = vadd.f32 %v10878_v15, %v6059_v36  ;;  %7458 = vmatmul.msk.f32.gmra.mxu2 %vm800_vm1, %v564_v34  ;;  %7654 = vmatmul.msk.f32.gmra.mxu3 %vm800_vm1, %v760_v35  ;;  %v5668_v43 = vmax.f32 %v3600_v37, %v4188_v38 }
 0x4f7   :  { %v6455_v42 = vmax.f32 %v6259_v41, 0.0  ;;  %7066 = vmatmul.msk.f32.gmra.mxu0 %vm800_vm1, %v172_v39  ;;  %7262 = vmatmul.msk.f32.gmra.mxu1 %vm800_vm1, %v368_v40  ;;  %v569_v41 = vld [vmem:[%s11883_s0 + $0x1158] sm:$0xff] }
 0x4f8   :  { %v4776_v44 = vpop.f32.mrf.mxu2  ;;  %v5364_v45 = vpop.f32.mrf.mxu3 }
 0x4f9   :  { %v6651_v46 = vpack.c.bf16 %v6455_v42, %v6455_v42  ;;  %v5864_v47 = vmax.f32 %v4776_v44, %v5364_v45  ;;  %v765_v42 = vld [vmem:[%s11883_s0 + $0x1778] sm:$0xff] }
 0x4fb   :  { %6848 = vst.msk [vmem:[%s11885_s3 + $0x234] sm:$0xf] %vm6706_vm2, %v6651_v46  ;;  %v6060_v50 = vmax.f32 %v5668_v43, %v5864_v47  ;;  %v177_v46 = vld [vmem:[%s11883_s0 + $0x518] sm:$0xff] }
 0x4fc   :  { %v3603_v51 = vpop.f32.mrf.mxu0  ;;  %v4191_v52 = vpop.f32.mrf.mxu1  ;;  %v373_v47 = vld [vmem:[%s11883_s0 + $0xb38] sm:$0xff] }
 0x4fd   :  { %v6260_v55 = vadd.f32 %v10878_v15, %v6060_v50  ;;  %7459 = vmatmul.msk.f32.gmra.mxu2 %vm800_vm1, %v565_v48  ;;  %7655 = vmatmul.msk.f32.gmra.mxu3 %vm800_vm1, %v761_v49  ;;  %v5669_v57 = vmax.f32 %v3603_v51, %v4191_v52 }
 0x4ff   :  { %v6456_v56 = vmax.f32 %v6260_v55, 0.0  ;;  %7067 = vmatmul.msk.f32.gmra.mxu0 %vm800_vm1, %v173_v53  ;;  %7263 = vmatmul.msk.f32.gmra.mxu1 %vm800_vm1, %v369_v54  ;;  %v570_v55 = vld [vmem:[%s11883_s0 + $0x1160] sm:$0xff] }
 0x500   :  { %v4779_v58 = vpop.f32.mrf.mxu2  ;;  %v5367_v59 = vpop.f32.mrf.mxu3 }
 0x501   :  { %v6652_v60 = vpack.c.bf16 %v6456_v56, %v6456_v56  ;;  %v5865_v61 = vmax.f32 %v4779_v58, %v5367_v59  ;;  %v766_v56 = vld [vmem:[%s11883_s0 + $0x1780] sm:$0xff] }
 0x503   :  { %6849 = vst.msk [vmem:[%s11885_s3 + $0x238] sm:$0xf] %vm6706_vm2, %v6652_v60  ;;  %v6061_v0 = vmax.f32 %v5669_v57, %v5865_v61  ;;  %v178_v60 = vld [vmem:[%s11883_s0 + $0x520] sm:$0xff] }
 0x504   :  { %v3606_v1 = vpop.f32.mrf.mxu0  ;;  %v4194_v2 = vpop.f32.mrf.mxu1  ;;  %v374_v61 = vld [vmem:[%s11883_s0 + $0xb40] sm:$0xff] }
 0x505   :  { %v6261_v5 = vadd.f32 %v10878_v15, %v6061_v0  ;;  %7460 = vmatmul.msk.f32.gmra.mxu2 %vm800_vm1, %v566_v62  ;;  %7656 = vmatmul.msk.f32.gmra.mxu3 %vm800_vm1, %v762_v63  ;;  %v5670_v7 = vmax.f32 %v3606_v1, %v4194_v2 }
 0x507   :  { %v6457_v6 = vmax.f32 %v6261_v5, 0.0  ;;  %7068 = vmatmul.msk.f32.gmra.mxu0 %vm800_vm1, %v174_v3  ;;  %7264 = vmatmul.msk.f32.gmra.mxu1 %vm800_vm1, %v370_v4  ;;  %v571_v5 = vld [vmem:[%s11883_s0 + $0x1168] sm:$0xff] }
 0x508   :  { %v4782_v8 = vpop.f32.mrf.mxu2  ;;  %v5370_v9 = vpop.f32.mrf.mxu3 }
 0x509   :  { %v6653_v10 = vpack.c.bf16 %v6457_v6, %v6457_v6  ;;  %v5866_v11 = vmax.f32 %v4782_v8, %v5370_v9  ;;  %v767_v6 = vld [vmem:[%s11883_s0 + $0x1788] sm:$0xff] }
 0x50b   :  { %6850 = vst.msk [vmem:[%s11885_s3 + $0x23c] sm:$0xf] %vm6706_vm2, %v6653_v10  ;;  %v6062_v17 = vmax.f32 %v5670_v7, %v5866_v11  ;;  %v179_v10 = vld [vmem:[%s11883_s0 + $0x528] sm:$0xff] }
 0x50c   :  { %v3609_v18 = vpop.f32.mrf.mxu0  ;;  %v4197_v19 = vpop.f32.mrf.mxu1  ;;  %v375_v11 = vld [vmem:[%s11883_s0 + $0xb48] sm:$0xff] }
 0x50d   :  { %v6262_v20 = vadd.f32 %v10878_v15, %v6062_v17  ;;  %7461 = vmatmul.msk.f32.gmra.mxu2 %vm800_vm1, %v567_v13  ;;  %7657 = vmatmul.msk.f32.gmra.mxu3 %vm800_vm1, %v763_v16  ;;  %v5671_v22 = vmax.f32 %v3609_v18, %v4197_v19 }
 0x50f   :  { %v6458_v21 = vmax.f32 %v6262_v20, 0.0  ;;  %7069 = vmatmul.msk.f32.gmra.mxu0 %vm800_vm1, %v175_v12  ;;  %7265 = vmatmul.msk.f32.gmra.mxu1 %vm800_vm1, %v371_v14  ;;  %v572_v20 = vld [vmem:[%s11883_s0 + $0x1170] sm:$0xff] }
 0x510   :  { %v4785_v23 = vpop.f32.mrf.mxu2  ;;  %v5373_v24 = vpop.f32.mrf.mxu3 }
 0x511   :  { %v6654_v25 = vpack.c.bf16 %v6458_v21, %v6458_v21  ;;  %v5867_v26 = vmax.f32 %v4785_v23, %v5373_v24  ;;  %v768_v21 = vld [vmem:[%s11883_s0 + $0x1790] sm:$0xff] }
 0x513   :  { %6851 = vst.msk [vmem:[%s11885_s3 + $0x240] sm:$0xf] %vm6706_vm2, %v6654_v25  ;;  %v6063_v29 = vmax.f32 %v5671_v22, %v5867_v26  ;;  %v180_v25 = vld [vmem:[%s11883_s0 + $0x530] sm:$0xff] }
 0x514   :  { %v3612_v30 = vpop.f32.mrf.mxu0  ;;  %v4200_v31 = vpop.f32.mrf.mxu1  ;;  %v376_v26 = vld [vmem:[%s11883_s0 + $0xb50] sm:$0xff] }
 0x515   :  { %v6263_v34 = vadd.f32 %v10878_v15, %v6063_v29  ;;  %7462 = vmatmul.msk.f32.gmra.mxu2 %vm800_vm1, %v568_v27  ;;  %7658 = vmatmul.msk.f32.gmra.mxu3 %vm800_vm1, %v764_v28  ;;  %v5672_v36 = vmax.f32 %v3612_v30, %v4200_v31 }
 0x517   :  { %v6459_v35 = vmax.f32 %v6263_v34, 0.0  ;;  %7070 = vmatmul.msk.f32.gmra.mxu0 %vm800_vm1, %v176_v32  ;;  %7266 = vmatmul.msk.f32.gmra.mxu1 %vm800_vm1, %v372_v33  ;;  %v573_v34 = vld [vmem:[%s11883_s0 + $0x1178] sm:$0xff] }
 0x518   :  { %v4788_v37 = vpop.f32.mrf.mxu2  ;;  %v5376_v38 = vpop.f32.mrf.mxu3 }
 0x519   :  { %v6655_v39 = vpack.c.bf16 %v6459_v35, %v6459_v35  ;;  %v5868_v40 = vmax.f32 %v4788_v37, %v5376_v38  ;;  %v769_v35 = vld [vmem:[%s11883_s0 + $0x1798] sm:$0xff] }
 0x51b   :  { %6852 = vst.msk [vmem:[%s11885_s3 + $0x244] sm:$0xf] %vm6706_vm2, %v6655_v39  ;;  %v6064_v43 = vmax.f32 %v5672_v36, %v5868_v40  ;;  %v181_v39 = vld [vmem:[%s11883_s0 + $0x538] sm:$0xff] }
 0x51c   :  { %v3615_v44 = vpop.f32.mrf.mxu0  ;;  %v4203_v45 = vpop.f32.mrf.mxu1  ;;  %v377_v40 = vld [vmem:[%s11883_s0 + $0xb58] sm:$0xff] }
 0x51d   :  { %v6264_v48 = vadd.f32 %v10878_v15, %v6064_v43  ;;  %7463 = vmatmul.msk.f32.gmra.mxu2 %vm800_vm1, %v569_v41  ;;  %7659 = vmatmul.msk.f32.gmra.mxu3 %vm800_vm1, %v765_v42  ;;  %v5673_v50 = vmax.f32 %v3615_v44, %v4203_v45 }
 0x51f   :  { %v6460_v49 = vmax.f32 %v6264_v48, 0.0  ;;  %7071 = vmatmul.msk.f32.gmra.mxu0 %vm800_vm1, %v177_v46  ;;  %7267 = vmatmul.msk.f32.gmra.mxu1 %vm800_vm1, %v373_v47  ;;  %v574_v48 = vld [vmem:[%s11883_s0 + $0x1180] sm:$0xff] }
 0x520   :  { %v4791_v51 = vpop.f32.mrf.mxu2  ;;  %v5379_v52 = vpop.f32.mrf.mxu3 }
 0x521   :  { %v6656_v53 = vpack.c.bf16 %v6460_v49, %v6460_v49  ;;  %v5869_v54 = vmax.f32 %v4791_v51, %v5379_v52  ;;  %v770_v49 = vld [vmem:[%s11883_s0 + $0x17a0] sm:$0xff] }
 0x523   :  { %6853 = vst.msk [vmem:[%s11885_s3 + $0x248] sm:$0xf] %vm6706_vm2, %v6656_v53  ;;  %v6065_v57 = vmax.f32 %v5673_v50, %v5869_v54  ;;  %v182_v53 = vld [vmem:[%s11883_s0 + $0x540] sm:$0xff] }
 0x524   :  { %v3618_v58 = vpop.f32.mrf.mxu0  ;;  %v4206_v59 = vpop.f32.mrf.mxu1  ;;  %v378_v54 = vld [vmem:[%s11883_s0 + $0xb60] sm:$0xff] }
 0x525   :  { %v6265_v62 = vadd.f32 %v10878_v15, %v6065_v57  ;;  %7464 = vmatmul.msk.f32.gmra.mxu2 %vm800_vm1, %v570_v55  ;;  %7660 = vmatmul.msk.f32.gmra.mxu3 %vm800_vm1, %v766_v56  ;;  %v5674_v0 = vmax.f32 %v3618_v58, %v4206_v59 }
 0x527   :  { %v6461_v63 = vmax.f32 %v6265_v62, 0.0  ;;  %7072 = vmatmul.msk.f32.gmra.mxu0 %vm800_vm1, %v178_v60  ;;  %7268 = vmatmul.msk.f32.gmra.mxu1 %vm800_vm1, %v374_v61  ;;  %v575_v62 = vld [vmem:[%s11883_s0 + $0x1188] sm:$0xff] }
 0x528   :  { %v4794_v1 = vpop.f32.mrf.mxu2  ;;  %v5382_v2 = vpop.f32.mrf.mxu3 }
 0x529   :  { %v6657_v3 = vpack.c.bf16 %v6461_v63, %v6461_v63  ;;  %v5870_v4 = vmax.f32 %v4794_v1, %v5382_v2  ;;  %v771_v63 = vld [vmem:[%s11883_s0 + $0x17a8] sm:$0xff] }
 0x52b   :  { %6854 = vst.msk [vmem:[%s11885_s3 + $0x24c] sm:$0xf] %vm6706_vm2, %v6657_v3  ;;  %v6066_v7 = vmax.f32 %v5674_v0, %v5870_v4  ;;  %v183_v3 = vld [vmem:[%s11883_s0 + $0x548] sm:$0xff] }
 0x52c   :  { %v3621_v8 = vpop.f32.mrf.mxu0  ;;  %v4209_v9 = vpop.f32.mrf.mxu1  ;;  %v379_v4 = vld [vmem:[%s11883_s0 + $0xb68] sm:$0xff] }
 0x52d   :  { %v6266_v13 = vadd.f32 %v10878_v15, %v6066_v7  ;;  %7465 = vmatmul.msk.f32.gmra.mxu2 %vm800_vm1, %v571_v5  ;;  %7661 = vmatmul.msk.f32.gmra.mxu3 %vm800_vm1, %v767_v6  ;;  %v5675_v17 = vmax.f32 %v3621_v8, %v4209_v9 }
 0x52f   :  { %v6462_v16 = vmax.f32 %v6266_v13, 0.0  ;;  %7073 = vmatmul.msk.f32.gmra.mxu0 %vm800_vm1, %v179_v10  ;;  %7269 = vmatmul.msk.f32.gmra.mxu1 %vm800_vm1, %v375_v11  ;;  %v576_v13 = vld [vmem:[%s11883_s0 + $0x1190] sm:$0xff] }
 0x530   :  { %v4797_v18 = vpop.f32.mrf.mxu2  ;;  %v5385_v19 = vpop.f32.mrf.mxu3 }
 0x531   :  { %v6658_v12 = vpack.c.bf16 %v6462_v16, %v6462_v16  ;;  %v5871_v14 = vmax.f32 %v4797_v18, %v5385_v19  ;;  %v772_v16 = vld [vmem:[%s11883_s0 + $0x17b0] sm:$0xff] }
 0x533   :  { %6855 = vst.msk [vmem:[%s11885_s3 + $0x250] sm:$0xf] %vm6706_vm2, %v6658_v12  ;;  %v6067_v22 = vmax.f32 %v5675_v17, %v5871_v14  ;;  %v184_v12 = vld [vmem:[%s11883_s0 + $0x550] sm:$0xff] }
 0x534   :  { %v3624_v23 = vpop.f32.mrf.mxu0  ;;  %v4212_v24 = vpop.f32.mrf.mxu1  ;;  %v380_v14 = vld [vmem:[%s11883_s0 + $0xb70] sm:$0xff] }
 0x535   :  { %v6267_v27 = vadd.f32 %v10878_v15, %v6067_v22  ;;  %7466 = vmatmul.msk.f32.gmra.mxu2 %vm800_vm1, %v572_v20  ;;  %7662 = vmatmul.msk.f32.gmra.mxu3 %vm800_vm1, %v768_v21  ;;  %v5676_v29 = vmax.f32 %v3624_v23, %v4212_v24 }
 0x537   :  { %v6463_v28 = vmax.f32 %v6267_v27, 0.0  ;;  %7074 = vmatmul.msk.f32.gmra.mxu0 %vm800_vm1, %v180_v25  ;;  %7270 = vmatmul.msk.f32.gmra.mxu1 %vm800_vm1, %v376_v26  ;;  %v577_v27 = vld [vmem:[%s11883_s0 + $0x1198] sm:$0xff] }
 0x538   :  { %v4800_v30 = vpop.f32.mrf.mxu2  ;;  %v5388_v31 = vpop.f32.mrf.mxu3 }
 0x539   :  { %v6659_v32 = vpack.c.bf16 %v6463_v28, %v6463_v28  ;;  %v5872_v33 = vmax.f32 %v4800_v30, %v5388_v31  ;;  %v773_v28 = vld [vmem:[%s11883_s0 + $0x17b8] sm:$0xff] }
 0x53b   :  { %6856 = vst.msk [vmem:[%s11885_s3 + $0x254] sm:$0xf] %vm6706_vm2, %v6659_v32  ;;  %v6068_v36 = vmax.f32 %v5676_v29, %v5872_v33  ;;  %v185_v32 = vld [vmem:[%s11883_s0 + $0x558] sm:$0xff] }
 0x53c   :  { %v3627_v37 = vpop.f32.mrf.mxu0  ;;  %v4215_v38 = vpop.f32.mrf.mxu1  ;;  %v381_v33 = vld [vmem:[%s11883_s0 + $0xb78] sm:$0xff] }
 0x53d   :  { %v6268_v41 = vadd.f32 %v10878_v15, %v6068_v36  ;;  %7467 = vmatmul.msk.f32.gmra.mxu2 %vm800_vm1, %v573_v34  ;;  %7663 = vmatmul.msk.f32.gmra.mxu3 %vm800_vm1, %v769_v35  ;;  %v5677_v43 = vmax.f32 %v3627_v37, %v4215_v38 }
 0x53f   :  { %v6464_v42 = vmax.f32 %v6268_v41, 0.0  ;;  %7075 = vmatmul.msk.f32.gmra.mxu0 %vm800_vm1, %v181_v39  ;;  %7271 = vmatmul.msk.f32.gmra.mxu1 %vm800_vm1, %v377_v40  ;;  %v578_v41 = vld [vmem:[%s11883_s0 + $0x11a0] sm:$0xff] }
 0x540   :  { %v4803_v44 = vpop.f32.mrf.mxu2  ;;  %v5391_v45 = vpop.f32.mrf.mxu3 }
 0x541   :  { %v6660_v46 = vpack.c.bf16 %v6464_v42, %v6464_v42  ;;  %v5873_v47 = vmax.f32 %v4803_v44, %v5391_v45  ;;  %v774_v42 = vld [vmem:[%s11883_s0 + $0x17c0] sm:$0xff] }
 0x543   :  { %6857 = vst.msk [vmem:[%s11885_s3 + $0x258] sm:$0xf] %vm6706_vm2, %v6660_v46  ;;  %v6069_v50 = vmax.f32 %v5677_v43, %v5873_v47  ;;  %v186_v46 = vld [vmem:[%s11883_s0 + $0x560] sm:$0xff] }
 0x544   :  { %v3630_v51 = vpop.f32.mrf.mxu0  ;;  %v4218_v52 = vpop.f32.mrf.mxu1  ;;  %v382_v47 = vld [vmem:[%s11883_s0 + $0xb80] sm:$0xff] }
 0x545   :  { %v6269_v55 = vadd.f32 %v10878_v15, %v6069_v50  ;;  %7468 = vmatmul.msk.f32.gmra.mxu2 %vm800_vm1, %v574_v48  ;;  %7664 = vmatmul.msk.f32.gmra.mxu3 %vm800_vm1, %v770_v49  ;;  %v5678_v57 = vmax.f32 %v3630_v51, %v4218_v52 }
 0x547   :  { %v6465_v56 = vmax.f32 %v6269_v55, 0.0  ;;  %7076 = vmatmul.msk.f32.gmra.mxu0 %vm800_vm1, %v182_v53  ;;  %7272 = vmatmul.msk.f32.gmra.mxu1 %vm800_vm1, %v378_v54  ;;  %v579_v55 = vld [vmem:[%s11883_s0 + $0x11a8] sm:$0xff] }
 0x548   :  { %v4806_v58 = vpop.f32.mrf.mxu2  ;;  %v5394_v59 = vpop.f32.mrf.mxu3 }
 0x549   :  { %v6661_v60 = vpack.c.bf16 %v6465_v56, %v6465_v56  ;;  %v5874_v61 = vmax.f32 %v4806_v58, %v5394_v59  ;;  %v775_v56 = vld [vmem:[%s11883_s0 + $0x17c8] sm:$0xff] }
 0x54b   :  { %6858 = vst.msk [vmem:[%s11885_s3 + $0x25c] sm:$0xf] %vm6706_vm2, %v6661_v60  ;;  %v6070_v0 = vmax.f32 %v5678_v57, %v5874_v61  ;;  %v187_v60 = vld [vmem:[%s11883_s0 + $0x568] sm:$0xff] }
 0x54c   :  { %v3633_v1 = vpop.f32.mrf.mxu0  ;;  %v4221_v2 = vpop.f32.mrf.mxu1  ;;  %v383_v61 = vld [vmem:[%s11883_s0 + $0xb88] sm:$0xff] }
 0x54d   :  { %v6270_v5 = vadd.f32 %v10878_v15, %v6070_v0  ;;  %7469 = vmatmul.msk.f32.gmra.mxu2 %vm800_vm1, %v575_v62  ;;  %7665 = vmatmul.msk.f32.gmra.mxu3 %vm800_vm1, %v771_v63  ;;  %v5679_v7 = vmax.f32 %v3633_v1, %v4221_v2 }
 0x54f   :  { %v6466_v6 = vmax.f32 %v6270_v5, 0.0  ;;  %7077 = vmatmul.msk.f32.gmra.mxu0 %vm800_vm1, %v183_v3  ;;  %7273 = vmatmul.msk.f32.gmra.mxu1 %vm800_vm1, %v379_v4  ;;  %v580_v5 = vld [vmem:[%s11883_s0 + $0x11b0] sm:$0xff] }
 0x550   :  { %v4809_v8 = vpop.f32.mrf.mxu2  ;;  %v5397_v9 = vpop.f32.mrf.mxu3 }
 0x551   :  { %v6662_v10 = vpack.c.bf16 %v6466_v6, %v6466_v6  ;;  %v5875_v11 = vmax.f32 %v4809_v8, %v5397_v9  ;;  %v776_v6 = vld [vmem:[%s11883_s0 + $0x17d0] sm:$0xff] }
 0x553   :  { %6859 = vst.msk [vmem:[%s11885_s3 + $0x260] sm:$0xf] %vm6706_vm2, %v6662_v10  ;;  %v6071_v17 = vmax.f32 %v5679_v7, %v5875_v11  ;;  %v188_v10 = vld [vmem:[%s11883_s0 + $0x570] sm:$0xff] }
 0x554   :  { %v3636_v18 = vpop.f32.mrf.mxu0  ;;  %v4224_v19 = vpop.f32.mrf.mxu1  ;;  %v384_v11 = vld [vmem:[%s11883_s0 + $0xb90] sm:$0xff] }
 0x555   :  { %v6271_v20 = vadd.f32 %v10878_v15, %v6071_v17  ;;  %7470 = vmatmul.msk.f32.gmra.mxu2 %vm800_vm1, %v576_v13  ;;  %7666 = vmatmul.msk.f32.gmra.mxu3 %vm800_vm1, %v772_v16  ;;  %v5680_v22 = vmax.f32 %v3636_v18, %v4224_v19 }
 0x557   :  { %v6467_v21 = vmax.f32 %v6271_v20, 0.0  ;;  %7078 = vmatmul.msk.f32.gmra.mxu0 %vm800_vm1, %v184_v12  ;;  %7274 = vmatmul.msk.f32.gmra.mxu1 %vm800_vm1, %v380_v14  ;;  %v581_v20 = vld [vmem:[%s11883_s0 + $0x11b8] sm:$0xff] }
 0x558   :  { %v4812_v23 = vpop.f32.mrf.mxu2  ;;  %v5400_v24 = vpop.f32.mrf.mxu3 }
 0x559   :  { %v6663_v25 = vpack.c.bf16 %v6467_v21, %v6467_v21  ;;  %v5876_v26 = vmax.f32 %v4812_v23, %v5400_v24  ;;  %v777_v21 = vld [vmem:[%s11883_s0 + $0x17d8] sm:$0xff] }
 0x55b   :  { %6860 = vst.msk [vmem:[%s11885_s3 + $0x264] sm:$0xf] %vm6706_vm2, %v6663_v25  ;;  %v6072_v29 = vmax.f32 %v5680_v22, %v5876_v26  ;;  %v189_v25 = vld [vmem:[%s11883_s0 + $0x578] sm:$0xff] }
 0x55c   :  { %v3639_v30 = vpop.f32.mrf.mxu0  ;;  %v4227_v31 = vpop.f32.mrf.mxu1  ;;  %v385_v26 = vld [vmem:[%s11883_s0 + $0xb98] sm:$0xff] }
 0x55d   :  { %v6272_v34 = vadd.f32 %v10878_v15, %v6072_v29  ;;  %7471 = vmatmul.msk.f32.gmra.mxu2 %vm800_vm1, %v577_v27  ;;  %7667 = vmatmul.msk.f32.gmra.mxu3 %vm800_vm1, %v773_v28  ;;  %v5681_v36 = vmax.f32 %v3639_v30, %v4227_v31 }
 0x55f   :  { %v6468_v35 = vmax.f32 %v6272_v34, 0.0  ;;  %7079 = vmatmul.msk.f32.gmra.mxu0 %vm800_vm1, %v185_v32  ;;  %7275 = vmatmul.msk.f32.gmra.mxu1 %vm800_vm1, %v381_v33  ;;  %v582_v34 = vld [vmem:[%s11883_s0 + $0x11c0] sm:$0xff] }
 0x560   :  { %v4815_v37 = vpop.f32.mrf.mxu2  ;;  %v5403_v38 = vpop.f32.mrf.mxu3 }
 0x561   :  { %v6664_v39 = vpack.c.bf16 %v6468_v35, %v6468_v35  ;;  %v5877_v40 = vmax.f32 %v4815_v37, %v5403_v38  ;;  %v778_v35 = vld [vmem:[%s11883_s0 + $0x17e0] sm:$0xff] }
 0x563   :  { %6861 = vst.msk [vmem:[%s11885_s3 + $0x268] sm:$0xf] %vm6706_vm2, %v6664_v39  ;;  %v6073_v43 = vmax.f32 %v5681_v36, %v5877_v40  ;;  %v190_v39 = vld [vmem:[%s11883_s0 + $0x580] sm:$0xff] }
 0x564   :  { %v3642_v44 = vpop.f32.mrf.mxu0  ;;  %v4230_v45 = vpop.f32.mrf.mxu1  ;;  %v386_v40 = vld [vmem:[%s11883_s0 + $0xba0] sm:$0xff] }
 0x565   :  { %v6273_v48 = vadd.f32 %v10878_v15, %v6073_v43  ;;  %7472 = vmatmul.msk.f32.gmra.mxu2 %vm800_vm1, %v578_v41  ;;  %7668 = vmatmul.msk.f32.gmra.mxu3 %vm800_vm1, %v774_v42  ;;  %v5682_v50 = vmax.f32 %v3642_v44, %v4230_v45 }
 0x567   :  { %v6469_v49 = vmax.f32 %v6273_v48, 0.0  ;;  %7080 = vmatmul.msk.f32.gmra.mxu0 %vm800_vm1, %v186_v46  ;;  %7276 = vmatmul.msk.f32.gmra.mxu1 %vm800_vm1, %v382_v47  ;;  %v583_v48 = vld [vmem:[%s11883_s0 + $0x11c8] sm:$0xff] }
 0x568   :  { %v4818_v51 = vpop.f32.mrf.mxu2  ;;  %v5406_v52 = vpop.f32.mrf.mxu3 }
 0x569   :  { %v6665_v53 = vpack.c.bf16 %v6469_v49, %v6469_v49  ;;  %v5878_v54 = vmax.f32 %v4818_v51, %v5406_v52  ;;  %v779_v49 = vld [vmem:[%s11883_s0 + $0x17e8] sm:$0xff] }
 0x56b   :  { %6862 = vst.msk [vmem:[%s11885_s3 + $0x26c] sm:$0xf] %vm6706_vm2, %v6665_v53  ;;  %v6074_v57 = vmax.f32 %v5682_v50, %v5878_v54  ;;  %v191_v53 = vld [vmem:[%s11883_s0 + $0x588] sm:$0xff] }
 0x56c   :  { %v3645_v58 = vpop.f32.mrf.mxu0  ;;  %v4233_v59 = vpop.f32.mrf.mxu1  ;;  %v387_v54 = vld [vmem:[%s11883_s0 + $0xba8] sm:$0xff] }
 0x56d   :  { %v6274_v62 = vadd.f32 %v10878_v15, %v6074_v57  ;;  %7473 = vmatmul.msk.f32.gmra.mxu2 %vm800_vm1, %v579_v55  ;;  %7669 = vmatmul.msk.f32.gmra.mxu3 %vm800_vm1, %v775_v56  ;;  %v5683_v0 = vmax.f32 %v3645_v58, %v4233_v59 }
 0x56f   :  { %v6470_v63 = vmax.f32 %v6274_v62, 0.0  ;;  %7081 = vmatmul.msk.f32.gmra.mxu0 %vm800_vm1, %v187_v60  ;;  %7277 = vmatmul.msk.f32.gmra.mxu1 %vm800_vm1, %v383_v61  ;;  %v584_v62 = vld [vmem:[%s11883_s0 + $0x11d0] sm:$0xff] }
 0x570   :  { %v4821_v1 = vpop.f32.mrf.mxu2  ;;  %v5409_v2 = vpop.f32.mrf.mxu3 }
 0x571   :  { %v6666_v3 = vpack.c.bf16 %v6470_v63, %v6470_v63  ;;  %v5879_v4 = vmax.f32 %v4821_v1, %v5409_v2  ;;  %v780_v63 = vld [vmem:[%s11883_s0 + $0x17f0] sm:$0xff] }
 0x573   :  { %6863 = vst.msk [vmem:[%s11885_s3 + $0x270] sm:$0xf] %vm6706_vm2, %v6666_v3  ;;  %v6075_v7 = vmax.f32 %v5683_v0, %v5879_v4  ;;  %v192_v3 = vld [vmem:[%s11883_s0 + $0x590] sm:$0xff] }
 0x574   :  { %v3648_v8 = vpop.f32.mrf.mxu0  ;;  %v4236_v9 = vpop.f32.mrf.mxu1  ;;  %v388_v4 = vld [vmem:[%s11883_s0 + $0xbb0] sm:$0xff] }
 0x575   :  { %v6275_v13 = vadd.f32 %v10878_v15, %v6075_v7  ;;  %7474 = vmatmul.msk.f32.gmra.mxu2 %vm800_vm1, %v580_v5  ;;  %7670 = vmatmul.msk.f32.gmra.mxu3 %vm800_vm1, %v776_v6  ;;  %v5684_v17 = vmax.f32 %v3648_v8, %v4236_v9 }
 0x577   :  { %v6471_v16 = vmax.f32 %v6275_v13, 0.0  ;;  %7082 = vmatmul.msk.f32.gmra.mxu0 %vm800_vm1, %v188_v10  ;;  %7278 = vmatmul.msk.f32.gmra.mxu1 %vm800_vm1, %v384_v11  ;;  %v585_v13 = vld [vmem:[%s11883_s0 + $0x11d8] sm:$0xff] }
 0x578   :  { %v4824_v18 = vpop.f32.mrf.mxu2  ;;  %v5412_v19 = vpop.f32.mrf.mxu3 }
 0x579   :  { %v6667_v12 = vpack.c.bf16 %v6471_v16, %v6471_v16  ;;  %v5880_v14 = vmax.f32 %v4824_v18, %v5412_v19  ;;  %v193_v19 = vld [vmem:[%s11883_s0 + $0x598] sm:$0xff] }
 0x57b   :  { %6864 = vst.msk [vmem:[%s11885_s3 + $0x274] sm:$0xf] %vm6706_vm2, %v6667_v12  ;;  %v6076_v22 = vmax.f32 %v5684_v17, %v5880_v14  ;;  %v389_v12 = vld [vmem:[%s11883_s0 + $0xbb8] sm:$0xff]  ;;  %v11450_v14 = vld [vmem:[%s11884_s2] ss:$0 sm:$0xff] }
 0x57c   :  { %v3651_v23 = vpop.f32.mrf.mxu0  ;;  %v4239_v24 = vpop.f32.mrf.mxu1 }
 0x57d   :  { %v6276_v27 = vadd.f32 %v10878_v15, %v6076_v22  ;;  %7475 = vmatmul.msk.f32.gmra.mxu2 %vm800_vm1, %v581_v20  ;;  %7671 = vmatmul.msk.f32.gmra.mxu3 %vm800_vm1, %v777_v21  ;;  %v5685_v29 = vmax.f32 %v3651_v23, %v4239_v24 }
 0x57f   :  { %v6472_v28 = vmax.f32 %v6276_v27, 0.0  ;;  %7083 = vmatmul.msk.f32.gmra.mxu0 %vm800_vm1, %v189_v25  ;;  %7279 = vmatmul.msk.f32.gmra.mxu1 %vm800_vm1, %v385_v26  ;;  %v586_v27 = vld [vmem:[%s11883_s0 + $0x11e0] sm:$0xff] }
 0x580   :  { %v4827_v30 = vpop.f32.mrf.mxu2  ;;  %v5415_v31 = vpop.f32.mrf.mxu3 }
 0x581   :  { %v6668_v32 = vpack.c.bf16 %v6472_v28, %v6472_v28  ;;  %v5881_v33 = vmax.f32 %v4827_v30, %v5415_v31  ;;  %v782_v28 = vld [vmem:[%s11883_s0 + $0x1800] sm:$0xff] }
 0x583   :  { %6865 = vst.msk [vmem:[%s11885_s3 + $0x278] sm:$0xf] %vm6706_vm2, %v6668_v32  ;;  %v6077_v36 = vmax.f32 %v5685_v29, %v5881_v33  ;;  %v194_v32 = vld [vmem:[%s11883_s0 + $0x5a0] sm:$0xff] }
 0x584   :  { %v3654_v37 = vpop.f32.mrf.mxu0  ;;  %v4242_v38 = vpop.f32.mrf.mxu1  ;;  %v390_v33 = vld [vmem:[%s11883_s0 + $0xbc0] sm:$0xff] }
 0x585   :  { %v6277_v41 = vadd.f32 %v10878_v15, %v6077_v36  ;;  %7476 = vmatmul.msk.f32.gmra.mxu2 %vm800_vm1, %v582_v34  ;;  %7672 = vmatmul.msk.f32.gmra.mxu3 %vm800_vm1, %v778_v35  ;;  %v5686_v43 = vmax.f32 %v3654_v37, %v4242_v38 }
 0x587   :  { %v6473_v42 = vmax.f32 %v6277_v41, 0.0  ;;  %7084 = vmatmul.msk.f32.gmra.mxu0 %vm800_vm1, %v190_v39  ;;  %7280 = vmatmul.msk.f32.gmra.mxu1 %vm800_vm1, %v386_v40  ;;  %v587_v41 = vld [vmem:[%s11883_s0 + $0x11e8] sm:$0xff] }
 0x588   :  { %v4830_v44 = vpop.f32.mrf.mxu2  ;;  %v5418_v45 = vpop.f32.mrf.mxu3 }
 0x589   :  { %v6669_v46 = vpack.c.bf16 %v6473_v42, %v6473_v42  ;;  %v5882_v47 = vmax.f32 %v4830_v44, %v5418_v45  ;;  %v783_v42 = vld [vmem:[%s11883_s0 + $0x1808] sm:$0xff] }
 0x58b   :  { %6866 = vst.msk [vmem:[%s11885_s3 + $0x27c] sm:$0xf] %vm6706_vm2, %v6669_v46  ;;  %v6078_v50 = vmax.f32 %v5686_v43, %v5882_v47  ;;  %v195_v46 = vld [vmem:[%s11883_s0 + $0x5a8] sm:$0xff] }
 0x58c   :  { %v3657_v51 = vpop.f32.mrf.mxu0  ;;  %v4245_v52 = vpop.f32.mrf.mxu1  ;;  %v391_v47 = vld [vmem:[%s11883_s0 + $0xbc8] sm:$0xff] }
 0x58d   :  { %v6278_v55 = vadd.f32 %v10878_v15, %v6078_v50  ;;  %7477 = vmatmul.msk.f32.gmra.mxu2 %vm800_vm1, %v583_v48  ;;  %7673 = vmatmul.msk.f32.gmra.mxu3 %vm800_vm1, %v779_v49  ;;  %v5687_v57 = vmax.f32 %v3657_v51, %v4245_v52 }
 0x58f   :  { %v6474_v56 = vmax.f32 %v6278_v55, 0.0  ;;  %7085 = vmatmul.msk.f32.gmra.mxu0 %vm800_vm1, %v191_v53  ;;  %7281 = vmatmul.msk.f32.gmra.mxu1 %vm800_vm1, %v387_v54  ;;  %v588_v55 = vld [vmem:[%s11883_s0 + $0x11f0] sm:$0xff] }
 0x590   :  { %v4833_v58 = vpop.f32.mrf.mxu2  ;;  %v5421_v59 = vpop.f32.mrf.mxu3 }
 0x591   :  { %v6670_v60 = vpack.c.bf16 %v6474_v56, %v6474_v56  ;;  %v5883_v61 = vmax.f32 %v4833_v58, %v5421_v59  ;;  %v784_v56 = vld [vmem:[%s11883_s0 + $0x1810] sm:$0xff] }
 0x593   :  { %6867 = vst.msk [vmem:[%s11885_s3 + $0x280] sm:$0xf] %vm6706_vm2, %v6670_v60  ;;  %v6079_v0 = vmax.f32 %v5687_v57, %v5883_v61  ;;  %v196_v60 = vld [vmem:[%s11883_s0 + $0x5b0] sm:$0xff] }
 0x594   :  { %v3660_v1 = vpop.f32.mrf.mxu0  ;;  %v4248_v2 = vpop.f32.mrf.mxu1  ;;  %v392_v61 = vld [vmem:[%s11883_s0 + $0xbd0] sm:$0xff] }
 0x595   :  { %v6279_v5 = vadd.f32 %v10878_v15, %v6079_v0  ;;  %7478 = vmatmul.msk.f32.gmra.mxu2 %vm800_vm1, %v584_v62  ;;  %7674 = vmatmul.msk.f32.gmra.mxu3 %vm800_vm1, %v780_v63  ;;  %v5688_v7 = vmax.f32 %v3660_v1, %v4248_v2  ;;  %v781_v15 = vld [vmem:[%s11883_s0 + $0x17f8] sm:$0xff] }
 0x597   :  { %v6475_v6 = vmax.f32 %v6279_v5, 0.0  ;;  %7086 = vmatmul.msk.f32.gmra.mxu0 %vm800_vm1, %v192_v3  ;;  %7282 = vmatmul.msk.f32.gmra.mxu1 %vm800_vm1, %v388_v4  ;;  %v589_v5 = vld [vmem:[%s11883_s0 + $0x11f8] sm:$0xff] }
 0x598   :  { %v4836_v8 = vpop.f32.mrf.mxu2  ;;  %v5424_v9 = vpop.f32.mrf.mxu3 }
 0x599   :  { %v6671_v10 = vpack.c.bf16 %v6475_v6, %v6475_v6  ;;  %v5884_v11 = vmax.f32 %v4836_v8, %v5424_v9  ;;  %v785_v6 = vld [vmem:[%s11883_s0 + $0x1818] sm:$0xff] }
 0x59b   :  { %6868 = vst.msk [vmem:[%s11885_s3 + $0x284] sm:$0xf] %vm6706_vm2, %v6671_v10  ;;  %v6080_v16 = vmax.f32 %v5688_v7, %v5884_v11  ;;  %v197_v10 = vld [vmem:[%s11883_s0 + $0x5b8] sm:$0xff] }
 0x59c   :  { %v3663_v17 = vpop.f32.mrf.mxu0  ;;  %v4251_v18 = vpop.f32.mrf.mxu1  ;;  %v393_v11 = vld [vmem:[%s11883_s0 + $0xbd8] sm:$0xff] }
 0x59d   :  { %v6280_v20 = vadd.f32 %v11450_v14, %v6080_v16  ;;  %7479 = vmatmul.msk.f32.gmra.mxu2 %vm800_vm1, %v585_v13  ;;  %7675 = vmatmul.msk.f32.gmra.mxu3 %vm800_vm1, %v781_v15  ;;  %v5689_v22 = vmax.f32 %v3663_v17, %v4251_v18 }
 0x59f   :  { %v6476_v21 = vmax.f32 %v6280_v20, 0.0  ;;  %7087 = vmatmul.msk.f32.gmra.mxu0 %vm800_vm1, %v193_v19  ;;  %7283 = vmatmul.msk.f32.gmra.mxu1 %vm800_vm1, %v389_v12  ;;  %v590_v20 = vld [vmem:[%s11883_s0 + $0x1200] sm:$0xff] }
 0x5a0   :  { %v4839_v23 = vpop.f32.mrf.mxu2  ;;  %v5427_v24 = vpop.f32.mrf.mxu3 }
 0x5a1   :  { %v6672_v25 = vpack.c.bf16 %v6476_v21, %v6476_v21  ;;  %v5885_v26 = vmax.f32 %v4839_v23, %v5427_v24  ;;  %v786_v21 = vld [vmem:[%s11883_s0 + $0x1820] sm:$0xff] }
 0x5a3   :  { %6869 = vst.msk [vmem:[%s11885_s3 + $0x288] sm:$0xf] %vm6706_vm2, %v6672_v25  ;;  %v6081_v29 = vmax.f32 %v5689_v22, %v5885_v26  ;;  %v198_v25 = vld [vmem:[%s11883_s0 + $0x5c0] sm:$0xff] }
 0x5a4   :  { %v3666_v30 = vpop.f32.mrf.mxu0  ;;  %v4254_v31 = vpop.f32.mrf.mxu1  ;;  %v394_v26 = vld [vmem:[%s11883_s0 + $0xbe0] sm:$0xff] }
 0x5a5   :  { %v6281_v34 = vadd.f32 %v11450_v14, %v6081_v29  ;;  %7480 = vmatmul.msk.f32.gmra.mxu2 %vm800_vm1, %v586_v27  ;;  %7676 = vmatmul.msk.f32.gmra.mxu3 %vm800_vm1, %v782_v28  ;;  %v5690_v36 = vmax.f32 %v3666_v30, %v4254_v31 }
 0x5a7   :  { %v6477_v35 = vmax.f32 %v6281_v34, 0.0  ;;  %7088 = vmatmul.msk.f32.gmra.mxu0 %vm800_vm1, %v194_v32  ;;  %7284 = vmatmul.msk.f32.gmra.mxu1 %vm800_vm1, %v390_v33  ;;  %v591_v34 = vld [vmem:[%s11883_s0 + $0x1208] sm:$0xff] }
 0x5a8   :  { %v4842_v37 = vpop.f32.mrf.mxu2  ;;  %v5430_v38 = vpop.f32.mrf.mxu3 }
 0x5a9   :  { %v6673_v39 = vpack.c.bf16 %v6477_v35, %v6477_v35  ;;  %v5886_v40 = vmax.f32 %v4842_v37, %v5430_v38  ;;  %v787_v35 = vld [vmem:[%s11883_s0 + $0x1828] sm:$0xff] }
 0x5ab   :  { %6870 = vst.msk [vmem:[%s11885_s3 + $0x28c] sm:$0xf] %vm6706_vm2, %v6673_v39  ;;  %v6082_v43 = vmax.f32 %v5690_v36, %v5886_v40  ;;  %v199_v39 = vld [vmem:[%s11883_s0 + $0x5c8] sm:$0xff] }
 0x5ac   :  { %v3669_v44 = vpop.f32.mrf.mxu0  ;;  %v4257_v45 = vpop.f32.mrf.mxu1  ;;  %v395_v40 = vld [vmem:[%s11883_s0 + $0xbe8] sm:$0xff] }
 0x5ad   :  { %v6282_v48 = vadd.f32 %v11450_v14, %v6082_v43  ;;  %7481 = vmatmul.msk.f32.gmra.mxu2 %vm800_vm1, %v587_v41  ;;  %7677 = vmatmul.msk.f32.gmra.mxu3 %vm800_vm1, %v783_v42  ;;  %v5691_v50 = vmax.f32 %v3669_v44, %v4257_v45 }
 0x5af   :  { %v6478_v49 = vmax.f32 %v6282_v48, 0.0  ;;  %7089 = vmatmul.msk.f32.gmra.mxu0 %vm800_vm1, %v195_v46  ;;  %7285 = vmatmul.msk.f32.gmra.mxu1 %vm800_vm1, %v391_v47  ;;  %v592_v48 = vld [vmem:[%s11883_s0 + $0x1210] sm:$0xff] }
 0x5b0   :  { %v4845_v51 = vpop.f32.mrf.mxu2  ;;  %v5433_v52 = vpop.f32.mrf.mxu3 }
 0x5b1   :  { %v6674_v53 = vpack.c.bf16 %v6478_v49, %v6478_v49  ;;  %v5887_v54 = vmax.f32 %v4845_v51, %v5433_v52  ;;  %v788_v49 = vld [vmem:[%s11883_s0 + $0x1830] sm:$0xff] }
 0x5b3   :  { %6871 = vst.msk [vmem:[%s11885_s3 + $0x290] sm:$0xf] %vm6706_vm2, %v6674_v53  ;;  %v6083_v57 = vmax.f32 %v5691_v50, %v5887_v54  ;;  %v200_v53 = vld [vmem:[%s11883_s0 + $0x5d0] sm:$0xff] }
 0x5b4   :  { %v3672_v58 = vpop.f32.mrf.mxu0  ;;  %v4260_v59 = vpop.f32.mrf.mxu1  ;;  %v396_v54 = vld [vmem:[%s11883_s0 + $0xbf0] sm:$0xff] }
 0x5b5   :  { %v6283_v62 = vadd.f32 %v11450_v14, %v6083_v57  ;;  %7482 = vmatmul.msk.f32.gmra.mxu2 %vm800_vm1, %v588_v55  ;;  %7678 = vmatmul.msk.f32.gmra.mxu3 %vm800_vm1, %v784_v56  ;;  %v5692_v0 = vmax.f32 %v3672_v58, %v4260_v59 }
 0x5b7   :  { %v6479_v63 = vmax.f32 %v6283_v62, 0.0  ;;  %7090 = vmatmul.msk.f32.gmra.mxu0 %vm800_vm1, %v196_v60  ;;  %7286 = vmatmul.msk.f32.gmra.mxu1 %vm800_vm1, %v392_v61  ;;  %v593_v62 = vld [vmem:[%s11883_s0 + $0x1218] sm:$0xff] }
 0x5b8   :  { %v4848_v1 = vpop.f32.mrf.mxu2  ;;  %v5436_v2 = vpop.f32.mrf.mxu3 }
 0x5b9   :  { %v6675_v3 = vpack.c.bf16 %v6479_v63, %v6479_v63  ;;  %v5888_v4 = vmax.f32 %v4848_v1, %v5436_v2  ;;  %v789_v63 = vld [vmem:[%s11883_s0 + $0x1838] sm:$0xff] }
 0x5bb   :  { %6872 = vst.msk [vmem:[%s11885_s3 + $0x294] sm:$0xf] %vm6706_vm2, %v6675_v3  ;;  %v6084_v7 = vmax.f32 %v5692_v0, %v5888_v4  ;;  %v201_v3 = vld [vmem:[%s11883_s0 + $0x5d8] sm:$0xff] }
 0x5bc   :  { %v3675_v8 = vpop.f32.mrf.mxu0  ;;  %v4263_v9 = vpop.f32.mrf.mxu1  ;;  %v397_v4 = vld [vmem:[%s11883_s0 + $0xbf8] sm:$0xff] }
 0x5bd   :  { %v6284_v13 = vadd.f32 %v11450_v14, %v6084_v7  ;;  %7483 = vmatmul.msk.f32.gmra.mxu2 %vm800_vm1, %v589_v5  ;;  %7679 = vmatmul.msk.f32.gmra.mxu3 %vm800_vm1, %v785_v6  ;;  %v5693_v16 = vmax.f32 %v3675_v8, %v4263_v9 }
 0x5bf   :  { %v6480_v15 = vmax.f32 %v6284_v13, 0.0  ;;  %7091 = vmatmul.msk.f32.gmra.mxu0 %vm800_vm1, %v197_v10  ;;  %7287 = vmatmul.msk.f32.gmra.mxu1 %vm800_vm1, %v393_v11  ;;  %v594_v13 = vld [vmem:[%s11883_s0 + $0x1220] sm:$0xff] }
 0x5c0   :  { %v4851_v17 = vpop.f32.mrf.mxu2  ;;  %v5439_v18 = vpop.f32.mrf.mxu3 }
 0x5c1   :  { %v6676_v19 = vpack.c.bf16 %v6480_v15, %v6480_v15  ;;  %v5889_v12 = vmax.f32 %v4851_v17, %v5439_v18  ;;  %v790_v15 = vld [vmem:[%s11883_s0 + $0x1840] sm:$0xff] }
 0x5c3   :  { %6873 = vst.msk [vmem:[%s11885_s3 + $0x298] sm:$0xf] %vm6706_vm2, %v6676_v19  ;;  %v6085_v22 = vmax.f32 %v5693_v16, %v5889_v12  ;;  %v202_v19 = vld [vmem:[%s11883_s0 + $0x5e0] sm:$0xff] }
 0x5c4   :  { %v3678_v23 = vpop.f32.mrf.mxu0  ;;  %v4266_v24 = vpop.f32.mrf.mxu1  ;;  %v398_v12 = vld [vmem:[%s11883_s0 + $0xc00] sm:$0xff] }
 0x5c5   :  { %v6285_v27 = vadd.f32 %v11450_v14, %v6085_v22  ;;  %7484 = vmatmul.msk.f32.gmra.mxu2 %vm800_vm1, %v590_v20  ;;  %7680 = vmatmul.msk.f32.gmra.mxu3 %vm800_vm1, %v786_v21  ;;  %v5694_v29 = vmax.f32 %v3678_v23, %v4266_v24 }
 0x5c7   :  { %v6481_v28 = vmax.f32 %v6285_v27, 0.0  ;;  %7092 = vmatmul.msk.f32.gmra.mxu0 %vm800_vm1, %v198_v25  ;;  %7288 = vmatmul.msk.f32.gmra.mxu1 %vm800_vm1, %v394_v26  ;;  %v595_v27 = vld [vmem:[%s11883_s0 + $0x1228] sm:$0xff] }
 0x5c8   :  { %v4854_v30 = vpop.f32.mrf.mxu2  ;;  %v5442_v31 = vpop.f32.mrf.mxu3 }
 0x5c9   :  { %v6677_v32 = vpack.c.bf16 %v6481_v28, %v6481_v28  ;;  %v5890_v33 = vmax.f32 %v4854_v30, %v5442_v31  ;;  %v791_v28 = vld [vmem:[%s11883_s0 + $0x1848] sm:$0xff] }
 0x5cb   :  { %6874 = vst.msk [vmem:[%s11885_s3 + $0x29c] sm:$0xf] %vm6706_vm2, %v6677_v32  ;;  %v6086_v36 = vmax.f32 %v5694_v29, %v5890_v33  ;;  %v203_v32 = vld [vmem:[%s11883_s0 + $0x5e8] sm:$0xff] }
 0x5cc   :  { %v3681_v37 = vpop.f32.mrf.mxu0  ;;  %v4269_v38 = vpop.f32.mrf.mxu1  ;;  %v399_v33 = vld [vmem:[%s11883_s0 + $0xc08] sm:$0xff] }
 0x5cd   :  { %v6286_v41 = vadd.f32 %v11450_v14, %v6086_v36  ;;  %7485 = vmatmul.msk.f32.gmra.mxu2 %vm800_vm1, %v591_v34  ;;  %7681 = vmatmul.msk.f32.gmra.mxu3 %vm800_vm1, %v787_v35  ;;  %v5695_v43 = vmax.f32 %v3681_v37, %v4269_v38 }
 0x5cf   :  { %v6482_v42 = vmax.f32 %v6286_v41, 0.0  ;;  %7093 = vmatmul.msk.f32.gmra.mxu0 %vm800_vm1, %v199_v39  ;;  %7289 = vmatmul.msk.f32.gmra.mxu1 %vm800_vm1, %v395_v40  ;;  %v596_v41 = vld [vmem:[%s11883_s0 + $0x1230] sm:$0xff] }
 0x5d0   :  { %v4857_v44 = vpop.f32.mrf.mxu2  ;;  %v5445_v45 = vpop.f32.mrf.mxu3 }
 0x5d1   :  { %v6678_v46 = vpack.c.bf16 %v6482_v42, %v6482_v42  ;;  %v5891_v47 = vmax.f32 %v4857_v44, %v5445_v45  ;;  %v792_v42 = vld [vmem:[%s11883_s0 + $0x1850] sm:$0xff] }
 0x5d3   :  { %6875 = vst.msk [vmem:[%s11885_s3 + $0x2a0] sm:$0xf] %vm6706_vm2, %v6678_v46  ;;  %v6087_v50 = vmax.f32 %v5695_v43, %v5891_v47  ;;  %v204_v46 = vld [vmem:[%s11883_s0 + $0x5f0] sm:$0xff] }
 0x5d4   :  { %v3684_v51 = vpop.f32.mrf.mxu0  ;;  %v4272_v52 = vpop.f32.mrf.mxu1  ;;  %v400_v47 = vld [vmem:[%s11883_s0 + $0xc10] sm:$0xff] }
 0x5d5   :  { %v6287_v55 = vadd.f32 %v11450_v14, %v6087_v50  ;;  %7486 = vmatmul.msk.f32.gmra.mxu2 %vm800_vm1, %v592_v48  ;;  %7682 = vmatmul.msk.f32.gmra.mxu3 %vm800_vm1, %v788_v49  ;;  %v5696_v57 = vmax.f32 %v3684_v51, %v4272_v52 }
 0x5d7   :  { %v6483_v56 = vmax.f32 %v6287_v55, 0.0  ;;  %7094 = vmatmul.msk.f32.gmra.mxu0 %vm800_vm1, %v200_v53  ;;  %7290 = vmatmul.msk.f32.gmra.mxu1 %vm800_vm1, %v396_v54  ;;  %v597_v55 = vld [vmem:[%s11883_s0 + $0x1238] sm:$0xff] }
 0x5d8   :  { %v4860_v58 = vpop.f32.mrf.mxu2  ;;  %v5448_v59 = vpop.f32.mrf.mxu3 }
 0x5d9   :  { %v6679_v60 = vpack.c.bf16 %v6483_v56, %v6483_v56  ;;  %v5892_v61 = vmax.f32 %v4860_v58, %v5448_v59  ;;  %v793_v56 = vld [vmem:[%s11883_s0 + $0x1858] sm:$0xff] }
 0x5db   :  { %6876 = vst.msk [vmem:[%s11885_s3 + $0x2a4] sm:$0xf] %vm6706_vm2, %v6679_v60  ;;  %v6088_v0 = vmax.f32 %v5696_v57, %v5892_v61  ;;  %v205_v60 = vld [vmem:[%s11883_s0 + $0x5f8] sm:$0xff] }
 0x5dc   :  { %v3687_v1 = vpop.f32.mrf.mxu0  ;;  %v4275_v2 = vpop.f32.mrf.mxu1  ;;  %v401_v61 = vld [vmem:[%s11883_s0 + $0xc18] sm:$0xff] }
 0x5dd   :  { %v6288_v5 = vadd.f32 %v11450_v14, %v6088_v0  ;;  %7487 = vmatmul.msk.f32.gmra.mxu2 %vm800_vm1, %v593_v62  ;;  %7683 = vmatmul.msk.f32.gmra.mxu3 %vm800_vm1, %v789_v63  ;;  %v5697_v7 = vmax.f32 %v3687_v1, %v4275_v2 }
 0x5df   :  { %v6484_v6 = vmax.f32 %v6288_v5, 0.0  ;;  %7095 = vmatmul.msk.f32.gmra.mxu0 %vm800_vm1, %v201_v3  ;;  %7291 = vmatmul.msk.f32.gmra.mxu1 %vm800_vm1, %v397_v4  ;;  %v598_v5 = vld [vmem:[%s11883_s0 + $0x1240] sm:$0xff] }
 0x5e0   :  { %v4863_v8 = vpop.f32.mrf.mxu2  ;;  %v5451_v9 = vpop.f32.mrf.mxu3 }
 0x5e1   :  { %v6680_v10 = vpack.c.bf16 %v6484_v6, %v6484_v6  ;;  %v5893_v11 = vmax.f32 %v4863_v8, %v5451_v9  ;;  %v794_v6 = vld [vmem:[%s11883_s0 + $0x1860] sm:$0xff] }
 0x5e3   :  { %6877 = vst.msk [vmem:[%s11885_s3 + $0x2a8] sm:$0xf] %vm6706_vm2, %v6680_v10  ;;  %v6089_v16 = vmax.f32 %v5697_v7, %v5893_v11  ;;  %v206_v10 = vld [vmem:[%s11883_s0 + $0x600] sm:$0xff] }
 0x5e4   :  { %v3690_v17 = vpop.f32.mrf.mxu0  ;;  %v4278_v18 = vpop.f32.mrf.mxu1  ;;  %v402_v11 = vld [vmem:[%s11883_s0 + $0xc20] sm:$0xff] }
 0x5e5   :  { %v6289_v20 = vadd.f32 %v11450_v14, %v6089_v16  ;;  %7488 = vmatmul.msk.f32.gmra.mxu2 %vm800_vm1, %v594_v13  ;;  %7684 = vmatmul.msk.f32.gmra.mxu3 %vm800_vm1, %v790_v15  ;;  %v5698_v22 = vmax.f32 %v3690_v17, %v4278_v18 }
 0x5e7   :  { %v6485_v21 = vmax.f32 %v6289_v20, 0.0  ;;  %7096 = vmatmul.msk.f32.gmra.mxu0 %vm800_vm1, %v202_v19  ;;  %7292 = vmatmul.msk.f32.gmra.mxu1 %vm800_vm1, %v398_v12  ;;  %v599_v20 = vld [vmem:[%s11883_s0 + $0x1248] sm:$0xff] }
 0x5e8   :  { %v4866_v23 = vpop.f32.mrf.mxu2  ;;  %v5454_v24 = vpop.f32.mrf.mxu3 }
 0x5e9   :  { %v6681_v25 = vpack.c.bf16 %v6485_v21, %v6485_v21  ;;  %v5894_v26 = vmax.f32 %v4866_v23, %v5454_v24  ;;  %v795_v21 = vld [vmem:[%s11883_s0 + $0x1868] sm:$0xff] }
 0x5eb   :  { %6878 = vst.msk [vmem:[%s11885_s3 + $0x2ac] sm:$0xf] %vm6706_vm2, %v6681_v25  ;;  %v6090_v29 = vmax.f32 %v5698_v22, %v5894_v26  ;;  %v207_v25 = vld [vmem:[%s11883_s0 + $0x608] sm:$0xff] }
 0x5ec   :  { %v3693_v30 = vpop.f32.mrf.mxu0  ;;  %v4281_v31 = vpop.f32.mrf.mxu1  ;;  %v403_v26 = vld [vmem:[%s11883_s0 + $0xc28] sm:$0xff] }
 0x5ed   :  { %v6290_v34 = vadd.f32 %v11450_v14, %v6090_v29  ;;  %7489 = vmatmul.msk.f32.gmra.mxu2 %vm800_vm1, %v595_v27  ;;  %7685 = vmatmul.msk.f32.gmra.mxu3 %vm800_vm1, %v791_v28  ;;  %v5699_v36 = vmax.f32 %v3693_v30, %v4281_v31 }
 0x5ef   :  { %v6486_v35 = vmax.f32 %v6290_v34, 0.0  ;;  %7097 = vmatmul.msk.f32.gmra.mxu0 %vm800_vm1, %v203_v32  ;;  %7293 = vmatmul.msk.f32.gmra.mxu1 %vm800_vm1, %v399_v33  ;;  %v600_v34 = vld [vmem:[%s11883_s0 + $0x1250] sm:$0xff] }
 0x5f0   :  { %v4869_v37 = vpop.f32.mrf.mxu2  ;;  %v5457_v38 = vpop.f32.mrf.mxu3 }
 0x5f1   :  { %v6682_v39 = vpack.c.bf16 %v6486_v35, %v6486_v35  ;;  %v5895_v40 = vmax.f32 %v4869_v37, %v5457_v38  ;;  %v796_v35 = vld [vmem:[%s11883_s0 + $0x1870] sm:$0xff] }
 0x5f3   :  { %6879 = vst.msk [vmem:[%s11885_s3 + $0x2b0] sm:$0xf] %vm6706_vm2, %v6682_v39  ;;  %v6091_v43 = vmax.f32 %v5699_v36, %v5895_v40  ;;  %v208_v39 = vld [vmem:[%s11883_s0 + $0x610] sm:$0xff] }
 0x5f4   :  { %v3696_v44 = vpop.f32.mrf.mxu0  ;;  %v4284_v45 = vpop.f32.mrf.mxu1  ;;  %v404_v40 = vld [vmem:[%s11883_s0 + $0xc30] sm:$0xff] }
 0x5f5   :  { %v6291_v48 = vadd.f32 %v11450_v14, %v6091_v43  ;;  %7490 = vmatmul.msk.f32.gmra.mxu2 %vm800_vm1, %v596_v41  ;;  %7686 = vmatmul.msk.f32.gmra.mxu3 %vm800_vm1, %v792_v42  ;;  %v5700_v50 = vmax.f32 %v3696_v44, %v4284_v45 }
 0x5f7   :  { %v6487_v49 = vmax.f32 %v6291_v48, 0.0  ;;  %7098 = vmatmul.msk.f32.gmra.mxu0 %vm800_vm1, %v204_v46  ;;  %7294 = vmatmul.msk.f32.gmra.mxu1 %vm800_vm1, %v400_v47  ;;  %v601_v48 = vld [vmem:[%s11883_s0 + $0x1258] sm:$0xff] }
 0x5f8   :  { %v4872_v51 = vpop.f32.mrf.mxu2  ;;  %v5460_v52 = vpop.f32.mrf.mxu3 }
 0x5f9   :  { %v6683_v53 = vpack.c.bf16 %v6487_v49, %v6487_v49  ;;  %v5896_v54 = vmax.f32 %v4872_v51, %v5460_v52  ;;  %v797_v49 = vld [vmem:[%s11883_s0 + $0x1878] sm:$0xff] }
 0x5fb   :  { %6880 = vst.msk [vmem:[%s11885_s3 + $0x2b4] sm:$0xf] %vm6706_vm2, %v6683_v53  ;;  %v6092_v57 = vmax.f32 %v5700_v50, %v5896_v54  ;;  %v209_v53 = vld [vmem:[%s11883_s0 + $0x618] sm:$0xff] }
 0x5fc   :  { %v3699_v58 = vpop.f32.mrf.mxu0  ;;  %v4287_v59 = vpop.f32.mrf.mxu1  ;;  %v405_v54 = vld [vmem:[%s11883_s0 + $0xc38] sm:$0xff] }
 0x5fd   :  { %v6292_v62 = vadd.f32 %v11450_v14, %v6092_v57  ;;  %7491 = vmatmul.msk.f32.gmra.mxu2 %vm800_vm1, %v597_v55  ;;  %7687 = vmatmul.msk.f32.gmra.mxu3 %vm800_vm1, %v793_v56  ;;  %v5701_v0 = vmax.f32 %v3699_v58, %v4287_v59 }
 0x5ff   :  { %v6488_v63 = vmax.f32 %v6292_v62, 0.0  ;;  %7099 = vmatmul.msk.f32.gmra.mxu0 %vm800_vm1, %v205_v60  ;;  %7295 = vmatmul.msk.f32.gmra.mxu1 %vm800_vm1, %v401_v61 }
 0x600   :  { %v4875_v1 = vpop.f32.mrf.mxu2  ;;  %v5463_v2 = vpop.f32.mrf.mxu3 }
 0x601   :  { %v6684_v3 = vpack.c.bf16 %v6488_v63, %v6488_v63  ;;  %v5897_v4 = vmax.f32 %v4875_v1, %v5463_v2 }
 0x603   :  { %6881 = vst.msk [vmem:[%s11885_s3 + $0x2b8] sm:$0xf] %vm6706_vm2, %v6684_v3  ;;  %v6093_v7 = vmax.f32 %v5701_v0, %v5897_v4 }
 0x604   :  { %v3702_v8 = vpop.f32.mrf.mxu0  ;;  %v4290_v9 = vpop.f32.mrf.mxu1 }
 0x605   :  { %v6293_v13 = vadd.f32 %v11450_v14, %v6093_v7  ;;  %7492 = vmatmul.msk.f32.gmra.mxu2 %vm800_vm1, %v598_v5  ;;  %7688 = vmatmul.msk.f32.gmra.mxu3 %vm800_vm1, %v794_v6  ;;  %v5702_v16 = vmax.f32 %v3702_v8, %v4290_v9 }
 0x607   :  { %v6489_v15 = vmax.f32 %v6293_v13, 0.0  ;;  %7100 = vmatmul.msk.f32.gmra.mxu0 %vm800_vm1, %v206_v10  ;;  %7296 = vmatmul.msk.f32.gmra.mxu1 %vm800_vm1, %v402_v11 }
 0x608   :  { %v4878_v17 = vpop.f32.mrf.mxu2  ;;  %v5466_v18 = vpop.f32.mrf.mxu3 }
 0x609   :  { %v6685_v19 = vpack.c.bf16 %v6489_v15, %v6489_v15  ;;  %v5898_v12 = vmax.f32 %v4878_v17, %v5466_v18 }
 0x60b   :  { %6882 = vst.msk [vmem:[%s11885_s3 + $0x2bc] sm:$0xf] %vm6706_vm2, %v6685_v19  ;;  %v6094_v22 = vmax.f32 %v5702_v16, %v5898_v12 }
 0x60c   :  { %v3705_v23 = vpop.f32.mrf.mxu0  ;;  %v4293_v24 = vpop.f32.mrf.mxu1 }
 0x60d   :  { %v6294_v27 = vadd.f32 %v11450_v14, %v6094_v22  ;;  %7493 = vmatmul.msk.f32.gmra.mxu2 %vm800_vm1, %v599_v20  ;;  %7689 = vmatmul.msk.f32.gmra.mxu3 %vm800_vm1, %v795_v21  ;;  %v5703_v29 = vmax.f32 %v3705_v23, %v4293_v24 }
 0x60f   :  { %v6490_v28 = vmax.f32 %v6294_v27, 0.0  ;;  %7101 = vmatmul.msk.f32.gmra.mxu0 %vm800_vm1, %v207_v25  ;;  %7297 = vmatmul.msk.f32.gmra.mxu1 %vm800_vm1, %v403_v26 }
 0x610   :  { %v4881_v30 = vpop.f32.mrf.mxu2  ;;  %v5469_v31 = vpop.f32.mrf.mxu3 }
 0x611   :  { %v6686_v32 = vpack.c.bf16 %v6490_v28, %v6490_v28  ;;  %v5899_v33 = vmax.f32 %v4881_v30, %v5469_v31 }
 0x613   :  { %6883 = vst.msk [vmem:[%s11885_s3 + $0x2c0] sm:$0xf] %vm6706_vm2, %v6686_v32  ;;  %v6095_v36 = vmax.f32 %v5703_v29, %v5899_v33 }
 0x614   :  { %v3708_v37 = vpop.f32.mrf.mxu0  ;;  %v4296_v38 = vpop.f32.mrf.mxu1 }
 0x615   :  { %v6295_v41 = vadd.f32 %v11450_v14, %v6095_v36  ;;  %7494 = vmatmul.msk.f32.gmra.mxu2 %vm800_vm1, %v600_v34  ;;  %7690 = vmatmul.msk.f32.gmra.mxu3 %vm800_vm1, %v796_v35  ;;  %v5704_v43 = vmax.f32 %v3708_v37, %v4296_v38 }
 0x617   :  { %v6491_v42 = vmax.f32 %v6295_v41, 0.0  ;;  %7102 = vmatmul.msk.f32.gmra.mxu0 %vm800_vm1, %v208_v39  ;;  %7298 = vmatmul.msk.f32.gmra.mxu1 %vm800_vm1, %v404_v40 }
 0x618   :  { %v4884_v44 = vpop.f32.mrf.mxu2  ;;  %v5472_v45 = vpop.f32.mrf.mxu3 }
 0x619   :  { %v6687_v46 = vpack.c.bf16 %v6491_v42, %v6491_v42  ;;  %v5900_v47 = vmax.f32 %v4884_v44, %v5472_v45 }
 0x61b   :  { %6884 = vst.msk [vmem:[%s11885_s3 + $0x2c4] sm:$0xf] %vm6706_vm2, %v6687_v46  ;;  %v6096_v50 = vmax.f32 %v5704_v43, %v5900_v47 }
 0x61c   :  { %v3711_v51 = vpop.f32.mrf.mxu0  ;;  %v4299_v52 = vpop.f32.mrf.mxu1 }
 0x61d   :  { %v6296_v55 = vadd.f32 %v11450_v14, %v6096_v50  ;;  %7495 = vmatmul.msk.f32.gmra.mxu2 %vm800_vm1, %v601_v48  ;;  %7691 = vmatmul.msk.f32.gmra.mxu3 %vm800_vm1, %v797_v49  ;;  %v5705_v57 = vmax.f32 %v3711_v51, %v4299_v52 }
 0x61f   :  { %v6492_v56 = vmax.f32 %v6296_v55, 0.0  ;;  %7103 = vmatmul.msk.f32.gmra.mxu0 %vm800_vm1, %v209_v53  ;;  %7299 = vmatmul.msk.f32.gmra.mxu1 %vm800_vm1, %v405_v54 }
 0x620   :  { %v4887_v58 = vpop.f32.mrf.mxu2  ;;  %v5475_v59 = vpop.f32.mrf.mxu3 }
 0x621   :  { %v6688_v60 = vpack.c.bf16 %v6492_v56, %v6492_v56  ;;  %v5901_v61 = vmax.f32 %v4887_v58, %v5475_v59 }
 0x623   :  { %6885 = vst.msk [vmem:[%s11885_s3 + $0x2c8] sm:$0xf] %vm6706_vm2, %v6688_v60  ;;  %v6097_v62 = vmax.f32 %v5705_v57, %v5901_v61 }
 0x624   :  { %v3714_v63 = vpop.f32.mrf.mxu0  ;;  %v4302_v0 = vpop.f32.mrf.mxu1 }
 0x625   :  { %v6297_v1 = vadd.f32 %v11450_v14, %v6097_v62  ;;  %v5706_v3 = vmax.f32 %v3714_v63, %v4302_v0 }
 0x627   :  { %v6493_v2 = vmax.f32 %v6297_v1, 0.0 }
 0x628   :  { %v4890_v4 = vpop.f32.mrf.mxu2  ;;  %v5478_v5 = vpop.f32.mrf.mxu3 }
 0x629   :  { %v6689_v6 = vpack.c.bf16 %v6493_v2, %v6493_v2  ;;  %v5902_v7 = vmax.f32 %v4890_v4, %v5478_v5 }
 0x62b   :  { %6886 = vst.msk [vmem:[%s11885_s3 + $0x2cc] sm:$0xf] %vm6706_vm2, %v6689_v6  ;;  %v6098_v8 = vmax.f32 %v5706_v3, %v5902_v7 }
 0x62c   :  { %v3717_v9 = vpop.f32.mrf.mxu0  ;;  %v4305_v10 = vpop.f32.mrf.mxu1 }
 0x62d   :  { %v6298_v11 = vadd.f32 %v11450_v14, %v6098_v8  ;;  %v5707_v15 = vmax.f32 %v3717_v9, %v4305_v10 }
 0x62f   :  { %v6494_v13 = vmax.f32 %v6298_v11, 0.0 }
 0x630   :  { %v4893_v16 = vpop.f32.mrf.mxu2  ;;  %v5481_v17 = vpop.f32.mrf.mxu3 }
 0x631   :  { %v6690_v18 = vpack.c.bf16 %v6494_v13, %v6494_v13  ;;  %v5903_v19 = vmax.f32 %v4893_v16, %v5481_v17 }
 0x633   :  { %6887 = vst.msk [vmem:[%s11885_s3 + $0x2d0] sm:$0xf] %vm6706_vm2, %v6690_v18  ;;  %v6099_v12 = vmax.f32 %v5707_v15, %v5903_v19 }
 0x634   :  { %v3720_v20 = vpop.f32.mrf.mxu0  ;;  %v4308_v21 = vpop.f32.mrf.mxu1 }
 0x635   :  { %v6299_v22 = vadd.f32 %v11450_v14, %v6099_v12  ;;  %v5708_v24 = vmax.f32 %v3720_v20, %v4308_v21 }
 0x637   :  { %v6495_v23 = vmax.f32 %v6299_v22, 0.0 }
 0x638   :  { %v4896_v25 = vpop.f32.mrf.mxu2  ;;  %v5484_v26 = vpop.f32.mrf.mxu3 }
 0x639   :  { %v6691_v27 = vpack.c.bf16 %v6495_v23, %v6495_v23  ;;  %v5904_v28 = vmax.f32 %v4896_v25, %v5484_v26 }
 0x63b   :  { %6888 = vst.msk [vmem:[%s11885_s3 + $0x2d4] sm:$0xf] %vm6706_vm2, %v6691_v27  ;;  %v6100_v29 = vmax.f32 %v5708_v24, %v5904_v28 }
 0x63c   :  { %v3723_v30 = vpop.f32.mrf.mxu0  ;;  %v4311_v31 = vpop.f32.mrf.mxu1 }
 0x63d   :  { %v6300_v32 = vadd.f32 %v11450_v14, %v6100_v29  ;;  %v5709_v34 = vmax.f32 %v3723_v30, %v4311_v31 }
 0x63f   :  { %v6496_v33 = vmax.f32 %v6300_v32, 0.0 }
 0x640   :  { %v4899_v35 = vpop.f32.mrf.mxu2  ;;  %v5487_v36 = vpop.f32.mrf.mxu3 }
 0x641   :  { %v6692_v37 = vpack.c.bf16 %v6496_v33, %v6496_v33  ;;  %v5905_v38 = vmax.f32 %v4899_v35, %v5487_v36 }
 0x643   :  { %6889 = vst.msk [vmem:[%s11885_s3 + $0x2d8] sm:$0xf] %vm6706_vm2, %v6692_v37  ;;  %v6101_v39 = vmax.f32 %v5709_v34, %v5905_v38 }
 0x644   :  { %v3726_v40 = vpop.f32.mrf.mxu0  ;;  %v4314_v41 = vpop.f32.mrf.mxu1 }
 0x645   :  { %v6301_v42 = vadd.f32 %v11450_v14, %v6101_v39  ;;  %v5710_v44 = vmax.f32 %v3726_v40, %v4314_v41 }
 0x647   :  { %v6497_v43 = vmax.f32 %v6301_v42, 0.0 }
 0x648   :  { %v4902_v45 = vpop.f32.mrf.mxu2  ;;  %v5490_v46 = vpop.f32.mrf.mxu3 }
 0x649   :  { %v6693_v47 = vpack.c.bf16 %v6497_v43, %v6497_v43  ;;  %v5906_v48 = vmax.f32 %v4902_v45, %v5490_v46 }
 0x64b   :  { %6890 = vst.msk [vmem:[%s11885_s3 + $0x2dc] sm:$0xf] %vm6706_vm2, %v6693_v47  ;;  %v6102_v49 = vmax.f32 %v5710_v44, %v5906_v48 }
 0x64c   :  { %v3729_v50 = vpop.f32.mrf.mxu0  ;;  %v4317_v51 = vpop.f32.mrf.mxu1 }
 0x64d   :  { %v6302_v52 = vadd.f32 %v11450_v14, %v6102_v49  ;;  %v5711_v54 = vmax.f32 %v3729_v50, %v4317_v51 }
 0x64f   :  { %v6498_v53 = vmax.f32 %v6302_v52, 0.0 }
 0x650   :  { %v4905_v55 = vpop.f32.mrf.mxu2  ;;  %v5493_v56 = vpop.f32.mrf.mxu3 }
 0x651   :  { %v6694_v57 = vpack.c.bf16 %v6498_v53, %v6498_v53  ;;  %v5907_v58 = vmax.f32 %v4905_v55, %v5493_v56 }
 0x653   :  { %6891 = vst.msk [vmem:[%s11885_s3 + $0x2e0] sm:$0xf] %vm6706_vm2, %v6694_v57  ;;  %v6103_v59 = vmax.f32 %v5711_v54, %v5907_v58 }
 0x654   :  { %v3732_v60 = vpop.f32.mrf.mxu0  ;;  %v4320_v61 = vpop.f32.mrf.mxu1 }
 0x655   :  { %v6303_v62 = vadd.f32 %v11450_v14, %v6103_v59  ;;  %v5712_v0 = vmax.f32 %v3732_v60, %v4320_v61 }
 0x657   :  { %v6499_v63 = vmax.f32 %v6303_v62, 0.0 }
 0x658   :  { %v4908_v1 = vpop.f32.mrf.mxu2  ;;  %v5496_v2 = vpop.f32.mrf.mxu3 }
 0x659   :  { %v6695_v3 = vpack.c.bf16 %v6499_v63, %v6499_v63  ;;  %v5908_v4 = vmax.f32 %v4908_v1, %v5496_v2 }
 0x65b   :  { %6892 = vst.msk [vmem:[%s11885_s3 + $0x2e4] sm:$0xf] %vm6706_vm2, %v6695_v3  ;;  %v6104_v5 = vmax.f32 %v5712_v0, %v5908_v4 }
 0x65c   :  { %v3735_v6 = vpop.f32.mrf.mxu0  ;;  %v4323_v7 = vpop.f32.mrf.mxu1 }
 0x65d   :  { %v6304_v8 = vadd.f32 %v11450_v14, %v6104_v5  ;;  %v5713_v10 = vmax.f32 %v3735_v6, %v4323_v7 }
 0x65f   :  { %v6500_v9 = vmax.f32 %v6304_v8, 0.0 }
 0x660   :  { %v4911_v11 = vpop.f32.mrf.mxu2  ;;  %v5499_v13 = vpop.f32.mrf.mxu3 }
 0x661   :  { %v6696_v15 = vpack.c.bf16 %v6500_v9, %v6500_v9  ;;  %v5909_v16 = vmax.f32 %v4911_v11, %v5499_v13 }
 0x663   :  { %6893 = vst.msk [vmem:[%s11885_s3 + $0x2e8] sm:$0xf] %vm6706_vm2, %v6696_v15  ;;  %v6105_v17 = vmax.f32 %v5713_v10, %v5909_v16 }
 0x664   :  { %v3738_v18 = vpop.f32.mrf.mxu0  ;;  %v4326_v19 = vpop.f32.mrf.mxu1 }
 0x665   :  { %v6305_v12 = vadd.f32 %v11450_v14, %v6105_v17  ;;  %v5714_v21 = vmax.f32 %v3738_v18, %v4326_v19 }
 0x667   :  { %v6501_v20 = vmax.f32 %v6305_v12, 0.0 }
 0x668   :  { %v4914_v22 = vpop.f32.mrf.mxu2  ;;  %v5502_v23 = vpop.f32.mrf.mxu3 }
 0x669   :  { %v6697_v24 = vpack.c.bf16 %v6501_v20, %v6501_v20  ;;  %v5910_v25 = vmax.f32 %v4914_v22, %v5502_v23 }
 0x66b   :  { %6894 = vst.msk [vmem:[%s11885_s3 + $0x2ec] sm:$0xf] %vm6706_vm2, %v6697_v24  ;;  %v6106_v26 = vmax.f32 %v5714_v21, %v5910_v25 }
 0x66c   :  { %v3741_v27 = vpop.f32.mrf.mxu0  ;;  %v4329_v28 = vpop.f32.mrf.mxu1 }
 0x66d   :  { %v6306_v29 = vadd.f32 %v11450_v14, %v6106_v26  ;;  %v5715_v31 = vmax.f32 %v3741_v27, %v4329_v28 }
 0x66f   :  { %v6502_v30 = vmax.f32 %v6306_v29, 0.0 }
 0x670   :  { %v4917_v32 = vpop.f32.mrf.mxu2  ;;  %v5505_v33 = vpop.f32.mrf.mxu3 }
 0x671   :  { %v6698_v34 = vpack.c.bf16 %v6502_v30, %v6502_v30  ;;  %v5911_v35 = vmax.f32 %v4917_v32, %v5505_v33 }
 0x673   :  { %6895 = vst.msk [vmem:[%s11885_s3 + $0x2f0] sm:$0xf] %vm6706_vm2, %v6698_v34  ;;  %v6107_v36 = vmax.f32 %v5715_v31, %v5911_v35 }
 0x674   :  { %v3744_v37 = vpop.f32.mrf.mxu0  ;;  %v4332_v38 = vpop.f32.mrf.mxu1 }
 0x675   :  { %v6307_v39 = vadd.f32 %v11450_v14, %v6107_v36  ;;  %v5716_v41 = vmax.f32 %v3744_v37, %v4332_v38 }
 0x677   :  { %v6503_v40 = vmax.f32 %v6307_v39, 0.0 }
 0x678   :  { %v4920_v42 = vpop.f32.mrf.mxu2  ;;  %v5508_v43 = vpop.f32.mrf.mxu3 }
 0x679   :  { %v6699_v44 = vpack.c.bf16 %v6503_v40, %v6503_v40  ;;  %v5912_v45 = vmax.f32 %v4920_v42, %v5508_v43 }
 0x67b   :  { %6896 = vst.msk [vmem:[%s11885_s3 + $0x2f4] sm:$0xf] %vm6706_vm2, %v6699_v44  ;;  %v6108_v46 = vmax.f32 %v5716_v41, %v5912_v45 }
 0x67c   :  { %v3747_v47 = vpop.f32.mrf.mxu0  ;;  %v4335_v48 = vpop.f32.mrf.mxu1 }
 0x67d   :  { %v6308_v49 = vadd.f32 %v11450_v14, %v6108_v46  ;;  %v5717_v51 = vmax.f32 %v3747_v47, %v4335_v48 }
 0x67f   :  { %v6504_v50 = vmax.f32 %v6308_v49, 0.0 }
 0x680   :  { %v4923_v52 = vpop.f32.mrf.mxu2  ;;  %v5511_v53 = vpop.f32.mrf.mxu3 }
 0x681   :  { %v6700_v54 = vpack.c.bf16 %v6504_v50, %v6504_v50  ;;  %v5913_v55 = vmax.f32 %v4923_v52, %v5511_v53 }
 0x683   :  { %6897 = vst.msk [vmem:[%s11885_s3 + $0x2f8] sm:$0xf] %vm6706_vm2, %v6700_v54  ;;  %v6109_v56 = vmax.f32 %v5717_v51, %v5913_v55 }
 0x684   :  { %v3750_v57 = vpop.f32.mrf.mxu0  ;;  %v4338_v58 = vpop.f32.mrf.mxu1 }
 0x685   :  { %v6309_v59 = vadd.f32 %v11450_v14, %v6109_v56  ;;  %v5718_v61 = vmax.f32 %v3750_v57, %v4338_v58 }
 0x687   :  { %v6505_v60 = vmax.f32 %v6309_v59, 0.0 }
 0x688   :  { %v4926_v62 = vpop.f32.mrf.mxu2  ;;  %v5514_v63 = vpop.f32.mrf.mxu3 }
 0x689   :  { %v6701_v0 = vpack.c.bf16 %v6505_v60, %v6505_v60  ;;  %v5914_v1 = vmax.f32 %v4926_v62, %v5514_v63 }
 0x68b   :  { %6898 = vst.msk [vmem:[%s11885_s3 + $0x2fc] sm:$0xf] %vm6706_vm2, %v6701_v0  ;;  %v6110_v2 = vmax.f32 %v5718_v61, %v5914_v1 }
 0x68c   :  { %v3753_v3 = vpop.f32.mrf.mxu0  ;;  %v4341_v4 = vpop.f32.mrf.mxu1 }
 0x68d   :  { %v6310_v5 = vadd.f32 %v11450_v14, %v6110_v2  ;;  %v5719_v7 = vmax.f32 %v3753_v3, %v4341_v4 }
 0x68f   :  { %v6506_v6 = vmax.f32 %v6310_v5, 0.0 }
 0x690   :  { %v4929_v8 = vpop.f32.mrf.mxu2  ;;  %v5517_v9 = vpop.f32.mrf.mxu3 }
 0x691   :  { %v6702_v10 = vpack.c.bf16 %v6506_v6, %v6506_v6  ;;  %v5915_v11 = vmax.f32 %v4929_v8, %v5517_v9 }
 0x693   :  { %6899 = vst.msk [vmem:[%s11885_s3 + $0x300] sm:$0xf] %vm6706_vm2, %v6702_v10  ;;  %v6111_v13 = vmax.f32 %v5719_v7, %v5915_v11 }
 0x694   :  { %v3756_v15 = vpop.f32.mrf.mxu0  ;;  %v4344_v16 = vpop.f32.mrf.mxu1 }
 0x695   :  { %v6311_v17 = vadd.f32 %v11450_v14, %v6111_v13  ;;  %v5720_v19 = vmax.f32 %v3756_v15, %v4344_v16 }
 0x697   :  { %v6507_v18 = vmax.f32 %v6311_v17, 0.0 }
 0x698   :  { %v4932_v12 = vpop.f32.mrf.mxu2  ;;  %v5520_v20 = vpop.f32.mrf.mxu3 }
 0x699   :  { %v6703_v21 = vpack.c.bf16 %v6507_v18, %v6507_v18  ;;  %v5916_v22 = vmax.f32 %v4932_v12, %v5520_v20 }
 0x69b   :  { %6900 = vst.msk [vmem:[%s11885_s3 + $0x304] sm:$0xf] %vm6706_vm2, %v6703_v21  ;;  %v6112_v23 = vmax.f32 %v5720_v19, %v5916_v22 }
 0x69c   :  { %v3759_v24 = vpop.f32.mrf.mxu0  ;;  %v4347_v25 = vpop.f32.mrf.mxu1 }
 0x69d   :  { %v6312_v26 = vadd.f32 %v11450_v14, %v6112_v23  ;;  %v5721_v28 = vmax.f32 %v3759_v24, %v4347_v25 }
 0x69f   :  { %v6508_v27 = vmax.f32 %v6312_v26, 0.0 }
 0x6a0   :  { %v4935_v29 = vpop.f32.mrf.mxu2  ;;  %v5523_v30 = vpop.f32.mrf.mxu3 }
 0x6a1   :  { %v6704_v31 = vpack.c.bf16 %v6508_v27, %v6508_v27  ;;  %v5917_v32 = vmax.f32 %v4935_v29, %v5523_v30 }
 0x6a3   :  { %6901 = vst.msk [vmem:[%s11885_s3 + $0x308] sm:$0xf] %vm6706_vm2, %v6704_v31  ;;  %v6113_v33 = vmax.f32 %v5721_v28, %v5917_v32 }
 0x6a5   :  { %v6313_v34 = vadd.f32 %v11450_v14, %v6113_v33 }
 0x6a7   :  { %v6509_v35 = vmax.f32 %v6313_v34, 0.0 }
 0x6a9   :  { %v6705_v36 = vpack.c.bf16 %v6509_v35, %v6509_v35 }
 0x6ab   :  { %6902 = vst.msk [vmem:[%s11885_s3 + $0x30c] sm:$0xf] %vm6706_vm2, %v6705_v36 }

// kernel: simple_cnn_forward.3
= control target key start
LH: loop header
LB: loop body
LE: loop exit
PB: predicated region body
PF: predicated region fallthrough
CT: control target
= control target key end

     0   :  { %vm2033_vm0 = vcmask 261120   ;;  %vm4074_vm1 = vcmask 523264   ;;  %s8963_s10 = smov 64   ;;  %vm4080_vm2 = vcmask 1048064   ;;  %s12439_s1 = inlined_call_operand.vmem [shape: bf16[288,64], index: 1, kind: input, shape index: {}]   ;;  %s12440_s0 = inlined_call_operand.vmem [shape: bf16[1568,288], index: 0, kind: input, shape index: {}]   ;;  %s12441_s2 = inlined_call_operand.vmem [shape: f32[1,64], index: 2, kind: input, shape index: {}]   ;;  %s12442_s3 = inlined_call_operand.vmem [shape: bf16[3136,128], index: 3, kind: input, shape index: {}]   ;;  %s12443_s4 = inlined_call_operand.vmem [shape: f32[1,128], index: 4, kind: input, shape index: {}]   ;;  %s12444_s6 = inlined_call_operand.vmem [shape: f32[1,128], index: 6, kind: input, shape index: {}]   ;;  %s12445_s5 = inlined_call_operand.vmem [shape: bf16[128,128], index: 5, kind: input, shape index: {}]   ;;  %s12446_s7 = inlined_call_operand.vmem [shape: f32[8,128], index: 7, kind: output, shape index: {}]  }
   0x1   :  { %v8723_v0 = vld [vmem:[%s12439_s1 + $0x38] sm:$0xff]  ;;  %v8733_v2 = vld [vmem:[%s12439_s1 + $0x88] sm:$0xff]  ;;  %v8722_v3 = vld [vmem:[%s12439_s1 + $0x30] sm:$0xff] }
   0x2   :  { %v8731_v1 = vld [vmem:[%s12439_s1 + $0x78] sm:$0xff]  ;;  %2328 = vmatpush.bf16.msra.mxu0 %v8723_v0  ;;  %v8730_v4 = vld [vmem:[%s12439_s1 + $0x70] sm:$0xff]  ;;  %3332 = vmatpush.bf16.msra.mxu2 %v8733_v2  ;;  %v8732_v5 = vld [vmem:[%s12439_s1 + $0x80] sm:$0xff] }
   0x3   :  { %2827 = vmatpush.bf16.msra.mxu1 %v8731_v1  ;;  %v6269_v6 = vld [vmem:[%s12440_s0 + $0x8] sm:$0xf]  ;;  %v8424_v7 = vld [vmem:[%s12440_s0 + $0x10] sm:$0xf0]  ;;  %8938 = vmatpush.bf16.msra.mxu3 %v8723_v0  ;;  %v8720_v11 = vld [vmem:[%s12439_s1 + $0x20] sm:$0xff] }
   0x4   :  { %v6270_v8 = vor.u32 %v8424_v7, %v6269_v6  ;;  %v8721_v9 = vld [vmem:[%s12439_s1 + $0x28] sm:$0xff]  ;;  %v8728_v12 = vld [vmem:[%s12439_s1 + $0x60] sm:$0xff]  ;;  %v8719_v13 = vld [vmem:[%s12439_s1 + $0x18] sm:$0xff] }
   0x5   :  { %v8729_v10 = vld [vmem:[%s12439_s1 + $0x68] sm:$0xff]  ;;  %v8727_v14 = vld [vmem:[%s12439_s1 + $0x58] sm:$0xff]  ;;  %v8718_v15 = vld [vmem:[%s12439_s1 + $0x10] sm:$0xff] }
   0x6   :  { %2329 = vmatpush.bf16.msra.mxu0 %v8722_v3  ;;  %3333 = vmatpush.bf16.msra.mxu2 %v8732_v5  ;;  %v8726_v16 = vld [vmem:[%s12439_s1 + $0x50] sm:$0xff]  ;;  %v6281_v17 = vld [vmem:[%s12440_s0 + $0x20] sm:$0xf]  ;;  %v8427_v18 = vld [vmem:[%s12440_s0 + $0x28] sm:$0xf0] }
   0x7   :  { %2828 = vmatpush.bf16.msra.mxu1 %v8730_v4  ;;  %8939 = vmatpush.bf16.msra.mxu3 %v8722_v3  ;;  %v6282_v19 = vor.u32 %v8427_v18, %v6281_v17  ;;  %v8717_v20 = vld [vmem:[%s12439_s1 + $0x8] sm:$0xff]  ;;  %v8716_v22 = vld [vmem:[%s12439_s1] sm:$0xff]  ;;  %v6263_v27 = vld [vmem:[%s12440_s0 + $0xc] sm:$0xf0] }
   0x8   :  { %v8725_v21 = vld [vmem:[%s12439_s1 + $0x48] sm:$0xff]  ;;  %v6261_v23 = vld [vmem:[%s12440_s0] sm:$0xf]  ;;  %v8422_v26 = vld [vmem:[%s12440_s0 + $0x4] sm:$0xf] }
   0x9   :  { %7507 = vmatmul.msk.bf16.vlgmr.msra.gmra.mxu2 %vm2033_vm0, %v6270_v8  ;;  %v8423_v24 = vld [vmem:[%s12440_s0 + $0x8] sm:$0xf0]  ;;  %v8724_v25 = vld [vmem:[%s12439_s1 + $0x40] sm:$0xff]  ;;  %v6266_v29 = vor.u32 %v8422_v26, %v6263_v27  ;;  %v6293_v30 = vld [vmem:[%s12440_s0 + $0x38] sm:$0xf] }
   0xa   :  { %2330 = vmatpush.bf16.msra.mxu0 %v8721_v9  ;;  %v6262_v28 = vor.u32 %v8423_v24, %v6261_v23  ;;  %v8430_v31 = vld [vmem:[%s12440_s0 + $0x40] sm:$0xf0]  ;;  %v6273_v33 = vld [vmem:[%s12440_s0 + $0x18] sm:$0xf]  ;;  %v8425_v35 = vld [vmem:[%s12440_s0 + $0x1c] sm:$0xf] }
   0xb   :  { %2829 = vmatpush.bf16.msra.mxu1 %v8729_v10  ;;  %8940 = vmatpush.bf16.msra.mxu3 %v8721_v9  ;;  %v6294_v32 = vor.u32 %v8430_v31, %v6293_v30  ;;  %v8426_v34 = vld [vmem:[%s12440_s0 + $0x20] sm:$0xf0]  ;;  %v6275_v36 = vld [vmem:[%s12440_s0 + $0x24] sm:$0xf0]  ;;  %v6305_v39 = vld [vmem:[%s12440_s0 + $0x50] sm:$0xf] }
   0xc   :  { %v6274_v37 = vor.u32 %v8426_v34, %v6273_v33  ;;  %v6278_v38 = vor.u32 %v8425_v35, %v6275_v36  ;;  %v8433_v40 = vld [vmem:[%s12440_s0 + $0x58] sm:$0xf0]  ;;  %v6285_v42 = vld [vmem:[%s12440_s0 + $0x30] sm:$0xf]  ;;  %v8428_v44 = vld [vmem:[%s12440_s0 + $0x34] sm:$0xf] }
   0xd   :  { %v6306_v41 = vor.u32 %v8433_v40, %v6305_v39  ;;  %v8429_v43 = vld [vmem:[%s12440_s0 + $0x38] sm:$0xf0]  ;;  %v6287_v45 = vld [vmem:[%s12440_s0 + $0x3c] sm:$0xf0]  ;;  %v6317_v48 = vld [vmem:[%s12440_s0 + $0x68] sm:$0xf] }
   0xe   :  { %2331 = vmatpush.bf16.msra.mxu0 %v8720_v11  ;;  %v6286_v46 = vor.u32 %v8429_v43, %v6285_v42  ;;  %v6290_v47 = vor.u32 %v8428_v44, %v6287_v45  ;;  %v8436_v49 = vld [vmem:[%s12440_s0 + $0x70] sm:$0xf0]  ;;  %v6297_v51 = vld [vmem:[%s12440_s0 + $0x48] sm:$0xf]  ;;  %v8431_v53 = vld [vmem:[%s12440_s0 + $0x4c] sm:$0xf] }
   0xf   :  { %2830 = vmatpush.bf16.msra.mxu1 %v8728_v12  ;;  %8941 = vmatpush.bf16.msra.mxu3 %v8720_v11  ;;  %v6318_v50 = vor.u32 %v8436_v49, %v6317_v48  ;;  %v8432_v52 = vld [vmem:[%s12440_s0 + $0x50] sm:$0xf0]  ;;  %v6299_v54 = vld [vmem:[%s12440_s0 + $0x54] sm:$0xf0]  ;;  %v6329_v57 = vld [vmem:[%s12440_s0 + $0x80] sm:$0xf] }
  0x10   :  { %v6298_v55 = vor.u32 %v8432_v52, %v6297_v51  ;;  %v6302_v56 = vor.u32 %v8431_v53, %v6299_v54  ;;  %v8439_v58 = vld [vmem:[%s12440_s0 + $0x88] sm:$0xf0]  ;;  %v6309_v60 = vld [vmem:[%s12440_s0 + $0x60] sm:$0xf]  ;;  %v8434_v62 = vld [vmem:[%s12440_s0 + $0x64] sm:$0xf] }
  0x11   :  { %v6330_v59 = vor.u32 %v8439_v58, %v6329_v57  ;;  %v8435_v61 = vld [vmem:[%s12440_s0 + $0x68] sm:$0xf0]  ;;  %v6311_v63 = vld [vmem:[%s12440_s0 + $0x6c] sm:$0xf0]  ;;  %v6341_v2 = vld [vmem:[%s12440_s0 + $0x98] sm:$0xf] }
  0x12   :  { %2332 = vmatpush.bf16.msra.mxu0 %v8719_v13  ;;  %v6310_v0 = vor.u32 %v8435_v61, %v6309_v60  ;;  %v8442_v3 = vld [vmem:[%s12440_s0 + $0xa0] sm:$0xf0]  ;;  %v6321_v5 = vld [vmem:[%s12440_s0 + $0x78] sm:$0xf]  ;;  %v8437_v7 = vld [vmem:[%s12440_s0 + $0x7c] sm:$0xf] }
  0x13   :  { %2831 = vmatpush.bf16.msra.mxu1 %v8727_v14  ;;  %8942 = vmatpush.bf16.msra.mxu3 %v8719_v13  ;;  %v8438_v6 = vld [vmem:[%s12440_s0 + $0x80] sm:$0xf0]  ;;  %v6323_v8 = vld [vmem:[%s12440_s0 + $0x84] sm:$0xf0]  ;;  %v6353_v11 = vld [vmem:[%s12440_s0 + $0xb0] sm:$0xf] }
  0x14   :  { %v6322_v9 = vor.u32 %v8438_v6, %v6321_v5  ;;  %v6335_v17 = vld [vmem:[%s12440_s0 + $0x9c] sm:$0xf0]  ;;  %v6345_v23 = vld [vmem:[%s12440_s0 + $0xa8] sm:$0xf]  ;;  %v8444_v24 = vld [vmem:[%s12440_s0 + $0xb0] sm:$0xf0] }
  0x15   :  { %v6347_v26 = vld [vmem:[%s12440_s0 + $0xb4] sm:$0xf0]  ;;  %v6377_v30 = vld [vmem:[%s12440_s0 + $0xe0] sm:$0xf]  ;;  %v8451_v31 = vld [vmem:[%s12440_s0 + $0xe8] sm:$0xf0] }
  0x16   :  { %2333 = vmatpush.bf16.msra.mxu0 %v8718_v15  ;;  %v6378_v33 = vor.u32 %v8451_v31, %v6377_v30  ;;  %v6357_v34 = vld [vmem:[%s12440_s0 + $0xc0] sm:$0xf]  ;;  %v8447_v35 = vld [vmem:[%s12440_s0 + $0xc8] sm:$0xf0]  ;;  %v8446_v36 = vld [vmem:[%s12440_s0 + $0xc4] sm:$0xf] }
  0x17   :  { %2832 = vmatpush.bf16.msra.mxu1 %v8726_v16  ;;  %8943 = vmatpush.bf16.msra.mxu3 %v8718_v15  ;;  %v8441_v15 = vld [vmem:[%s12440_s0 + $0x98] sm:$0xf0]  ;;  %v6358_v39 = vor.u32 %v8447_v35, %v6357_v34  ;;  %v6389_v45 = vld [vmem:[%s12440_s0 + $0xf8] sm:$0xf]  ;;  %v8450_v54 = vld [vmem:[%s12440_s0 + $0xe0] sm:$0xf0] }
  0x18   :  { %v6369_v53 = vld [vmem:[%s12440_s0 + $0xd8] sm:$0xf] }
  0x19   :  { %7508 = vmatmul.msk.bf16.gmra.mxu2 %vm2033_vm0, %v6282_v19  ;;  %v6370_v58 = vor.u32 %v8450_v54, %v6369_v53  ;;  %v6395_v30 = vld [vmem:[%s12440_s0 + $0x114] sm:$0xf0] }
  0x1a   :  { %2334 = vmatpush.bf16.msra.mxu0 %v8717_v20 }
  0x1b   :  { %2833 = vmatpush.bf16.msra.mxu1 %v8725_v21  ;;  %8944 = vmatpush.bf16.msra.mxu3 %v8717_v20  ;;  %v6365_v20 = vld [vmem:[%s12440_s0 + $0xc8] sm:$0xf] }
  0x1e   :  { %2335 = vmatpush.bf16.msra.mxu0 %v8716_v22 }
  0x1f   :  { %2834 = vmatpush.bf16.msra.mxu1 %v8724_v25  ;;  %8945 = vmatpush.bf16.msra.mxu3 %v8716_v22 }
  0x21   :  { %2336 = vmatmul.bf16.vlgmr.msra.gmra.mxu0 %v6262_v28  ;;  %v6346_v28 = vor.u32 %v8444_v24, %v6345_v23 }
  0x22   :  { %2835 = vmatmul.bf16.vlgmr.msra.gmra.mxu1 %v6266_v29 }
  0x23   :  { %8946 = vmatpush.bf16.msrb.mxu3 %v8731_v1  ;;  %v6314_v1 = vor.u32 %v8434_v62, %v6311_v63 }
  0x27   :  { %8947 = vmatpush.bf16.msrb.mxu3 %v8730_v4  ;;  %v6342_v4 = vor.u32 %v8442_v3, %v6341_v2 }
  0x29   :  { %7509 = vmatmul.msk.bf16.gmra.mxu2 %vm2033_vm0, %v6294_v32 }
  0x2b   :  { %8948 = vmatpush.bf16.msrb.mxu3 %v8729_v10  ;;  %v6326_v10 = vor.u32 %v8437_v7, %v6323_v8  ;;  %v6381_v8 = vld [vmem:[%s12440_s0 + $0xf0] sm:$0xf] }
  0x2f   :  { %8949 = vmatpush.bf16.msrb.mxu3 %v8728_v12  ;;  %v8445_v12 = vld [vmem:[%s12440_s0 + $0xb8] sm:$0xf0] }
  0x30   :  { %v6354_v13 = vor.u32 %v8445_v12, %v6353_v11  ;;  %v6383_v11 = vld [vmem:[%s12440_s0 + $0xfc] sm:$0xf0] }
  0x31   :  { %2341 = vmatmul.bf16.gmra.mxu0 %v6274_v37  ;;  %v6359_v37 = vld [vmem:[%s12440_s0 + $0xcc] sm:$0xf0] }
  0x32   :  { %2840 = vmatmul.bf16.gmra.mxu1 %v6278_v38 }
  0x33   :  { %8950 = vmatpush.bf16.msrb.mxu3 %v8727_v14  ;;  %v6333_v14 = vld [vmem:[%s12440_s0 + $0x90] sm:$0xf] }
  0x34   :  { %v6334_v18 = vor.u32 %v8441_v15, %v6333_v14 }
  0x37   :  { %8951 = vmatpush.bf16.msrb.mxu3 %v8726_v16  ;;  %v8440_v16 = vld [vmem:[%s12440_s0 + $0x94] sm:$0xf] }
  0x38   :  { %v6338_v19 = vor.u32 %v8440_v16, %v6335_v17 }
  0x39   :  { %7510 = vmatmul.msk.bf16.gmra.mxu2 %vm2033_vm0, %v6306_v41  ;;  %v6362_v41 = vor.u32 %v8446_v36, %v6359_v37 }
  0x3b   :  { %8952 = vmatpush.bf16.msrb.mxu3 %v8725_v21  ;;  %v8448_v21 = vld [vmem:[%s12440_s0 + $0xd0] sm:$0xf0] }
  0x3c   :  { %v6366_v22 = vor.u32 %v8448_v21, %v6365_v20  ;;  %v8460_v20 = vld [vmem:[%s12440_s0 + $0x130] sm:$0xf0] }
  0x3f   :  { %8953 = vmatpush.bf16.msrb.mxu3 %v8724_v25  ;;  %v8443_v25 = vld [vmem:[%s12440_s0 + $0xac] sm:$0xf] }
  0x40   :  { %v6350_v29 = vor.u32 %v8443_v25, %v6347_v26 }
  0x41   :  { %2346 = vmatmul.bf16.gmra.mxu0 %v6286_v46  ;;  %v8454_v46 = vld [vmem:[%s12440_s0 + $0x100] sm:$0xf0] }
  0x42   :  { %2845 = vmatmul.bf16.gmra.mxu1 %v6290_v47  ;;  %v6390_v49 = vor.u32 %v8454_v46, %v6389_v45 }
  0x49   :  { %7511 = vmatmul.msk.bf16.gmra.mxu2 %vm2033_vm0, %v6318_v50 }
  0x51   :  { %2351 = vmatmul.bf16.gmra.mxu0 %v6298_v55  ;;  %v8449_v55 = vld [vmem:[%s12440_s0 + $0xdc] sm:$0xf] }
  0x52   :  { %2850 = vmatmul.bf16.gmra.mxu1 %v6302_v56  ;;  %v6371_v56 = vld [vmem:[%s12440_s0 + $0xe4] sm:$0xf0] }
  0x53   :  { %v6374_v60 = vor.u32 %v8449_v55, %v6371_v56 }
  0x59   :  { %7512 = vmatmul.msk.bf16.gmra.mxu2 %vm2033_vm0, %v6330_v59 }
  0x61   :  { %2356 = vmatmul.bf16.gmra.mxu0 %v6310_v0  ;;  %v6401_v0 = vld [vmem:[%s12440_s0 + $0x110] sm:$0xf] }
  0x62   :  { %2855 = vmatmul.bf16.gmra.mxu1 %v6314_v1  ;;  %v8457_v1 = vld [vmem:[%s12440_s0 + $0x118] sm:$0xf0] }
  0x69   :  { %7513 = vmatmul.msk.bf16.gmra.mxu2 %vm2033_vm0, %v6342_v4  ;;  %v6402_v4 = vor.u32 %v8457_v1, %v6401_v0 }
  0x71   :  { %2361 = vmatmul.bf16.gmra.mxu0 %v6322_v9  ;;  %v8453_v9 = vld [vmem:[%s12440_s0 + $0xf8] sm:$0xf0] }
  0x72   :  { %2860 = vmatmul.bf16.gmra.mxu1 %v6326_v10  ;;  %v8452_v10 = vld [vmem:[%s12440_s0 + $0xf4] sm:$0xf] }
  0x73   :  { %v6386_v15 = vor.u32 %v8452_v10, %v6383_v11 }
  0x79   :  { %7514 = vmatmul.msk.bf16.gmra.mxu2 %vm2033_vm0, %v6354_v13  ;;  %v6382_v13 = vor.u32 %v8453_v9, %v6381_v8  ;;  %v6419_v8 = vld [vmem:[%s12440_s0 + $0x144] sm:$0xf0] }
  0x81   :  { %2366 = vmatmul.bf16.gmra.mxu0 %v6334_v18 }
  0x82   :  { %2865 = vmatmul.bf16.gmra.mxu1 %v6338_v19  ;;  %v6413_v19 = vld [vmem:[%s12440_s0 + $0x128] sm:$0xf] }
  0x83   :  { %v6414_v23 = vor.u32 %v8460_v20, %v6413_v19 }
  0x89   :  { %7515 = vmatmul.msk.bf16.gmra.mxu2 %vm2033_vm0, %v6366_v22 }
  0x8c   :  { %v3335_v27 = vpop.f32.mrf.mxu2 }
  0x91   :  { %2371 = vmatmul.bf16.gmra.mxu0 %v6346_v28  ;;  %v8456_v28 = vld [vmem:[%s12440_s0 + $0x110] sm:$0xf0] }
  0x92   :  { %2870 = vmatmul.bf16.gmra.mxu1 %v6350_v29  ;;  %v8455_v29 = vld [vmem:[%s12440_s0 + $0x10c] sm:$0xf] }
  0x93   :  { %v6398_v34 = vor.u32 %v8455_v29, %v6395_v30  ;;  %v6431_v29 = vld [vmem:[%s12440_s0 + $0x15c] sm:$0xf0] }
  0x94   :  { %v3337_v32 = vpop.f32.mrf.mxu2 }
  0x99   :  { %7516 = vmatmul.msk.bf16.gmra.mxu2 %vm2033_vm0, %v6378_v33 }
  0x9c   :  { %v3340_v38 = vpop.f32.mrf.mxu2 }
  0x9e   :  { %v2337_v40 = vpop.f32.mrf.mxu0 }
  0x9f   :  { %v2836_v42 = vpop.f32.mrf.mxu1 }
  0xa0   :  { %v2837_v43 = vadd.f32 %v2836_v42, %v2337_v40 }
  0xa1   :  { %2376 = vmatmul.bf16.gmra.mxu0 %v6358_v39  ;;  %v8463_v39 = vld [vmem:[%s12440_s0 + $0x148] sm:$0xf0] }
  0xa2   :  { %v9236_v44 = vadd.f32 %v3335_v27, %v2837_v43  ;;  %2875 = vmatmul.bf16.gmra.mxu1 %v6362_v41  ;;  %v6393_v27 = vld [vmem:[%s12440_s0 + $0x108] sm:$0xf] }
  0xa4   :  { %12528 = vst [vmem:[#allocation3_spill] sm:$0xff] %v9236_v44  ;;  %v3342_v47 = vpop.f32.mrf.mxu2 }
  0xa6   :  { %v2339_v48 = vpop.f32.mrf.mxu0 }
  0xa7   :  { %v2838_v50 = vpop.f32.mrf.mxu1 }
  0xa8   :  { %v2839_v51 = vadd.f32 %v2838_v50, %v2339_v48  ;;  %v8459_v48 = vld [vmem:[%s12440_s0 + $0x128] sm:$0xf0]  ;;  %v6407_v50 = vld [vmem:[%s12440_s0 + $0x12c] sm:$0xf0] }
  0xa9   :  { %7517 = vmatmul.msk.bf16.gmra.mxu2 %vm2033_vm0, %v6390_v49  ;;  %v8458_v49 = vld [vmem:[%s12440_s0 + $0x124] sm:$0xf] }
  0xaa   :  { %v9244_v52 = vadd.f32 %v3337_v32, %v2839_v51  ;;  %v6394_v32 = vor.u32 %v8456_v28, %v6393_v27  ;;  %v6410_v55 = vor.u32 %v8458_v49, %v6407_v50  ;;  %v8465_v27 = vld [vmem:[%s12440_s0 + $0x158] sm:$0xf0]  ;;  %v8464_v28 = vld [vmem:[%s12440_s0 + $0x154] sm:$0xf]  ;;  %v8467_v50 = vld [vmem:[%s12440_s0 + $0x16c] sm:$0xf] }
  0xab   :  { %v8468_v49 = vld [vmem:[%s12440_s0 + $0x170] sm:$0xf0] }
  0xac   :  { %12529 = vst [vmem:[#allocation4_spill] sm:$0xff] %v9244_v52  ;;  %v3345_v57 = vpop.f32.mrf.mxu2 }
  0xae   :  { %v2342_v59 = vpop.f32.mrf.mxu0 }
  0xaf   :  { %v2841_v61 = vpop.f32.mrf.mxu1 }
  0xb0   :  { %v2842_v62 = vadd.f32 %v2841_v61, %v2342_v59  ;;  %v6437_v59 = vld [vmem:[%s12440_s0 + $0x158] sm:$0xf] }
  0xb1   :  { %2381 = vmatmul.bf16.gmra.mxu0 %v6370_v58 }
  0xb2   :  { %v9259_v63 = vadd.f32 %v3340_v38, %v2842_v62  ;;  %2880 = vmatmul.bf16.gmra.mxu1 %v6374_v60  ;;  %v6425_v38 = vld [vmem:[%s12440_s0 + $0x140] sm:$0xf]  ;;  %v8466_v60 = vld [vmem:[%s12440_s0 + $0x160] sm:$0xf0] }
  0xb3   :  { %v6426_v42 = vor.u32 %v8463_v39, %v6425_v38  ;;  %v6438_v0 = vor.u32 %v8466_v60, %v6437_v59  ;;  %v6461_v38 = vld [vmem:[%s12440_s0 + $0x188] sm:$0xf]  ;;  %v8472_v39 = vld [vmem:[%s12440_s0 + $0x190] sm:$0xf0] }
  0xb4   :  { %12530 = vst [vmem:[#allocation5_spill] sm:$0xff] %v9259_v63  ;;  %v3347_v2 = vpop.f32.mrf.mxu2  ;;  %v7391_v63 = vld [vmem:[%s12440_s0 + $0x8dc] sm:$0xf0] }
  0xb6   :  { %v2344_v3 = vpop.f32.mrf.mxu0 }
  0xb7   :  { %v2843_v5 = vpop.f32.mrf.mxu1 }
  0xb8   :  { %v2844_v6 = vadd.f32 %v2843_v5, %v2344_v3  ;;  %v8462_v5 = vld [vmem:[%s12440_s0 + $0x140] sm:$0xf0] }
  0xb9   :  { %7518 = vmatmul.msk.bf16.gmra.mxu2 %vm2033_vm0, %v6402_v4  ;;  %v6417_v4 = vld [vmem:[%s12440_s0 + $0x138] sm:$0xf] }
  0xba   :  { %v9267_v7 = vadd.f32 %v3342_v47, %v2844_v6  ;;  %v6405_v47 = vld [vmem:[%s12440_s0 + $0x120] sm:$0xf]  ;;  %v8461_v6 = vld [vmem:[%s12440_s0 + $0x13c] sm:$0xf]  ;;  %v6418_v10 = vor.u32 %v8462_v5, %v6417_v4 }
  0xbb   :  { %v6406_v53 = vor.u32 %v8459_v48, %v6405_v47  ;;  %v6441_v48 = vld [vmem:[%s12440_s0 + $0x168] sm:$0xf] }
  0xbc   :  { %12531 = vst [vmem:[#allocation6_spill] sm:$0xff] %v9267_v7  ;;  %v3350_v12 = vpop.f32.mrf.mxu2 }
  0xbe   :  { %v2347_v14 = vpop.f32.mrf.mxu0 }
  0xbf   :  { %v2846_v16 = vpop.f32.mrf.mxu1 }
  0xc0   :  { %v2847_v17 = vadd.f32 %v2846_v16, %v2347_v14  ;;  %v6449_v16 = vld [vmem:[%s12440_s0 + $0x170] sm:$0xf] }
  0xc1   :  { %2386 = vmatmul.bf16.gmra.mxu0 %v6382_v13 }
  0xc2   :  { %v9282_v18 = vadd.f32 %v3345_v57, %v2847_v17  ;;  %2885 = vmatmul.bf16.gmra.mxu1 %v6386_v15  ;;  %v8469_v17 = vld [vmem:[%s12440_s0 + $0x178] sm:$0xf0] }
  0xc4   :  { %12532 = vst [vmem:[#allocation7_spill] sm:$0xff] %v9282_v18  ;;  %v3352_v21 = vpop.f32.mrf.mxu2 }
  0xc6   :  { %v2349_v22 = vpop.f32.mrf.mxu0 }
  0xc7   :  { %v2848_v24 = vpop.f32.mrf.mxu1 }
  0xc8   :  { %v2849_v25 = vadd.f32 %v2848_v24, %v2349_v22 }
  0xc9   :  { %7519 = vmatmul.msk.bf16.gmra.mxu2 %vm2033_vm0, %v6414_v23 }
  0xca   :  { %v9290_v26 = vadd.f32 %v3347_v2, %v2849_v25  ;;  %v6429_v25 = vld [vmem:[%s12440_s0 + $0x150] sm:$0xf] }
  0xcc   :  { %12533 = vst [vmem:[#allocation8_spill] sm:$0xff] %v9290_v26  ;;  %v3355_v31 = vpop.f32.mrf.mxu2 }
  0xce   :  { %v2352_v33 = vpop.f32.mrf.mxu0 }
  0xcf   :  { %v2851_v35 = vpop.f32.mrf.mxu1 }
  0xd0   :  { %v2852_v36 = vadd.f32 %v2851_v35, %v2352_v33  ;;  %v6434_v33 = vor.u32 %v8464_v28, %v6431_v29 }
  0xd1   :  { %2391 = vmatmul.bf16.gmra.mxu0 %v6394_v32 }
  0xd2   :  { %v9305_v37 = vadd.f32 %v3350_v12, %v2852_v36  ;;  %2890 = vmatmul.bf16.gmra.mxu1 %v6398_v34  ;;  %v6422_v12 = vor.u32 %v8461_v6, %v6419_v8  ;;  %v6453_v8 = vld [vmem:[%s12440_s0 + $0x180] sm:$0xf] }
  0xd4   :  { %12534 = vst [vmem:[#allocation9_spill] sm:$0xff] %v9305_v37  ;;  %v3357_v40 = vpop.f32.mrf.mxu2  ;;  %v7379_v37 = vld [vmem:[%s12440_s0 + $0x8c4] sm:$0xf0] }
  0xd6   :  { %v2354_v41 = vpop.f32.mrf.mxu0 }
  0xd7   :  { %v2853_v43 = vpop.f32.mrf.mxu1 }
  0xd8   :  { %v2854_v45 = vadd.f32 %v2853_v43, %v2354_v41 }
  0xd9   :  { %7520 = vmatmul.msk.bf16.gmra.mxu2 %vm2033_vm0, %v6426_v42  ;;  %v6462_v42 = vor.u32 %v8472_v39, %v6461_v38 }
  0xda   :  { %v9313_v46 = vadd.f32 %v3352_v21, %v2854_v45  ;;  %v6450_v21 = vor.u32 %v8469_v17, %v6449_v16 }
  0xdc   :  { %12535 = vst [vmem:[#allocation10_spill] sm:$0xff] %v9313_v46  ;;  %v3360_v51 = vpop.f32.mrf.mxu2 }
  0xde   :  { %v2357_v54 = vpop.f32.mrf.mxu0 }
  0xdf   :  { %v2856_v56 = vpop.f32.mrf.mxu1 }
  0xe0   :  { %v2857_v57 = vadd.f32 %v2856_v56, %v2357_v54  ;;  %v6442_v54 = vor.u32 %v8468_v49, %v6441_v48  ;;  %v8481_v48 = vld [vmem:[%s12440_s0 + $0x1d8] sm:$0xf0] }
  0xe1   :  { %2396 = vmatmul.bf16.gmra.mxu0 %v6406_v53 }
  0xe2   :  { %v9328_v58 = vadd.f32 %v3355_v31, %v2857_v57  ;;  %2895 = vmatmul.bf16.gmra.mxu1 %v6410_v55  ;;  %v6430_v31 = vor.u32 %v8465_v27, %v6429_v25 }
  0xe4   :  { %12536 = vst [vmem:[#allocation11_spill] sm:$0xff] %v9328_v58  ;;  %v3362_v61 = vpop.f32.mrf.mxu2 }
  0xe6   :  { %v2359_v62 = vpop.f32.mrf.mxu0 }
  0xe7   :  { %v2858_v1 = vpop.f32.mrf.mxu1 }
  0xe8   :  { %v2859_v2 = vadd.f32 %v2858_v1, %v2359_v62  ;;  %v8475_v62 = vld [vmem:[%s12440_s0 + $0x1a8] sm:$0xf0] }
  0xe9   :  { %7521 = vmatmul.msk.bf16.gmra.mxu2 %vm2033_vm0, %v6438_v0 }
  0xea   :  { %v9336_v3 = vadd.f32 %v3357_v40, %v2859_v2 }
  0xec   :  { %12537 = vst [vmem:[#allocation12_spill] sm:$0xff] %v9336_v3  ;;  %v3365_v9 = vpop.f32.mrf.mxu2 }
  0xee   :  { %v2362_v11 = vpop.f32.mrf.mxu0 }
  0xef   :  { %v2861_v13 = vpop.f32.mrf.mxu1 }
  0xf0   :  { %v2862_v14 = vadd.f32 %v2861_v13, %v2362_v11  ;;  %v6455_v11 = vld [vmem:[%s12440_s0 + $0x18c] sm:$0xf0] }
  0xf1   :  { %2401 = vmatmul.bf16.gmra.mxu0 %v6418_v10  ;;  %v8470_v10 = vld [vmem:[%s12440_s0 + $0x184] sm:$0xf] }
  0xf2   :  { %v9351_v15 = vadd.f32 %v3360_v51, %v2862_v14  ;;  %2900 = vmatmul.bf16.gmra.mxu1 %v6422_v12  ;;  %v6443_v51 = vld [vmem:[%s12440_s0 + $0x174] sm:$0xf0]  ;;  %v6458_v16 = vor.u32 %v8470_v10, %v6455_v11  ;;  %v8484_v10 = vld [vmem:[%s12440_s0 + $0x1f0] sm:$0xf0] }
  0xf3   :  { %v6446_v56 = vor.u32 %v8467_v50, %v6443_v51 }
  0xf4   :  { %12538 = vst [vmem:[#allocation13_spill] sm:$0xff] %v9351_v15  ;;  %v3367_v19 = vpop.f32.mrf.mxu2  ;;  %v7367_v15 = vld [vmem:[%s12440_s0 + $0x8ac] sm:$0xf0] }
  0xf6   :  { %v2364_v20 = vpop.f32.mrf.mxu0 }
  0xf7   :  { %v2863_v22 = vpop.f32.mrf.mxu1 }
  0xf8   :  { %v2864_v23 = vadd.f32 %v2863_v22, %v2364_v20  ;;  %v8478_v22 = vld [vmem:[%s12440_s0 + $0x1c0] sm:$0xf0] }
  0xf9   :  { %7522 = vmatmul.msk.bf16.gmra.mxu2 %vm2033_vm0, %v6450_v21  ;;  %v6485_v21 = vld [vmem:[%s12440_s0 + $0x1b8] sm:$0xf] }
  0xfa   :  { %v9359_v24 = vadd.f32 %v3362_v61, %v2864_v23  ;;  %v6473_v61 = vld [vmem:[%s12440_s0 + $0x1a0] sm:$0xf]  ;;  %v6486_v27 = vor.u32 %v8478_v22, %v6485_v21  ;;  %v8480_v21 = vld [vmem:[%s12440_s0 + $0x1d0] sm:$0xf0]  ;;  %v8479_v22 = vld [vmem:[%s12440_s0 + $0x1cc] sm:$0xf] }
  0xfb   :  { %v6474_v2 = vor.u32 %v8475_v62, %v6473_v61  ;;  %v6479_v61 = vld [vmem:[%s12440_s0 + $0x1bc] sm:$0xf0] }
  0xfc   :  { %12539 = vst [vmem:[#allocation14_spill] sm:$0xff] %v9359_v24  ;;  %v3370_v30 = vpop.f32.mrf.mxu2 }
  0xfe   :  { %v2367_v32 = vpop.f32.mrf.mxu0 }
  0xff   :  { %v2866_v34 = vpop.f32.mrf.mxu1 }
 0x100   :  { %v2867_v35 = vadd.f32 %v2866_v34, %v2367_v32  ;;  %v8474_v32 = vld [vmem:[%s12440_s0 + $0x1a0] sm:$0xf0]  ;;  %v6467_v34 = vld [vmem:[%s12440_s0 + $0x1a4] sm:$0xf0] }
 0x101   :  { %2406 = vmatmul.bf16.gmra.mxu0 %v6430_v31  ;;  %v6465_v31 = vld [vmem:[%s12440_s0 + $0x198] sm:$0xf] }
 0x102   :  { %v9374_v36 = vadd.f32 %v3365_v9, %v2867_v35  ;;  %2905 = vmatmul.bf16.gmra.mxu1 %v6434_v33  ;;  %v8471_v9 = vld [vmem:[%s12440_s0 + $0x188] sm:$0xf0]  ;;  %v8473_v33 = vld [vmem:[%s12440_s0 + $0x19c] sm:$0xf]  ;;  %v6466_v38 = vor.u32 %v8474_v32, %v6465_v31 }
 0x103   :  { %v6454_v13 = vor.u32 %v8471_v9, %v6453_v8  ;;  %v6509_v9 = vld [vmem:[%s12440_s0 + $0x1e8] sm:$0xf] }
 0x104   :  { %12540 = vst [vmem:[#allocation15_spill] sm:$0xff] %v9374_v36  ;;  %v3372_v40 = vpop.f32.mrf.mxu2 }
 0x106   :  { %v2369_v41 = vpop.f32.mrf.mxu0 }
 0x107   :  { %v2868_v43 = vpop.f32.mrf.mxu1 }
 0x108   :  { %v2869_v45 = vadd.f32 %v2868_v43, %v2369_v41 }
 0x109   :  { %7523 = vmatmul.msk.bf16.gmra.mxu2 %vm2033_vm0, %v6462_v42 }
 0x10a   :  { %v9382_v47 = vadd.f32 %v3367_v19, %v2869_v45  ;;  %v6497_v45 = vld [vmem:[%s12440_s0 + $0x1d0] sm:$0xf] }
 0x10b   :  { %v6498_v51 = vor.u32 %v8481_v48, %v6497_v45  ;;  %v6501_v48 = vld [vmem:[%s12440_s0 + $0x1e0] sm:$0xf] }
 0x10c   :  { %12541 = vst [vmem:[#allocation16_spill] sm:$0xff] %v9382_v47  ;;  %v3375_v53 = vpop.f32.mrf.mxu2 }
 0x10e   :  { %v2372_v55 = vpop.f32.mrf.mxu0 }
 0x10f   :  { %v2871_v57 = vpop.f32.mrf.mxu1 }
 0x110   :  { %v2872_v59 = vadd.f32 %v2871_v57, %v2372_v55  ;;  %v8477_v57 = vld [vmem:[%s12440_s0 + $0x1b8] sm:$0xf0] }
 0x111   :  { %2411 = vmatmul.bf16.gmra.mxu0 %v6442_v54 }
 0x112   :  { %v9397_v60 = vadd.f32 %v3370_v30, %v2872_v59  ;;  %2910 = vmatmul.bf16.gmra.mxu1 %v6446_v56  ;;  %v6477_v56 = vld [vmem:[%s12440_s0 + $0x1b0] sm:$0xf]  ;;  %v8476_v59 = vld [vmem:[%s12440_s0 + $0x1b4] sm:$0xf] }
 0x114   :  { %12542 = vst [vmem:[#allocation17_spill] sm:$0xff] %v9397_v60  ;;  %v3377_v0 = vpop.f32.mrf.mxu2  ;;  %v7355_v60 = vld [vmem:[%s12440_s0 + $0x894] sm:$0xf0] }
 0x116   :  { %v2374_v1 = vpop.f32.mrf.mxu0 }
 0x117   :  { %v2873_v4 = vpop.f32.mrf.mxu1 }
 0x118   :  { %v2874_v5 = vadd.f32 %v2873_v4, %v2374_v1 }
 0x119   :  { %7524 = vmatmul.msk.bf16.gmra.mxu2 %vm2033_vm0, %v6474_v2  ;;  %v6482_v2 = vor.u32 %v8476_v59, %v6479_v61 }
 0x11a   :  { %v9405_v6 = vadd.f32 %v3372_v40, %v2874_v5  ;;  %v6470_v40 = vor.u32 %v8473_v33, %v6467_v34  ;;  %v6521_v34 = vld [vmem:[%s12440_s0 + $0x200] sm:$0xf] }
 0x11c   :  { %12543 = vst [vmem:[#allocation18_spill] sm:$0xff] %v9405_v6  ;;  %v3380_v12 = vpop.f32.mrf.mxu2 }
 0x11e   :  { %v2377_v14 = vpop.f32.mrf.mxu0 }
 0x11f   :  { %v2876_v17 = vpop.f32.mrf.mxu1 }
 0x120   :  { %v2877_v19 = vadd.f32 %v2876_v17, %v2377_v14 }
 0x121   :  { %2416 = vmatmul.bf16.gmra.mxu0 %v6454_v13  ;;  %v6510_v13 = vor.u32 %v8484_v10, %v6509_v9 }
 0x122   :  { %v9420_v20 = vadd.f32 %v3375_v53, %v2877_v19  ;;  %2915 = vmatmul.bf16.gmra.mxu1 %v6458_v16  ;;  %v6489_v19 = vld [vmem:[%s12440_s0 + $0x1c8] sm:$0xf] }
 0x124   :  { %12544 = vst [vmem:[#allocation19_spill] sm:$0xff] %v9420_v20  ;;  %v3382_v23 = vpop.f32.mrf.mxu2  ;;  %v8695_v20 = vld [vmem:[%s12440_s0 + $0x88c] sm:$0xf] }
 0x126   :  { %v2379_v25 = vpop.f32.mrf.mxu0 }
 0x127   :  { %v2878_v28 = vpop.f32.mrf.mxu1 }
 0x128   :  { %v2879_v29 = vadd.f32 %v2878_v28, %v2379_v25 }
 0x129   :  { %7525 = vmatmul.msk.bf16.gmra.mxu2 %vm2033_vm0, %v6486_v27  ;;  %v6490_v27 = vor.u32 %v8480_v21, %v6489_v19 }
 0x12a   :  { %v9428_v30 = vadd.f32 %v3377_v0, %v2879_v29  ;;  %v6478_v0 = vor.u32 %v8477_v57, %v6477_v56 }
 0x12c   :  { %12545 = vst [vmem:[#allocation20_spill] sm:$0xff] %v9428_v30  ;;  %v3385_v35 = vpop.f32.mrf.mxu2 }
 0x12e   :  { %v2382_v39 = vpop.f32.mrf.mxu0 }
 0x12f   :  { %v2881_v41 = vpop.f32.mrf.mxu1 }
 0x130   :  { %v2882_v42 = vadd.f32 %v2881_v41, %v2382_v39 }
 0x131   :  { %2421 = vmatmul.bf16.gmra.mxu0 %v6466_v38 }
 0x132   :  { %v9443_v43 = vadd.f32 %v3380_v12, %v2882_v42  ;;  %2920 = vmatmul.bf16.gmra.mxu1 %v6470_v40 }
 0x134   :  { %12546 = vst [vmem:[#allocation21_spill] sm:$0xff] %v9443_v43  ;;  %v3387_v49 = vpop.f32.mrf.mxu2 }
 0x136   :  { %v2384_v50 = vpop.f32.mrf.mxu0 }
 0x137   :  { %v2883_v53 = vpop.f32.mrf.mxu1 }
 0x138   :  { %v2884_v54 = vadd.f32 %v2883_v53, %v2384_v50  ;;  %v8482_v50 = vld [vmem:[%s12440_s0 + $0x1e4] sm:$0xf] }
 0x139   :  { %7526 = vmatmul.msk.bf16.gmra.mxu2 %vm2033_vm0, %v6498_v51  ;;  %v6503_v51 = vld [vmem:[%s12440_s0 + $0x1ec] sm:$0xf0] }
 0x13a   :  { %v9451_v55 = vadd.f32 %v3382_v23, %v2884_v54  ;;  %v6491_v23 = vld [vmem:[%s12440_s0 + $0x1d4] sm:$0xf0]  ;;  %v6506_v57 = vor.u32 %v8482_v50, %v6503_v51 }
 0x13b   :  { %v6494_v29 = vor.u32 %v8479_v22, %v6491_v23 }
 0x13c   :  { %12547 = vst [vmem:[#allocation22_spill] sm:$0xff] %v9451_v55  ;;  %v3390_v62 = vpop.f32.mrf.mxu2 }
 0x13e   :  { %v2387_v1 = vpop.f32.mrf.mxu0 }
 0x13f   :  { %v2886_v4 = vpop.f32.mrf.mxu1 }
 0x140   :  { %v2887_v5 = vadd.f32 %v2886_v4, %v2387_v1  ;;  %v8490_v1 = vld [vmem:[%s12440_s0 + $0x220] sm:$0xf0] }
 0x141   :  { %2426 = vmatmul.bf16.gmra.mxu0 %v6478_v0  ;;  %v6533_v0 = vld [vmem:[%s12440_s0 + $0x218] sm:$0xf] }
 0x142   :  { %v9466_v8 = vadd.f32 %v3385_v35, %v2887_v5  ;;  %2925 = vmatmul.bf16.gmra.mxu1 %v6482_v2  ;;  %v8487_v35 = vld [vmem:[%s12440_s0 + $0x208] sm:$0xf0]  ;;  %v6534_v5 = vor.u32 %v8490_v1, %v6533_v0  ;;  %v8496_v0 = vld [vmem:[%s12440_s0 + $0x250] sm:$0xf0] }
 0x143   :  { %v6522_v40 = vor.u32 %v8487_v35, %v6521_v34 }
 0x144   :  { %12548 = vst [vmem:[#allocation23_spill] sm:$0xff] %v9466_v8  ;;  %v3392_v11 = vpop.f32.mrf.mxu2 }
 0x146   :  { %v2389_v12 = vpop.f32.mrf.mxu0 }
 0x147   :  { %v2888_v14 = vpop.f32.mrf.mxu1 }
 0x148   :  { %v2889_v16 = vadd.f32 %v2888_v14, %v2389_v12  ;;  %v6513_v12 = vld [vmem:[%s12440_s0 + $0x1f8] sm:$0xf]  ;;  %v8485_v14 = vld [vmem:[%s12440_s0 + $0x1fc] sm:$0xf] }
 0x149   :  { %7527 = vmatmul.msk.bf16.gmra.mxu2 %vm2033_vm0, %v6510_v13  ;;  %v8486_v13 = vld [vmem:[%s12440_s0 + $0x200] sm:$0xf0] }
 0x14a   :  { %v9474_v17 = vadd.f32 %v3387_v49, %v2889_v16  ;;  %v8483_v49 = vld [vmem:[%s12440_s0 + $0x1e8] sm:$0xf0]  ;;  %v6515_v16 = vld [vmem:[%s12440_s0 + $0x204] sm:$0xf0]  ;;  %v6514_v21 = vor.u32 %v8486_v13, %v6513_v12  ;;  %v8492_v13 = vld [vmem:[%s12440_s0 + $0x230] sm:$0xf0] }
 0x14b   :  { %v6502_v54 = vor.u32 %v8483_v49, %v6501_v48  ;;  %v6518_v23 = vor.u32 %v8485_v14, %v6515_v16  ;;  %v8488_v48 = vld [vmem:[%s12440_s0 + $0x214] sm:$0xf]  ;;  %v6527_v49 = vld [vmem:[%s12440_s0 + $0x21c] sm:$0xf0]  ;;  %v6537_v12 = vld [vmem:[%s12440_s0 + $0x228] sm:$0xf] }
 0x14c   :  { %12549 = vst [vmem:[#allocation24_spill] sm:$0xff] %v9474_v17  ;;  %v3395_v25 = vpop.f32.mrf.mxu2  ;;  %v8491_v14 = vld [vmem:[%s12440_s0 + $0x22c] sm:$0xf]  ;;  %v6539_v16 = vld [vmem:[%s12440_s0 + $0x234] sm:$0xf0] }
 0x14d   :  { %v7295_v17 = vld [vmem:[%s12440_s0 + $0x81c] sm:$0xf0] }
 0x14e   :  { %v2392_v28 = vpop.f32.mrf.mxu0 }
 0x14f   :  { %v2891_v31 = vpop.f32.mrf.mxu1 }
 0x150   :  { %v2892_v32 = vadd.f32 %v2891_v31, %v2392_v28  ;;  %v8493_v31 = vld [vmem:[%s12440_s0 + $0x238] sm:$0xf0] }
 0x151   :  { %2431 = vmatmul.bf16.gmra.mxu0 %v6490_v27 }
 0x152   :  { %v9489_v33 = vadd.f32 %v3390_v62, %v2892_v32  ;;  %2930 = vmatmul.bf16.gmra.mxu1 %v6494_v29  ;;  %v6545_v29 = vld [vmem:[%s12440_s0 + $0x230] sm:$0xf] }
 0x153   :  { %v6546_v35 = vor.u32 %v8493_v31, %v6545_v29  ;;  %v6569_v31 = vld [vmem:[%s12440_s0 + $0x260] sm:$0xf] }
 0x154   :  { %12550 = vst [vmem:[#allocation25_spill] sm:$0xff] %v9489_v33  ;;  %v3397_v38 = vpop.f32.mrf.mxu2 }
 0x156   :  { %v2394_v39 = vpop.f32.mrf.mxu0 }
 0x157   :  { %v2893_v41 = vpop.f32.mrf.mxu1 }
 0x158   :  { %v2894_v42 = vadd.f32 %v2893_v41, %v2394_v39  ;;  %v6525_v41 = vld [vmem:[%s12440_s0 + $0x210] sm:$0xf] }
 0x159   :  { %7528 = vmatmul.msk.bf16.gmra.mxu2 %vm2033_vm0, %v6522_v40 }
 0x15a   :  { %v9497_v45 = vadd.f32 %v3392_v11, %v2894_v42  ;;  %v8489_v42 = vld [vmem:[%s12440_s0 + $0x218] sm:$0xf0] }
 0x15b   :  { %v6526_v51 = vor.u32 %v8489_v42, %v6525_v41 }
 0x15c   :  { %12551 = vst [vmem:[#allocation26_spill] sm:$0xff] %v9497_v45  ;;  %v3400_v53 = vpop.f32.mrf.mxu2  ;;  %v7307_v45 = vld [vmem:[%s12440_s0 + $0x834] sm:$0xf0] }
 0x15e   :  { %v2397_v56 = vpop.f32.mrf.mxu0 }
 0x15f   :  { %v2896_v59 = vpop.f32.mrf.mxu1 }
 0x160   :  { %v2897_v61 = vadd.f32 %v2896_v59, %v2397_v56 }
 0x161   :  { %2436 = vmatmul.bf16.gmra.mxu0 %v6502_v54  ;;  %v6530_v54 = vor.u32 %v8488_v48, %v6527_v49  ;;  %v6549_v48 = vld [vmem:[%s12440_s0 + $0x240] sm:$0xf]  ;;  %v8495_v49 = vld [vmem:[%s12440_s0 + $0x248] sm:$0xf0] }
 0x162   :  { %v9512_v62 = vadd.f32 %v3395_v25, %v2897_v61  ;;  %2935 = vmatmul.bf16.gmra.mxu1 %v6506_v57  ;;  %v6557_v61 = vld [vmem:[%s12440_s0 + $0x248] sm:$0xf] }
 0x164   :  { %12552 = vst [vmem:[#allocation27_spill] sm:$0xff] %v9512_v62  ;;  %v3402_v2 = vpop.f32.mrf.mxu2  ;;  %v7319_v62 = vld [vmem:[%s12440_s0 + $0x84c] sm:$0xf0] }
 0x166   :  { %v2399_v4 = vpop.f32.mrf.mxu0 }
 0x167   :  { %v2898_v9 = vpop.f32.mrf.mxu1 }
 0x168   :  { %v2899_v10 = vadd.f32 %v2898_v9, %v2399_v4  ;;  %v6558_v4 = vor.u32 %v8496_v0, %v6557_v61 }
 0x169   :  { %7529 = vmatmul.msk.bf16.gmra.mxu2 %vm2033_vm0, %v6534_v5 }
 0x16a   :  { %v9520_v11 = vadd.f32 %v3397_v38, %v2899_v10 }
 0x16c   :  { %12553 = vst [vmem:[#allocation28_spill] sm:$0xff] %v9520_v11  ;;  %v3405_v19 = vpop.f32.mrf.mxu2 }
 0x16e   :  { %v2402_v22 = vpop.f32.mrf.mxu0 }
 0x16f   :  { %v2901_v25 = vpop.f32.mrf.mxu1 }
 0x170   :  { %v2902_v27 = vadd.f32 %v2901_v25, %v2402_v22 }
 0x171   :  { %2441 = vmatmul.bf16.gmra.mxu0 %v6514_v21  ;;  %v6538_v21 = vor.u32 %v8492_v13, %v6537_v12 }
 0x172   :  { %v9535_v28 = vadd.f32 %v3400_v53, %v2902_v27  ;;  %2940 = vmatmul.bf16.gmra.mxu1 %v6518_v23  ;;  %v6542_v23 = vor.u32 %v8491_v14, %v6539_v16 }
 0x174   :  { %12554 = vst [vmem:[#allocation29_spill] sm:$0xff] %v9535_v28  ;;  %v3407_v32 = vpop.f32.mrf.mxu2 }
 0x176   :  { %v2404_v34 = vpop.f32.mrf.mxu0 }
 0x177   :  { %v2903_v38 = vpop.f32.mrf.mxu1 }
 0x178   :  { %v2904_v39 = vadd.f32 %v2903_v38, %v2404_v34 }
 0x179   :  { %7530 = vmatmul.msk.bf16.gmra.mxu2 %vm2033_vm0, %v6546_v35 }
 0x17a   :  { %v9543_v40 = vadd.f32 %v3402_v2, %v2904_v39 }
 0x17c   :  { %12555 = vst [vmem:[#allocation30_spill] sm:$0xff] %v9543_v40  ;;  %v3410_v50 = vpop.f32.mrf.mxu2  ;;  %v7331_v40 = vld [vmem:[%s12440_s0 + $0x864] sm:$0xf0] }
 0x17e   :  { %v2407_v53 = vpop.f32.mrf.mxu0 }
 0x17f   :  { %v2906_v56 = vpop.f32.mrf.mxu1 }
 0x180   :  { %v2907_v57 = vadd.f32 %v2906_v56, %v2407_v53 }
 0x181   :  { %2446 = vmatmul.bf16.gmra.mxu0 %v6526_v51  ;;  %v6551_v51 = vld [vmem:[%s12440_s0 + $0x24c] sm:$0xf0] }
 0x182   :  { %v9558_v59 = vadd.f32 %v3405_v19, %v2907_v57  ;;  %2945 = vmatmul.bf16.gmra.mxu1 %v6530_v54  ;;  %v6550_v54 = vor.u32 %v8495_v49, %v6549_v48 }
 0x184   :  { %12556 = vst [vmem:[#allocation31_spill] sm:$0xff] %v9558_v59  ;;  %v3412_v1 = vpop.f32.mrf.mxu2  ;;  %v7343_v59 = vld [vmem:[%s12440_s0 + $0x87c] sm:$0xf0] }
 0x186   :  { %v2409_v2 = vpop.f32.mrf.mxu0 }
 0x187   :  { %v2908_v5 = vpop.f32.mrf.mxu1 }
 0x188   :  { %v2909_v9 = vadd.f32 %v2908_v5, %v2409_v2  ;;  %v6581_v2 = vld [vmem:[%s12440_s0 + $0x278] sm:$0xf] }
 0x189   :  { %7531 = vmatmul.msk.bf16.gmra.mxu2 %vm2033_vm0, %v6558_v4  ;;  %v8502_v4 = vld [vmem:[%s12440_s0 + $0x280] sm:$0xf0] }
 0x18a   :  { %v9566_v10 = vadd.f32 %v3407_v32, %v2909_v9  ;;  %v8499_v32 = vld [vmem:[%s12440_s0 + $0x268] sm:$0xf0]  ;;  %v6582_v12 = vor.u32 %v8502_v4, %v6581_v2 }
 0x18b   :  { %v6570_v38 = vor.u32 %v8499_v32, %v6569_v31 }
 0x18c   :  { %v3415_v19 = vpop.f32.mrf.mxu2 }
 0x18e   :  { %v2412_v22 = vpop.f32.mrf.mxu0 }
 0x18f   :  { %v2911_v25 = vpop.f32.mrf.mxu1 }
 0x190   :  { %v2912_v27 = vadd.f32 %v2911_v25, %v2412_v22  ;;  %v8497_v22 = vld [vmem:[%s12440_s0 + $0x25c] sm:$0xf] }
 0x191   :  { %2451 = vmatmul.bf16.gmra.mxu0 %v6538_v21  ;;  %v8498_v21 = vld [vmem:[%s12440_s0 + $0x260] sm:$0xf0] }
 0x192   :  { %v9581_v29 = vadd.f32 %v3410_v50, %v2912_v27  ;;  %2950 = vmatmul.bf16.gmra.mxu1 %v6542_v23  ;;  %v8494_v50 = vld [vmem:[%s12440_s0 + $0x244] sm:$0xf]  ;;  %v6563_v23 = vld [vmem:[%s12440_s0 + $0x264] sm:$0xf0] }
 0x193   :  { %v6554_v57 = vor.u32 %v8494_v50, %v6551_v51  ;;  %v6566_v32 = vor.u32 %v8497_v22, %v6563_v23 }
 0x194   :  { %v3417_v34 = vpop.f32.mrf.mxu2 }
 0x196   :  { %v2414_v35 = vpop.f32.mrf.mxu0 }
 0x197   :  { %v2913_v39 = vpop.f32.mrf.mxu1 }
 0x198   :  { %v2914_v41 = vadd.f32 %v2913_v39, %v2414_v35  ;;  %v6593_v39 = vld [vmem:[%s12440_s0 + $0x290] sm:$0xf] }
 0x199   :  { %7532 = vmatmul.msk.bf16.gmra.mxu2 %vm2033_vm0, %v6570_v38 }
 0x19a   :  { %v9589_v42 = vadd.f32 %v3412_v1, %v2914_v41  ;;  %v8505_v41 = vld [vmem:[%s12440_s0 + $0x298] sm:$0xf0] }
 0x19b   :  { %v6594_v50 = vor.u32 %v8505_v41, %v6593_v39  ;;  %v8503_v39 = vld [vmem:[%s12440_s0 + $0x28c] sm:$0xf]  ;;  %v6587_v41 = vld [vmem:[%s12440_s0 + $0x294] sm:$0xf0] }
 0x19c   :  { %v3420_v53 = vpop.f32.mrf.mxu2 }
 0x19e   :  { %v2417_v56 = vpop.f32.mrf.mxu0 }
 0x19f   :  { %v2916_v61 = vpop.f32.mrf.mxu1 }
 0x1a0   :  { %v2917_v0 = vadd.f32 %v2916_v61, %v2417_v56  ;;  %v8500_v61 = vld [vmem:[%s12440_s0 + $0x274] sm:$0xf] }
 0x1a1   :  { %2456 = vmatmul.bf16.gmra.mxu0 %v6550_v54 }
 0x1a2   :  { %v9604_v1 = vadd.f32 %v3415_v19, %v2917_v0  ;;  %2955 = vmatmul.bf16.gmra.mxu1 %v6554_v57  ;;  %v6561_v19 = vld [vmem:[%s12440_s0 + $0x258] sm:$0xf]  ;;  %v8501_v57 = vld [vmem:[%s12440_s0 + $0x278] sm:$0xf0]  ;;  %v6575_v0 = vld [vmem:[%s12440_s0 + $0x27c] sm:$0xf0] }
 0x1a3   :  { %v6562_v27 = vor.u32 %v8498_v21, %v6561_v19  ;;  %v6605_v19 = vld [vmem:[%s12440_s0 + $0x2a8] sm:$0xf]  ;;  %v8508_v21 = vld [vmem:[%s12440_s0 + $0x2b0] sm:$0xf0] }
 0x1a4   :  { %v3422_v5 = vpop.f32.mrf.mxu2 }
 0x1a6   :  { %v2419_v9 = vpop.f32.mrf.mxu0 }
 0x1a7   :  { %v2918_v13 = vpop.f32.mrf.mxu1 }
 0x1a8   :  { %v2919_v14 = vadd.f32 %v2918_v13, %v2419_v9  ;;  %v6578_v9 = vor.u32 %v8500_v61, %v6575_v0  ;;  %v6617_v61 = vld [vmem:[%s12440_s0 + $0x2c0] sm:$0xf]  ;;  %v8511_v0 = vld [vmem:[%s12440_s0 + $0x2c8] sm:$0xf0] }
 0x1a9   :  { %7533 = vmatmul.msk.bf16.gmra.mxu2 %vm2033_vm0, %v6582_v12 }
 0x1aa   :  { %v9612_v16 = vadd.f32 %v3417_v34, %v2919_v14 }
 0x1ac   :  { %v3425_v25 = vpop.f32.mrf.mxu2 }
 0x1ae   :  { %v2422_v31 = vpop.f32.mrf.mxu0 }
 0x1af   :  { %v2921_v34 = vpop.f32.mrf.mxu1 }
 0x1b0   :  { %v2922_v35 = vadd.f32 %v2921_v34, %v2422_v31 }
 0x1b1   :  { %2461 = vmatmul.bf16.gmra.mxu0 %v6562_v27  ;;  %v6606_v27 = vor.u32 %v8508_v21, %v6605_v19  ;;  %v8507_v21 = vld [vmem:[%s12440_s0 + $0x2a8] sm:$0xf0] }
 0x1b2   :  { %v9627_v38 = vadd.f32 %v3420_v53, %v2922_v35  ;;  %2960 = vmatmul.bf16.gmra.mxu1 %v6566_v32  ;;  %v6573_v53 = vld [vmem:[%s12440_s0 + $0x270] sm:$0xf]  ;;  %v8504_v35 = vld [vmem:[%s12440_s0 + $0x290] sm:$0xf0] }
 0x1b3   :  { %v6574_v4 = vor.u32 %v8501_v57, %v6573_v53 }
 0x1b4   :  { %v3427_v48 = vpop.f32.mrf.mxu2 }
 0x1b6   :  { %v2424_v49 = vpop.f32.mrf.mxu0 }
 0x1b7   :  { %v2923_v51 = vpop.f32.mrf.mxu1 }
 0x1b8   :  { %v2924_v54 = vadd.f32 %v2923_v51, %v2424_v49  ;;  %v6590_v51 = vor.u32 %v8503_v39, %v6587_v41 }
 0x1b9   :  { %7534 = vmatmul.msk.bf16.gmra.mxu2 %vm2033_vm0, %v6594_v50 }
 0x1ba   :  { %v9635_v56 = vadd.f32 %v3422_v5, %v2924_v54 }
 0x1bc   :  { %v3430_v2 = vpop.f32.mrf.mxu2 }
 0x1be   :  { %v2427_v5 = vpop.f32.mrf.mxu0 }
 0x1bf   :  { %v2926_v12 = vpop.f32.mrf.mxu1 }
 0x1c0   :  { %v2927_v13 = vadd.f32 %v2926_v12, %v2427_v5 }
 0x1c1   :  { %2466 = vmatmul.bf16.gmra.mxu0 %v6574_v4 }
 0x1c2   :  { %v9650_v14 = vadd.f32 %v3425_v25, %v2927_v13  ;;  %2965 = vmatmul.bf16.gmra.mxu1 %v6578_v9  ;;  %v6585_v25 = vld [vmem:[%s12440_s0 + $0x288] sm:$0xf]  ;;  %v6618_v9 = vor.u32 %v8511_v0, %v6617_v61 }
 0x1c3   :  { %v6586_v49 = vor.u32 %v8504_v35, %v6585_v25 }
 0x1c4   :  { %v3432_v22 = vpop.f32.mrf.mxu2 }
 0x1c6   :  { %v2429_v23 = vpop.f32.mrf.mxu0 }
 0x1c7   :  { %v2928_v31 = vpop.f32.mrf.mxu1 }
 0x1c8   :  { %v2929_v32 = vadd.f32 %v2928_v31, %v2429_v23  ;;  %v8506_v23 = vld [vmem:[%s12440_s0 + $0x2a4] sm:$0xf] }
 0x1c9   :  { %7535 = vmatmul.msk.bf16.gmra.mxu2 %vm2033_vm0, %v6606_v27  ;;  %v6599_v27 = vld [vmem:[%s12440_s0 + $0x2ac] sm:$0xf0] }
 0x1ca   :  { %v9658_v34 = vadd.f32 %v3427_v48, %v2929_v32  ;;  %v6602_v25 = vor.u32 %v8506_v23, %v6599_v27 }
 0x1cc   :  { %v3435_v48 = vpop.f32.mrf.mxu2 }
 0x1ce   :  { %v2432_v50 = vpop.f32.mrf.mxu0 }
 0x1cf   :  { %v2931_v54 = vpop.f32.mrf.mxu1 }
 0x1d0   :  { %v2932_v53 = vadd.f32 %v2931_v54, %v2432_v50  ;;  %v8514_v50 = vld [vmem:[%s12440_s0 + $0x2e0] sm:$0xf0] }
 0x1d1   :  { %2471 = vmatmul.bf16.gmra.mxu0 %v6586_v49  ;;  %v6629_v49 = vld [vmem:[%s12440_s0 + $0x2d8] sm:$0xf] }
 0x1d2   :  { %v9673_v57 = vadd.f32 %v3430_v2, %v2932_v53  ;;  %2970 = vmatmul.bf16.gmra.mxu1 %v6590_v51  ;;  %v6597_v2 = vld [vmem:[%s12440_s0 + $0x2a0] sm:$0xf]  ;;  %v6630_v53 = vor.u32 %v8514_v50, %v6629_v49 }
 0x1d3   :  { %v6598_v31 = vor.u32 %v8507_v21, %v6597_v2 }
 0x1d4   :  { %12557 = vst [vmem:[#allocation32_spill] sm:$0xff] %v9673_v57  ;;  %v3437_v4 = vpop.f32.mrf.mxu2 }
 0x1d6   :  { %v2434_v5 = vpop.f32.mrf.mxu0 }
 0x1d7   :  { %v2933_v12 = vpop.f32.mrf.mxu1 }
 0x1d8   :  { %v2934_v13 = vadd.f32 %v2933_v12, %v2434_v5  ;;  %v8509_v12 = vld [vmem:[%s12440_s0 + $0x2bc] sm:$0xf] }
 0x1d9   :  { %7536 = vmatmul.msk.bf16.gmra.mxu2 %vm2033_vm0, %v6618_v9  ;;  %v8510_v9 = vld [vmem:[%s12440_s0 + $0x2c0] sm:$0xf0] }
 0x1da   :  { %v9681_v19 = vadd.f32 %v3432_v22, %v2934_v13  ;;  %v6611_v13 = vld [vmem:[%s12440_s0 + $0x2c4] sm:$0xf0] }
 0x1db   :  { %v6614_v23 = vor.u32 %v8509_v12, %v6611_v13 }
 0x1dc   :  { %12558 = vst [vmem:[#allocation33_spill] sm:$0xff] %v9681_v19  ;;  %v3440_v22 = vpop.f32.mrf.mxu2 }
 0x1de   :  { %v2437_v32 = vpop.f32.mrf.mxu0 }
 0x1df   :  { %v2936_v35 = vpop.f32.mrf.mxu1 }
 0x1e0   :  { %v2937_v39 = vadd.f32 %v2936_v35, %v2437_v32  ;;  %v8517_v35 = vld [vmem:[%s12440_s0 + $0x2f8] sm:$0xf0] }
 0x1e1   :  { %2476 = vmatmul.bf16.gmra.mxu0 %v6598_v31 }
 0x1e2   :  { %v9696_v41 = vadd.f32 %v3435_v48, %v2937_v39  ;;  %2975 = vmatmul.bf16.gmra.mxu1 %v6602_v25  ;;  %v6609_v48 = vld [vmem:[%s12440_s0 + $0x2b8] sm:$0xf]  ;;  %v6641_v25 = vld [vmem:[%s12440_s0 + $0x2f0] sm:$0xf] }
 0x1e3   :  { %v6610_v2 = vor.u32 %v8510_v9, %v6609_v48  ;;  %v6642_v50 = vor.u32 %v8517_v35, %v6641_v25  ;;  %v8512_v48 = vld [vmem:[%s12440_s0 + $0x2d4] sm:$0xf]  ;;  %v6623_v9 = vld [vmem:[%s12440_s0 + $0x2dc] sm:$0xf0] }
 0x1e4   :  { %12559 = vst [vmem:[#allocation34_spill] sm:$0xff] %v9696_v41  ;;  %v3442_v51 = vpop.f32.mrf.mxu2  ;;  %v8520_v25 = vld [vmem:[%s12440_s0 + $0x310] sm:$0xf0] }
 0x1e6   :  { %v2439_v54 = vpop.f32.mrf.mxu0 }
 0x1e7   :  { %v2938_v61 = vpop.f32.mrf.mxu1 }
 0x1e8   :  { %v2939_v0 = vadd.f32 %v2938_v61, %v2439_v54 }
 0x1e9   :  { %7537 = vmatmul.msk.bf16.gmra.mxu2 %vm2033_vm0, %v6630_v53 }
 0x1ea   :  { %v9704_v5 = vadd.f32 %v3437_v4, %v2939_v0  ;;  %v8513_v0 = vld [vmem:[%s12440_s0 + $0x2d8] sm:$0xf0] }
 0x1ec   :  { %12560 = vst [vmem:[#allocation35_spill] sm:$0xff] %v9704_v5  ;;  %v3445_v4 = vpop.f32.mrf.mxu2 }
 0x1ee   :  { %v2442_v21 = vpop.f32.mrf.mxu0 }
 0x1ef   :  { %v2941_v27 = vpop.f32.mrf.mxu1 }
 0x1f0   :  { %v2942_v31 = vadd.f32 %v2941_v27, %v2442_v21 }
 0x1f1   :  { %2481 = vmatmul.bf16.gmra.mxu0 %v6610_v2  ;;  %v6626_v2 = vor.u32 %v8512_v48, %v6623_v9  ;;  %v8515_v48 = vld [vmem:[%s12440_s0 + $0x2ec] sm:$0xf]  ;;  %v6635_v9 = vld [vmem:[%s12440_s0 + $0x2f4] sm:$0xf0] }
 0x1f2   :  { %v9719_v32 = vadd.f32 %v3440_v22, %v2942_v31  ;;  %2980 = vmatmul.bf16.gmra.mxu1 %v6614_v23  ;;  %v6621_v22 = vld [vmem:[%s12440_s0 + $0x2d0] sm:$0xf]  ;;  %v6653_v31 = vld [vmem:[%s12440_s0 + $0x308] sm:$0xf] }
 0x1f3   :  { %v6622_v12 = vor.u32 %v8513_v0, %v6621_v22  ;;  %v8516_v0 = vld [vmem:[%s12440_s0 + $0x2f0] sm:$0xf0] }
 0x1f4   :  { %12561 = vst [vmem:[#allocation36_spill] sm:$0xff] %v9719_v32  ;;  %v3447_v39 = vpop.f32.mrf.mxu2 }
 0x1f6   :  { %v2444_v49 = vpop.f32.mrf.mxu0 }
 0x1f7   :  { %v2943_v54 = vpop.f32.mrf.mxu1 }
 0x1f8   :  { %v2944_v53 = vadd.f32 %v2943_v54, %v2444_v49 }
 0x1f9   :  { %7538 = vmatmul.msk.bf16.gmra.mxu2 %vm2033_vm0, %v6642_v50  ;;  %v6654_v50 = vor.u32 %v8520_v25, %v6653_v31  ;;  %v6665_v25 = vld [vmem:[%s12440_s0 + $0x320] sm:$0xf] }
 0x1fa   :  { %v9727_v61 = vadd.f32 %v3442_v51, %v2944_v53 }
 0x1fc   :  { %12562 = vst [vmem:[#allocation37_spill] sm:$0xff] %v9727_v61  ;;  %v3450_v51 = vpop.f32.mrf.mxu2 }
 0x1fe   :  { %v2447_v13 = vpop.f32.mrf.mxu0 }
 0x1ff   :  { %v2946_v21 = vpop.f32.mrf.mxu1 }
 0x200   :  { %v2947_v23 = vadd.f32 %v2946_v21, %v2447_v13 }
 0x201   :  { %2486 = vmatmul.bf16.gmra.mxu0 %v6622_v12 }
 0x202   :  { %v9742_v27 = vadd.f32 %v3445_v4, %v2947_v23  ;;  %2985 = vmatmul.bf16.gmra.mxu1 %v6626_v2  ;;  %v6633_v4 = vld [vmem:[%s12440_s0 + $0x2e8] sm:$0xf]  ;;  %v6638_v2 = vor.u32 %v8515_v48, %v6635_v9  ;;  %v8519_v9 = vld [vmem:[%s12440_s0 + $0x308] sm:$0xf0] }
 0x203   :  { %v6634_v12 = vor.u32 %v8516_v0, %v6633_v4 }
 0x204   :  { %12563 = vst [vmem:[#allocation38_spill] sm:$0xff] %v9742_v27  ;;  %v3452_v35 = vpop.f32.mrf.mxu2 }
 0x206   :  { %v2449_v49 = vpop.f32.mrf.mxu0 }
 0x207   :  { %v2948_v54 = vpop.f32.mrf.mxu1 }
 0x208   :  { %v2949_v53 = vadd.f32 %v2948_v54, %v2449_v49  ;;  %v8523_v49 = vld [vmem:[%s12440_s0 + $0x328] sm:$0xf0] }
 0x209   :  { %7539 = vmatmul.msk.bf16.gmra.mxu2 %vm2033_vm0, %v6654_v50 }
 0x20a   :  { %v9750_v22 = vadd.f32 %v3447_v39, %v2949_v53  ;;  %v6666_v53 = vor.u32 %v8523_v49, %v6665_v25 }
 0x20c   :  { %12564 = vst [vmem:[#allocation39_spill] sm:$0xff] %v9750_v22  ;;  %v3455_v39 = vpop.f32.mrf.mxu2  ;;  %v7325_v22 = vld [vmem:[%s12440_s0 + $0x848] sm:$0xf] }
 0x20e   :  { %v2452_v13 = vpop.f32.mrf.mxu0 }
 0x20f   :  { %v2951_v21 = vpop.f32.mrf.mxu1 }
 0x210   :  { %v2952_v23 = vadd.f32 %v2951_v21, %v2452_v13  ;;  %v6647_v13 = vld [vmem:[%s12440_s0 + $0x30c] sm:$0xf0] }
 0x211   :  { %2491 = vmatmul.bf16.gmra.mxu0 %v6634_v12  ;;  %v8518_v12 = vld [vmem:[%s12440_s0 + $0x304] sm:$0xf] }
 0x212   :  { %v9765_v31 = vadd.f32 %v3450_v51, %v2952_v23  ;;  %2990 = vmatmul.bf16.gmra.mxu1 %v6638_v2  ;;  %v6645_v51 = vld [vmem:[%s12440_s0 + $0x300] sm:$0xf]  ;;  %v6650_v23 = vor.u32 %v8518_v12, %v6647_v13  ;;  %v8960_v12 = vld [vmem:[%s12439_s1 + $0x88] sm:$0xff] }
 0x213   :  { %v6646_v2 = vor.u32 %v8519_v9, %v6645_v51  ;;  %v6677_v51 = vld [vmem:[%s12440_s0 + $0x338] sm:$0xf]  ;;  %v8526_v9 = vld [vmem:[%s12440_s0 + $0x340] sm:$0xf0] }
 0x214   :  { %12565 = vst [vmem:[#allocation40_spill] sm:$0xff] %v9765_v31  ;;  %v3457_v50 = vpop.f32.mrf.mxu2 }
 0x216   :  { %v2454_v54 = vpop.f32.mrf.mxu0 }
 0x217   :  { %v2953_v4 = vpop.f32.mrf.mxu1 }
 0x218   :  { %v2954_v0 = vadd.f32 %v2953_v4, %v2454_v54  ;;  %v7293_v54 = vld [vmem:[%s12440_s0 + $0x810] sm:$0xf] }
 0x219   :  { %7540 = vmatmul.msk.bf16.gmra.mxu2 %vm2033_vm0, %v6666_v53  ;;  %v8681_v53 = vld [vmem:[%s12440_s0 + $0x818] sm:$0xf0] }
 0x21a   :  { %v9773_v48 = vadd.f32 %v3452_v35, %v2954_v0  ;;  %v7294_v4 = vor.u32 %v8681_v53, %v7293_v54  ;;  %v6657_v54 = vld [vmem:[%s12440_s0 + $0x318] sm:$0xf]  ;;  %v8522_v53 = vld [vmem:[%s12440_s0 + $0x320] sm:$0xf0] }
 0x21c   :  { %12566 = vst [vmem:[#allocation41_spill] sm:$0xff] %v9773_v48  ;;  %v3460_v35 = vpop.f32.mrf.mxu2  ;;  %2766 = vmatmul.bf16.vlgmr.msra.gmra.mxu3 %v7294_v4  ;;  %v8521_v4 = vld [vmem:[%s12440_s0 + $0x31c] sm:$0xf] }
 0x21d   :  { %8954 = vmatpush.bf16.msra.mxu3 %v8960_v12  ;;  %v6658_v12 = vor.u32 %v8522_v53, %v6657_v54  ;;  %v6689_v54 = vld [vmem:[%s12440_s0 + $0x350] sm:$0xf]  ;;  %v8529_v53 = vld [vmem:[%s12440_s0 + $0x358] sm:$0xf0] }
 0x21e   :  { %v2457_v21 = vpop.f32.mrf.mxu0 }
 0x21f   :  { %v2956_v25 = vpop.f32.mrf.mxu1 }
 0x220   :  { %v2957_v49 = vadd.f32 %v2956_v25, %v2457_v21  ;;  %v6678_v21 = vor.u32 %v8526_v9, %v6677_v51  ;;  %v6659_v51 = vld [vmem:[%s12440_s0 + $0x324] sm:$0xf0] }
 0x221   :  { %2496 = vmatmul.bf16.gmra.mxu0 %v6646_v2 }
 0x222   :  { %v9794_v0 = vadd.f32 %v3455_v39, %v2957_v49  ;;  %2995 = vmatmul.bf16.gmra.mxu1 %v6650_v23  ;;  %v8961_v23 = vld [vmem:[%s12439_s1 + $0x80] sm:$0xff] }
 0x223   :  { %8955 = vmatpush.bf16.msra.mxu3 %v8961_v23  ;;  %v7305_v23 = vld [vmem:[%s12440_s0 + $0x828] sm:$0xf] }
 0x224   :  { %12567 = vst [vmem:[#allocation42_spill] sm:$0xff] %v9794_v0  ;;  %v3462_v13 = vpop.f32.mrf.mxu2  ;;  %v8684_v0 = vld [vmem:[%s12440_s0 + $0x830] sm:$0xf0] }
 0x225   :  { %v7306_v48 = vor.u32 %v8684_v0, %v7305_v23  ;;  %v6671_v23 = vld [vmem:[%s12440_s0 + $0x33c] sm:$0xf0] }
 0x226   :  { %v2459_v2 = vpop.f32.mrf.mxu0 }
 0x227   :  { %v2958_v39 = vpop.f32.mrf.mxu1 }
 0x228   :  { %v2959_v25 = vadd.f32 %v2958_v39, %v2459_v2 }
 0x229   :  { %7541 = vmatmul.msk.bf16.gmra.mxu2 %vm2033_vm0, %v6678_v21  ;;  %v6662_v21 = vor.u32 %v8521_v4, %v6659_v51  ;;  %v7317_v4 = vld [vmem:[%s12440_s0 + $0x840] sm:$0xf] }
 0x22a   :  { %v9808_v49 = vadd.f32 %v3457_v50, %v2959_v25  ;;  %v8687_v50 = vld [vmem:[%s12440_s0 + $0x848] sm:$0xf0] }
 0x22c   :  { %12568 = vst [vmem:[#allocation43_spill] sm:$0xff] %v9808_v49  ;;  %v3465_v9 = vpop.f32.mrf.mxu2  ;;  %2771 = vmatmul.bf16.gmra.mxu3 %v7306_v48  ;;  %v8525_v48 = vld [vmem:[%s12440_s0 + $0x338] sm:$0xf0] }
 0x22e   :  { %v2462_v2 = vpop.f32.mrf.mxu0 }
 0x22f   :  { %v2961_v39 = vpop.f32.mrf.mxu1 }
 0x230   :  { %v2962_v25 = vadd.f32 %v2961_v39, %v2462_v2  ;;  %v6690_v39 = vor.u32 %v8529_v53, %v6689_v54 }
 0x231   :  { %2501 = vmatmul.bf16.gmra.mxu0 %v6658_v12 }
 0x232   :  { %v9831_v31 = vadd.f32 %v3460_v35, %v2962_v25  ;;  %3000 = vmatmul.bf16.gmra.mxu1 %v6662_v21  ;;  %v6669_v21 = vld [vmem:[%s12440_s0 + $0x330] sm:$0xf]  ;;  %v8524_v25 = vld [vmem:[%s12440_s0 + $0x334] sm:$0xf] }
 0x233   :  { %v6670_v53 = vor.u32 %v8525_v48, %v6669_v21  ;;  %v6701_v21 = vld [vmem:[%s12440_s0 + $0x368] sm:$0xf]  ;;  %v8532_v48 = vld [vmem:[%s12440_s0 + $0x370] sm:$0xf0] }
 0x234   :  { %12569 = vst [vmem:[#allocation44_spill] sm:$0xff] %v9831_v31  ;;  %v3467_v51 = vpop.f32.mrf.mxu2  ;;  %v7318_v31 = vor.u32 %v8687_v50, %v7317_v4  ;;  %v6681_v4 = vld [vmem:[%s12440_s0 + $0x348] sm:$0xf] }
 0x236   :  { %v2464_v2 = vpop.f32.mrf.mxu0 }
 0x237   :  { %v2963_v12 = vpop.f32.mrf.mxu1 }
 0x238   :  { %v2964_v0 = vadd.f32 %v2963_v12, %v2464_v2 }
 0x239   :  { %7542 = vmatmul.msk.bf16.gmra.mxu2 %vm2033_vm0, %v6690_v39  ;;  %v6674_v39 = vor.u32 %v8524_v25, %v6671_v23  ;;  %v7329_v25 = vld [vmem:[%s12440_s0 + $0x858] sm:$0xf] }
 0x23a   :  { %v9841_v35 = vadd.f32 %v3462_v13, %v2964_v0  ;;  %v8690_v13 = vld [vmem:[%s12440_s0 + $0x860] sm:$0xf0] }
 0x23c   :  { %12570 = vst [vmem:[#allocation45_spill] sm:$0xff] %v9841_v35  ;;  %v3470_v54 = vpop.f32.mrf.mxu2  ;;  %2776 = vmatmul.bf16.gmra.mxu3 %v7318_v31  ;;  %v8528_v31 = vld [vmem:[%s12440_s0 + $0x350] sm:$0xf0] }
 0x23d   :  { %v8704_v35 = vld [vmem:[%s12440_s0 + $0x8d4] sm:$0xf] }
 0x23e   :  { %v2467_v2 = vpop.f32.mrf.mxu0  ;;  %v7394_v49 = vor.u32 %v8704_v35, %v7391_v63 }
 0x23f   :  { %v2966_v12 = vpop.f32.mrf.mxu1 }
 0x240   :  { %v2967_v0 = vadd.f32 %v2966_v12, %v2467_v2  ;;  %v6702_v12 = vor.u32 %v8532_v48, %v6701_v21  ;;  %v6682_v48 = vor.u32 %v8528_v31, %v6681_v4  ;;  %v6713_v4 = vld [vmem:[%s12440_s0 + $0x380] sm:$0xf]  ;;  %v8535_v31 = vld [vmem:[%s12440_s0 + $0x388] sm:$0xf0] }
 0x241   :  { %2506 = vmatmul.bf16.gmra.mxu0 %v6670_v53 }
 0x242   :  { %v9864_v52 = vadd.f32 %v3465_v9, %v2967_v0  ;;  %3005 = vmatmul.bf16.gmra.mxu1 %v6674_v39  ;;  %v8527_v39 = vld [vmem:[%s12440_s0 + $0x34c] sm:$0xf]  ;;  %v6683_v0 = vld [vmem:[%s12440_s0 + $0x354] sm:$0xf0] }
 0x244   :  { %12571 = vst [vmem:[#allocation46_spill] sm:$0xff] %v9864_v52  ;;  %v3472_v23 = vpop.f32.mrf.mxu2  ;;  %v7330_v52 = vor.u32 %v8690_v13, %v7329_v25  ;;  %v6693_v25 = vld [vmem:[%s12440_s0 + $0x360] sm:$0xf] }
 0x246   :  { %v2469_v2 = vpop.f32.mrf.mxu0 }
 0x247   :  { %v2968_v53 = vpop.f32.mrf.mxu1 }
 0x248   :  { %v2969_v50 = vadd.f32 %v2968_v53, %v2469_v2 }
 0x249   :  { %7543 = vmatmul.msk.bf16.gmra.mxu2 %vm2033_vm0, %v6702_v12  ;;  %v6686_v12 = vor.u32 %v8527_v39, %v6683_v0  ;;  %v7341_v39 = vld [vmem:[%s12440_s0 + $0x870] sm:$0xf] }
 0x24a   :  { %v9874_v9 = vadd.f32 %v3467_v51, %v2969_v50  ;;  %v8693_v51 = vld [vmem:[%s12440_s0 + $0x878] sm:$0xf0] }
 0x24c   :  { %12572 = vst [vmem:[#allocation47_spill] sm:$0xff] %v9874_v9  ;;  %v3475_v21 = vpop.f32.mrf.mxu2  ;;  %2781 = vmatmul.bf16.gmra.mxu3 %v7330_v52  ;;  %v8531_v52 = vld [vmem:[%s12440_s0 + $0x368] sm:$0xf0] }
 0x24e   :  { %v2472_v2 = vpop.f32.mrf.mxu0 }
 0x24f   :  { %v2971_v53 = vpop.f32.mrf.mxu1 }
 0x250   :  { %v2972_v50 = vadd.f32 %v2971_v53, %v2472_v2  ;;  %v6714_v53 = vor.u32 %v8535_v31, %v6713_v4  ;;  %v6694_v31 = vor.u32 %v8531_v52, %v6693_v25  ;;  %v6725_v25 = vld [vmem:[%s12440_s0 + $0x398] sm:$0xf]  ;;  %v8538_v52 = vld [vmem:[%s12440_s0 + $0x3a0] sm:$0xf0] }
 0x251   :  { %2511 = vmatmul.bf16.gmra.mxu0 %v6682_v48 }
 0x252   :  { %v9897_v7 = vadd.f32 %v3470_v54, %v2972_v50  ;;  %3010 = vmatmul.bf16.gmra.mxu1 %v6686_v12  ;;  %v8530_v12 = vld [vmem:[%s12440_s0 + $0x364] sm:$0xf]  ;;  %v6695_v50 = vld [vmem:[%s12440_s0 + $0x36c] sm:$0xf0] }
 0x254   :  { %12573 = vst [vmem:[#allocation48_spill] sm:$0xff] %v9897_v7  ;;  %v3477_v0 = vpop.f32.mrf.mxu2  ;;  %v7342_v7 = vor.u32 %v8693_v51, %v7341_v39  ;;  %v6705_v39 = vld [vmem:[%s12440_s0 + $0x378] sm:$0xf] }
 0x256   :  { %v2474_v2 = vpop.f32.mrf.mxu0 }
 0x257   :  { %v2973_v48 = vpop.f32.mrf.mxu1 }
 0x258   :  { %v2974_v13 = vadd.f32 %v2973_v48, %v2474_v2 }
 0x259   :  { %7544 = vmatmul.msk.bf16.gmra.mxu2 %vm2033_vm0, %v6714_v53  ;;  %v6698_v53 = vor.u32 %v8530_v12, %v6695_v50  ;;  %v7353_v12 = vld [vmem:[%s12440_s0 + $0x888] sm:$0xf] }
 0x25a   :  { %v9907_v54 = vadd.f32 %v3472_v23, %v2974_v13  ;;  %v8696_v23 = vld [vmem:[%s12440_s0 + $0x890] sm:$0xf0] }
 0x25c   :  { %12574 = vst [vmem:[#allocation49_spill] sm:$0xff] %v9907_v54  ;;  %v3480_v4 = vpop.f32.mrf.mxu2  ;;  %2786 = vmatmul.bf16.gmra.mxu3 %v7342_v7  ;;  %v8534_v7 = vld [vmem:[%s12440_s0 + $0x380] sm:$0xf0]  ;;  %v8701_v54 = vld [vmem:[%s12440_s0 + $0x8bc] sm:$0xf] }
 0x25d   :  { %v7382_v9 = vor.u32 %v8701_v54, %v7379_v37 }
 0x25e   :  { %v2477_v2 = vpop.f32.mrf.mxu0 }
 0x25f   :  { %v2976_v48 = vpop.f32.mrf.mxu1 }
 0x260   :  { %v2977_v13 = vadd.f32 %v2976_v48, %v2477_v2  ;;  %v6726_v48 = vor.u32 %v8538_v52, %v6725_v25  ;;  %v6706_v52 = vor.u32 %v8534_v7, %v6705_v39  ;;  %v6737_v39 = vld [vmem:[%s12440_s0 + $0x3b0] sm:$0xf]  ;;  %v8541_v7 = vld [vmem:[%s12440_s0 + $0x3b8] sm:$0xf0] }
 0x261   :  { %2516 = vmatmul.bf16.gmra.mxu0 %v6694_v31 }
 0x262   :  { %v9930_v26 = vadd.f32 %v3475_v21, %v2977_v13  ;;  %3015 = vmatmul.bf16.gmra.mxu1 %v6698_v53  ;;  %v8533_v53 = vld [vmem:[%s12440_s0 + $0x37c] sm:$0xf]  ;;  %v6707_v13 = vld [vmem:[%s12440_s0 + $0x384] sm:$0xf0] }
 0x264   :  { %12575 = vst [vmem:[#allocation50_spill] sm:$0xff] %v9930_v26  ;;  %v3482_v50 = vpop.f32.mrf.mxu2  ;;  %v7354_v26 = vor.u32 %v8696_v23, %v7353_v12  ;;  %v6717_v12 = vld [vmem:[%s12440_s0 + $0x390] sm:$0xf] }
 0x266   :  { %v2479_v2 = vpop.f32.mrf.mxu0 }
 0x267   :  { %v2978_v31 = vpop.f32.mrf.mxu1 }
 0x268   :  { %v2979_v51 = vadd.f32 %v2978_v31, %v2479_v2 }
 0x269   :  { %7545 = vmatmul.msk.bf16.gmra.mxu2 %vm2033_vm0, %v6726_v48  ;;  %v6710_v48 = vor.u32 %v8533_v53, %v6707_v13  ;;  %v7365_v53 = vld [vmem:[%s12440_s0 + $0x8a0] sm:$0xf] }
 0x26a   :  { %v9940_v21 = vadd.f32 %v3477_v0, %v2979_v51  ;;  %v8699_v0 = vld [vmem:[%s12440_s0 + $0x8a8] sm:$0xf0] }
 0x26c   :  { %12576 = vst [vmem:[#allocation51_spill] sm:$0xff] %v9940_v21  ;;  %v3485_v25 = vpop.f32.mrf.mxu2  ;;  %2791 = vmatmul.bf16.gmra.mxu3 %v7354_v26  ;;  %v8537_v26 = vld [vmem:[%s12440_s0 + $0x398] sm:$0xf0] }
 0x26e   :  { %v2482_v2 = vpop.f32.mrf.mxu0 }
 0x26f   :  { %v2981_v31 = vpop.f32.mrf.mxu1 }
 0x270   :  { %v2982_v51 = vadd.f32 %v2981_v31, %v2482_v2  ;;  %v6738_v31 = vor.u32 %v8541_v7, %v6737_v39  ;;  %v6718_v7 = vor.u32 %v8537_v26, %v6717_v12  ;;  %v6749_v12 = vld [vmem:[%s12440_s0 + $0x3c8] sm:$0xf]  ;;  %v8544_v26 = vld [vmem:[%s12440_s0 + $0x3d0] sm:$0xf0] }
 0x271   :  { %2521 = vmatmul.bf16.gmra.mxu0 %v6706_v52 }
 0x272   :  { %v9963_v46 = vadd.f32 %v3480_v4, %v2982_v51  ;;  %3020 = vmatmul.bf16.gmra.mxu1 %v6710_v48  ;;  %v8536_v48 = vld [vmem:[%s12440_s0 + $0x394] sm:$0xf]  ;;  %v6719_v51 = vld [vmem:[%s12440_s0 + $0x39c] sm:$0xf0] }
 0x274   :  { %12577 = vst [vmem:[#allocation52_spill] sm:$0xff] %v9963_v46  ;;  %v3487_v13 = vpop.f32.mrf.mxu2  ;;  %v7366_v46 = vor.u32 %v8699_v0, %v7365_v53  ;;  %v6729_v53 = vld [vmem:[%s12440_s0 + $0x3a8] sm:$0xf] }
 0x276   :  { %v2484_v2 = vpop.f32.mrf.mxu0 }
 0x277   :  { %v2983_v52 = vpop.f32.mrf.mxu1 }
 0x278   :  { %v2984_v23 = vadd.f32 %v2983_v52, %v2484_v2 }
 0x279   :  { %7546 = vmatmul.msk.bf16.gmra.mxu2 %vm2033_vm0, %v6738_v31  ;;  %v6722_v31 = vor.u32 %v8536_v48, %v6719_v51  ;;  %v7377_v48 = vld [vmem:[%s12440_s0 + $0x8b8] sm:$0xf] }
 0x27a   :  { %v9973_v4 = vadd.f32 %v3482_v50, %v2984_v23  ;;  %v8702_v50 = vld [vmem:[%s12440_s0 + $0x8c0] sm:$0xf0] }
 0x27c   :  { %12578 = vst [vmem:[#allocation53_spill] sm:$0xff] %v9973_v4  ;;  %v3490_v39 = vpop.f32.mrf.mxu2  ;;  %2796 = vmatmul.bf16.gmra.mxu3 %v7366_v46  ;;  %v8540_v46 = vld [vmem:[%s12440_s0 + $0x3b0] sm:$0xf0]  ;;  %v8698_v4 = vld [vmem:[%s12440_s0 + $0x8a4] sm:$0xf] }
 0x27d   :  { %v7370_v21 = vor.u32 %v8698_v4, %v7367_v15 }
 0x27e   :  { %v2487_v2 = vpop.f32.mrf.mxu0 }
 0x27f   :  { %v2986_v52 = vpop.f32.mrf.mxu1 }
 0x280   :  { %v2987_v23 = vadd.f32 %v2986_v52, %v2487_v2  ;;  %v6750_v52 = vor.u32 %v8544_v26, %v6749_v12  ;;  %v6730_v26 = vor.u32 %v8540_v46, %v6729_v53  ;;  %v6761_v53 = vld [vmem:[%s12440_s0 + $0x3e0] sm:$0xf]  ;;  %v8547_v46 = vld [vmem:[%s12440_s0 + $0x3e8] sm:$0xf0] }
 0x281   :  { %2526 = vmatmul.bf16.gmra.mxu0 %v6718_v7 }
 0x282   :  { %v9996_v3 = vadd.f32 %v3485_v25, %v2987_v23  ;;  %3025 = vmatmul.bf16.gmra.mxu1 %v6722_v31  ;;  %v8539_v31 = vld [vmem:[%s12440_s0 + $0x3ac] sm:$0xf]  ;;  %v6731_v23 = vld [vmem:[%s12440_s0 + $0x3b4] sm:$0xf0] }
 0x284   :  { %12579 = vst [vmem:[#allocation54_spill] sm:$0xff] %v9996_v3  ;;  %v3492_v51 = vpop.f32.mrf.mxu2  ;;  %v7378_v3 = vor.u32 %v8702_v50, %v7377_v48  ;;  %v6741_v48 = vld [vmem:[%s12440_s0 + $0x3c0] sm:$0xf] }
 0x286   :  { %v2489_v2 = vpop.f32.mrf.mxu0 }
 0x287   :  { %v2988_v7 = vpop.f32.mrf.mxu1 }
 0x288   :  { %v2989_v0 = vadd.f32 %v2988_v7, %v2489_v2 }
 0x289   :  { %7547 = vmatmul.msk.bf16.gmra.mxu2 %vm2033_vm0, %v6750_v52  ;;  %v6734_v52 = vor.u32 %v8539_v31, %v6731_v23  ;;  %v7389_v31 = vld [vmem:[%s12440_s0 + $0x8d0] sm:$0xf] }
 0x28a   :  { %v10006_v25 = vadd.f32 %v3487_v13, %v2989_v0  ;;  %v8705_v13 = vld [vmem:[%s12440_s0 + $0x8d8] sm:$0xf0] }
 0x28c   :  { %12580 = vst [vmem:[#allocation55_spill] sm:$0xff] %v10006_v25  ;;  %v3495_v12 = vpop.f32.mrf.mxu2  ;;  %2801 = vmatmul.bf16.gmra.mxu3 %v7378_v3  ;;  %v8543_v3 = vld [vmem:[%s12440_s0 + $0x3c8] sm:$0xf0]  ;;  %v7358_v25 = vor.u32 %v8695_v20, %v7355_v60 }
 0x28e   :  { %v2492_v2 = vpop.f32.mrf.mxu0 }
 0x28f   :  { %v2991_v7 = vpop.f32.mrf.mxu1 }
 0x290   :  { %v2992_v0 = vadd.f32 %v2991_v7, %v2492_v2  ;;  %v6762_v7 = vor.u32 %v8547_v46, %v6761_v53  ;;  %v6742_v46 = vor.u32 %v8543_v3, %v6741_v48  ;;  %v6773_v48 = vld [vmem:[%s12440_s0 + $0x3f8] sm:$0xf]  ;;  %v8550_v3 = vld [vmem:[%s12440_s0 + $0x400] sm:$0xf0] }
 0x291   :  { %2531 = vmatmul.bf16.gmra.mxu0 %v6730_v26 }
 0x292   :  { %v10029_v24 = vadd.f32 %v3490_v39, %v2992_v0  ;;  %3030 = vmatmul.bf16.gmra.mxu1 %v6734_v52  ;;  %v8542_v52 = vld [vmem:[%s12440_s0 + $0x3c4] sm:$0xf]  ;;  %v6743_v0 = vld [vmem:[%s12440_s0 + $0x3cc] sm:$0xf0] }
 0x294   :  { %12581 = vst [vmem:[#allocation56_spill] sm:$0xff] %v10029_v24  ;;  %v3497_v23 = vpop.f32.mrf.mxu2  ;;  %v7390_v24 = vor.u32 %v8705_v13, %v7389_v31 }
 0x296   :  { %v2494_v2 = vpop.f32.mrf.mxu0 }
 0x297   :  { %v2993_v26 = vpop.f32.mrf.mxu1 }
 0x298   :  { %v2994_v50 = vadd.f32 %v2993_v26, %v2494_v2 }
 0x299   :  { %7548 = vmatmul.msk.bf16.gmra.mxu2 %vm2033_vm0, %v6762_v7  ;;  %v6746_v7 = vor.u32 %v8542_v52, %v6743_v0 }
 0x29a   :  { %v10039_v39 = vadd.f32 %v3492_v51, %v2994_v50 }
 0x29c   :  { %12582 = vst [vmem:[#allocation57_spill] sm:$0xff] %v10039_v39  ;;  %v3500_v53 = vpop.f32.mrf.mxu2  ;;  %2806 = vmatmul.bf16.gmra.mxu3 %v7390_v24  ;;  %v8546_v24 = vld [vmem:[%s12440_s0 + $0x3e0] sm:$0xf0] }
 0x29e   :  { %v2497_v2 = vpop.f32.mrf.mxu0 }
 0x29f   :  { %v2996_v26 = vpop.f32.mrf.mxu1 }
 0x2a0   :  { %v2997_v50 = vadd.f32 %v2996_v26, %v2497_v2  ;;  %v6774_v26 = vor.u32 %v8550_v3, %v6773_v48  ;;  %v6755_v48 = vld [vmem:[%s12440_s0 + $0x3e4] sm:$0xf0] }
 0x2a1   :  { %2536 = vmatmul.bf16.gmra.mxu0 %v6742_v46  ;;  %v10072_v46 = vpop.f32.mrf.mxu3 }
 0x2a2   :  { %v10062_v47 = vadd.f32 %v3495_v12, %v2997_v50  ;;  %3035 = vmatmul.bf16.gmra.mxu1 %v6746_v7  ;;  %12584 = vst [vmem:[#allocation59_spill] sm:$0xff] %v10072_v46  ;;  %v6753_v7 = vld [vmem:[%s12440_s0 + $0x3d8] sm:$0xf]  ;;  %v8545_v50 = vld [vmem:[%s12440_s0 + $0x3dc] sm:$0xf] }
 0x2a3   :  { %v7401_v46 = vld [vmem:[%s12440_s0 + $0x8e8] sm:$0xf] }
 0x2a4   :  { %12583 = vst [vmem:[#allocation58_spill] sm:$0xff] %v10062_v47  ;;  %v3502_v0 = vpop.f32.mrf.mxu2  ;;  %v8708_v47 = vld [vmem:[%s12440_s0 + $0x8f0] sm:$0xf0] }
 0x2a5   :  { %v7402_v6 = vor.u32 %v8708_v47, %v7401_v46  ;;  %v6765_v46 = vld [vmem:[%s12440_s0 + $0x3f0] sm:$0xf] }
 0x2a6   :  { %v2499_v2 = vpop.f32.mrf.mxu0 }
 0x2a7   :  { %v2998_v13 = vpop.f32.mrf.mxu1 }
 0x2a8   :  { %v2999_v12 = vadd.f32 %v2998_v13, %v2499_v2  ;;  %v6754_v2 = vor.u32 %v8546_v24, %v6753_v7  ;;  %v6758_v13 = vor.u32 %v8545_v50, %v6755_v48  ;;  %v6785_v7 = vld [vmem:[%s12440_s0 + $0x410] sm:$0xf] }
 0x2a9   :  { %7549 = vmatmul.msk.bf16.gmra.mxu2 %vm2033_vm0, %v6774_v26 }
 0x2aa   :  { %v10074_v31 = vadd.f32 %v3497_v23, %v2999_v12  ;;  %v10091_v12 = vpop.f32.mrf.mxu3 }
 0x2ab   :  { %12586 = vst [vmem:[#allocation61_spill] sm:$0xff] %v10091_v12  ;;  %v8711_v12 = vld [vmem:[%s12440_s0 + $0x908] sm:$0xf0] }
 0x2ac   :  { %12585 = vst [vmem:[#allocation60_spill] sm:$0xff] %v10074_v31  ;;  %v3505_v3 = vpop.f32.mrf.mxu2  ;;  %2811 = vmatmul.bf16.gmra.mxu3 %v7402_v6  ;;  %v8549_v6 = vld [vmem:[%s12440_s0 + $0x3f8] sm:$0xf0] }
 0x2ae   :  { %v2502_v26 = vpop.f32.mrf.mxu0 }
 0x2af   :  { %v3001_v52 = vpop.f32.mrf.mxu1 }
 0x2b0   :  { %v3002_v51 = vadd.f32 %v3001_v52, %v2502_v26  ;;  %v8553_v52 = vld [vmem:[%s12440_s0 + $0x418] sm:$0xf0] }
 0x2b1   :  { %2541 = vmatmul.bf16.gmra.mxu0 %v6754_v2  ;;  %v6786_v26 = vor.u32 %v8553_v52, %v6785_v7  ;;  %v6767_v7 = vld [vmem:[%s12440_s0 + $0x3fc] sm:$0xf0] }
 0x2b2   :  { %v10099_v39 = vadd.f32 %v3500_v53, %v3002_v51  ;;  %3040 = vmatmul.bf16.gmra.mxu1 %v6758_v13  ;;  %v10109_v2 = vpop.f32.mrf.mxu3  ;;  %v8548_v13 = vld [vmem:[%s12440_s0 + $0x3f4] sm:$0xf] }
 0x2b3   :  { %12588 = vst [vmem:[#allocation63_spill] sm:$0xff] %v10109_v2  ;;  %v7413_v2 = vld [vmem:[%s12440_s0 + $0x900] sm:$0xf] }
 0x2b4   :  { %12587 = vst [vmem:[#allocation62_spill] sm:$0xff] %v10099_v39  ;;  %v3507_v50 = vpop.f32.mrf.mxu2  ;;  %v7414_v39 = vor.u32 %v8711_v12, %v7413_v2  ;;  %v6777_v2 = vld [vmem:[%s12440_s0 + $0x408] sm:$0xf] }
 0x2b6   :  { %v2504_v48 = vpop.f32.mrf.mxu0 }
 0x2b7   :  { %v3003_v47 = vpop.f32.mrf.mxu1 }
 0x2b8   :  { %v3004_v51 = vadd.f32 %v3003_v47, %v2504_v48  ;;  %v6766_v48 = vor.u32 %v8549_v6, %v6765_v46  ;;  %v6770_v47 = vor.u32 %v8548_v13, %v6767_v7  ;;  %v6797_v46 = vld [vmem:[%s12440_s0 + $0x428] sm:$0xf] }
 0x2b9   :  { %7550 = vmatmul.msk.bf16.gmra.mxu2 %vm2033_vm0, %v6786_v26 }
 0x2ba   :  { %v10111_v53 = vadd.f32 %v3502_v0, %v3004_v51  ;;  %v10128_v51 = vpop.f32.mrf.mxu3 }
 0x2bb   :  { %12590 = vst [vmem:[#allocation65_spill] sm:$0xff] %v10128_v51  ;;  %v7425_v51 = vld [vmem:[%s12440_s0 + $0x918] sm:$0xf] }
 0x2bc   :  { %12589 = vst [vmem:[#allocation64_spill] sm:$0xff] %v10111_v53  ;;  %v3510_v52 = vpop.f32.mrf.mxu2  ;;  %2816 = vmatmul.bf16.gmra.mxu3 %v7414_v39  ;;  %v8552_v39 = vld [vmem:[%s12440_s0 + $0x410] sm:$0xf0] }
 0x2be   :  { %v2507_v26 = vpop.f32.mrf.mxu0 }
 0x2bf   :  { %v3006_v24 = vpop.f32.mrf.mxu1 }
 0x2c0   :  { %v3007_v23 = vadd.f32 %v3006_v24, %v2507_v26  ;;  %v8556_v24 = vld [vmem:[%s12440_s0 + $0x430] sm:$0xf0] }
 0x2c1   :  { %2546 = vmatmul.bf16.gmra.mxu0 %v6766_v48  ;;  %v6798_v26 = vor.u32 %v8556_v24, %v6797_v46  ;;  %v6779_v46 = vld [vmem:[%s12440_s0 + $0x414] sm:$0xf0] }
 0x2c2   :  { %v10136_v30 = vadd.f32 %v3505_v3, %v3007_v23  ;;  %3045 = vmatmul.bf16.gmra.mxu1 %v6770_v47  ;;  %v10146_v48 = vpop.f32.mrf.mxu3  ;;  %v8551_v47 = vld [vmem:[%s12440_s0 + $0x40c] sm:$0xf] }
 0x2c4   :  { %12591 = vst [vmem:[#allocation66_spill] sm:$0xff] %v10136_v30  ;;  %v3512_v13 = vpop.f32.mrf.mxu2  ;;  %v8714_v30 = vld [vmem:[%s12440_s0 + $0x920] sm:$0xf0] }
 0x2c5   :  { %v7426_v55 = vor.u32 %v8714_v30, %v7425_v51  ;;  %v6789_v51 = vld [vmem:[%s12440_s0 + $0x420] sm:$0xf] }
 0x2c6   :  { %v2509_v7 = vpop.f32.mrf.mxu0 }
 0x2c7   :  { %v3008_v23 = vpop.f32.mrf.mxu1 }
 0x2c8   :  { %v3009_v3 = vadd.f32 %v3008_v23, %v2509_v7  ;;  %v6778_v7 = vor.u32 %v8552_v39, %v6777_v2  ;;  %v6782_v23 = vor.u32 %v8551_v47, %v6779_v46  ;;  %v6809_v2 = vld [vmem:[%s12440_s0 + $0x440] sm:$0xf] }
 0x2c9   :  { %7551 = vmatmul.msk.bf16.gmra.mxu2 %vm2033_vm0, %v6798_v26 }
 0x2ca   :  { %v10148_v12 = vadd.f32 %v3507_v50, %v3009_v3  ;;  %v10165_v3 = vpop.f32.mrf.mxu3 }
 0x2cc   :  { %12592 = vst [vmem:[#allocation67_spill] sm:$0xff] %v10148_v12  ;;  %v3515_v24 = vpop.f32.mrf.mxu2  ;;  %2821 = vmatmul.bf16.gmra.mxu3 %v7426_v55  ;;  %v8555_v55 = vld [vmem:[%s12440_s0 + $0x428] sm:$0xf0] }
 0x2ce   :  { %v2512_v26 = vpop.f32.mrf.mxu0 }
 0x2cf   :  { %v3011_v6 = vpop.f32.mrf.mxu1 }
 0x2d0   :  { %v3012_v0 = vadd.f32 %v3011_v6, %v2512_v26  ;;  %v8559_v6 = vld [vmem:[%s12440_s0 + $0x448] sm:$0xf0] }
 0x2d1   :  { %2551 = vmatmul.bf16.gmra.mxu0 %v6778_v7  ;;  %v6810_v26 = vor.u32 %v8559_v6, %v6809_v2  ;;  %v6791_v2 = vld [vmem:[%s12440_s0 + $0x42c] sm:$0xf0] }
 0x2d2   :  { %v10173_v53 = vadd.f32 %v3510_v52, %v3012_v0  ;;  %3050 = vmatmul.bf16.gmra.mxu1 %v6782_v23  ;;  %v10183_v7 = vpop.f32.mrf.mxu3  ;;  %v8554_v23 = vld [vmem:[%s12440_s0 + $0x424] sm:$0xf] }
 0x2d4   :  { %12593 = vst [vmem:[#allocation68_spill] sm:$0xff] %v10173_v53  ;;  %v3517_v47 = vpop.f32.mrf.mxu2  ;;  %v8680_v53 = vld [vmem:[%s12440_s0 + $0x814] sm:$0xf] }
 0x2d5   :  { %v7298_v12 = vor.u32 %v8680_v53, %v7295_v17 }
 0x2d6   :  { %v2514_v46 = vpop.f32.mrf.mxu0 }
 0x2d7   :  { %v3013_v30 = vpop.f32.mrf.mxu1 }
 0x2d8   :  { %v3014_v0 = vadd.f32 %v3013_v30, %v2514_v46  ;;  %v6790_v46 = vor.u32 %v8555_v55, %v6789_v51  ;;  %v6794_v30 = vor.u32 %v8554_v23, %v6791_v2  ;;  %v6821_v51 = vld [vmem:[%s12440_s0 + $0x458] sm:$0xf] }
 0x2d9   :  { %7552 = vmatmul.msk.bf16.gmra.mxu2 %vm2033_vm0, %v6810_v26 }
 0x2da   :  { %v10185_v52 = vadd.f32 %v3512_v13, %v3014_v0  ;;  %v10202_v0 = vpop.f32.mrf.mxu3 }
 0x2dc   :  { %12594 = vst [vmem:[#allocation69_spill] sm:$0xff] %v10185_v52  ;;  %v3520_v6 = vpop.f32.mrf.mxu2  ;;  %3265 = vmatmul.bf16.vlgmr.msrb.gmra.mxu3 %v7298_v12  ;;  %v8558_v12 = vld [vmem:[%s12440_s0 + $0x440] sm:$0xf0] }
 0x2de   :  { %v2517_v26 = vpop.f32.mrf.mxu0 }
 0x2df   :  { %v3016_v39 = vpop.f32.mrf.mxu1 }
 0x2e0   :  { %v3017_v50 = vadd.f32 %v3016_v39, %v2517_v26  ;;  %v8562_v39 = vld [vmem:[%s12440_s0 + $0x460] sm:$0xf0] }
 0x2e1   :  { %2556 = vmatmul.bf16.gmra.mxu0 %v6790_v46  ;;  %v6822_v26 = vor.u32 %v8562_v39, %v6821_v51  ;;  %v6803_v51 = vld [vmem:[%s12440_s0 + $0x444] sm:$0xf0] }
 0x2e2   :  { %v10210_v8 = vadd.f32 %v3515_v24, %v3017_v50  ;;  %3055 = vmatmul.bf16.gmra.mxu1 %v6794_v30  ;;  %v10220_v46 = vpop.f32.mrf.mxu3  ;;  %v6801_v24 = vld [vmem:[%s12440_s0 + $0x438] sm:$0xf]  ;;  %v8557_v30 = vld [vmem:[%s12440_s0 + $0x43c] sm:$0xf] }
 0x2e4   :  { %12595 = vst [vmem:[#allocation70_spill] sm:$0xff] %v10210_v8  ;;  %v3522_v23 = vpop.f32.mrf.mxu2  ;;  %v8683_v8 = vld [vmem:[%s12440_s0 + $0x82c] sm:$0xf] }
 0x2e5   :  { %v7310_v52 = vor.u32 %v8683_v8, %v7307_v45 }
 0x2e6   :  { %v2519_v2 = vpop.f32.mrf.mxu0 }
 0x2e7   :  { %v3018_v17 = vpop.f32.mrf.mxu1 }
 0x2e8   :  { %v3019_v53 = vadd.f32 %v3018_v17, %v2519_v2  ;;  %v6802_v2 = vor.u32 %v8558_v12, %v6801_v24  ;;  %v6806_v17 = vor.u32 %v8557_v30, %v6803_v51  ;;  %v6833_v24 = vld [vmem:[%s12440_s0 + $0x470] sm:$0xf] }
 0x2e9   :  { %7553 = vmatmul.msk.bf16.gmra.mxu2 %vm2033_vm0, %v6822_v26 }
 0x2ea   :  { %v10222_v50 = vadd.f32 %v3517_v47, %v3019_v53  ;;  %v10239_v53 = vpop.f32.mrf.mxu3 }
 0x2ec   :  { %12596 = vst [vmem:[#allocation71_spill] sm:$0xff] %v10222_v50  ;;  %v3525_v39 = vpop.f32.mrf.mxu2  ;;  %3270 = vmatmul.bf16.gmra.mxu3 %v7310_v52  ;;  %v8561_v52 = vld [vmem:[%s12440_s0 + $0x458] sm:$0xf0]  ;;  %v8686_v50 = vld [vmem:[%s12440_s0 + $0x844] sm:$0xf] }
 0x2ee   :  { %v2522_v26 = vpop.f32.mrf.mxu0 }
 0x2ef   :  { %v3021_v55 = vpop.f32.mrf.mxu1 }
 0x2f0   :  { %v3022_v13 = vadd.f32 %v3021_v55, %v2522_v26  ;;  %v8565_v55 = vld [vmem:[%s12440_s0 + $0x478] sm:$0xf0] }
 0x2f1   :  { %2561 = vmatmul.bf16.gmra.mxu0 %v6802_v2  ;;  %v6834_v26 = vor.u32 %v8565_v55, %v6833_v24  ;;  %v6815_v24 = vld [vmem:[%s12440_s0 + $0x45c] sm:$0xf0] }
 0x2f2   :  { %v10247_v33 = vadd.f32 %v3520_v6, %v3022_v13  ;;  %3060 = vmatmul.bf16.gmra.mxu1 %v6806_v17  ;;  %v10257_v2 = vpop.f32.mrf.mxu3  ;;  %v6813_v6 = vld [vmem:[%s12440_s0 + $0x450] sm:$0xf]  ;;  %v8560_v17 = vld [vmem:[%s12440_s0 + $0x454] sm:$0xf] }
 0x2f4   :  { %12597 = vst [vmem:[#allocation72_spill] sm:$0xff] %v10247_v33  ;;  %v3527_v30 = vpop.f32.mrf.mxu2  ;;  %v7322_v33 = vor.u32 %v8686_v50, %v7319_v62 }
 0x2f6   :  { %v2524_v51 = vpop.f32.mrf.mxu0 }
 0x2f7   :  { %v3023_v8 = vpop.f32.mrf.mxu1 }
 0x2f8   :  { %v3024_v45 = vadd.f32 %v3023_v8, %v2524_v51  ;;  %v6814_v51 = vor.u32 %v8561_v52, %v6813_v6  ;;  %v6818_v8 = vor.u32 %v8560_v17, %v6815_v24  ;;  %v6845_v6 = vld [vmem:[%s12440_s0 + $0x488] sm:$0xf] }
 0x2f9   :  { %7554 = vmatmul.msk.bf16.gmra.mxu2 %vm2033_vm0, %v6834_v26 }
 0x2fa   :  { %v10259_v13 = vadd.f32 %v3522_v23, %v3024_v45  ;;  %v10276_v45 = vpop.f32.mrf.mxu3 }
 0x2fc   :  { %12598 = vst [vmem:[#allocation73_spill] sm:$0xff] %v10259_v13  ;;  %v3530_v55 = vpop.f32.mrf.mxu2  ;;  %3275 = vmatmul.bf16.gmra.mxu3 %v7322_v33  ;;  %v8564_v33 = vld [vmem:[%s12440_s0 + $0x470] sm:$0xf0] }
 0x2fe   :  { %v2527_v26 = vpop.f32.mrf.mxu0 }
 0x2ff   :  { %v3026_v47 = vpop.f32.mrf.mxu1 }
 0x300   :  { %v3027_v12 = vadd.f32 %v3026_v47, %v2527_v26  ;;  %v8568_v47 = vld [vmem:[%s12440_s0 + $0x490] sm:$0xf0] }
 0x301   :  { %2566 = vmatmul.bf16.gmra.mxu0 %v6814_v51  ;;  %v6846_v26 = vor.u32 %v8568_v47, %v6845_v6  ;;  %v6827_v6 = vld [vmem:[%s12440_s0 + $0x474] sm:$0xf0] }
 0x302   :  { %v10284_v11 = vadd.f32 %v3525_v39, %v3027_v12  ;;  %3065 = vmatmul.bf16.gmra.mxu1 %v6818_v8  ;;  %v10294_v51 = vpop.f32.mrf.mxu3  ;;  %v6825_v12 = vld [vmem:[%s12440_s0 + $0x468] sm:$0xf]  ;;  %v8563_v8 = vld [vmem:[%s12440_s0 + $0x46c] sm:$0xf] }
 0x304   :  { %12599 = vst [vmem:[#allocation74_spill] sm:$0xff] %v10284_v11  ;;  %v3532_v17 = vpop.f32.mrf.mxu2  ;;  %v8689_v11 = vld [vmem:[%s12440_s0 + $0x85c] sm:$0xf] }
 0x305   :  { %v7334_v13 = vor.u32 %v8689_v11, %v7331_v40 }
 0x306   :  { %v2529_v24 = vpop.f32.mrf.mxu0 }
 0x307   :  { %v3028_v62 = vpop.f32.mrf.mxu1 }
 0x308   :  { %v3029_v50 = vadd.f32 %v3028_v62, %v2529_v24  ;;  %v6826_v24 = vor.u32 %v8564_v33, %v6825_v12  ;;  %v6830_v62 = vor.u32 %v8563_v8, %v6827_v6  ;;  %v6857_v12 = vld [vmem:[%s12440_s0 + $0x4a0] sm:$0xf] }
 0x309   :  { %7555 = vmatmul.msk.bf16.gmra.mxu2 %vm2033_vm0, %v6846_v26 }
 0x30a   :  { %v10296_v39 = vadd.f32 %v3527_v30, %v3029_v50  ;;  %v10313_v50 = vpop.f32.mrf.mxu3 }
 0x30c   :  { %12600 = vst [vmem:[#allocation75_spill] sm:$0xff] %v10296_v39  ;;  %v3535_v47 = vpop.f32.mrf.mxu2  ;;  %3280 = vmatmul.bf16.gmra.mxu3 %v7334_v13  ;;  %v8567_v13 = vld [vmem:[%s12440_s0 + $0x488] sm:$0xf0]  ;;  %v8692_v39 = vld [vmem:[%s12440_s0 + $0x874] sm:$0xf] }
 0x30d   :  { %v7346_v43 = vor.u32 %v8692_v39, %v7343_v59 }
 0x30e   :  { %v2532_v26 = vpop.f32.mrf.mxu0 }
 0x30f   :  { %v3031_v52 = vpop.f32.mrf.mxu1 }
 0x310   :  { %v3032_v23 = vadd.f32 %v3031_v52, %v2532_v26  ;;  %v8571_v52 = vld [vmem:[%s12440_s0 + $0x4a8] sm:$0xf0] }
 0x311   :  { %2571 = vmatmul.bf16.gmra.mxu0 %v6826_v24  ;;  %v6858_v26 = vor.u32 %v8571_v52, %v6857_v12  ;;  %v6839_v12 = vld [vmem:[%s12440_s0 + $0x48c] sm:$0xf0] }
 0x312   :  { %v10321_v28 = vadd.f32 %v3530_v55, %v3032_v23  ;;  %3070 = vmatmul.bf16.gmra.mxu1 %v6830_v62  ;;  %v10331_v24 = vpop.f32.mrf.mxu3  ;;  %v6837_v55 = vld [vmem:[%s12440_s0 + $0x480] sm:$0xf]  ;;  %v8566_v62 = vld [vmem:[%s12440_s0 + $0x484] sm:$0xf] }
 0x314   :  { %v3537_v8 = vpop.f32.mrf.mxu2 }
 0x316   :  { %v2534_v6 = vpop.f32.mrf.mxu0 }
 0x317   :  { %v3033_v11 = vpop.f32.mrf.mxu1 }
 0x318   :  { %v3034_v40 = vadd.f32 %v3033_v11, %v2534_v6  ;;  %v6838_v6 = vor.u32 %v8567_v13, %v6837_v55  ;;  %v6842_v11 = vor.u32 %v8566_v62, %v6839_v12  ;;  %v6869_v55 = vld [vmem:[%s12440_s0 + $0x4b8] sm:$0xf] }
 0x319   :  { %7556 = vmatmul.msk.bf16.gmra.mxu2 %vm2033_vm0, %v6858_v26 }
 0x31a   :  { %v10333_v23 = vadd.f32 %v3532_v17, %v3034_v40  ;;  %v10350_v40 = vpop.f32.mrf.mxu3 }
 0x31b   :  { %12601 = vst [vmem:[#allocation76_spill] sm:$0xff] %v10350_v40 }
 0x31c   :  { %v3540_v52 = vpop.f32.mrf.mxu2  ;;  %3285 = vmatmul.bf16.gmra.mxu3 %v7346_v43  ;;  %v8570_v43 = vld [vmem:[%s12440_s0 + $0x4a0] sm:$0xf0] }
 0x31e   :  { %v2537_v26 = vpop.f32.mrf.mxu0 }
 0x31f   :  { %v3036_v30 = vpop.f32.mrf.mxu1 }
 0x320   :  { %v3037_v33 = vadd.f32 %v3036_v30, %v2537_v26  ;;  %v8574_v30 = vld [vmem:[%s12440_s0 + $0x4c0] sm:$0xf0] }
 0x321   :  { %2576 = vmatmul.bf16.gmra.mxu0 %v6838_v6  ;;  %v6870_v26 = vor.u32 %v8574_v30, %v6869_v55  ;;  %v6851_v55 = vld [vmem:[%s12440_s0 + $0x4a4] sm:$0xf0] }
 0x322   :  { %v10358_v31 = vadd.f32 %v3535_v47, %v3037_v33  ;;  %3075 = vmatmul.bf16.gmra.mxu1 %v6842_v11  ;;  %v10368_v6 = vpop.f32.mrf.mxu3  ;;  %v6849_v33 = vld [vmem:[%s12440_s0 + $0x498] sm:$0xf]  ;;  %v8569_v11 = vld [vmem:[%s12440_s0 + $0x49c] sm:$0xf] }
 0x324   :  { %v3542_v62 = vpop.f32.mrf.mxu2 }
 0x326   :  { %v2539_v12 = vpop.f32.mrf.mxu0 }
 0x327   :  { %v3038_v59 = vpop.f32.mrf.mxu1 }
 0x328   :  { %v3039_v39 = vadd.f32 %v3038_v59, %v2539_v12  ;;  %v6850_v12 = vor.u32 %v8570_v43, %v6849_v33  ;;  %v6854_v59 = vor.u32 %v8569_v11, %v6851_v55  ;;  %v6881_v33 = vld [vmem:[%s12440_s0 + $0x4d0] sm:$0xf] }
 0x329   :  { %7557 = vmatmul.msk.bf16.gmra.mxu2 %vm2033_vm0, %v6870_v26 }
 0x32a   :  { %v10370_v47 = vadd.f32 %v3537_v8, %v3039_v39  ;;  %v10387_v39 = vpop.f32.mrf.mxu3 }
 0x32b   :  { %12602 = vst [vmem:[#allocation77_spill] sm:$0xff] %v10387_v39 }
 0x32c   :  { %v3545_v30 = vpop.f32.mrf.mxu2  ;;  %3290 = vmatmul.bf16.gmra.mxu3 %v7358_v25  ;;  %v8573_v25 = vld [vmem:[%s12440_s0 + $0x4b8] sm:$0xf0] }
 0x32e   :  { %v2542_v26 = vpop.f32.mrf.mxu0 }
 0x32f   :  { %v3041_v13 = vpop.f32.mrf.mxu1 }
 0x330   :  { %v3042_v17 = vadd.f32 %v3041_v13, %v2542_v26  ;;  %v8577_v13 = vld [vmem:[%s12440_s0 + $0x4d8] sm:$0xf0] }
 0x331   :  { %2581 = vmatmul.bf16.gmra.mxu0 %v6850_v12  ;;  %v6882_v26 = vor.u32 %v8577_v13, %v6881_v33  ;;  %v6863_v33 = vld [vmem:[%s12440_s0 + $0x4bc] sm:$0xf0] }
 0x332   :  { %v10395_v36 = vadd.f32 %v3540_v52, %v3042_v17  ;;  %3080 = vmatmul.bf16.gmra.mxu1 %v6854_v59  ;;  %v10405_v12 = vpop.f32.mrf.mxu3  ;;  %v6861_v52 = vld [vmem:[%s12440_s0 + $0x4b0] sm:$0xf]  ;;  %v8572_v59 = vld [vmem:[%s12440_s0 + $0x4b4] sm:$0xf] }
 0x334   :  { %v3547_v11 = vpop.f32.mrf.mxu2 }
 0x336   :  { %v2544_v55 = vpop.f32.mrf.mxu0 }
 0x337   :  { %v3043_v60 = vpop.f32.mrf.mxu1 }
 0x338   :  { %v3044_v20 = vadd.f32 %v3043_v60, %v2544_v55  ;;  %v6862_v55 = vor.u32 %v8573_v25, %v6861_v52  ;;  %v6866_v60 = vor.u32 %v8572_v59, %v6863_v33  ;;  %v6893_v52 = vld [vmem:[%s12440_s0 + $0x4e8] sm:$0xf] }
 0x339   :  { %7558 = vmatmul.msk.bf16.gmra.mxu2 %vm2033_vm0, %v6882_v26 }
 0x33a   :  { %v10407_v17 = vadd.f32 %v3542_v62, %v3044_v20  ;;  %v10424_v20 = vpop.f32.mrf.mxu3 }
 0x33b   :  { %12603 = vst [vmem:[#allocation78_spill] sm:$0xff] %v10424_v20 }
 0x33c   :  { %v3550_v13 = vpop.f32.mrf.mxu2  ;;  %3295 = vmatmul.bf16.gmra.mxu3 %v7370_v21  ;;  %v8576_v21 = vld [vmem:[%s12440_s0 + $0x4d0] sm:$0xf0] }
 0x33e   :  { %v2547_v26 = vpop.f32.mrf.mxu0 }
 0x33f   :  { %v3046_v43 = vpop.f32.mrf.mxu1 }
 0x340   :  { %v3047_v8 = vadd.f32 %v3046_v43, %v2547_v26  ;;  %v8580_v43 = vld [vmem:[%s12440_s0 + $0x4f0] sm:$0xf0] }
 0x341   :  { %2586 = vmatmul.bf16.gmra.mxu0 %v6862_v55  ;;  %v6894_v26 = vor.u32 %v8580_v43, %v6893_v52  ;;  %v6875_v52 = vld [vmem:[%s12440_s0 + $0x4d4] sm:$0xf0] }
 0x342   :  { %v10432_v58 = vadd.f32 %v3545_v30, %v3047_v8  ;;  %3085 = vmatmul.bf16.gmra.mxu1 %v6866_v60  ;;  %v10442_v55 = vpop.f32.mrf.mxu3  ;;  %v6873_v30 = vld [vmem:[%s12440_s0 + $0x4c8] sm:$0xf]  ;;  %v8575_v60 = vld [vmem:[%s12440_s0 + $0x4cc] sm:$0xf] }
 0x344   :  { %v3552_v59 = vpop.f32.mrf.mxu2 }
 0x346   :  { %v2549_v33 = vpop.f32.mrf.mxu0 }
 0x347   :  { %v3048_v15 = vpop.f32.mrf.mxu1 }
 0x348   :  { %v3049_v4 = vadd.f32 %v3048_v15, %v2549_v33  ;;  %v6874_v33 = vor.u32 %v8576_v21, %v6873_v30  ;;  %v6878_v15 = vor.u32 %v8575_v60, %v6875_v52  ;;  %v6905_v30 = vld [vmem:[%s12440_s0 + $0x500] sm:$0xf] }
 0x349   :  { %7559 = vmatmul.msk.bf16.gmra.mxu2 %vm2033_vm0, %v6894_v26 }
 0x34a   :  { %v10444_v8 = vadd.f32 %v3547_v11, %v3049_v4  ;;  %v10461_v4 = vpop.f32.mrf.mxu3 }
 0x34b   :  { %12604 = vst [vmem:[#allocation79_spill] sm:$0xff] %v10461_v4 }
 0x34c   :  { %v3555_v43 = vpop.f32.mrf.mxu2  ;;  %3300 = vmatmul.bf16.gmra.mxu3 %v7382_v9  ;;  %v8579_v9 = vld [vmem:[%s12440_s0 + $0x4e8] sm:$0xf0] }
 0x34e   :  { %v2552_v26 = vpop.f32.mrf.mxu0 }
 0x34f   :  { %v3051_v25 = vpop.f32.mrf.mxu1 }
 0x350   :  { %v3052_v62 = vadd.f32 %v3051_v25, %v2552_v26  ;;  %v8583_v25 = vld [vmem:[%s12440_s0 + $0x508] sm:$0xf0] }
 0x351   :  { %2591 = vmatmul.bf16.gmra.mxu0 %v6874_v33  ;;  %v6906_v26 = vor.u32 %v8583_v25, %v6905_v30  ;;  %v6887_v30 = vld [vmem:[%s12440_s0 + $0x4ec] sm:$0xf0] }
 0x352   :  { %v10469_v18 = vadd.f32 %v3550_v13, %v3052_v62  ;;  %3090 = vmatmul.bf16.gmra.mxu1 %v6878_v15  ;;  %v10479_v33 = vpop.f32.mrf.mxu3  ;;  %v6885_v13 = vld [vmem:[%s12440_s0 + $0x4e0] sm:$0xf]  ;;  %v8578_v15 = vld [vmem:[%s12440_s0 + $0x4e4] sm:$0xf] }
 0x354   :  { %12605 = vst [vmem:[#allocation80_spill] sm:$0xff] %v10469_v18  ;;  %v3557_v60 = vpop.f32.mrf.mxu2 }
 0x356   :  { %v2554_v52 = vpop.f32.mrf.mxu0 }
 0x357   :  { %v3053_v37 = vpop.f32.mrf.mxu1 }
 0x358   :  { %v3054_v54 = vadd.f32 %v3053_v37, %v2554_v52  ;;  %v6886_v52 = vor.u32 %v8579_v9, %v6885_v13  ;;  %v6890_v37 = vor.u32 %v8578_v15, %v6887_v30  ;;  %v6917_v13 = vld [vmem:[%s12440_s0 + $0x518] sm:$0xf] }
 0x359   :  { %7560 = vmatmul.msk.bf16.gmra.mxu2 %vm2033_vm0, %v6906_v26 }
 0x35a   :  { %v10481_v62 = vadd.f32 %v3552_v59, %v3054_v54  ;;  %v10498_v54 = vpop.f32.mrf.mxu3 }
 0x35b   :  { %12607 = vst [vmem:[#allocation82_spill] sm:$0xff] %v10498_v54  ;;  %v7403_v54 = vld [vmem:[%s12440_s0 + $0x8f4] sm:$0xf0] }
 0x35c   :  { %12606 = vst [vmem:[#allocation81_spill] sm:$0xff] %v10481_v62  ;;  %v3560_v25 = vpop.f32.mrf.mxu2  ;;  %3305 = vmatmul.bf16.gmra.mxu3 %v7394_v49  ;;  %v8582_v49 = vld [vmem:[%s12440_s0 + $0x500] sm:$0xf0] }
 0x35e   :  { %v2557_v26 = vpop.f32.mrf.mxu0 }
 0x35f   :  { %v3056_v21 = vpop.f32.mrf.mxu1 }
 0x360   :  { %v3057_v11 = vadd.f32 %v3056_v21, %v2557_v26  ;;  %v8586_v21 = vld [vmem:[%s12440_s0 + $0x520] sm:$0xf0] }
 0x361   :  { %2596 = vmatmul.bf16.gmra.mxu0 %v6886_v52  ;;  %v6918_v26 = vor.u32 %v8586_v21, %v6917_v13  ;;  %v6899_v13 = vld [vmem:[%s12440_s0 + $0x504] sm:$0xf0] }
 0x362   :  { %v10506_v44 = vadd.f32 %v3555_v43, %v3057_v11  ;;  %3095 = vmatmul.bf16.gmra.mxu1 %v6890_v37  ;;  %v10516_v52 = vpop.f32.mrf.mxu3  ;;  %v6897_v43 = vld [vmem:[%s12440_s0 + $0x4f8] sm:$0xf]  ;;  %v8581_v37 = vld [vmem:[%s12440_s0 + $0x4fc] sm:$0xf] }
 0x363   :  { %12609 = vst [vmem:[#allocation84_spill] sm:$0xff] %v10516_v52  ;;  %v8707_v52 = vld [vmem:[%s12440_s0 + $0x8ec] sm:$0xf] }
 0x364   :  { %12608 = vst [vmem:[#allocation83_spill] sm:$0xff] %v10506_v44  ;;  %v3562_v15 = vpop.f32.mrf.mxu2  ;;  %v7406_v4 = vor.u32 %v8707_v52, %v7403_v54  ;;  %v6909_v52 = vld [vmem:[%s12440_s0 + $0x510] sm:$0xf] }
 0x366   :  { %v2559_v30 = vpop.f32.mrf.mxu0 }
 0x367   :  { %v3058_v63 = vpop.f32.mrf.mxu1 }
 0x368   :  { %v3059_v35 = vadd.f32 %v3058_v63, %v2559_v30  ;;  %v6898_v30 = vor.u32 %v8582_v49, %v6897_v43  ;;  %v6902_v63 = vor.u32 %v8581_v37, %v6899_v13  ;;  %v6929_v43 = vld [vmem:[%s12440_s0 + $0x530] sm:$0xf] }
 0x369   :  { %7561 = vmatmul.msk.bf16.gmra.mxu2 %vm2033_vm0, %v6918_v26 }
 0x36a   :  { %v10518_v11 = vadd.f32 %v3557_v60, %v3059_v35  ;;  %v10535_v35 = vpop.f32.mrf.mxu3 }
 0x36b   :  { %12611 = vst [vmem:[#allocation86_spill] sm:$0xff] %v10535_v35  ;;  %v7415_v35 = vld [vmem:[%s12440_s0 + $0x90c] sm:$0xf0] }
 0x36c   :  { %12610 = vst [vmem:[#allocation85_spill] sm:$0xff] %v10518_v11  ;;  %v3565_v21 = vpop.f32.mrf.mxu2  ;;  %3310 = vmatmul.bf16.gmra.mxu3 %v7406_v4  ;;  %v8585_v4 = vld [vmem:[%s12440_s0 + $0x518] sm:$0xf0] }
 0x36e   :  { %v2562_v26 = vpop.f32.mrf.mxu0 }
 0x36f   :  { %v3061_v9 = vpop.f32.mrf.mxu1 }
 0x370   :  { %v3062_v59 = vadd.f32 %v3061_v9, %v2562_v26  ;;  %v8589_v9 = vld [vmem:[%s12440_s0 + $0x538] sm:$0xf0] }
 0x371   :  { %2601 = vmatmul.bf16.gmra.mxu0 %v6898_v30  ;;  %v6930_v26 = vor.u32 %v8589_v9, %v6929_v43  ;;  %v6911_v43 = vld [vmem:[%s12440_s0 + $0x51c] sm:$0xf0] }
 0x372   :  { %v10543_v20 = vadd.f32 %v3560_v25, %v3062_v59  ;;  %3100 = vmatmul.bf16.gmra.mxu1 %v6902_v63  ;;  %v10553_v30 = vpop.f32.mrf.mxu3  ;;  %v8584_v63 = vld [vmem:[%s12440_s0 + $0x514] sm:$0xf] }
 0x373   :  { %12613 = vst [vmem:[#allocation88_spill] sm:$0xff] %v10553_v30  ;;  %v8710_v30 = vld [vmem:[%s12440_s0 + $0x904] sm:$0xf] }
 0x374   :  { %12612 = vst [vmem:[#allocation87_spill] sm:$0xff] %v10543_v20  ;;  %v3567_v37 = vpop.f32.mrf.mxu2  ;;  %v7418_v20 = vor.u32 %v8710_v30, %v7415_v35  ;;  %v6921_v30 = vld [vmem:[%s12440_s0 + $0x528] sm:$0xf] }
 0x376   :  { %v2564_v13 = vpop.f32.mrf.mxu0 }
 0x377   :  { %v3063_v59 = vpop.f32.mrf.mxu1 }
 0x378   :  { %v3064_v25 = vadd.f32 %v3063_v59, %v2564_v13  ;;  %v6910_v13 = vor.u32 %v8585_v4, %v6909_v52  ;;  %v6914_v59 = vor.u32 %v8584_v63, %v6911_v43  ;;  %v6941_v52 = vld [vmem:[%s12440_s0 + $0x548] sm:$0xf] }
 0x379   :  { %7562 = vmatmul.msk.bf16.gmra.mxu2 %vm2033_vm0, %v6930_v26 }
 0x37a   :  { %v10555_v54 = vadd.f32 %v3562_v15, %v3064_v25  ;;  %v10572_v25 = vpop.f32.mrf.mxu3 }
 0x37b   :  { %12615 = vst [vmem:[#allocation90_spill] sm:$0xff] %v10572_v25  ;;  %v8713_v25 = vld [vmem:[%s12440_s0 + $0x91c] sm:$0xf] }
 0x37c   :  { %12614 = vst [vmem:[#allocation89_spill] sm:$0xff] %v10555_v54  ;;  %v3570_v9 = vpop.f32.mrf.mxu2  ;;  %3315 = vmatmul.bf16.gmra.mxu3 %v7418_v20  ;;  %v8588_v20 = vld [vmem:[%s12440_s0 + $0x530] sm:$0xf0] }
 0x37e   :  { %v2567_v26 = vpop.f32.mrf.mxu0 }
 0x37f   :  { %v3066_v49 = vpop.f32.mrf.mxu1 }
 0x380   :  { %v3067_v60 = vadd.f32 %v3066_v49, %v2567_v26  ;;  %v8592_v49 = vld [vmem:[%s12440_s0 + $0x550] sm:$0xf0] }
 0x381   :  { %2606 = vmatmul.bf16.gmra.mxu0 %v6910_v13  ;;  %v6942_v26 = vor.u32 %v8592_v49, %v6941_v52  ;;  %v6923_v52 = vld [vmem:[%s12440_s0 + $0x534] sm:$0xf0] }
 0x382   :  { %v10580_v5 = vadd.f32 %v3565_v21, %v3067_v60  ;;  %3105 = vmatmul.bf16.gmra.mxu1 %v6914_v59  ;;  %v10590_v13 = vpop.f32.mrf.mxu3  ;;  %v8587_v59 = vld [vmem:[%s12440_s0 + $0x52c] sm:$0xf] }
 0x384   :  { %12616 = vst [vmem:[#allocation91_spill] sm:$0xff] %v10580_v5  ;;  %v3572_v63 = vpop.f32.mrf.mxu2  ;;  %v7427_v5 = vld [vmem:[%s12440_s0 + $0x924] sm:$0xf0] }
 0x385   :  { %v7430_v61 = vor.u32 %v8713_v25, %v7427_v5  ;;  %v6933_v25 = vld [vmem:[%s12440_s0 + $0x540] sm:$0xf] }
 0x386   :  { %v2569_v43 = vpop.f32.mrf.mxu0 }
 0x387   :  { %v3068_v60 = vpop.f32.mrf.mxu1 }
 0x388   :  { %v3069_v21 = vadd.f32 %v3068_v60, %v2569_v43  ;;  %v6922_v43 = vor.u32 %v8588_v20, %v6921_v30  ;;  %v6926_v60 = vor.u32 %v8587_v59, %v6923_v52  ;;  %v6953_v30 = vld [vmem:[%s12440_s0 + $0x560] sm:$0xf] }
 0x389   :  { %7563 = vmatmul.msk.bf16.gmra.mxu2 %vm2033_vm0, %v6942_v26 }
 0x38a   :  { %v10592_v35 = vadd.f32 %v3567_v37, %v3069_v21  ;;  %v10609_v21 = vpop.f32.mrf.mxu3 }
 0x38c   :  { %12617 = vst [vmem:[#allocation92_spill] sm:$0xff] %v10592_v35  ;;  %v3575_v49 = vpop.f32.mrf.mxu2  ;;  %3320 = vmatmul.bf16.gmra.mxu3 %v7430_v61  ;;  %v8591_v61 = vld [vmem:[%s12440_s0 + $0x548] sm:$0xf0]  ;;  %v8688_v35 = vld [vmem:[%s12440_s0 + $0x850] sm:$0xf0] }
 0x38d   :  { %v7326_v27 = vor.u32 %v8688_v35, %v7325_v22 }
 0x38e   :  { %v2572_v26 = vpop.f32.mrf.mxu0 }
 0x38f   :  { %v3071_v4 = vpop.f32.mrf.mxu1 }
 0x390   :  { %v3072_v15 = vadd.f32 %v3071_v4, %v2572_v26  ;;  %v8595_v4 = vld [vmem:[%s12440_s0 + $0x568] sm:$0xf0] }
 0x391   :  { %2611 = vmatmul.bf16.gmra.mxu0 %v6922_v43  ;;  %v6954_v26 = vor.u32 %v8595_v4, %v6953_v30  ;;  %v6935_v30 = vld [vmem:[%s12440_s0 + $0x54c] sm:$0xf0] }
 0x392   :  { %v10617_v54 = vadd.f32 %v3570_v9, %v3072_v15  ;;  %3110 = vmatmul.bf16.gmra.mxu1 %v6926_v60  ;;  %v10627_v43 = vpop.f32.mrf.mxu3  ;;  %v8590_v60 = vld [vmem:[%s12440_s0 + $0x544] sm:$0xf] }
 0x394   :  { %12618 = vst [vmem:[#allocation93_spill] sm:$0xff] %v10617_v54  ;;  %v3577_v59 = vpop.f32.mrf.mxu2 }
 0x396   :  { %v2574_v52 = vpop.f32.mrf.mxu0 }
 0x397   :  { %v3073_v5 = vpop.f32.mrf.mxu1 }
 0x398   :  { %v3074_v15 = vadd.f32 %v3073_v5, %v2574_v52 }
 0x399   :  { %7564 = vmatmul.msk.bf16.gmra.mxu2 %vm2033_vm0, %v6954_v26  ;;  %v6934_v26 = vor.u32 %v8591_v61, %v6933_v25  ;;  %v6965_v25 = vld [vmem:[%s12440_s0 + $0x578] sm:$0xf] }
 0x39a   :  { %v10629_v9 = vadd.f32 %v3572_v63, %v3074_v15  ;;  %v6938_v15 = vor.u32 %v8590_v60, %v6935_v30  ;;  %v10646_v20 = vpop.f32.mrf.mxu3  ;;  %v8691_v63 = vld [vmem:[%s12440_s0 + $0x868] sm:$0xf0] }
 0x39c   :  { %12619 = vst [vmem:[#allocation94_spill] sm:$0xff] %v10629_v9  ;;  %v3580_v52 = vpop.f32.mrf.mxu2  ;;  %7595 = vmatmul.msk.bf16.vlgmr.msra.gmra.mxu3 %vm2033_vm0, %v7326_v27  ;;  %v8594_v27 = vld [vmem:[%s12440_s0 + $0x560] sm:$0xf0]  ;;  %v7337_v9 = vld [vmem:[%s12440_s0 + $0x860] sm:$0xf] }
 0x39d   :  { %v7338_v39 = vor.u32 %v8691_v63, %v7337_v9 }
 0x39e   :  { %v2577_v5 = vpop.f32.mrf.mxu0 }
 0x39f   :  { %v3076_v37 = vpop.f32.mrf.mxu1 }
 0x3a0   :  { %v3077_v54 = vadd.f32 %v3076_v37, %v2577_v5  ;;  %v8598_v37 = vld [vmem:[%s12440_s0 + $0x580] sm:$0xf0] }
 0x3a1   :  { %2616 = vmatmul.bf16.gmra.mxu0 %v6934_v26  ;;  %v6966_v26 = vor.u32 %v8598_v37, %v6965_v25  ;;  %v8593_v25 = vld [vmem:[%s12440_s0 + $0x55c] sm:$0xf]  ;;  %v6947_v37 = vld [vmem:[%s12440_s0 + $0x564] sm:$0xf0] }
 0x3a2   :  { %v10654_v32 = vadd.f32 %v3575_v49, %v3077_v54  ;;  %3115 = vmatmul.bf16.gmra.mxu1 %v6938_v15  ;;  %v10665_v22 = vpop.f32.mrf.mxu3  ;;  %v6945_v15 = vld [vmem:[%s12440_s0 + $0x558] sm:$0xf]  ;;  %v6950_v60 = vor.u32 %v8593_v25, %v6947_v37 }
 0x3a4   :  { %12621 = vst [vmem:[#allocation95_spill] sm:$0xff] %v10654_v32  ;;  %v3582_v30 = vpop.f32.mrf.mxu2 }
 0x3a6   :  { %v2579_v5 = vpop.f32.mrf.mxu0 }
 0x3a7   :  { %v3078_v54 = vpop.f32.mrf.mxu1 }
 0x3a8   :  { %v3079_v35 = vadd.f32 %v3078_v54, %v2579_v5  ;;  %v6946_v54 = vor.u32 %v8594_v27, %v6945_v15  ;;  %v6977_v15 = vld [vmem:[%s12440_s0 + $0x590] sm:$0xf]  ;;  %v7349_v5 = vld [vmem:[%s12440_s0 + $0x878] sm:$0xf] }
 0x3a9   :  { %7565 = vmatmul.msk.bf16.gmra.mxu2 %vm2033_vm0, %v6966_v26 }
 0x3aa   :  { %v10667_v49 = vadd.f32 %v3577_v59, %v3079_v35  ;;  %v10684_v4 = vpop.f32.mrf.mxu3 }
 0x3ac   :  { %12623 = vst [vmem:[#allocation96_spill] sm:$0xff] %v10667_v49  ;;  %v3585_v26 = vpop.f32.mrf.mxu2  ;;  %7596 = vmatmul.msk.bf16.gmra.mxu3 %vm2033_vm0, %v7338_v39  ;;  %v8596_v39 = vld [vmem:[%s12440_s0 + $0x574] sm:$0xf] }
 0x3ae   :  { %v2582_v35 = vpop.f32.mrf.mxu0 }
 0x3af   :  { %v3081_v32 = vpop.f32.mrf.mxu1 }
 0x3b0   :  { %v3082_v61 = vadd.f32 %v3081_v32, %v2582_v35  ;;  %v8601_v32 = vld [vmem:[%s12440_s0 + $0x598] sm:$0xf0] }
 0x3b1   :  { %2621 = vmatmul.bf16.gmra.mxu0 %v6946_v54  ;;  %v6978_v37 = vor.u32 %v8601_v32, %v6977_v15 }
 0x3b2   :  { %v10692_v11 = vadd.f32 %v3580_v52, %v3082_v61  ;;  %3120 = vmatmul.bf16.gmra.mxu1 %v6950_v60  ;;  %v10701_v35 = vpop.f32.mrf.mxu3  ;;  %v6957_v52 = vld [vmem:[%s12440_s0 + $0x570] sm:$0xf]  ;;  %v8597_v61 = vld [vmem:[%s12440_s0 + $0x578] sm:$0xf0]  ;;  %v6959_v60 = vld [vmem:[%s12440_s0 + $0x57c] sm:$0xf0] }
 0x3b3   :  { %v6958_v15 = vor.u32 %v8597_v61, %v6957_v52  ;;  %v6989_v52 = vld [vmem:[%s12440_s0 + $0x5a8] sm:$0xf]  ;;  %v8604_v61 = vld [vmem:[%s12440_s0 + $0x5b0] sm:$0xf0] }
 0x3b4   :  { %12625 = vst [vmem:[#allocation97_spill] sm:$0xff] %v10692_v11  ;;  %v3587_v27 = vpop.f32.mrf.mxu2 }
 0x3b6   :  { %v2584_v25 = vpop.f32.mrf.mxu0 }
 0x3b7   :  { %v3083_v54 = vpop.f32.mrf.mxu1 }
 0x3b8   :  { %v3084_v9 = vadd.f32 %v3083_v54, %v2584_v25  ;;  %v6962_v25 = vor.u32 %v8596_v39, %v6959_v60 }
 0x3b9   :  { %7566 = vmatmul.msk.bf16.gmra.mxu2 %vm2033_vm0, %v6978_v37 }
 0x3ba   :  { %v10703_v63 = vadd.f32 %v3582_v30, %v3084_v9  ;;  %v10718_v37 = vpop.f32.mrf.mxu3 }
 0x3bc   :  { %12626 = vst [vmem:[#allocation98_spill] sm:$0xff] %v10703_v63  ;;  %v3590_v30 = vpop.f32.mrf.mxu2  ;;  %v8694_v63 = vld [vmem:[%s12440_s0 + $0x880] sm:$0xf0] }
 0x3bd   :  { %v7350_v11 = vor.u32 %v8694_v63, %v7349_v5  ;;  %v6969_v63 = vld [vmem:[%s12440_s0 + $0x588] sm:$0xf] }
 0x3be   :  { %v2587_v32 = vpop.f32.mrf.mxu0 }
 0x3bf   :  { %v3086_v54 = vpop.f32.mrf.mxu1  ;;  %7597 = vmatmul.msk.bf16.gmra.mxu3 %vm2033_vm0, %v7350_v11  ;;  %v8599_v11 = vld [vmem:[%s12440_s0 + $0x58c] sm:$0xf] }
 0x3c0   :  { %v3087_v9 = vadd.f32 %v3086_v54, %v2587_v32  ;;  %v6990_v32 = vor.u32 %v8604_v61, %v6989_v52 }
 0x3c1   :  { %2626 = vmatmul.bf16.gmra.mxu0 %v6958_v15 }
 0x3c2   :  { %v10726_v49 = vadd.f32 %v3585_v26, %v3087_v9  ;;  %3125 = vmatmul.bf16.gmra.mxu1 %v6962_v25  ;;  %v10735_v54 = vpop.f32.mrf.mxu3  ;;  %v8600_v25 = vld [vmem:[%s12440_s0 + $0x590] sm:$0xf0]  ;;  %v6971_v9 = vld [vmem:[%s12440_s0 + $0x594] sm:$0xf0] }
 0x3c3   :  { %v6970_v52 = vor.u32 %v8600_v25, %v6969_v63  ;;  %v7001_v63 = vld [vmem:[%s12440_s0 + $0x5c0] sm:$0xf]  ;;  %v8607_v25 = vld [vmem:[%s12440_s0 + $0x5c8] sm:$0xf0] }
 0x3c4   :  { %12627 = vst [vmem:[#allocation99_spill] sm:$0xff] %v10726_v49  ;;  %v3592_v39 = vpop.f32.mrf.mxu2  ;;  %v8697_v49 = vld [vmem:[%s12440_s0 + $0x898] sm:$0xf0] }
 0x3c6   :  { %v2589_v60 = vpop.f32.mrf.mxu0 }
 0x3c7   :  { %v3088_v15 = vpop.f32.mrf.mxu1 }
 0x3c8   :  { %v3089_v5 = vadd.f32 %v3088_v15, %v2589_v60  ;;  %v6974_v60 = vor.u32 %v8599_v11, %v6971_v9 }
 0x3c9   :  { %7567 = vmatmul.msk.bf16.gmra.mxu2 %vm2033_vm0, %v6990_v32 }
 0x3ca   :  { %v10737_v26 = vadd.f32 %v3587_v27, %v3089_v5  ;;  %v10752_v32 = vpop.f32.mrf.mxu3 }
 0x3cc   :  { %12628 = vst [vmem:[#allocation100_spill] sm:$0xff] %v10737_v26  ;;  %v3595_v27 = vpop.f32.mrf.mxu2  ;;  %v7361_v26 = vld [vmem:[%s12440_s0 + $0x890] sm:$0xf] }
 0x3cd   :  { %v7362_v59 = vor.u32 %v8697_v49, %v7361_v26  ;;  %v6981_v26 = vld [vmem:[%s12440_s0 + $0x5a0] sm:$0xf] }
 0x3ce   :  { %v2592_v61 = vpop.f32.mrf.mxu0 }
 0x3cf   :  { %v3091_v15 = vpop.f32.mrf.mxu1  ;;  %7598 = vmatmul.msk.bf16.gmra.mxu3 %vm2033_vm0, %v7362_v59  ;;  %v8602_v59 = vld [vmem:[%s12440_s0 + $0x5a4] sm:$0xf] }
 0x3d0   :  { %v3092_v5 = vadd.f32 %v3091_v15, %v2592_v61  ;;  %v7002_v61 = vor.u32 %v8607_v25, %v7001_v63 }
 0x3d1   :  { %2631 = vmatmul.bf16.gmra.mxu0 %v6970_v52 }
 0x3d2   :  { %v10760_v41 = vadd.f32 %v3590_v30, %v3092_v5  ;;  %3130 = vmatmul.bf16.gmra.mxu1 %v6974_v60  ;;  %v10769_v15 = vpop.f32.mrf.mxu3  ;;  %v8603_v60 = vld [vmem:[%s12440_s0 + $0x5a8] sm:$0xf0]  ;;  %v6983_v5 = vld [vmem:[%s12440_s0 + $0x5ac] sm:$0xf0] }
 0x3d3   :  { %v6982_v63 = vor.u32 %v8603_v60, %v6981_v26  ;;  %v7013_v26 = vld [vmem:[%s12440_s0 + $0x5d8] sm:$0xf]  ;;  %v8610_v60 = vld [vmem:[%s12440_s0 + $0x5e0] sm:$0xf0] }
 0x3d4   :  { %12629 = vst [vmem:[#allocation101_spill] sm:$0xff] %v10760_v41  ;;  %v3597_v11 = vpop.f32.mrf.mxu2  ;;  %v8700_v41 = vld [vmem:[%s12440_s0 + $0x8b0] sm:$0xf0] }
 0x3d6   :  { %v2594_v9 = vpop.f32.mrf.mxu0 }
 0x3d7   :  { %v3093_v52 = vpop.f32.mrf.mxu1 }
 0x3d8   :  { %v3094_v49 = vadd.f32 %v3093_v52, %v2594_v9  ;;  %v6986_v9 = vor.u32 %v8602_v59, %v6983_v5 }
 0x3d9   :  { %7568 = vmatmul.msk.bf16.gmra.mxu2 %vm2033_vm0, %v7002_v61 }
 0x3da   :  { %v10771_v30 = vadd.f32 %v3592_v39, %v3094_v49  ;;  %v10786_v61 = vpop.f32.mrf.mxu3 }
 0x3db   :  { %12631 = vst [vmem:[#allocation103_spill] sm:$0xff] %v10786_v61 }
 0x3dc   :  { %12630 = vst [vmem:[#allocation102_spill] sm:$0xff] %v10771_v30  ;;  %v3600_v39 = vpop.f32.mrf.mxu2  ;;  %v7373_v30 = vld [vmem:[%s12440_s0 + $0x8a8] sm:$0xf] }
 0x3dd   :  { %v7374_v44 = vor.u32 %v8700_v41, %v7373_v30  ;;  %v6993_v30 = vld [vmem:[%s12440_s0 + $0x5b8] sm:$0xf] }
 0x3de   :  { %v2597_v25 = vpop.f32.mrf.mxu0 }
 0x3df   :  { %v3096_v52 = vpop.f32.mrf.mxu1  ;;  %7599 = vmatmul.msk.bf16.gmra.mxu3 %vm2033_vm0, %v7374_v44  ;;  %v8605_v44 = vld [vmem:[%s12440_s0 + $0x5bc] sm:$0xf] }
 0x3e0   :  { %v3097_v49 = vadd.f32 %v3096_v52, %v2597_v25  ;;  %v7014_v25 = vor.u32 %v8610_v60, %v7013_v26 }
 0x3e1   :  { %2636 = vmatmul.bf16.gmra.mxu0 %v6982_v63 }
 0x3e2   :  { %v10794_v19 = vadd.f32 %v3595_v27, %v3097_v49  ;;  %3135 = vmatmul.bf16.gmra.mxu1 %v6986_v9  ;;  %v10803_v52 = vpop.f32.mrf.mxu3  ;;  %v8606_v9 = vld [vmem:[%s12440_s0 + $0x5c0] sm:$0xf0]  ;;  %v6995_v49 = vld [vmem:[%s12440_s0 + $0x5c4] sm:$0xf0] }
 0x3e3   :  { %v6994_v26 = vor.u32 %v8606_v9, %v6993_v30  ;;  %v7025_v30 = vld [vmem:[%s12440_s0 + $0x5f0] sm:$0xf]  ;;  %v8613_v9 = vld [vmem:[%s12440_s0 + $0x5f8] sm:$0xf0] }
 0x3e4   :  { %12632 = vst [vmem:[#allocation104_spill] sm:$0xff] %v10794_v19  ;;  %v3602_v59 = vpop.f32.mrf.mxu2  ;;  %v8703_v19 = vld [vmem:[%s12440_s0 + $0x8c8] sm:$0xf0] }
 0x3e6   :  { %v2599_v5 = vpop.f32.mrf.mxu0 }
 0x3e7   :  { %v3098_v63 = vpop.f32.mrf.mxu1 }
 0x3e8   :  { %v3099_v41 = vadd.f32 %v3098_v63, %v2599_v5  ;;  %v6998_v5 = vor.u32 %v8605_v44, %v6995_v49 }
 0x3e9   :  { %7569 = vmatmul.msk.bf16.gmra.mxu2 %vm2033_vm0, %v7014_v25 }
 0x3ea   :  { %v10805_v27 = vadd.f32 %v3597_v11, %v3099_v41  ;;  %v10820_v25 = vpop.f32.mrf.mxu3 }
 0x3eb   :  { %12634 = vst [vmem:[#allocation106_spill] sm:$0xff] %v10820_v25 }
 0x3ec   :  { %12633 = vst [vmem:[#allocation105_spill] sm:$0xff] %v10805_v27  ;;  %v3605_v11 = vpop.f32.mrf.mxu2  ;;  %v7385_v27 = vld [vmem:[%s12440_s0 + $0x8c0] sm:$0xf] }
 0x3ed   :  { %v7386_v61 = vor.u32 %v8703_v19, %v7385_v27  ;;  %v7005_v27 = vld [vmem:[%s12440_s0 + $0x5d0] sm:$0xf] }
 0x3ee   :  { %v2602_v60 = vpop.f32.mrf.mxu0 }
 0x3ef   :  { %v3101_v63 = vpop.f32.mrf.mxu1  ;;  %7600 = vmatmul.msk.bf16.gmra.mxu3 %vm2033_vm0, %v7386_v61  ;;  %v8608_v61 = vld [vmem:[%s12440_s0 + $0x5d4] sm:$0xf] }
 0x3f0   :  { %v3102_v41 = vadd.f32 %v3101_v63, %v2602_v60  ;;  %v7026_v60 = vor.u32 %v8613_v9, %v7025_v30 }
 0x3f1   :  { %2641 = vmatmul.bf16.gmra.mxu0 %v6994_v26 }
 0x3f2   :  { %v10828_v40 = vadd.f32 %v3600_v39, %v3102_v41  ;;  %3140 = vmatmul.bf16.gmra.mxu1 %v6998_v5  ;;  %v10837_v63 = vpop.f32.mrf.mxu3  ;;  %v8609_v5 = vld [vmem:[%s12440_s0 + $0x5d8] sm:$0xf0]  ;;  %v7007_v41 = vld [vmem:[%s12440_s0 + $0x5dc] sm:$0xf0] }
 0x3f3   :  { %v7006_v30 = vor.u32 %v8609_v5, %v7005_v27  ;;  %v7037_v27 = vld [vmem:[%s12440_s0 + $0x608] sm:$0xf]  ;;  %v8616_v5 = vld [vmem:[%s12440_s0 + $0x610] sm:$0xf0] }
 0x3f4   :  { %12635 = vst [vmem:[#allocation107_spill] sm:$0xff] %v10828_v40  ;;  %v3607_v44 = vpop.f32.mrf.mxu2  ;;  %v8706_v40 = vld [vmem:[%s12440_s0 + $0x8e0] sm:$0xf0] }
 0x3f6   :  { %v2604_v49 = vpop.f32.mrf.mxu0 }
 0x3f7   :  { %v3103_v26 = vpop.f32.mrf.mxu1 }
 0x3f8   :  { %v3104_v19 = vadd.f32 %v3103_v26, %v2604_v49  ;;  %v7010_v49 = vor.u32 %v8608_v61, %v7007_v41 }
 0x3f9   :  { %7570 = vmatmul.msk.bf16.gmra.mxu2 %vm2033_vm0, %v7026_v60 }
 0x3fa   :  { %v10839_v39 = vadd.f32 %v3602_v59, %v3104_v19  ;;  %v10854_v60 = vpop.f32.mrf.mxu3 }
 0x3fb   :  { %12637 = vst [vmem:[#allocation109_spill] sm:$0xff] %v10854_v60 }
 0x3fc   :  { %12636 = vst [vmem:[#allocation108_spill] sm:$0xff] %v10839_v39  ;;  %v3610_v59 = vpop.f32.mrf.mxu2  ;;  %v7397_v39 = vld [vmem:[%s12440_s0 + $0x8d8] sm:$0xf] }
 0x3fd   :  { %v7398_v25 = vor.u32 %v8706_v40, %v7397_v39  ;;  %v7017_v39 = vld [vmem:[%s12440_s0 + $0x5e8] sm:$0xf] }
 0x3fe   :  { %v2607_v9 = vpop.f32.mrf.mxu0 }
 0x3ff   :  { %v3106_v26 = vpop.f32.mrf.mxu1  ;;  %7601 = vmatmul.msk.bf16.gmra.mxu3 %vm2033_vm0, %v7398_v25  ;;  %v8611_v25 = vld [vmem:[%s12440_s0 + $0x5ec] sm:$0xf] }
 0x400   :  { %v3107_v19 = vadd.f32 %v3106_v26, %v2607_v9  ;;  %v7038_v9 = vor.u32 %v8616_v5, %v7037_v27 }
 0x401   :  { %2646 = vmatmul.bf16.gmra.mxu0 %v7006_v30 }
 0x402   :  { %v10862_v62 = vadd.f32 %v3605_v11, %v3107_v19  ;;  %3145 = vmatmul.bf16.gmra.mxu1 %v7010_v49  ;;  %v10871_v26 = vpop.f32.mrf.mxu3  ;;  %v8612_v49 = vld [vmem:[%s12440_s0 + $0x5f0] sm:$0xf0]  ;;  %v7019_v19 = vld [vmem:[%s12440_s0 + $0x5f4] sm:$0xf0] }
 0x403   :  { %v7018_v27 = vor.u32 %v8612_v49, %v7017_v39  ;;  %v7049_v39 = vld [vmem:[%s12440_s0 + $0x620] sm:$0xf]  ;;  %v8619_v49 = vld [vmem:[%s12440_s0 + $0x628] sm:$0xf0] }
 0x404   :  { %12638 = vst [vmem:[#allocation110_spill] sm:$0xff] %v10862_v62  ;;  %v3612_v61 = vpop.f32.mrf.mxu2  ;;  %v8709_v62 = vld [vmem:[%s12440_s0 + $0x8f8] sm:$0xf0] }
 0x406   :  { %v2609_v41 = vpop.f32.mrf.mxu0 }
 0x407   :  { %v3108_v30 = vpop.f32.mrf.mxu1 }
 0x408   :  { %v3109_v40 = vadd.f32 %v3108_v30, %v2609_v41  ;;  %v7022_v41 = vor.u32 %v8611_v25, %v7019_v19 }
 0x409   :  { %7571 = vmatmul.msk.bf16.gmra.mxu2 %vm2033_vm0, %v7038_v9 }
 0x40a   :  { %v10873_v11 = vadd.f32 %v3607_v44, %v3109_v40  ;;  %v10888_v9 = vpop.f32.mrf.mxu3 }
 0x40b   :  { %12640 = vst [vmem:[#allocation112_spill] sm:$0xff] %v10888_v9 }
 0x40c   :  { %12639 = vst [vmem:[#allocation111_spill] sm:$0xff] %v10873_v11  ;;  %v3615_v44 = vpop.f32.mrf.mxu2  ;;  %v7409_v11 = vld [vmem:[%s12440_s0 + $0x8f0] sm:$0xf] }
 0x40d   :  { %v7410_v60 = vor.u32 %v8709_v62, %v7409_v11  ;;  %v7029_v11 = vld [vmem:[%s12440_s0 + $0x600] sm:$0xf] }
 0x40e   :  { %v2612_v5 = vpop.f32.mrf.mxu0 }
 0x40f   :  { %v3111_v30 = vpop.f32.mrf.mxu1  ;;  %7602 = vmatmul.msk.bf16.gmra.mxu3 %vm2033_vm0, %v7410_v60  ;;  %v8614_v60 = vld [vmem:[%s12440_s0 + $0x604] sm:$0xf] }
 0x410   :  { %v3112_v40 = vadd.f32 %v3111_v30, %v2612_v5  ;;  %v7050_v5 = vor.u32 %v8619_v49, %v7049_v39 }
 0x411   :  { %2651 = vmatmul.bf16.gmra.mxu0 %v7018_v27 }
 0x412   :  { %v10896_v57 = vadd.f32 %v3610_v59, %v3112_v40  ;;  %3150 = vmatmul.bf16.gmra.mxu1 %v7022_v41  ;;  %v10905_v30 = vpop.f32.mrf.mxu3  ;;  %v8615_v41 = vld [vmem:[%s12440_s0 + $0x608] sm:$0xf0]  ;;  %v7031_v40 = vld [vmem:[%s12440_s0 + $0x60c] sm:$0xf0] }
 0x413   :  { %v7030_v39 = vor.u32 %v8615_v41, %v7029_v11  ;;  %v3277_v11 = vadd.f32 %v10590_v13, %v10146_v48  ;;  %v7061_v41 = vld [vmem:[%s12440_s0 + $0x638] sm:$0xf]  ;;  %v8618_v13 = vld [vmem:[%s12440_s0 + $0x620] sm:$0xf0] }
 0x414   :  { %12641 = vst [vmem:[#allocation113_spill] sm:$0xff] %v10896_v57  ;;  %v3617_v25 = vpop.f32.mrf.mxu2  ;;  %v8712_v57 = vld [vmem:[%s12440_s0 + $0x910] sm:$0xf0]  ;;  %v7041_v48 = vld [vmem:[%s12440_s0 + $0x618] sm:$0xf] }
 0x416   :  { %v2614_v19 = vpop.f32.mrf.mxu0 }
 0x417   :  { %v3113_v27 = vpop.f32.mrf.mxu1 }
 0x418   :  { %v3114_v62 = vadd.f32 %v3113_v27, %v2614_v19  ;;  %v7034_v19 = vor.u32 %v8614_v60, %v7031_v40  ;;  %v8622_v60 = vld [vmem:[%s12440_s0 + $0x640] sm:$0xf0] }
 0x419   :  { %7572 = vmatmul.msk.bf16.gmra.mxu2 %vm2033_vm0, %v7050_v5 }
 0x41a   :  { %v10907_v59 = vadd.f32 %v3612_v61, %v3114_v62  ;;  %v10922_v5 = vpop.f32.mrf.mxu3 }
 0x41b   :  { %12643 = vst [vmem:[#allocation115_spill] sm:$0xff] %v10922_v5 }
 0x41c   :  { %12642 = vst [vmem:[#allocation114_spill] sm:$0xff] %v10907_v59  ;;  %v3620_v61 = vpop.f32.mrf.mxu2  ;;  %v7421_v59 = vld [vmem:[%s12440_s0 + $0x908] sm:$0xf] }
 0x41d   :  { %v7422_v9 = vor.u32 %v8712_v57, %v7421_v59 }
 0x41e   :  { %v2617_v49 = vpop.f32.mrf.mxu0 }
 0x41f   :  { %v3116_v27 = vpop.f32.mrf.mxu1  ;;  %7603 = vmatmul.msk.bf16.gmra.mxu3 %vm2033_vm0, %v7422_v9  ;;  %v8617_v9 = vld [vmem:[%s12440_s0 + $0x61c] sm:$0xf] }
 0x420   :  { %v3117_v62 = vadd.f32 %v3116_v27, %v2617_v49 }
 0x421   :  { %2656 = vmatmul.bf16.gmra.mxu0 %v7030_v39  ;;  %v7062_v39 = vor.u32 %v8622_v60, %v7061_v41 }
 0x422   :  { %v10930_v18 = vadd.f32 %v3615_v44, %v3117_v62  ;;  %3155 = vmatmul.bf16.gmra.mxu1 %v7034_v19  ;;  %v3775_v57 = vpop.f32.mrf.mxu3  ;;  %v7043_v62 = vld [vmem:[%s12440_s0 + $0x624] sm:$0xf0] }
 0x423   :  { %v10941_v59 = vadd.f32 %v3775_v57, %v3277_v11  ;;  %v7042_v11 = vor.u32 %v8618_v13, %v7041_v48  ;;  %v7046_v60 = vor.u32 %v8617_v9, %v7043_v62  ;;  %v3282_v48 = vadd.f32 %v10627_v43, %v10183_v7  ;;  %v7073_v13 = vld [vmem:[%s12440_s0 + $0x650] sm:$0xf]  ;;  %v8625_v9 = vld [vmem:[%s12440_s0 + $0x658] sm:$0xf0] }
 0x424   :  { %12644 = vst [vmem:[#allocation116_spill] sm:$0xff] %v10930_v18  ;;  %v3622_v40 = vpop.f32.mrf.mxu2  ;;  %v7053_v7 = vld [vmem:[%s12440_s0 + $0x630] sm:$0xf]  ;;  %v8621_v43 = vld [vmem:[%s12440_s0 + $0x638] sm:$0xf0] }
 0x426   :  { %v2619_v49 = vpop.f32.mrf.mxu0 }
 0x427   :  { %v3118_v44 = vpop.f32.mrf.mxu1 }
 0x428   :  { %v3119_v19 = vadd.f32 %v3118_v44, %v2619_v49  ;;  %v7433_v44 = vld [vmem:[%s12440_s0 + $0x920] sm:$0xf] }
 0x429   :  { %7573 = vmatmul.msk.bf16.gmra.mxu2 %vm2033_vm0, %v7062_v39 }
 0x42a   :  { %v10943_v27 = vadd.f32 %v3617_v25, %v3119_v19  ;;  %v10958_v49 = vpop.f32.mrf.mxu3  ;;  %v8715_v19 = vld [vmem:[%s12440_s0 + $0x928] sm:$0xf0] }
 0x42c   :  { %12645 = vst [vmem:[#allocation117_spill] sm:$0xff] %v10943_v27  ;;  %v3625_v25 = vpop.f32.mrf.mxu2  ;;  %v7434_v27 = vor.u32 %v8715_v19, %v7433_v44  ;;  %v7055_v19 = vld [vmem:[%s12440_s0 + $0x63c] sm:$0xf0] }
 0x42e   :  { %v2622_v41 = vpop.f32.mrf.mxu0 }
 0x42f   :  { %v3121_v39 = vpop.f32.mrf.mxu1  ;;  %7604 = vmatmul.msk.bf16.gmra.mxu3 %vm2033_vm0, %v7434_v27  ;;  %v8620_v27 = vld [vmem:[%s12440_s0 + $0x634] sm:$0xf] }
 0x430   :  { %v3122_v57 = vadd.f32 %v3121_v39, %v2622_v41 }
 0x431   :  { %2661 = vmatmul.bf16.gmra.mxu0 %v7042_v11  ;;  %v7074_v11 = vor.u32 %v8625_v9, %v7073_v13  ;;  %v7058_v9 = vor.u32 %v8620_v27, %v7055_v19 }
 0x432   :  { %v10966_v18 = vadd.f32 %v3620_v61, %v3122_v57  ;;  %3160 = vmatmul.bf16.gmra.mxu1 %v7046_v60  ;;  %v3780_v39 = vpop.f32.mrf.mxu3 }
 0x433   :  { %v10977_v57 = vadd.f32 %v3780_v39, %v3282_v48  ;;  %v7054_v48 = vor.u32 %v8621_v43, %v7053_v7  ;;  %v8628_v7 = vld [vmem:[%s12440_s0 + $0x670] sm:$0xf0] }
 0x434   :  { %12646 = vst [vmem:[#allocation118_spill] sm:$0xff] %v10966_v18  ;;  %v3627_v62 = vpop.f32.mrf.mxu2 }
 0x436   :  { %v2624_v41 = vpop.f32.mrf.mxu0 }
 0x437   :  { %v3123_v61 = vpop.f32.mrf.mxu1 }
 0x438   :  { %v3124_v60 = vadd.f32 %v3123_v61, %v2624_v41 }
 0x439   :  { %7574 = vmatmul.msk.bf16.gmra.mxu2 %vm2033_vm0, %v7074_v11 }
 0x43a   :  { %v10979_v44 = vadd.f32 %v3622_v40, %v3124_v60  ;;  %v10994_v41 = vpop.f32.mrf.mxu3  ;;  %v3287_v60 = vadd.f32 %v10665_v22, %v10220_v46  ;;  %v7065_v46 = vld [vmem:[%s12440_s0 + $0x648] sm:$0xf]  ;;  %v8624_v22 = vld [vmem:[%s12440_s0 + $0x650] sm:$0xf0] }
 0x43c   :  { %12647 = vst [vmem:[#allocation119_spill] sm:$0xff] %v10979_v44  ;;  %v3630_v40 = vpop.f32.mrf.mxu2  ;;  %v7085_v44 = vld [vmem:[%s12440_s0 + $0x668] sm:$0xf] }
 0x43d   :  { %v7086_v19 = vor.u32 %v8628_v7, %v7085_v44  ;;  %v8623_v44 = vld [vmem:[%s12440_s0 + $0x64c] sm:$0xf] }
 0x43e   :  { %v2627_v13 = vpop.f32.mrf.mxu0 }
 0x43f   :  { %v3126_v11 = vpop.f32.mrf.mxu1 }
 0x440   :  { %v3127_v39 = vadd.f32 %v3126_v11, %v2627_v13  ;;  %v7066_v11 = vor.u32 %v8624_v22, %v7065_v46  ;;  %v8631_v46 = vld [vmem:[%s12440_s0 + $0x688] sm:$0xf0] }
 0x441   :  { %2666 = vmatmul.bf16.gmra.mxu0 %v7054_v48 }
 0x442   :  { %v10996_v61 = vadd.f32 %v3625_v25, %v3127_v39  ;;  %3165 = vmatmul.bf16.gmra.mxu1 %v7058_v9  ;;  %v3785_v18 = vpop.f32.mrf.mxu3 }
 0x443   :  { %v11006_v48 = vadd.f32 %v3785_v18, %v3287_v60  ;;  %v7067_v18 = vld [vmem:[%s12440_s0 + $0x654] sm:$0xf0] }
 0x444   :  { %12648 = vst [vmem:[#allocation120_spill] sm:$0xff] %v10996_v61  ;;  %v3632_v43 = vpop.f32.mrf.mxu2  ;;  %v7070_v60 = vor.u32 %v8623_v44, %v7067_v18 }
 0x446   :  { %v2629_v27 = vpop.f32.mrf.mxu0 }
 0x447   :  { %v3128_v13 = vpop.f32.mrf.mxu1 }
 0x448   :  { %v3129_v25 = vadd.f32 %v3128_v13, %v2629_v27 }
 0x449   :  { %7575 = vmatmul.msk.bf16.gmra.mxu2 %vm2033_vm0, %v7086_v19 }
 0x44a   :  { %v11008_v9 = vadd.f32 %v3627_v62, %v3129_v25  ;;  %v11023_v7 = vpop.f32.mrf.mxu3  ;;  %v3292_v25 = vadd.f32 %v10701_v35, %v10257_v2  ;;  %v7077_v2 = vld [vmem:[%s12440_s0 + $0x660] sm:$0xf]  ;;  %v8627_v35 = vld [vmem:[%s12440_s0 + $0x668] sm:$0xf0] }
 0x44c   :  { %12649 = vst [vmem:[#allocation121_spill] sm:$0xff] %v11008_v9  ;;  %v3635_v62 = vpop.f32.mrf.mxu2  ;;  %v7097_v9 = vld [vmem:[%s12440_s0 + $0x680] sm:$0xf] }
 0x44d   :  { %v7098_v18 = vor.u32 %v8631_v46, %v7097_v9  ;;  %v8626_v9 = vld [vmem:[%s12440_s0 + $0x664] sm:$0xf] }
 0x44e   :  { %v2632_v39 = vpop.f32.mrf.mxu0 }
 0x44f   :  { %v3131_v27 = vpop.f32.mrf.mxu1 }
 0x450   :  { %v3132_v19 = vadd.f32 %v3131_v27, %v2632_v39  ;;  %v7078_v27 = vor.u32 %v8627_v35, %v7077_v2  ;;  %v8634_v2 = vld [vmem:[%s12440_s0 + $0x6a0] sm:$0xf0] }
 0x451   :  { %2671 = vmatmul.bf16.gmra.mxu0 %v7066_v11 }
 0x452   :  { %v11025_v13 = vadd.f32 %v3630_v40, %v3132_v19  ;;  %3170 = vmatmul.bf16.gmra.mxu1 %v7070_v60  ;;  %v3790_v61 = vpop.f32.mrf.mxu3 }
 0x453   :  { %v11035_v11 = vadd.f32 %v3790_v61, %v3292_v25  ;;  %v7079_v61 = vld [vmem:[%s12440_s0 + $0x66c] sm:$0xf0] }
 0x454   :  { %12650 = vst [vmem:[#allocation122_spill] sm:$0xff] %v11025_v13  ;;  %v3637_v22 = vpop.f32.mrf.mxu2  ;;  %v7082_v25 = vor.u32 %v8626_v9, %v7079_v61 }
 0x456   :  { %v2634_v44 = vpop.f32.mrf.mxu0 }
 0x457   :  { %v3133_v39 = vpop.f32.mrf.mxu1 }
 0x458   :  { %v3134_v40 = vadd.f32 %v3133_v39, %v2634_v44 }
 0x459   :  { %7576 = vmatmul.msk.bf16.gmra.mxu2 %vm2033_vm0, %v7098_v18 }
 0x45a   :  { %v11037_v60 = vadd.f32 %v3632_v43, %v3134_v40  ;;  %v11052_v46 = vpop.f32.mrf.mxu3  ;;  %v3297_v40 = vadd.f32 %v10735_v54, %v10294_v51  ;;  %v7089_v51 = vld [vmem:[%s12440_s0 + $0x678] sm:$0xf]  ;;  %v8630_v54 = vld [vmem:[%s12440_s0 + $0x680] sm:$0xf0] }
 0x45c   :  { %12651 = vst [vmem:[#allocation123_spill] sm:$0xff] %v11037_v60  ;;  %v3640_v43 = vpop.f32.mrf.mxu2  ;;  %v7109_v60 = vld [vmem:[%s12440_s0 + $0x698] sm:$0xf] }
 0x45d   :  { %v7110_v61 = vor.u32 %v8634_v2, %v7109_v60  ;;  %v8629_v60 = vld [vmem:[%s12440_s0 + $0x67c] sm:$0xf] }
 0x45e   :  { %v2637_v19 = vpop.f32.mrf.mxu0 }
 0x45f   :  { %v3136_v44 = vpop.f32.mrf.mxu1 }
 0x460   :  { %v3137_v18 = vadd.f32 %v3136_v44, %v2637_v19  ;;  %v7090_v44 = vor.u32 %v8630_v54, %v7089_v51  ;;  %v8637_v51 = vld [vmem:[%s12440_s0 + $0x6b8] sm:$0xf0] }
 0x461   :  { %2676 = vmatmul.bf16.gmra.mxu0 %v7078_v27 }
 0x462   :  { %v11054_v39 = vadd.f32 %v3635_v62, %v3137_v18  ;;  %3175 = vmatmul.bf16.gmra.mxu1 %v7082_v25  ;;  %v3795_v13 = vpop.f32.mrf.mxu3 }
 0x463   :  { %v11064_v27 = vadd.f32 %v3795_v13, %v3297_v40  ;;  %v7091_v13 = vld [vmem:[%s12440_s0 + $0x684] sm:$0xf0] }
 0x464   :  { %12652 = vst [vmem:[#allocation124_spill] sm:$0xff] %v11054_v39  ;;  %v3642_v35 = vpop.f32.mrf.mxu2  ;;  %v7094_v40 = vor.u32 %v8629_v60, %v7091_v13 }
 0x466   :  { %v2639_v9 = vpop.f32.mrf.mxu0 }
 0x467   :  { %v3138_v19 = vpop.f32.mrf.mxu1 }
 0x468   :  { %v3139_v62 = vadd.f32 %v3138_v19, %v2639_v9 }
 0x469   :  { %7577 = vmatmul.msk.bf16.gmra.mxu2 %vm2033_vm0, %v7110_v61 }
 0x46a   :  { %v11066_v25 = vadd.f32 %v3637_v22, %v3139_v62  ;;  %v11081_v2 = vpop.f32.mrf.mxu3  ;;  %v3302_v62 = vadd.f32 %v10769_v15, %v10331_v24  ;;  %v7101_v24 = vld [vmem:[%s12440_s0 + $0x690] sm:$0xf]  ;;  %v8633_v15 = vld [vmem:[%s12440_s0 + $0x698] sm:$0xf0] }
 0x46c   :  { %12653 = vst [vmem:[#allocation125_spill] sm:$0xff] %v11066_v25  ;;  %v3645_v22 = vpop.f32.mrf.mxu2  ;;  %v7121_v25 = vld [vmem:[%s12440_s0 + $0x6b0] sm:$0xf] }
 0x46d   :  { %v7122_v13 = vor.u32 %v8637_v51, %v7121_v25  ;;  %v8632_v25 = vld [vmem:[%s12440_s0 + $0x694] sm:$0xf] }
 0x46e   :  { %v2642_v18 = vpop.f32.mrf.mxu0 }
 0x46f   :  { %v3141_v9 = vpop.f32.mrf.mxu1 }
 0x470   :  { %v3142_v61 = vadd.f32 %v3141_v9, %v2642_v18  ;;  %v7102_v9 = vor.u32 %v8633_v15, %v7101_v24  ;;  %v8640_v24 = vld [vmem:[%s12440_s0 + $0x6d0] sm:$0xf0] }
 0x471   :  { %2681 = vmatmul.bf16.gmra.mxu0 %v7090_v44 }
 0x472   :  { %v11083_v19 = vadd.f32 %v3640_v43, %v3142_v61  ;;  %3180 = vmatmul.bf16.gmra.mxu1 %v7094_v40  ;;  %v3800_v39 = vpop.f32.mrf.mxu3 }
 0x473   :  { %v11093_v44 = vadd.f32 %v3800_v39, %v3302_v62  ;;  %v7103_v39 = vld [vmem:[%s12440_s0 + $0x69c] sm:$0xf0] }
 0x474   :  { %12654 = vst [vmem:[#allocation126_spill] sm:$0xff] %v11083_v19  ;;  %v3647_v54 = vpop.f32.mrf.mxu2  ;;  %v7106_v62 = vor.u32 %v8632_v25, %v7103_v39  ;;  %v7133_v19 = vld [vmem:[%s12440_s0 + $0x6c8] sm:$0xf] }
 0x475   :  { %v7134_v39 = vor.u32 %v8640_v24, %v7133_v19  ;;  %v8635_v19 = vld [vmem:[%s12440_s0 + $0x6ac] sm:$0xf] }
 0x476   :  { %v2644_v60 = vpop.f32.mrf.mxu0 }
 0x477   :  { %v3143_v18 = vpop.f32.mrf.mxu1 }
 0x478   :  { %v3144_v43 = vadd.f32 %v3143_v18, %v2644_v60 }
 0x479   :  { %7578 = vmatmul.msk.bf16.gmra.mxu2 %vm2033_vm0, %v7122_v13 }
 0x47a   :  { %v11095_v40 = vadd.f32 %v3642_v35, %v3144_v43  ;;  %v11110_v51 = vpop.f32.mrf.mxu3  ;;  %v3307_v43 = vadd.f32 %v10803_v52, %v10368_v6  ;;  %v7113_v6 = vld [vmem:[%s12440_s0 + $0x6a8] sm:$0xf]  ;;  %v8636_v52 = vld [vmem:[%s12440_s0 + $0x6b0] sm:$0xf0] }
 0x47c   :  { %12655 = vst [vmem:[#allocation127_spill] sm:$0xff] %v11095_v40  ;;  %v3650_v35 = vpop.f32.mrf.mxu2 }
 0x47e   :  { %v2647_v61 = vpop.f32.mrf.mxu0 }
 0x47f   :  { %v3146_v60 = vpop.f32.mrf.mxu1 }
 0x480   :  { %v3147_v13 = vadd.f32 %v3146_v60, %v2647_v61  ;;  %v7114_v60 = vor.u32 %v8636_v52, %v7113_v6  ;;  %v8643_v6 = vld [vmem:[%s12440_s0 + $0x6e8] sm:$0xf0] }
 0x481   :  { %2686 = vmatmul.bf16.gmra.mxu0 %v7102_v9 }
 0x482   :  { %v11112_v18 = vadd.f32 %v3645_v22, %v3147_v13  ;;  %3185 = vmatmul.bf16.gmra.mxu1 %v7106_v62  ;;  %v3805_v40 = vpop.f32.mrf.mxu3 }
 0x483   :  { %v11122_v9 = vadd.f32 %v3805_v40, %v3307_v43  ;;  %v7115_v40 = vld [vmem:[%s12440_s0 + $0x6b4] sm:$0xf0] }
 0x484   :  { %12656 = vst [vmem:[#allocation128_spill] sm:$0xff] %v11112_v18  ;;  %v3652_v15 = vpop.f32.mrf.mxu2  ;;  %v7118_v43 = vor.u32 %v8635_v19, %v7115_v40 }
 0x486   :  { %v2649_v25 = vpop.f32.mrf.mxu0 }
 0x487   :  { %v3148_v61 = vpop.f32.mrf.mxu1 }
 0x488   :  { %v3149_v22 = vadd.f32 %v3148_v61, %v2649_v25 }
 0x489   :  { %7579 = vmatmul.msk.bf16.gmra.mxu2 %vm2033_vm0, %v7134_v39 }
 0x48a   :  { %v11124_v62 = vadd.f32 %v3647_v54, %v3149_v22  ;;  %v11139_v24 = vpop.f32.mrf.mxu3  ;;  %v3312_v22 = vadd.f32 %v10837_v63, %v10405_v12  ;;  %v7125_v12 = vld [vmem:[%s12440_s0 + $0x6c0] sm:$0xf]  ;;  %v8639_v63 = vld [vmem:[%s12440_s0 + $0x6c8] sm:$0xf0] }
 0x48c   :  { %12657 = vst [vmem:[#allocation129_spill] sm:$0xff] %v11124_v62  ;;  %v3655_v54 = vpop.f32.mrf.mxu2  ;;  %v7145_v62 = vld [vmem:[%s12440_s0 + $0x6e0] sm:$0xf] }
 0x48d   :  { %v7146_v40 = vor.u32 %v8643_v6, %v7145_v62  ;;  %v8638_v62 = vld [vmem:[%s12440_s0 + $0x6c4] sm:$0xf] }
 0x48e   :  { %v2652_v13 = vpop.f32.mrf.mxu0 }
 0x48f   :  { %v3151_v25 = vpop.f32.mrf.mxu1 }
 0x490   :  { %v3152_v39 = vadd.f32 %v3151_v25, %v2652_v13 }
 0x491   :  { %2691 = vmatmul.bf16.gmra.mxu0 %v7114_v60 }
 0x492   :  { %v11141_v61 = vadd.f32 %v3650_v35, %v3152_v39  ;;  %3190 = vmatmul.bf16.gmra.mxu1 %v7118_v43  ;;  %v3810_v18 = vpop.f32.mrf.mxu3  ;;  %v7126_v39 = vor.u32 %v8639_v63, %v7125_v12 }
 0x493   :  { %v11151_v60 = vadd.f32 %v3810_v18, %v3312_v22  ;;  %v7127_v18 = vld [vmem:[%s12440_s0 + $0x6cc] sm:$0xf0]  ;;  %v3279_v22 = vadd.f32 %v10609_v21, %v10165_v3  ;;  %v7157_v3 = vld [vmem:[%s12440_s0 + $0x6f8] sm:$0xf] }
 0x494   :  { %12658 = vst [vmem:[#allocation130_spill] sm:$0xff] %v11141_v61  ;;  %v3657_v52 = vpop.f32.mrf.mxu2 }
 0x495   :  { %12659 = vst [vmem:[#allocation131_spill] sm:$0xff] %v11151_v60  ;;  %v3778_v60 = vadd.f32 %v10958_v49, %v3279_v22  ;;  %v7139_v22 = vld [vmem:[%s12440_s0 + $0x6e4] sm:$0xf0] }
 0x496   :  { %v2654_v19 = vpop.f32.mrf.mxu0 }
 0x497   :  { %v3153_v13 = vpop.f32.mrf.mxu1 }
 0x498   :  { %v3154_v35 = vadd.f32 %v3153_v13, %v2654_v19  ;;  %v7130_v19 = vor.u32 %v8638_v62, %v7127_v18  ;;  %v12660_v13 = vmax.f32 %v9566_v10, %v10321_v28  ;;  %v8646_v28 = vld [vmem:[%s12440_s0 + $0x700] sm:$0xf0] }
 0x499   :  { %7580 = vmatmul.msk.bf16.gmra.mxu2 %vm2033_vm0, %v7146_v40 }
 0x49a   :  { %v3653_v43 = vadd.f32 %v3652_v15, %v3154_v35  ;;  %v11169_v40 = vpop.f32.mrf.mxu3 }
 0x49c   :  { %v3903_v15 = vmax.f32 %v3653_v43, %v10941_v59  ;;  %v3660_v25 = vpop.f32.mrf.mxu2  ;;  %v3317_v43 = vadd.f32 %v10871_v26, %v10442_v55  ;;  %v11191_v55 = vld [vmem:[%s12441_s2] ss:$0 sm:$0xff] }
 0x49e   :  { %v2657_v6 = vpop.f32.mrf.mxu0  ;;  %v11174_v35 = vmax.f32 %v12660_v13, %v3903_v15  ;;  %v3284_v13 = vadd.f32 %v10646_v20, %v10202_v0  ;;  %v7169_v0 = vld [vmem:[%s12440_s0 + $0x710] sm:$0xf] }
 0x49f   :  { %v3156_v61 = vpop.f32.mrf.mxu1 }
 0x4a0   :  { %v3157_v5 = vadd.f32 %v3156_v61, %v2657_v6  ;;  %v12661_v61 = vmax.f32 %v9581_v29, %v10333_v23  ;;  %v7137_v29 = vld [vmem:[%s12440_s0 + $0x6d8] sm:$0xf]  ;;  %v8642_v23 = vld [vmem:[%s12440_s0 + $0x6e0] sm:$0xf0] }
 0x4a1   :  { %2696 = vmatmul.bf16.gmra.mxu0 %v7126_v39  ;;  %v8641_v39 = vld [vmem:[%s12440_s0 + $0x6dc] sm:$0xf] }
 0x4a2   :  { %v3656_v59 = vadd.f32 %v3655_v54, %v3157_v5  ;;  %3195 = vmatmul.bf16.gmra.mxu1 %v7130_v19  ;;  %v7158_v5 = vor.u32 %v8646_v28, %v7157_v3  ;;  %v3815_v54 = vpop.f32.mrf.mxu3  ;;  %v7138_v19 = vor.u32 %v8642_v23, %v7137_v29  ;;  %v12662_v28 = vmax.f32 %v9589_v42, %v10358_v31  ;;  %v8649_v42 = vld [vmem:[%s12440_s0 + $0x718] sm:$0xf0]  ;;  %v7149_v23 = vld [vmem:[%s12440_s0 + $0x6f0] sm:$0xf] }
 0x4a3   :  { %v11193_v63 = vadd.f32 %v3815_v54, %v3317_v43  ;;  %v7142_v43 = vor.u32 %v8641_v39, %v7139_v22  ;;  %v12663_v54 = vmax.f32 %v9604_v1, %v10370_v47  ;;  %v8645_v1 = vld [vmem:[%s12440_s0 + $0x6f8] sm:$0xf0]  ;;  %v7151_v39 = vld [vmem:[%s12440_s0 + $0x6fc] sm:$0xf0] }
 0x4a4   :  { %v3904_v10 = vmax.f32 %v3656_v59, %v3778_v60  ;;  %v3662_v21 = vpop.f32.mrf.mxu2 }
 0x4a6   :  { %v3953_v12 = vmax.f32 %v12661_v61, %v3904_v10  ;;  %v2659_v49 = vpop.f32.mrf.mxu0 }
 0x4a7   :  { %v3158_v26 = vpop.f32.mrf.mxu1 }
 0x4a8   :  { %v3159_v62 = vadd.f32 %v3158_v26, %v2659_v49  ;;  %v4006_v18 = vadd.f32 %v11191_v55, %v3953_v12 }
 0x4a9   :  { %7581 = vmatmul.msk.bf16.gmra.mxu2 %vm2033_vm0, %v7158_v5  ;;  %v3322_v5 = vadd.f32 %v10905_v30, %v10479_v33 }
 0x4aa   :  { %v3658_v60 = vadd.f32 %v3657_v52, %v3159_v62  ;;  %v4055_v15 = vmax.f32 %v4006_v18, 0.0  ;;  %v11213_v3 = vpop.f32.mrf.mxu3 }
 0x4ac   :  { %v3905_v52 = vmax.f32 %v3658_v60, %v10977_v57  ;;  %4166 = vst.msk [vmem:[#allocation2 + $0x78] sm:$0xff] %vm4074_vm1, %v4055_v15  ;;  %v3665_v6 = vpop.f32.mrf.mxu2  ;;  %v3783_v57 = vadd.f32 %v10994_v41, %v3284_v13  ;;  %v8644_v15 = vld [vmem:[%s12440_s0 + $0x6f4] sm:$0xf] }
 0x4ae   :  { %v2662_v59 = vpop.f32.mrf.mxu0  ;;  %v11218_v10 = vmax.f32 %v12662_v28, %v3905_v52  ;;  %v7150_v52 = vor.u32 %v8645_v1, %v7149_v23  ;;  %v12666_v23 = vmax.f32 %v9635_v56, %v10432_v58  ;;  %v12667_v58 = vmax.f32 %v9650_v14, %v10444_v8  ;;  %v8650_v14 = vld [vmem:[%s12440_s0 + $0x724] sm:$0xf]  ;;  %v7175_v8 = vld [vmem:[%s12440_s0 + $0x72c] sm:$0xf0] }
 0x4af   :  { %v3161_v61 = vpop.f32.mrf.mxu1 }
 0x4b0   :  { %v3162_v12 = vadd.f32 %v3161_v61, %v2662_v59  ;;  %v7154_v59 = vor.u32 %v8644_v15, %v7151_v39 }
 0x4b1   :  { %2701 = vmatmul.bf16.gmra.mxu0 %v7138_v19  ;;  %v3289_v19 = vadd.f32 %v10684_v4, %v10239_v53  ;;  %v8652_v53 = vld [vmem:[%s12440_s0 + $0x730] sm:$0xf0] }
 0x4b2   :  { %v3661_v49 = vadd.f32 %v3660_v25, %v3162_v12  ;;  %3200 = vmatmul.bf16.gmra.mxu1 %v7142_v43  ;;  %v7170_v25 = vor.u32 %v8649_v42, %v7169_v0  ;;  %v3820_v62 = vpop.f32.mrf.mxu3  ;;  %v12664_v43 = vmax.f32 %v9612_v16, %v10395_v36  ;;  %v12665_v36 = vmax.f32 %v9627_v38, %v10407_v17  ;;  %v8647_v38 = vld [vmem:[%s12440_s0 + $0x70c] sm:$0xf]  ;;  %v7163_v17 = vld [vmem:[%s12440_s0 + $0x714] sm:$0xf0] }
 0x4b3   :  { %v11232_v60 = vadd.f32 %v3820_v62, %v3322_v5 }
 0x4b4   :  { %v3906_v31 = vmax.f32 %v3661_v49, %v3783_v57  ;;  %v3667_v20 = vpop.f32.mrf.mxu2  ;;  %v3788_v57 = vadd.f32 %v11023_v7, %v3289_v19  ;;  %v7181_v49 = vld [vmem:[%s12440_s0 + $0x728] sm:$0xf] }
 0x4b5   :  { %v7182_v42 = vor.u32 %v8652_v53, %v7181_v49 }
 0x4b6   :  { %v3955_v26 = vmax.f32 %v12663_v54, %v3906_v31  ;;  %v2664_v41 = vpop.f32.mrf.mxu0 }
 0x4b7   :  { %v3163_v18 = vpop.f32.mrf.mxu1 }
 0x4b8   :  { %v3164_v33 = vadd.f32 %v3163_v18, %v2664_v41  ;;  %v4008_v30 = vadd.f32 %v11191_v55, %v3955_v26  ;;  %v7161_v26 = vld [vmem:[%s12440_s0 + $0x708] sm:$0xf]  ;;  %v8648_v41 = vld [vmem:[%s12440_s0 + $0x710] sm:$0xf0] }
 0x4b9   :  { %7582 = vmatmul.msk.bf16.gmra.mxu2 %vm2033_vm0, %v7170_v25  ;;  %v7162_v18 = vor.u32 %v8648_v41, %v7161_v26  ;;  %v12671_v41 = vld [vmem:[#allocation81_spill] sm:$0xff] }
 0x4ba   :  { %v3663_v29 = vadd.f32 %v3662_v21, %v3164_v33  ;;  %v4057_v47 = vmax.f32 %v4008_v30, 0.0  ;;  %v3294_v33 = vadd.f32 %v10718_v37, %v10276_v45  ;;  %v8655_v45 = vld [vmem:[%s12440_s0 + $0x748] sm:$0xf0] }
 0x4bc   :  { %v3907_v21 = vmax.f32 %v3663_v29, %v11006_v48  ;;  %4172 = vst.msk [vmem:[#allocation2 + $0x80] sm:$0xff] %vm4074_vm1, %v4057_v47  ;;  %v3670_v22 = vpop.f32.mrf.mxu2  ;;  %v7166_v29 = vor.u32 %v8647_v38, %v7163_v17  ;;  %v3793_v39 = vadd.f32 %v11052_v46, %v3294_v33 }
 0x4be   :  { %v2667_v13 = vpop.f32.mrf.mxu0  ;;  %v11255_v28 = vmax.f32 %v12664_v43, %v3907_v21  ;;  %v7193_v21 = vld [vmem:[%s12440_s0 + $0x740] sm:$0xf] }
 0x4bf   :  { %v3166_v61 = vpop.f32.mrf.mxu1 }
 0x4c0   :  { %v3167_v12 = vadd.f32 %v3166_v61, %v2667_v13  ;;  %v7194_v13 = vor.u32 %v8655_v45, %v7193_v21  ;;  %v7173_v61 = vld [vmem:[%s12440_s0 + $0x720] sm:$0xf]  ;;  %v12673_v45 = vld [vmem:[#allocation76_spill] sm:$0xff] }
 0x4c1   :  { %2706 = vmatmul.bf16.gmra.mxu0 %v7150_v52 }
 0x4c2   :  { %v3666_v48 = vadd.f32 %v3665_v6, %v3167_v12  ;;  %3205 = vmatmul.bf16.gmra.mxu1 %v7154_v59  ;;  %v8651_v12 = vld [vmem:[%s12440_s0 + $0x728] sm:$0xf0] }
 0x4c3   :  { %v7174_v53 = vor.u32 %v8651_v12, %v7173_v61  ;;  %v7217_v12 = vld [vmem:[%s12440_s0 + $0x770] sm:$0xf] }
 0x4c4   :  { %v3908_v4 = vmax.f32 %v3666_v48, %v3788_v57  ;;  %v3672_v5 = vpop.f32.mrf.mxu2 }
 0x4c6   :  { %v3957_v16 = vmax.f32 %v12665_v36, %v3908_v4  ;;  %v2669_v0 = vpop.f32.mrf.mxu0  ;;  %v3299_v4 = vadd.f32 %v10752_v32, %v10313_v50  ;;  %v7178_v36 = vor.u32 %v8650_v14, %v7175_v8  ;;  %v8658_v50 = vld [vmem:[%s12440_s0 + $0x760] sm:$0xf0] }
 0x4c7   :  { %v3168_v31 = vpop.f32.mrf.mxu1 }
 0x4c8   :  { %v3169_v7 = vadd.f32 %v3168_v31, %v2669_v0  ;;  %v4010_v6 = vadd.f32 %v11191_v55, %v3957_v16  ;;  %v12668_v16 = vld [vmem:[#allocation80_spill] sm:$0xff] }
 0x4c9   :  { %7583 = vmatmul.msk.bf16.gmra.mxu2 %vm2033_vm0, %v7182_v42  ;;  %v12669_v0 = vmax.f32 %v9658_v34, %v12668_v16  ;;  %v12670_v34 = vld [vmem:[#allocation32_spill] sm:$0xff] }
 0x4ca   :  { %v3668_v54 = vadd.f32 %v3667_v20, %v3169_v7  ;;  %v4059_v25 = vmax.f32 %v4010_v6, 0.0  ;;  %v3798_v6 = vadd.f32 %v11081_v2, %v3299_v4 }
 0x4cc   :  { %v3909_v20 = vmax.f32 %v3668_v54, %v11035_v11  ;;  %4178 = vst.msk [vmem:[#allocation2 + $0x88] sm:$0xff] %vm4074_vm1, %v4059_v25  ;;  %v3675_v62 = vpop.f32.mrf.mxu2  ;;  %v7205_v54 = vld [vmem:[%s12440_s0 + $0x758] sm:$0xf]  ;;  %v12672_v25 = vmax.f32 %v12670_v34, %v12671_v41 }
 0x4cd   :  { %v12681_v41 = vld [vmem:[#allocation77_spill] sm:$0xff] }
 0x4ce   :  { %v2672_v30 = vpop.f32.mrf.mxu0  ;;  %v11288_v1 = vmax.f32 %v12666_v23, %v3909_v20  ;;  %v7206_v20 = vor.u32 %v8658_v50, %v7205_v54  ;;  %v8656_v54 = vld [vmem:[%s12440_s0 + $0x754] sm:$0xf]  ;;  %v7199_v50 = vld [vmem:[%s12440_s0 + $0x75c] sm:$0xf0] }
 0x4cf   :  { %v3171_v47 = vpop.f32.mrf.mxu1 }
 0x4d0   :  { %v3172_v15 = vadd.f32 %v3171_v47, %v2672_v30  ;;  %v7185_v30 = vld [vmem:[%s12440_s0 + $0x738] sm:$0xf]  ;;  %v8653_v47 = vld [vmem:[%s12440_s0 + $0x73c] sm:$0xf] }
 0x4d1   :  { %2711 = vmatmul.bf16.gmra.mxu0 %v7162_v18 }
 0x4d2   :  { %v3671_v11 = vadd.f32 %v3670_v22, %v3172_v15  ;;  %3210 = vmatmul.bf16.gmra.mxu1 %v7166_v29  ;;  %v8654_v29 = vld [vmem:[%s12440_s0 + $0x740] sm:$0xf0]  ;;  %v7187_v15 = vld [vmem:[%s12440_s0 + $0x744] sm:$0xf0] }
 0x4d3   :  { %v7186_v21 = vor.u32 %v8654_v29, %v7185_v30 }
 0x4d4   :  { %v3910_v37 = vmax.f32 %v3671_v11, %v3793_v39  ;;  %v3677_v52 = vpop.f32.mrf.mxu2 }
 0x4d6   :  { %v3959_v56 = vmax.f32 %v12667_v58, %v3910_v37  ;;  %v2674_v19 = vpop.f32.mrf.mxu0  ;;  %v12674_v37 = vld [vmem:[#allocation103_spill] sm:$0xff] }
 0x4d7   :  { %v3173_v59 = vpop.f32.mrf.mxu1 }
 0x4d8   :  { %v3174_v46 = vadd.f32 %v3173_v59, %v2674_v19  ;;  %v4012_v22 = vadd.f32 %v11191_v55, %v3959_v56  ;;  %v7190_v56 = vor.u32 %v8653_v47, %v7187_v15  ;;  %v12675_v19 = vld [vmem:[#allocation33_spill] sm:$0xff]  ;;  %v7229_v47 = vld [vmem:[%s12440_s0 + $0x788] sm:$0xf]  ;;  %v8664_v15 = vld [vmem:[%s12440_s0 + $0x790] sm:$0xf0] }
 0x4d9   :  { %7584 = vmatmul.msk.bf16.gmra.mxu2 %vm2033_vm0, %v7194_v13  ;;  %v12676_v13 = vld [vmem:[#allocation83_spill] sm:$0xff] }
 0x4da   :  { %v3673_v43 = vadd.f32 %v3672_v5, %v3174_v46  ;;  %v4061_v57 = vmax.f32 %v4012_v22, 0.0  ;;  %v12677_v59 = vmax.f32 %v12675_v19, %v12676_v13  ;;  %v7230_v19 = vor.u32 %v8664_v15, %v7229_v47  ;;  %v8662_v47 = vld [vmem:[%s12440_s0 + $0x784] sm:$0xf]  ;;  %v7223_v15 = vld [vmem:[%s12440_s0 + $0x78c] sm:$0xf0] }
 0x4dc   :  { %v3911_v48 = vmax.f32 %v3673_v43, %v11064_v27  ;;  %4184 = vst.msk [vmem:[#allocation2 + $0x90] sm:$0xff] %vm4074_vm1, %v4061_v57  ;;  %v3680_v49 = vpop.f32.mrf.mxu2  ;;  %v8661_v57 = vld [vmem:[%s12440_s0 + $0x778] sm:$0xf0] }
 0x4dd   :  { %v7218_v16 = vor.u32 %v8661_v57, %v7217_v12  ;;  %v7211_v12 = vld [vmem:[%s12440_s0 + $0x774] sm:$0xf0]  ;;  %v12689_v57 = vld [vmem:[#allocation131_spill] sm:$0xff] }
 0x4de   :  { %v2677_v5 = vpop.f32.mrf.mxu0  ;;  %v11321_v42 = vmax.f32 %v12669_v0, %v3911_v48  ;;  %v12678_v48 = vld [vmem:[#allocation34_spill] sm:$0xff] }
 0x4df   :  { %v3176_v31 = vpop.f32.mrf.mxu1 }
 0x4e0   :  { %v3177_v7 = vadd.f32 %v3176_v31, %v2677_v5 }
 0x4e1   :  { %2716 = vmatmul.bf16.gmra.mxu0 %v7174_v53  ;;  %v12679_v53 = vld [vmem:[#allocation85_spill] sm:$0xff] }
 0x4e2   :  { %v3676_v27 = vadd.f32 %v3675_v62, %v3177_v7  ;;  %3215 = vmatmul.bf16.gmra.mxu1 %v7178_v36  ;;  %v12680_v4 = vmax.f32 %v12678_v48, %v12679_v53  ;;  %v7197_v7 = vld [vmem:[%s12440_s0 + $0x750] sm:$0xf]  ;;  %v12690_v53 = vld [vmem:[#allocation78_spill] sm:$0xff] }
 0x4e4   :  { %v3912_v32 = vmax.f32 %v3676_v27, %v3798_v6  ;;  %v3682_v26 = vpop.f32.mrf.mxu2  ;;  %v8657_v6 = vld [vmem:[%s12440_s0 + $0x758] sm:$0xf0] }
 0x4e5   :  { %v7198_v34 = vor.u32 %v8657_v6, %v7197_v7 }
 0x4e6   :  { %v3961_v38 = vmax.f32 %v12672_v25, %v3912_v32  ;;  %v2679_v17 = vpop.f32.mrf.mxu0  ;;  %v12682_v25 = vld [vmem:[#allocation106_spill] sm:$0xff] }
 0x4e7   :  { %v3178_v18 = vpop.f32.mrf.mxu1 }
 0x4e8   :  { %v3179_v2 = vadd.f32 %v3178_v18, %v2679_v17  ;;  %v4014_v62 = vadd.f32 %v11191_v55, %v3961_v38  ;;  %v3309_v38 = vadd.f32 %v12682_v25, %v12681_v41  ;;  %v12683_v18 = vld [vmem:[#allocation35_spill] sm:$0xff]  ;;  %v12695_v25 = vld [vmem:[#allocation38_spill] sm:$0xff] }
 0x4e9   :  { %7585 = vmatmul.msk.bf16.gmra.mxu2 %vm2033_vm0, %v7206_v20  ;;  %v7202_v20 = vor.u32 %v8656_v54, %v7199_v50  ;;  %v7241_v50 = vld [vmem:[%s12440_s0 + $0x7a0] sm:$0xf] }
 0x4ea   :  { %v3678_v33 = vadd.f32 %v3677_v52, %v3179_v2  ;;  %v4063_v23 = vmax.f32 %v4014_v62, 0.0  ;;  %v3304_v52 = vadd.f32 %v12674_v37, %v12673_v45  ;;  %v12684_v2 = vld [vmem:[#allocation87_spill] sm:$0xff]  ;;  %v12686_v45 = vld [vmem:[#allocation36_spill] sm:$0xff]  ;;  %v12687_v37 = vld [vmem:[#allocation89_spill] sm:$0xff] }
 0x4eb   :  { %v12685_v62 = vmax.f32 %v12683_v18, %v12684_v2 }
 0x4ec   :  { %v3913_v39 = vmax.f32 %v3678_v33, %v11093_v44  ;;  %4190 = vst.msk [vmem:[#allocation2 + $0x98] sm:$0xff] %vm4074_vm1, %v4063_v23  ;;  %v3685_v11 = vpop.f32.mrf.mxu2  ;;  %v3803_v61 = vadd.f32 %v11110_v51, %v3304_v52  ;;  %v3808_v23 = vadd.f32 %v11139_v24, %v3309_v38  ;;  %v12688_v52 = vmax.f32 %v12686_v45, %v12687_v37  ;;  %v12696_v38 = vld [vmem:[#allocation92_spill] sm:$0xff]  ;;  %v12698_v37 = vld [vmem:[#allocation79_spill] sm:$0xff] }
 0x4ee   :  { %v2682_v58 = vpop.f32.mrf.mxu0  ;;  %v11354_v46 = vmax.f32 %v12677_v59, %v3913_v39 }
 0x4ef   :  { %v3181_v22 = vpop.f32.mrf.mxu1 }
 0x4f0   :  { %v3182_v43 = vadd.f32 %v3181_v22, %v2682_v58  ;;  %v7209_v22 = vld [vmem:[%s12440_s0 + $0x768] sm:$0xf] }
 0x4f1   :  { %2721 = vmatmul.bf16.gmra.mxu0 %v7186_v21 }
 0x4f2   :  { %v3681_v44 = vadd.f32 %v3680_v49, %v3182_v43  ;;  %3220 = vmatmul.bf16.gmra.mxu1 %v7190_v56  ;;  %v8660_v43 = vld [vmem:[%s12440_s0 + $0x770] sm:$0xf0] }
 0x4f3   :  { %v7210_v48 = vor.u32 %v8660_v43, %v7209_v22 }
 0x4f4   :  { %v3914_v14 = vmax.f32 %v3681_v44, %v3803_v61  ;;  %v3687_v8 = vpop.f32.mrf.mxu2  ;;  %v8659_v44 = vld [vmem:[%s12440_s0 + $0x76c] sm:$0xf] }
 0x4f6   :  { %v3963_v5 = vmax.f32 %v12680_v4, %v3914_v14  ;;  %v2684_v36 = vpop.f32.mrf.mxu0  ;;  %v12691_v4 = vld [vmem:[#allocation109_spill] sm:$0xff] }
 0x4f7   :  { %v3183_v0 = vpop.f32.mrf.mxu1 }
 0x4f8   :  { %v3184_v51 = vadd.f32 %v3183_v0, %v2684_v36  ;;  %v4016_v49 = vadd.f32 %v11191_v55, %v3963_v5  ;;  %v3314_v5 = vadd.f32 %v12691_v4, %v12690_v53  ;;  %v12692_v0 = vld [vmem:[#allocation37_spill] sm:$0xff]  ;;  %v12704_v53 = vld [vmem:[#allocation94_spill] sm:$0xff] }
 0x4f9   :  { %7586 = vmatmul.msk.bf16.gmra.mxu2 %vm2033_vm0, %v7218_v16  ;;  %v7214_v16 = vor.u32 %v8659_v44, %v7211_v12  ;;  %v7253_v44 = vld [vmem:[%s12440_s0 + $0x7b8] sm:$0xf]  ;;  %v8670_v12 = vld [vmem:[%s12440_s0 + $0x7c0] sm:$0xf0] }
 0x4fa   :  { %v3683_v31 = vadd.f32 %v3682_v26, %v3184_v51  ;;  %v4065_v27 = vmax.f32 %v4016_v49, 0.0  ;;  %v12693_v51 = vld [vmem:[#allocation91_spill] sm:$0xff] }
 0x4fb   :  { %v12694_v49 = vmax.f32 %v12692_v0, %v12693_v51 }
 0x4fc   :  { %v3915_v32 = vmax.f32 %v3683_v31, %v11122_v9  ;;  %4196 = vst.msk [vmem:[#allocation2 + $0xa0] sm:$0xff] %vm4074_vm1, %v4065_v27  ;;  %v3690_v26 = vpop.f32.mrf.mxu2  ;;  %v3813_v27 = vadd.f32 %v11169_v40, %v3314_v5 }
 0x4fe   :  { %v2687_v17 = vpop.f32.mrf.mxu0  ;;  %v11387_v33 = vmax.f32 %v12685_v62, %v3915_v32  ;;  %v8667_v32 = vld [vmem:[%s12440_s0 + $0x7a8] sm:$0xf0] }
 0x4ff   :  { %v3186_v30 = vpop.f32.mrf.mxu1  ;;  %v7242_v2 = vor.u32 %v8667_v32, %v7241_v50 }
 0x500   :  { %v3187_v29 = vadd.f32 %v3186_v30, %v2687_v17  ;;  %v12697_v17 = vmax.f32 %v12695_v25, %v12696_v38  ;;  %v12707_v25 = vld [vmem:[#allocation115_spill] sm:$0xff] }
 0x501   :  { %2726 = vmatmul.bf16.gmra.mxu0 %v7198_v34 }
 0x502   :  { %v3686_v9 = vadd.f32 %v3685_v11, %v3187_v29  ;;  %3225 = vmatmul.bf16.gmra.mxu1 %v7202_v20  ;;  %v7221_v29 = vld [vmem:[%s12440_s0 + $0x780] sm:$0xf] }
 0x504   :  { %v3916_v39 = vmax.f32 %v3686_v9, %v3808_v23  ;;  %v3692_v21 = vpop.f32.mrf.mxu2  ;;  %v8663_v23 = vld [vmem:[%s12440_s0 + $0x788] sm:$0xf0] }
 0x505   :  { %v7222_v45 = vor.u32 %v8663_v23, %v7221_v29 }
 0x506   :  { %v3965_v58 = vmax.f32 %v12688_v52, %v3916_v39  ;;  %v2689_v56 = vpop.f32.mrf.mxu0  ;;  %v12699_v52 = vld [vmem:[#allocation112_spill] sm:$0xff] }
 0x507   :  { %v3188_v13 = vpop.f32.mrf.mxu1 }
 0x508   :  { %v3189_v24 = vadd.f32 %v3188_v13, %v2689_v56  ;;  %v4018_v11 = vadd.f32 %v11191_v55, %v3965_v58  ;;  %v3319_v58 = vadd.f32 %v12699_v52, %v12698_v37  ;;  %v12700_v13 = vld [vmem:[#allocation39_spill] sm:$0xff]  ;;  %v12712_v37 = vld [vmem:[#allocation96_spill] sm:$0xff] }
 0x509   :  { %7587 = vmatmul.msk.bf16.gmra.mxu2 %vm2033_vm0, %v7230_v19  ;;  %v7226_v19 = vor.u32 %v8662_v47, %v7223_v15  ;;  %v8673_v47 = vld [vmem:[%s12440_s0 + $0x7d8] sm:$0xf0] }
 0x50a   :  { %v3688_v59 = vadd.f32 %v3687_v8, %v3189_v24  ;;  %v4067_v61 = vmax.f32 %v4018_v11, 0.0  ;;  %v12701_v24 = vld [vmem:[#allocation93_spill] sm:$0xff] }
 0x50b   :  { %v12702_v11 = vmax.f32 %v12700_v13, %v12701_v24 }
 0x50c   :  { %v3917_v14 = vmax.f32 %v3688_v59, %v12689_v57  ;;  %4202 = vst.msk [vmem:[#allocation2 + $0xa8] sm:$0xff] %vm4074_vm1, %v4067_v61  ;;  %v3695_v8 = vpop.f32.mrf.mxu2  ;;  %v3818_v61 = vadd.f32 %v11213_v3, %v3319_v58 }
 0x50e   :  { %v2692_v36 = vpop.f32.mrf.mxu0  ;;  %v11420_v31 = vmax.f32 %v12694_v49, %v3917_v14  ;;  %v7233_v49 = vld [vmem:[%s12440_s0 + $0x798] sm:$0xf] }
 0x50f   :  { %v3191_v7 = vpop.f32.mrf.mxu1 }
 0x510   :  { %v3192_v6 = vadd.f32 %v3191_v7, %v2692_v36  ;;  %v8666_v7 = vld [vmem:[%s12440_s0 + $0x7a0] sm:$0xf0] }
 0x511   :  { %2731 = vmatmul.bf16.gmra.mxu0 %v7210_v48  ;;  %v12703_v48 = vld [vmem:[#allocation40_spill] sm:$0xff] }
 0x512   :  { %v3691_v54 = vadd.f32 %v3690_v26, %v3192_v6  ;;  %3230 = vmatmul.bf16.gmra.mxu1 %v7214_v16  ;;  %v12705_v4 = vmax.f32 %v12703_v48, %v12704_v53  ;;  %v7254_v16 = vor.u32 %v8670_v12, %v7253_v44  ;;  %v7247_v44 = vld [vmem:[%s12440_s0 + $0x7bc] sm:$0xf0]  ;;  %v12714_v12 = vld [vmem:[#allocation97_spill] sm:$0xff]  ;;  %v12715_v53 = vld [vmem:[#allocation3_spill] sm:$0xff] }
 0x514   :  { %v3918_v34 = vmax.f32 %v3691_v54, %v3813_v27  ;;  %v3697_v41 = vpop.f32.mrf.mxu2  ;;  %v8665_v27 = vld [vmem:[%s12440_s0 + $0x79c] sm:$0xf]  ;;  %v7235_v54 = vld [vmem:[%s12440_s0 + $0x7a4] sm:$0xf0] }
 0x516   :  { %v3967_v20 = vmax.f32 %v12697_v17, %v3918_v34  ;;  %v2694_v18 = vpop.f32.mrf.mxu0  ;;  %v7234_v34 = vor.u32 %v8666_v7, %v7233_v49 }
 0x517   :  { %v3193_v62 = vpop.f32.mrf.mxu1 }
 0x518   :  { %v3194_v40 = vadd.f32 %v3193_v62, %v2694_v18  ;;  %v4020_v26 = vadd.f32 %v11191_v55, %v3967_v20  ;;  %v7238_v20 = vor.u32 %v8665_v27, %v7235_v54  ;;  %v12708_v18 = vld [vmem:[#allocation41_spill] sm:$0xff]  ;;  %v8676_v27 = vld [vmem:[%s12440_s0 + $0x7f0] sm:$0xf0]  ;;  %v12718_v54 = vld [vmem:[#allocation98_spill] sm:$0xff] }
 0x519   :  { %7588 = vmatmul.msk.bf16.gmra.mxu2 %vm2033_vm0, %v7242_v2  ;;  %v12709_v2 = vld [vmem:[#allocation95_spill] sm:$0xff] }
 0x51a   :  { %v3693_v30 = vadd.f32 %v3692_v21, %v3194_v40  ;;  %v4069_v9 = vmax.f32 %v4020_v26, 0.0  ;;  %v12710_v62 = vmax.f32 %v12708_v18, %v12709_v2  ;;  %v3822_v26 = vpop.f32.mrf.mxu3 }
 0x51c   :  { %v3919_v39 = vmax.f32 %v3693_v30, %v11193_v63  ;;  %4208 = vst.msk [vmem:[#allocation2 + $0xb0] sm:$0xff] %vm4074_vm1, %v4069_v9  ;;  %v3700_v21 = vpop.f32.mrf.mxu2  ;;  %v7265_v9 = vld [vmem:[%s12440_s0 + $0x7d0] sm:$0xf] }
 0x51e   :  { %v2697_v56 = vpop.f32.mrf.mxu0  ;;  %v11453_v59 = vmax.f32 %v12702_v11, %v3919_v39 }
 0x51f   :  { %v3196_v22 = vpop.f32.mrf.mxu1 }
 0x520   :  { %v3197_v43 = vadd.f32 %v3196_v22, %v2697_v56 }
 0x521   :  { %2736 = vmatmul.bf16.gmra.mxu0 %v7222_v45  ;;  %v12711_v45 = vld [vmem:[#allocation42_spill] sm:$0xff] }
 0x522   :  { %v3696_v63 = vadd.f32 %v3695_v8, %v3197_v43  ;;  %3235 = vmatmul.bf16.gmra.mxu1 %v7226_v19  ;;  %v12713_v52 = vmax.f32 %v12711_v45, %v12712_v37  ;;  %v7266_v19 = vor.u32 %v8673_v47, %v7265_v9  ;;  %v7245_v43 = vld [vmem:[%s12440_s0 + $0x7b0] sm:$0xf]  ;;  %v7259_v9 = vld [vmem:[%s12440_s0 + $0x7d4] sm:$0xf0]  ;;  %v12722_v47 = vld [vmem:[#allocation99_spill] sm:$0xff] }
 0x523   :  { %v12723_v37 = vld [vmem:[#allocation5_spill] sm:$0xff] }
 0x524   :  { %v3920_v57 = vmax.f32 %v3696_v63, %v3818_v61  ;;  %v3702_v14 = vpop.f32.mrf.mxu2  ;;  %v8669_v61 = vld [vmem:[%s12440_s0 + $0x7b8] sm:$0xf0]  ;;  %v8668_v63 = vld [vmem:[%s12440_s0 + $0x7b4] sm:$0xf] }
 0x525   :  { %v7246_v48 = vor.u32 %v8669_v61, %v7245_v43  ;;  %v7289_v61 = vld [vmem:[%s12440_s0 + $0x800] sm:$0xf] }
 0x526   :  { %v3969_v5 = vmax.f32 %v12705_v4, %v3920_v57  ;;  %v2699_v36 = vpop.f32.mrf.mxu0  ;;  %v12716_v4 = vld [vmem:[#allocation43_spill] sm:$0xff] }
 0x527   :  { %v3198_v0 = vpop.f32.mrf.mxu1 }
 0x528   :  { %v3199_v3 = vadd.f32 %v3198_v0, %v2699_v36  ;;  %v4022_v8 = vadd.f32 %v11191_v55, %v3969_v5  ;;  %v12717_v5 = vmax.f32 %v12715_v53, %v12716_v4  ;;  %v7250_v0 = vor.u32 %v8668_v63, %v7247_v44  ;;  %v8679_v63 = vld [vmem:[%s12440_s0 + $0x808] sm:$0xf0]  ;;  %v12726_v44 = vld [vmem:[#allocation100_spill] sm:$0xff]  ;;  %v12727_v4 = vld [vmem:[#allocation6_spill] sm:$0xff] }
 0x529   :  { %7589 = vmatmul.msk.bf16.gmra.mxu2 %vm2033_vm0, %v7254_v16  ;;  %v7290_v53 = vor.u32 %v8679_v63, %v7289_v61  ;;  %v8677_v61 = vld [vmem:[%s12440_s0 + $0x7fc] sm:$0xf]  ;;  %v7283_v63 = vld [vmem:[%s12440_s0 + $0x804] sm:$0xf0] }
 0x52a   :  { %v3698_v51 = vadd.f32 %v3697_v41, %v3199_v3  ;;  %v4071_v6 = vmax.f32 %v4022_v8, 0.0  ;;  %v12706_v41 = vld [vmem:[#allocation82_spill] sm:$0xff] }
 0x52b   :  { %v3324_v38 = vadd.f32 %v12707_v25, %v12706_v41 }
 0x52c   :  { %v3921_v50 = vmax.f32 %v3698_v51, %v11232_v60  ;;  %4214 = vst.msk [vmem:[#allocation2 + $0xb8] sm:$0xff] %vm4074_vm1, %v4071_v6  ;;  %v3705_v32 = vpop.f32.mrf.mxu2  ;;  %v7277_v6 = vld [vmem:[%s12440_s0 + $0x7e8] sm:$0xf] }
 0x52d   :  { %v3823_v23 = vadd.f32 %v3822_v26, %v3324_v38  ;;  %v7278_v25 = vor.u32 %v8676_v27, %v7277_v6  ;;  %v12719_v38 = vld [vmem:[#allocation4_spill] sm:$0xff]  ;;  %v8674_v6 = vld [vmem:[%s12440_s0 + $0x7e4] sm:$0xf] }
 0x52e   :  { %v2702_v17 = vpop.f32.mrf.mxu0  ;;  %v11486_v40 = vmax.f32 %v12710_v62, %v3921_v50  ;;  %v7271_v27 = vld [vmem:[%s12440_s0 + $0x7ec] sm:$0xf0] }
 0x52f   :  { %v3201_v30 = vpop.f32.mrf.mxu1 }
 0x530   :  { %v3202_v29 = vadd.f32 %v3201_v30, %v2702_v17  ;;  %v12720_v17 = vld [vmem:[#allocation44_spill] sm:$0xff] }
 0x531   :  { %2741 = vmatmul.bf16.gmra.mxu0 %v7234_v34 }
 0x532   :  { %v3701_v60 = vadd.f32 %v3700_v21, %v3202_v29  ;;  %3240 = vmatmul.bf16.gmra.mxu1 %v7238_v20  ;;  %v7257_v29 = vld [vmem:[%s12440_s0 + $0x7c8] sm:$0xf] }
 0x534   :  { %v3922_v15 = vmax.f32 %v3701_v60, %v3823_v23  ;;  %v3707_v39 = vpop.f32.mrf.mxu2  ;;  %v8672_v23 = vld [vmem:[%s12440_s0 + $0x7d0] sm:$0xf0]  ;;  %v8671_v60 = vld [vmem:[%s12440_s0 + $0x7cc] sm:$0xf] }
 0x535   :  { %v7258_v45 = vor.u32 %v8672_v23, %v7257_v29  ;;  %v7301_v23 = vld [vmem:[%s12440_s0 + $0x818] sm:$0xf] }
 0x536   :  { %v3971_v58 = vmax.f32 %v12713_v52, %v3922_v15  ;;  %v2704_v56 = vpop.f32.mrf.mxu0  ;;  %v12724_v52 = vld [vmem:[#allocation45_spill] sm:$0xff] }
 0x537   :  { %v3203_v13 = vpop.f32.mrf.mxu1 }
 0x538   :  { %v4024_v21 = vadd.f32 %v11191_v55, %v3971_v58  ;;  %v3204_v24 = vadd.f32 %v3203_v13, %v2704_v56  ;;  %v12725_v58 = vmax.f32 %v12723_v37, %v12724_v52  ;;  %v7262_v13 = vor.u32 %v8671_v60, %v7259_v9  ;;  %v8682_v60 = vld [vmem:[%s12440_s0 + $0x820] sm:$0xf0]  ;;  %v12735_v52 = vld [vmem:[#allocation8_spill] sm:$0xff] }
 0x539   :  { %7590 = vmatmul.msk.bf16.gmra.mxu2 %vm2033_vm0, %v7266_v19  ;;  %v12734_v9 = vld [vmem:[#allocation102_spill] sm:$0xff]  ;;  %v7302_v37 = vor.u32 %v8682_v60, %v7301_v23 }
 0x53a   :  { %v4073_v11 = vmax.f32 %v4024_v21, 0.0  ;;  %v3703_v22 = vadd.f32 %v3702_v14, %v3204_v24 }
 0x53c   :  { %4220 = vst.msk [vmem:[#allocation2 + $0xc0] sm:$0xff] %vm4074_vm1, %v4073_v11  ;;  %v3874_v57 = vmax.f32 %v12714_v12, %v3703_v22  ;;  %v3710_v14 = vpop.f32.mrf.mxu2 }
 0x53e   :  { %v3923_v36 = vmax.f32 %v12717_v5, %v3874_v57  ;;  %v2707_v16 = vpop.f32.mrf.mxu0  ;;  %v12728_v5 = vld [vmem:[#allocation46_spill] sm:$0xff] }
 0x53f   :  { %v3206_v3 = vpop.f32.mrf.mxu1 }
 0x540   :  { %v3207_v8 = vadd.f32 %v3206_v3, %v2707_v16  ;;  %v3976_v51 = vadd.f32 %v11191_v55, %v3923_v36 }
 0x541   :  { %2746 = vmatmul.bf16.gmra.mxu0 %v7246_v48 }
 0x542   :  { %v3706_v49 = vadd.f32 %v3705_v32, %v3207_v8  ;;  %3245 = vmatmul.bf16.gmra.mxu1 %v7250_v0  ;;  %v4025_v7 = vmax.f32 %v3976_v51, 0.0  ;;  %v12721_v32 = vmax.f32 %v12719_v38, %v12720_v17  ;;  %v12732_v38 = vld [vmem:[#allocation47_spill] sm:$0xff] }
 0x544   :  { %v3875_v50 = vmax.f32 %v12718_v54, %v3706_v49  ;;  %4075 = vst.msk [vmem:[#allocation2] sm:$0xff] %vm4074_vm1, %v4025_v7  ;;  %v3712_v34 = vpop.f32.mrf.mxu2  ;;  %v7269_v49 = vld [vmem:[%s12440_s0 + $0x7e0] sm:$0xf]  ;;  %v8675_v7 = vld [vmem:[%s12440_s0 + $0x7e8] sm:$0xf0]  ;;  %v12730_v54 = vld [vmem:[#allocation101_spill] sm:$0xff] }
 0x546   :  { %v2709_v41 = vpop.f32.mrf.mxu0  ;;  %v3924_v20 = vmax.f32 %v12721_v32, %v3875_v50 }
 0x547   :  { %v3208_v18 = vpop.f32.mrf.mxu1 }
 0x548   :  { %v3209_v2 = vadd.f32 %v3208_v18, %v2709_v41  ;;  %v3977_v62 = vadd.f32 %v11191_v55, %v3924_v20  ;;  %v7270_v41 = vor.u32 %v8675_v7, %v7269_v49  ;;  %v7274_v18 = vor.u32 %v8674_v6, %v7271_v27  ;;  %v8740_v49 = vld [vmem:[%s12442_s3 + $0x30] sm:$0xff] }
 0x549   :  { %7591 = vmatmul.msk.bf16.gmra.mxu2 %vm2033_vm0, %v7278_v25  ;;  %v12731_v25 = vld [vmem:[#allocation7_spill] sm:$0xff]  ;;  %v7313_v27 = vld [vmem:[%s12440_s0 + $0x830] sm:$0xf] }
 0x54a   :  { %v3708_v26 = vadd.f32 %v3707_v39, %v3209_v2  ;;  %v4026_v30 = vmax.f32 %v3977_v62, 0.0  ;;  %v12733_v17 = vmax.f32 %v12731_v25, %v12732_v38 }
 0x54c   :  { %v3876_v15 = vmax.f32 %v12722_v47, %v3708_v26  ;;  %4077 = vrot.lane.b32.xlu0 %v4026_v30, %s8963_s10  ;;  %v3715_v39 = vpop.f32.mrf.mxu2 }
 0x54e   :  { %v3925_v56 = vmax.f32 %v12725_v58, %v3876_v15  ;;  %v2712_v19 = vpop.f32.mrf.mxu0  ;;  %v12736_v58 = vld [vmem:[#allocation48_spill] sm:$0xff] }
 0x54f   :  { %v3211_v21 = vpop.f32.mrf.mxu1 }
 0x550   :  { %v3212_v24 = vadd.f32 %v3211_v21, %v2712_v19  ;;  %v3978_v11 = vadd.f32 %v11191_v55, %v3925_v56 }
 0x551   :  { %2751 = vmatmul.bf16.gmra.mxu0 %v7258_v45 }
 0x552   :  { %v3711_v22 = vadd.f32 %v3710_v14, %v3212_v24  ;;  %3250 = vmatmul.bf16.gmra.mxu1 %v7262_v13  ;;  %v4027_v43 = vmax.f32 %v3978_v11, 0.0  ;;  %v12729_v14 = vmax.f32 %v12727_v4, %v12728_v5  ;;  %v12739_v4 = vld [vmem:[#allocation9_spill] sm:$0xff] }
 0x553   :  { %v12740_v5 = vld [vmem:[#allocation49_spill] sm:$0xff] }
 0x554   :  { %v3877_v12 = vmax.f32 %v12726_v44, %v3711_v22  ;;  %4082 = vst.msk [vmem:[#allocation2 + $0x8] sm:$0xff] %vm4074_vm1, %v4027_v43  ;;  %v3717_v57 = vpop.f32.mrf.mxu2  ;;  %v7281_v22 = vld [vmem:[%s12440_s0 + $0x7f8] sm:$0xf]  ;;  %v8678_v43 = vld [vmem:[%s12440_s0 + $0x800] sm:$0xf0]  ;;  %v12738_v44 = vld [vmem:[#allocation104_spill] sm:$0xff] }
 0x556   :  { %v2714_v48 = vpop.f32.mrf.mxu0  ;;  %v3926_v36 = vmax.f32 %v12729_v14, %v3877_v12  ;;  %v12741_v14 = vmax.f32 %v12739_v4, %v12740_v5 }
 0x557   :  { %v3213_v16 = vpop.f32.mrf.mxu1 }
 0x558   :  { %v3214_v0 = vadd.f32 %v3213_v16, %v2714_v48  ;;  %v3979_v3 = vadd.f32 %v11191_v55, %v3926_v36  ;;  %v7282_v48 = vor.u32 %v8678_v43, %v7281_v22  ;;  %v12750_v43 = vld [vmem:[#allocation108_spill] sm:$0xff] }
 0x559   :  { %7592 = vmatmul.msk.bf16.gmra.mxu2 %vm2033_vm0, %v7290_v53  ;;  %v8741_v53 = vld [vmem:[%s12442_s3 + $0x38] sm:$0xff] }
 0x55a   :  { %v3713_v8 = vadd.f32 %v3712_v34, %v3214_v0  ;;  %v4028_v51 = vmax.f32 %v3979_v3, 0.0  ;;  %v7286_v0 = vor.u32 %v8677_v61, %v7283_v63  ;;  %5846 = vmatpush.bf16.msrb.mxu3 %v8741_v53  ;;  %v12752_v53 = vld [vmem:[#allocation52_spill] sm:$0xff] }
 0x55c   :  { %v3878_v50 = vmax.f32 %v12730_v54, %v3713_v8  ;;  %4084 = vrot.lane.b32.xlu0 %v4028_v51, %s8963_s10  ;;  %v3720_v34 = vpop.f32.mrf.mxu2  ;;  %v8685_v54 = vld [vmem:[%s12440_s0 + $0x838] sm:$0xf0] }
 0x55e   :  { %v3927_v32 = vmax.f32 %v12733_v17, %v3878_v50  ;;  %v2717_v20 = vpop.f32.mrf.mxu0  ;;  %5847 = vmatpush.bf16.msrb.mxu3 %v8740_v49  ;;  %v12742_v50 = vld [vmem:[#allocation105_spill] sm:$0xff]  ;;  %v7314_v17 = vor.u32 %v8685_v54, %v7313_v27 }
 0x55f   :  { %v3216_v2 = vpop.f32.mrf.mxu1  ;;  %v12756_v27 = vld [vmem:[#allocation53_spill] sm:$0xff] }
 0x560   :  { %v3217_v62 = vadd.f32 %v3216_v2, %v2717_v20  ;;  %v3980_v26 = vadd.f32 %v11191_v55, %v3927_v32  ;;  %v12743_v32 = vld [vmem:[#allocation10_spill] sm:$0xff] }
 0x561   :  { %2756 = vmatmul.bf16.gmra.mxu0 %v7270_v41  ;;  %v12744_v20 = vld [vmem:[#allocation50_spill] sm:$0xff] }
 0x562   :  { %v3716_v30 = vadd.f32 %v3715_v39, %v3217_v62  ;;  %3255 = vmatmul.bf16.gmra.mxu1 %v7274_v18  ;;  %v4029_v29 = vmax.f32 %v3980_v26, 0.0  ;;  %v12737_v39 = vmax.f32 %v12735_v52, %v12736_v58  ;;  %v12745_v18 = vmax.f32 %v12743_v32, %v12744_v20  ;;  %v12747_v52 = vld [vmem:[#allocation11_spill] sm:$0xff] }
 0x563   :  { %v12748_v58 = vld [vmem:[#allocation51_spill] sm:$0xff] }
 0x564   :  { %v3879_v47 = vmax.f32 %v12734_v9, %v3716_v30  ;;  %4088 = vst.msk [vmem:[#allocation2 + $0x10] sm:$0xff] %vm4074_vm1, %v4029_v29  ;;  %v3722_v15 = vpop.f32.mrf.mxu2  ;;  %v8738_v29 = vld [vmem:[%s12442_s3 + $0x20] sm:$0xff]  ;;  %v12746_v9 = vld [vmem:[#allocation107_spill] sm:$0xff] }
 0x565   :  { %v8747_v20 = vld [vmem:[%s12442_s3 + $0x68] sm:$0xff] }
 0x566   :  { %v2719_v45 = vpop.f32.mrf.mxu0  ;;  %v3928_v56 = vmax.f32 %v12737_v39, %v3879_v47  ;;  %v12749_v39 = vmax.f32 %v12747_v52, %v12748_v58 }
 0x567   :  { %v3218_v19 = vpop.f32.mrf.mxu1 }
 0x568   :  { %v3219_v13 = vadd.f32 %v3218_v19, %v2719_v45  ;;  %v3981_v21 = vadd.f32 %v11191_v55, %v3928_v56 }
 0x569   :  { %7593 = vmatmul.msk.bf16.gmra.mxu2 %vm2033_vm0, %v7302_v37  ;;  %v8737_v37 = vld [vmem:[%s12442_s3 + $0x18] sm:$0xff] }
 0x56a   :  { %v3718_v24 = vadd.f32 %v3717_v57, %v3219_v13  ;;  %v4030_v11 = vmax.f32 %v3981_v21, 0.0 }
 0x56c   :  { %v3880_v12 = vmax.f32 %v12738_v44, %v3718_v24  ;;  %4090 = vrot.lane.b32.xlu1 %v4030_v11, %s8963_s10  ;;  %v3725_v57 = vpop.f32.mrf.mxu2  ;;  %v8736_v24 = vld [vmem:[%s12442_s3 + $0x10] sm:$0xff]  ;;  %v8735_v44 = vld [vmem:[%s12442_s3 + $0x8] sm:$0xff] }
 0x56e   :  { %v3929_v36 = vmax.f32 %v12741_v14, %v3880_v12  ;;  %v2722_v16 = vpop.f32.mrf.mxu0 }
 0x56f   :  { %v3221_v3 = vpop.f32.mrf.mxu1 }
 0x570   :  { %v3222_v8 = vadd.f32 %v3221_v3, %v2722_v16  ;;  %v3982_v51 = vadd.f32 %v11191_v55, %v3929_v36  ;;  %v8734_v16 = vld [vmem:[%s12442_s3] sm:$0xff] }
 0x571   :  { %2761 = vmatmul.bf16.gmra.mxu0 %v7282_v48  ;;  %v12751_v48 = vld [vmem:[#allocation12_spill] sm:$0xff] }
 0x572   :  { %v3721_v7 = vadd.f32 %v3720_v34, %v3222_v8  ;;  %3260 = vmatmul.bf16.gmra.mxu1 %v7286_v0  ;;  %v4031_v6 = vmax.f32 %v3982_v51, 0.0  ;;  %v8739_v34 = vld [vmem:[%s12442_s3 + $0x28] sm:$0xff]  ;;  %v12753_v4 = vmax.f32 %v12751_v48, %v12752_v53  ;;  %v8749_v8 = vld [vmem:[%s12442_s3 + $0x78] sm:$0xff]  ;;  %v12754_v51 = vld [vmem:[#allocation110_spill] sm:$0xff] }
 0x573   :  { %5848 = vmatpush.bf16.msrb.mxu3 %v8739_v34  ;;  %v8743_v53 = vld [vmem:[%s12442_s3 + $0x48] sm:$0xff] }
 0x574   :  { %v3881_v41 = vmax.f32 %v12742_v50, %v3721_v7  ;;  %4094 = vst.msk [vmem:[#allocation2 + $0x18] sm:$0xff] %vm4074_vm1, %v4031_v6  ;;  %v3727_v25 = vpop.f32.mrf.mxu2  ;;  %v12755_v6 = vld [vmem:[#allocation13_spill] sm:$0xff] }
 0x575   :  { %v12757_v54 = vmax.f32 %v12755_v6, %v12756_v27 }
 0x576   :  { %v2724_v38 = vpop.f32.mrf.mxu0  ;;  %v3930_v2 = vmax.f32 %v12745_v18, %v3881_v41 }
 0x577   :  { %v3223_v62 = vpop.f32.mrf.mxu1  ;;  %5849 = vmatpush.bf16.msrb.mxu3 %v8738_v29  ;;  %v12759_v29 = vld [vmem:[#allocation14_spill] sm:$0xff] }
 0x578   :  { %v3224_v26 = vadd.f32 %v3223_v62, %v2724_v38  ;;  %v3983_v30 = vadd.f32 %v11191_v55, %v3930_v2  ;;  %v12758_v2 = vld [vmem:[#allocation111_spill] sm:$0xff] }
 0x579   :  { %7594 = vmatmul.msk.bf16.gmra.mxu2 %vm2033_vm0, %v7314_v17 }
 0x57a   :  { %v3723_v23 = vadd.f32 %v3722_v15, %v3224_v26  ;;  %v4032_v60 = vmax.f32 %v3983_v30, 0.0 }
 0x57b   :  { %5850 = vmatpush.bf16.msrb.mxu3 %v8737_v37 }
 0x57c   :  { %v3882_v47 = vmax.f32 %v12746_v9, %v3723_v23  ;;  %4096 = vrot.lane.b32.xlu1 %v4032_v60, %s8963_s10  ;;  %v3730_v45 = vpop.f32.mrf.mxu2  ;;  %v12760_v23 = vld [vmem:[#allocation54_spill] sm:$0xff] }
 0x57d   :  { %v12761_v60 = vmax.f32 %v12759_v29, %v12760_v23  ;;  %v12774_v29 = vld [vmem:[#allocation117_spill] sm:$0xff] }
 0x57e   :  { %v3931_v56 = vmax.f32 %v12749_v39, %v3882_v47  ;;  %v2727_v19 = vpop.f32.mrf.mxu0  ;;  %v8746_v47 = vld [vmem:[%s12442_s3 + $0x60] sm:$0xff] }
 0x57f   :  { %v3226_v13 = vpop.f32.mrf.mxu1  ;;  %5851 = vmatpush.bf16.msrb.mxu3 %v8736_v24  ;;  %v12764_v24 = vld [vmem:[#allocation55_spill] sm:$0xff] }
 0x580   :  { %v3227_v15 = vadd.f32 %v3226_v13, %v2727_v19  ;;  %v3984_v21 = vadd.f32 %v11191_v55, %v3931_v56  ;;  %v8745_v56 = vld [vmem:[%s12442_s3 + $0x58] sm:$0xff] }
 0x581   :  { %v12762_v19 = vld [vmem:[#allocation113_spill] sm:$0xff] }
 0x582   :  { %v3726_v11 = vadd.f32 %v3725_v57, %v3227_v15  ;;  %v4033_v22 = vmax.f32 %v3984_v21, 0.0  ;;  %v12763_v21 = vld [vmem:[#allocation15_spill] sm:$0xff] }
 0x583   :  { %5852 = vmatpush.bf16.msrb.mxu3 %v8735_v44 }
 0x584   :  { %v3883_v61 = vmax.f32 %v12750_v43, %v3726_v11  ;;  %4100 = vst.msk [vmem:[#allocation2 + $0x20] sm:$0xff] %vm4074_vm1, %v4033_v22  ;;  %v3732_v63 = vpop.f32.mrf.mxu2  ;;  %v12765_v11 = vmax.f32 %v12763_v21, %v12764_v24  ;;  %v12778_v21 = vld [vmem:[#allocation118_spill] sm:$0xff] }
 0x586   :  { %v2729_v12 = vpop.f32.mrf.mxu0  ;;  %v3932_v5 = vmax.f32 %v12753_v4, %v3883_v61  ;;  %v8744_v61 = vld [vmem:[%s12442_s3 + $0x50] sm:$0xff] }
 0x587   :  { %v3228_v14 = vpop.f32.mrf.mxu1  ;;  %5853 = vmatpush.bf16.msrb.mxu3 %v8734_v16  ;;  %v12767_v16 = vld [vmem:[#allocation16_spill] sm:$0xff] }
 0x588   :  { %v3229_v36 = vadd.f32 %v3228_v14, %v2729_v12  ;;  %v3985_v57 = vadd.f32 %v11191_v55, %v3932_v5  ;;  %v12766_v5 = vld [vmem:[#allocation114_spill] sm:$0xff] }
 0x58a   :  { %v3728_v0 = vadd.f32 %v3727_v25, %v3229_v36  ;;  %v4034_v3 = vmax.f32 %v3985_v57, 0.0  ;;  %v8748_v25 = vld [vmem:[%s12442_s3 + $0x70] sm:$0xff] }
 0x58b   :  { %5859 = vmatpush.bf16.msra.mxu3 %v8749_v8 }
 0x58c   :  { %v3884_v49 = vmax.f32 %v12754_v51, %v3728_v0  ;;  %4102 = vrot.lane.b32.xlu2 %v4034_v3, %s8963_s10  ;;  %v3735_v7 = vpop.f32.mrf.mxu2  ;;  %v12768_v0 = vld [vmem:[#allocation56_spill] sm:$0xff]  ;;  %v8742_v51 = vld [vmem:[%s12442_s3 + $0x40] sm:$0xff] }
 0x58d   :  { %v12769_v3 = vmax.f32 %v12767_v16, %v12768_v0 }
 0x58e   :  { %v3933_v50 = vmax.f32 %v12757_v54, %v3884_v49  ;;  %v2732_v41 = vpop.f32.mrf.mxu0 }
 0x58f   :  { %v3231_v34 = vpop.f32.mrf.mxu1  ;;  %5860 = vmatpush.bf16.msra.mxu3 %v8748_v25 }
 0x590   :  { %v3232_v38 = vadd.f32 %v3231_v34, %v2732_v41  ;;  %v3986_v17 = vadd.f32 %v11191_v55, %v3933_v50  ;;  %v12770_v50 = vld [vmem:[#allocation116_spill] sm:$0xff]  ;;  %v12771_v34 = vld [vmem:[#allocation17_spill] sm:$0xff] }
 0x592   :  { %v3731_v32 = vadd.f32 %v3730_v45, %v3232_v38  ;;  %v4035_v18 = vmax.f32 %v3986_v17, 0.0  ;;  %v12772_v38 = vld [vmem:[#allocation57_spill] sm:$0xff] }
 0x593   :  { %5861 = vmatpush.bf16.msra.mxu3 %v8747_v20  ;;  %v12773_v17 = vmax.f32 %v12771_v34, %v12772_v38  ;;  %v8756_v34 = vld [vmem:[%s12442_s3 + $0xb0] sm:$0xff] }
 0x594   :  { %v3885_v62 = vmax.f32 %v12758_v2, %v3731_v32  ;;  %4106 = vst.msk [vmem:[#allocation2 + $0x28] sm:$0xff] %vm4074_vm1, %v4035_v18  ;;  %v3737_v26 = vpop.f32.mrf.mxu2  ;;  %v12786_v38 = vld [vmem:[#allocation120_spill] sm:$0xff] }
 0x596   :  { %v2734_v30 = vpop.f32.mrf.mxu0  ;;  %v3934_v9 = vmax.f32 %v12761_v60, %v3885_v62  ;;  %v11715_v62 = vld [vmem:[%s12441_s2] ss:$0 sm:$0xff] }
 0x597   :  { %v3233_v45 = vpop.f32.mrf.mxu1  ;;  %5862 = vmatpush.bf16.msra.mxu3 %v8746_v47  ;;  %v12775_v47 = vld [vmem:[#allocation18_spill] sm:$0xff] }
 0x598   :  { %v3234_v37 = vadd.f32 %v3233_v45, %v2734_v30  ;;  %v3987_v52 = vadd.f32 %v11191_v55, %v3934_v9  ;;  %v12776_v45 = vld [vmem:[#allocation58_spill] sm:$0xff] }
 0x59a   :  { %v3733_v58 = vadd.f32 %v3732_v63, %v3234_v37  ;;  %v4036_v39 = vmax.f32 %v3987_v52, 0.0  ;;  %v12777_v37 = vmax.f32 %v12775_v47, %v12776_v45  ;;  %v8754_v45 = vld [vmem:[%s12442_s3 + $0xa0] sm:$0xff] }
 0x59b   :  { %5863 = vmatpush.bf16.msra.mxu3 %v8745_v56 }
 0x59c   :  { %v3886_v13 = vmax.f32 %v12762_v19, %v3733_v58  ;;  %4108 = vrot.lane.b32.xlu2 %v4036_v39, %s8963_s10  ;;  %v3740_v15 = vpop.f32.mrf.mxu2 }
 0x59e   :  { %v3935_v22 = vmax.f32 %v12765_v11, %v3886_v13  ;;  %v2737_v43 = vpop.f32.mrf.mxu0  ;;  %v12779_v11 = vld [vmem:[#allocation19_spill] sm:$0xff] }
 0x59f   :  { %v3236_v63 = vpop.f32.mrf.mxu1  ;;  %5864 = vmatpush.bf16.msra.mxu3 %v8744_v61 }
 0x5a0   :  { %v3237_v44 = vadd.f32 %v3236_v63, %v2737_v43  ;;  %v3988_v12 = vadd.f32 %v11191_v55, %v3935_v22  ;;  %v12780_v22 = vld [vmem:[#allocation60_spill] sm:$0xff] }
 0x5a1   :  { %v12781_v43 = vmax.f32 %v12779_v11, %v12780_v22 }
 0x5a2   :  { %v3736_v48 = vadd.f32 %v3735_v7, %v3237_v44  ;;  %v4037_v4 = vmax.f32 %v3988_v12, 0.0 }
 0x5a3   :  { %5865 = vmatpush.bf16.msra.mxu3 %v8743_v53 }
 0x5a4   :  { %v3887_v14 = vmax.f32 %v12766_v5, %v3736_v48  ;;  %4112 = vst.msk [vmem:[#allocation2 + $0x30] sm:$0xff] %vm4074_vm1, %v4037_v4  ;;  %v3742_v36 = vpop.f32.mrf.mxu2 }
 0x5a6   :  { %v2739_v57 = vpop.f32.mrf.mxu0  ;;  %v3936_v8 = vmax.f32 %v12769_v3, %v3887_v14  ;;  %v12782_v14 = vld [vmem:[#allocation119_spill] sm:$0xff]  ;;  %v8757_v3 = vld [vmem:[%s12442_s3 + $0xb8] sm:$0xff] }
 0x5a7   :  { %v3238_v49 = vpop.f32.mrf.mxu1  ;;  %5866 = vmatpush.bf16.msra.mxu3 %v8742_v51  ;;  %v12784_v51 = vld [vmem:[#allocation62_spill] sm:$0xff] }
 0x5a8   :  { %v3239_v7 = vadd.f32 %v3238_v49, %v2739_v57  ;;  %v3989_v6 = vadd.f32 %v11191_v55, %v3936_v8  ;;  %v12783_v8 = vld [vmem:[#allocation20_spill] sm:$0xff] }
 0x5a9   :  { %v12785_v49 = vmax.f32 %v12783_v8, %v12784_v51 }
 0x5aa   :  { %v3738_v27 = vadd.f32 %v3737_v26, %v3239_v7  ;;  %v4038_v54 = vmax.f32 %v3989_v6, 0.0 }
 0x5ac   :  { %v3888_v41 = vmax.f32 %v12770_v50, %v3738_v27  ;;  %4114 = vrot.lane.b32.xlu0 %v4038_v54, %s8963_s10  ;;  %v3745_v25 = vpop.f32.mrf.mxu2 }
 0x5ae   :  { %v3937_v32 = vmax.f32 %v12773_v17, %v3888_v41  ;;  %v2742_v20 = vpop.f32.mrf.mxu0 }
 0x5af   :  { %v3241_v18 = vpop.f32.mrf.mxu1 }
 0x5b0   :  { %v3242_v2 = vadd.f32 %v3241_v18, %v2742_v20  ;;  %v3990_v55 = vadd.f32 %v11715_v62, %v3937_v32  ;;  %v12787_v20 = vld [vmem:[#allocation21_spill] sm:$0xff]  ;;  %v12788_v18 = vld [vmem:[#allocation64_spill] sm:$0xff] }
 0x5b2   :  { %v3741_v26 = vadd.f32 %v3740_v15, %v3242_v2  ;;  %v4039_v30 = vmax.f32 %v3990_v55, 0.0  ;;  %v12789_v2 = vmax.f32 %v12787_v20, %v12788_v18  ;;  %v12800_v18 = vld [vmem:[#allocation68_spill] sm:$0xff] }
 0x5b4   :  { %v3889_v23 = vmax.f32 %v12774_v29, %v3741_v26  ;;  %4118 = vst.msk [vmem:[#allocation2 + $0x38] sm:$0xff] %vm4074_vm1, %v4039_v30  ;;  %v3747_v60 = vpop.f32.mrf.mxu2  ;;  %v8755_v29 = vld [vmem:[%s12442_s3 + $0xa8] sm:$0xff] }
 0x5b6   :  { %v2744_v9 = vpop.f32.mrf.mxu0  ;;  %v3938_v52 = vmax.f32 %v12777_v37, %v3889_v23 }
 0x5b7   :  { %v3243_v58 = vpop.f32.mrf.mxu1 }
 0x5b8   :  { %v3244_v39 = vadd.f32 %v3243_v58, %v2744_v9  ;;  %v3991_v56 = vadd.f32 %v11715_v62, %v3938_v52  ;;  %v12790_v52 = vld [vmem:[#allocation121_spill] sm:$0xff] }
 0x5ba   :  { %v3743_v19 = vadd.f32 %v3742_v36, %v3244_v39  ;;  %v4040_v13 = vmax.f32 %v3991_v56, 0.0 }
 0x5bc   :  { %v3890_v24 = vmax.f32 %v12778_v21, %v3743_v19  ;;  %4120 = vrot.lane.b32.xlu1 %v4040_v13, %s8963_s10  ;;  %v3750_v15 = vpop.f32.mrf.mxu2  ;;  %v8753_v13 = vld [vmem:[%s12442_s3 + $0x98] sm:$0xff]  ;;  %v12791_v21 = vld [vmem:[#allocation22_spill] sm:$0xff] }
 0x5be   :  { %v3939_v61 = vmax.f32 %v12781_v43, %v3890_v24  ;;  %v4078_v63 = vpop.permute.xlu0 %4077  ;;  %v2747_v44 = vpop.f32.mrf.mxu0  ;;  %v12792_v24 = vld [vmem:[#allocation66_spill] sm:$0xff] }
 0x5bf   :  { %4081 = vst.msk [vmem:[#allocation2] sm:$0xff] %vm4080_vm2, %v4078_v63  ;;  %v3246_v12 = vpop.f32.mrf.mxu1 }
 0x5c0   :  { %v3247_v48 = vadd.f32 %v3246_v12, %v2747_v44  ;;  %v3992_v53 = vadd.f32 %v11715_v62, %v3939_v61 }
 0x5c2   :  { %v3746_v4 = vadd.f32 %v3745_v25, %v3247_v48  ;;  %v4041_v5 = vmax.f32 %v3992_v53, 0.0  ;;  %v8752_v48 = vld [vmem:[%s12442_s3 + $0x90] sm:$0xff]  ;;  %v12794_v53 = vld [vmem:[#allocation122_spill] sm:$0xff] }
 0x5c4   :  { %v3891_v36 = vmax.f32 %v12782_v14, %v3746_v4  ;;  %4124 = vst.msk [vmem:[#allocation2 + $0x40] sm:$0xff] %vm4074_vm1, %v4041_v5  ;;  %v3752_v57 = vpop.f32.mrf.mxu2  ;;  %v12795_v14 = vld [vmem:[#allocation23_spill] sm:$0xff] }
 0x5c6   :  { %v2749_v16 = vpop.f32.mrf.mxu0  ;;  %v4221_v0 = vld [vmem:[#allocation2] sm:$0xff]  ;;  %v3940_v7 = vmax.f32 %v12785_v49, %v3891_v36  ;;  %v12796_v36 = vld [vmem:[#allocation67_spill] sm:$0xff] }
 0x5c7   :  { %v3248_v6 = vpop.f32.mrf.mxu1  ;;  %v4246_v27 = vpack.c.bf16 %v4221_v0, %v4221_v0 }
 0x5c8   :  { %v3249_v54 = vadd.f32 %v3248_v6, %v2749_v16  ;;  %v3993_v50 = vadd.f32 %v11715_v62, %v3940_v7  ;;  %v12797_v16 = vmax.f32 %v12795_v14, %v12796_v36  ;;  %v12810_v14 = vld [vmem:[#allocation72_spill] sm:$0xff] }
 0x5c9   :  { %5854 = vmatmul.bf16.vlgmr.msrb.gmra.mxu3 %v4246_v27  ;;  %v8750_v27 = vld [vmem:[%s12442_s3 + $0x80] sm:$0xff] }
 0x5ca   :  { %v3748_v41 = vadd.f32 %v3747_v60, %v3249_v54  ;;  %5872 = vmatpush.bf16.msrb.mxu3 %v8757_v3  ;;  %v4042_v25 = vmax.f32 %v3993_v50, 0.0  ;;  %v8765_v50 = vld [vmem:[%s12442_s3 + $0xf8] sm:$0xff] }
 0x5cc   :  { %v3892_v17 = vmax.f32 %v12786_v38, %v3748_v41  ;;  %4126 = vrot.lane.b32.xlu2 %v4042_v25, %s8963_s10  ;;  %v3755_v32 = vpop.f32.mrf.mxu2  ;;  %v12798_v41 = vld [vmem:[#allocation123_spill] sm:$0xff] }
 0x5ce   :  { %v3941_v55 = vmax.f32 %v12789_v2, %v3892_v17  ;;  %5873 = vmatpush.bf16.msrb.mxu3 %v8756_v34  ;;  %v4085_v26 = vpop.permute.xlu0 %4084  ;;  %v2752_v30 = vpop.f32.mrf.mxu0 }
 0x5cf   :  { %4087 = vst.msk [vmem:[#allocation2 + $0x8] sm:$0xff] %vm4080_vm2, %v4085_v26  ;;  %v3251_v23 = vpop.f32.mrf.mxu1 }
 0x5d0   :  { %v3252_v60 = vadd.f32 %v3251_v23, %v2752_v30  ;;  %v3994_v9 = vadd.f32 %v11715_v62, %v3941_v55 }
 0x5d2   :  { %v3751_v47 = vadd.f32 %v3750_v15, %v3252_v60  ;;  %5874 = vmatpush.bf16.msrb.mxu3 %v8755_v29  ;;  %v4043_v37 = vmax.f32 %v3994_v9, 0.0  ;;  %v12793_v15 = vmax.f32 %v12791_v21, %v12792_v24  ;;  %v8764_v29 = vld [vmem:[%s12442_s3 + $0xf0] sm:$0xff]  ;;  %v12805_v21 = vld [vmem:[#allocation25_spill] sm:$0xff] }
 0x5d3   :  { %v12806_v24 = vld [vmem:[#allocation69_spill] sm:$0xff] }
 0x5d4   :  { %v3893_v58 = vmax.f32 %v12790_v52, %v3751_v47  ;;  %4130 = vst.msk [vmem:[#allocation2 + $0x48] sm:$0xff] %vm4074_vm1, %v4043_v37  ;;  %v3757_v39 = vpop.f32.mrf.mxu2  ;;  %v12802_v37 = vld [vmem:[#allocation59_spill] sm:$0xff]  ;;  %v12803_v52 = vld [vmem:[#allocation84_spill] sm:$0xff] }
 0x5d6   :  { %5875 = vmatpush.bf16.msrb.mxu3 %v8754_v45  ;;  %v2754_v56 = vpop.f32.mrf.mxu0  ;;  %v4222_v19 = vld [vmem:[#allocation2 + $0x8] sm:$0xff]  ;;  %v3942_v11 = vmax.f32 %v12793_v15, %v3893_v58  ;;  %v3267_v58 = vadd.f32 %v12803_v52, %v12802_v37  ;;  %v12807_v15 = vmax.f32 %v12805_v21, %v12806_v24  ;;  %v4007_v52 = vadd.f32 %v11715_v62, %v11218_v10  ;;  %v12824_v21 = vld [vmem:[#allocation126_spill] sm:$0xff] }
 0x5d7   :  { %v3253_v22 = vpop.f32.mrf.mxu1  ;;  %v4247_v43 = vpack.c.bf16 %v4222_v19, %v4222_v19  ;;  %v8763_v45 = vld [vmem:[%s12442_s3 + $0xe8] sm:$0xff] }
 0x5d8   :  { %v3254_v61 = vadd.f32 %v3253_v22, %v2754_v56  ;;  %v3995_v63 = vadd.f32 %v11715_v62, %v3942_v11  ;;  %v12804_v56 = vld [vmem:[#allocation124_spill] sm:$0xff]  ;;  %v12826_v10 = vld [vmem:[#allocation71_spill] sm:$0xff] }
 0x5d9   :  { %5867 = vmatmul.bf16.vlgmr.msra.gmra.mxu3 %v4247_v43 }
 0x5da   :  { %v3753_v44 = vadd.f32 %v3752_v57, %v3254_v61  ;;  %5876 = vmatpush.bf16.msrb.mxu3 %v8753_v13  ;;  %v4044_v12 = vmax.f32 %v3995_v63, 0.0  ;;  %v8751_v57 = vld [vmem:[%s12442_s3 + $0x88] sm:$0xff]  ;;  %v8762_v63 = vld [vmem:[%s12442_s3 + $0xe0] sm:$0xff] }
 0x5dc   :  { %v3894_v4 = vmax.f32 %v12794_v53, %v3753_v44  ;;  %4132 = vrot.lane.b32.xlu0 %v4044_v12, %s8963_s10  ;;  %v3760_v5 = vpop.f32.mrf.mxu2  ;;  %v12808_v44 = vld [vmem:[#allocation127_spill] sm:$0xff] }
 0x5de   :  { %v3943_v0 = vmax.f32 %v12797_v16, %v3894_v4  ;;  %5877 = vmatpush.bf16.msrb.mxu3 %v8752_v48  ;;  %v4091_v3 = vpop.permute.xlu1 %4090  ;;  %v2757_v8 = vpop.f32.mrf.mxu0  ;;  %v12809_v4 = vld [vmem:[#allocation28_spill] sm:$0xff] }
 0x5df   :  { %4093 = vst.msk [vmem:[#allocation2 + $0x10] sm:$0xff] %vm4080_vm2, %v4091_v3  ;;  %v3256_v51 = vpop.f32.mrf.mxu1  ;;  %v12811_v36 = vmax.f32 %v12809_v4, %v12810_v14 }
 0x5e0   :  { %v3257_v49 = vadd.f32 %v3256_v51, %v2757_v8  ;;  %v3996_v7 = vadd.f32 %v11715_v62, %v3943_v0  ;;  %v8761_v8 = vld [vmem:[%s12442_s3 + $0xd8] sm:$0xff]  ;;  %v12813_v51 = vld [vmem:[#allocation86_spill] sm:$0xff] }
 0x5e2   :  { %v3756_v6 = vadd.f32 %v3755_v32, %v3257_v49  ;;  %5878 = vmatpush.bf16.msrb.mxu3 %v8751_v57  ;;  %v4045_v54 = vmax.f32 %v3996_v7, 0.0  ;;  %v12799_v32 = vld [vmem:[#allocation24_spill] sm:$0xff]  ;;  %v12812_v57 = vld [vmem:[#allocation61_spill] sm:$0xff] }
 0x5e3   :  { %v12801_v2 = vmax.f32 %v12799_v32, %v12800_v18  ;;  %v3269_v49 = vadd.f32 %v12813_v51, %v12812_v57  ;;  %v12814_v7 = vld [vmem:[#allocation125_spill] sm:$0xff]  ;;  %v4013_v51 = vadd.f32 %v11715_v62, %v11321_v42  ;;  %v4011_v42 = vadd.f32 %v11715_v62, %v11288_v1 }
 0x5e4   :  { %v3895_v25 = vmax.f32 %v12798_v41, %v3756_v6  ;;  %4136 = vst.msk [vmem:[#allocation2 + $0x50] sm:$0xff] %vm4074_vm1, %v4045_v54  ;;  %v3762_v34 = vpop.f32.mrf.mxu2  ;;  %v4009_v1 = vadd.f32 %v11715_v62, %v11255_v28  ;;  %v8769_v28 = vld [vmem:[%s12442_s3 + $0x118] sm:$0xff] }
 0x5e6   :  { %5879 = vmatpush.bf16.msrb.mxu3 %v8750_v27  ;;  %v4103_v38 = vpop.permute.xlu2 %4102  ;;  %v2759_v17 = vpop.f32.mrf.mxu0  ;;  %v4223_v20 = vld [vmem:[#allocation2 + $0x10] sm:$0xff]  ;;  %v3944_v55 = vmax.f32 %v12801_v2, %v3895_v25 }
 0x5e7   :  { %4105 = vst.msk [vmem:[#allocation2 + $0x20] sm:$0xff] %vm4080_vm2, %v4103_v38  ;;  %v3258_v26 = vpop.f32.mrf.mxu1  ;;  %v4248_v30 = vpack.c.bf16 %v4223_v20, %v4223_v20  ;;  %v12815_v38 = vld [vmem:[#allocation26_spill] sm:$0xff]  ;;  %v8760_v2 = vld [vmem:[%s12442_s3 + $0xd0] sm:$0xff] }
 0x5e8   :  { %v3259_v23 = vadd.f32 %v3258_v26, %v2759_v17  ;;  %v3997_v60 = vadd.f32 %v11715_v62, %v3944_v55  ;;  %v12816_v17 = vld [vmem:[#allocation70_spill] sm:$0xff]  ;;  %v12818_v55 = vld [vmem:[#allocation128_spill] sm:$0xff] }
 0x5e9   :  { %5880 = vmatmul.bf16.vlgmr.msrb.gmra.mxu3 %v4248_v30  ;;  %v12817_v20 = vmax.f32 %v12815_v38, %v12816_v17  ;;  %v4062_v38 = vmax.f32 %v4013_v51, 0.0  ;;  %v12834_v17 = vld [vmem:[#allocation130_spill] sm:$0xff] }
 0x5ea   :  { %5885 = vmatpush.bf16.msra.mxu3 %v8765_v50  ;;  %v3758_v9 = vadd.f32 %v3757_v39, %v3259_v23  ;;  %v4046_v47 = vmax.f32 %v3997_v60, 0.0  ;;  %v12819_v23 = vld [vmem:[#allocation29_spill] sm:$0xff] }
 0x5eb   :  { %v12820_v60 = vld [vmem:[#allocation73_spill] sm:$0xff] }
 0x5ec   :  { %v3896_v19 = vmax.f32 %v12804_v56, %v3758_v9  ;;  %4138 = vrot.lane.b32.xlu1 %v4046_v47, %s8963_s10  ;;  %v3765_v13 = vpop.f32.mrf.mxu2  ;;  %v12821_v9 = vmax.f32 %v12819_v23, %v12820_v60  ;;  %v12822_v56 = vld [vmem:[#allocation63_spill] sm:$0xff]  ;;  %v8770_v23 = vld [vmem:[%s12442_s3 + $0x120] sm:$0xff] }
 0x5ed   :  { %v3766_v22 = vadd.f32 %v3765_v13, %v3267_v58  ;;  %v8759_v58 = vld [vmem:[%s12442_s3 + $0xc8] sm:$0xff] }
 0x5ee   :  { %5886 = vmatpush.bf16.msra.mxu3 %v8764_v29  ;;  %v3945_v11 = vmax.f32 %v12807_v15, %v3896_v19  ;;  %v4097_v39 = vpop.permute.xlu1 %4096  ;;  %v2762_v43 = vpop.f32.mrf.mxu0  ;;  %v12823_v19 = vld [vmem:[#allocation88_spill] sm:$0xff] }
 0x5ef   :  { %4099 = vst.msk [vmem:[#allocation2 + $0x18] sm:$0xff] %vm4080_vm2, %v4097_v39  ;;  %v3261_v61 = vpop.f32.mrf.mxu1  ;;  %v3899_v12 = vmax.f32 %v12808_v44, %v3766_v22  ;;  %v3272_v13 = vadd.f32 %v12823_v19, %v12822_v56  ;;  %v12825_v22 = vld [vmem:[#allocation27_spill] sm:$0xff]  ;;  %v4023_v56 = vadd.f32 %v11715_v62, %v11486_v40  ;;  %v8781_v40 = vld [vmem:[%s12442_s3 + $0x178] sm:$0xff] }
 0x5f0   :  { %v3262_v48 = vadd.f32 %v3261_v61, %v2762_v43  ;;  %v3998_v53 = vadd.f32 %v11715_v62, %v3945_v11  ;;  %v12827_v39 = vmax.f32 %v12825_v22, %v12826_v10  ;;  %v8767_v19 = vld [vmem:[%s12442_s3 + $0x108] sm:$0xff]  ;;  %v8778_v10 = vld [vmem:[%s12442_s3 + $0x160] sm:$0xff] }
 0x5f1   :  { %v3948_v16 = vmax.f32 %v12811_v36, %v3899_v12  ;;  %v8758_v12 = vld [vmem:[%s12442_s3 + $0xc0] sm:$0xff] }
 0x5f2   :  { %5887 = vmatpush.bf16.msra.mxu3 %v8763_v45  ;;  %v3761_v0 = vadd.f32 %v3760_v5, %v3262_v48  ;;  %v4047_v3 = vmax.f32 %v3998_v53, 0.0  ;;  %v12828_v48 = vld [vmem:[#allocation129_spill] sm:$0xff]  ;;  %v12829_v36 = vld [vmem:[#allocation30_spill] sm:$0xff] }
 0x5f3   :  { %v4001_v27 = vadd.f32 %v11715_v62, %v3948_v16  ;;  %v12830_v16 = vld [vmem:[#allocation74_spill] sm:$0xff] }
 0x5f4   :  { %v3897_v6 = vmax.f32 %v12814_v7, %v3761_v0  ;;  %4142 = vst.msk [vmem:[#allocation2 + $0x58] sm:$0xff] %vm4074_vm1, %v4047_v3  ;;  %v3767_v54 = vpop.f32.mrf.mxu2  ;;  %v12831_v0 = vmax.f32 %v12829_v36, %v12830_v16  ;;  %v12833_v7 = vld [vmem:[#allocation90_spill] sm:$0xff]  ;;  %v8785_v36 = vld [vmem:[%s12442_s3 + $0x198] sm:$0xff] }
 0x5f5   :  { %v3768_v50 = vadd.f32 %v3767_v54, %v3269_v49  ;;  %v4050_v5 = vmax.f32 %v4001_v27, 0.0  ;;  %v12832_v49 = vld [vmem:[#allocation65_spill] sm:$0xff]  ;;  %v8772_v54 = vld [vmem:[%s12442_s3 + $0x130] sm:$0xff] }
 0x5f6   :  { %5888 = vmatpush.bf16.msra.mxu3 %v8762_v63  ;;  %v4109_v41 = vpop.permute.xlu2 %4108  ;;  %v2764_v25 = vpop.f32.mrf.mxu0  ;;  %v3946_v32 = vmax.f32 %v12817_v20, %v3897_v6  ;;  %v4056_v63 = vmax.f32 %v4007_v52, 0.0  ;;  %v4224_v14 = vld [vmem:[#allocation2 + $0x18] sm:$0xff]  ;;  %v3274_v6 = vadd.f32 %v12833_v7, %v12832_v49  ;;  %v4015_v52 = vadd.f32 %v11715_v62, %v11354_v46  ;;  %v8782_v49 = vld [vmem:[%s12442_s3 + $0x180] sm:$0xff] }
 0x5f7   :  { %4111 = vst.msk [vmem:[#allocation2 + $0x28] sm:$0xff] %vm4080_vm2, %v4109_v41  ;;  %v3263_v18 = vpop.f32.mrf.mxu1  ;;  %v3900_v26 = vmax.f32 %v12818_v55, %v3768_v50  ;;  %4150 = vrot.lane.b32.xlu0 %v4050_v5, %s8963_s10  ;;  %v4249_v27 = vpack.c.bf16 %v4224_v14, %v4224_v14  ;;  %v4021_v46 = vadd.f32 %v11715_v62, %v11453_v59  ;;  %v8786_v14 = vld [vmem:[%s12442_s3 + $0x1a0] sm:$0xff] }
 0x5f8   :  { %v3264_v30 = vadd.f32 %v3263_v18, %v2764_v25  ;;  %v3999_v29 = vadd.f32 %v11715_v62, %v3946_v32  ;;  %v8771_v32 = vld [vmem:[%s12442_s3 + $0x128] sm:$0xff]  ;;  %v8958_v7 = vld [vmem:[%s12443_s4] ss:$0 sm:$0xff] }
 0x5f9   :  { %v3949_v47 = vmax.f32 %v12821_v9, %v3900_v26  ;;  %v12835_v18 = vld [vmem:[#allocation31_spill] sm:$0xff]  ;;  %v4058_v9 = vmax.f32 %v4009_v1, 0.0 }
 0x5fa   :  { %5889 = vmatpush.bf16.msra.mxu3 %v8761_v8  ;;  %v3763_v45 = vadd.f32 %v3762_v34, %v3264_v30  ;;  %v4048_v37 = vmax.f32 %v3999_v29, 0.0  ;;  %v4005_v34 = vadd.f32 %v11715_v62, %v11174_v35  ;;  %v8773_v35 = vld [vmem:[%s12442_s3 + $0x138] sm:$0xff]  ;;  %v4060_v30 = vmax.f32 %v4011_v42, 0.0 }
 0x5fb   :  { %v4002_v15 = vadd.f32 %v11715_v62, %v3949_v47  ;;  %v4019_v29 = vadd.f32 %v11715_v62, %v11420_v31  ;;  %v4017_v47 = vadd.f32 %v11715_v62, %v11387_v33  ;;  %v8768_v33 = vld [vmem:[%s12442_s3 + $0x110] sm:$0xff] }
 0x5fc   :  { %v3898_v24 = vmax.f32 %v12824_v21, %v3763_v45  ;;  %4144 = vrot.lane.b32.xlu2 %v4048_v37, %s8963_s10  ;;  %v3770_v11 = vpop.f32.mrf.mxu2  ;;  %v4054_v8 = vmax.f32 %v4005_v34, 0.0  ;;  %v8766_v21 = vld [vmem:[%s12442_s3 + $0x100] sm:$0xff]  ;;  %v8779_v34 = vld [vmem:[%s12442_s3 + $0x168] sm:$0xff] }
 0x5fd   :  { %v3771_v61 = vadd.f32 %v3770_v11, %v3272_v13  ;;  %v4051_v44 = vmax.f32 %v4002_v15, 0.0  ;;  %v4068_v37 = vmax.f32 %v4019_v29, 0.0  ;;  %v4066_v31 = vmax.f32 %v4017_v47, 0.0  ;;  %v4225_v11 = vld [vmem:[#allocation2 + $0x20] sm:$0xff] }
 0x5fe   :  { %5890 = vmatpush.bf16.msra.mxu3 %v8760_v2  ;;  %v3947_v43 = vmax.f32 %v12827_v39, %v3898_v24  ;;  %v12836_v2 = vld [vmem:[#allocation75_spill] sm:$0xff]  ;;  %v4072_v13 = vmax.f32 %v4023_v56, 0.0  ;;  %v4070_v15 = vmax.f32 %v4021_v46, 0.0  ;;  %v4250_v59 = vpack.c.bf16 %v4225_v11, %v4225_v11  ;;  %v8777_v39 = vld [vmem:[%s12442_s3 + $0x158] sm:$0xff] }
 0x5ff   :  { %v3901_v53 = vmax.f32 %v12828_v48, %v3771_v61  ;;  %4168 = vrot.lane.b32.xlu0 %v4056_v63, %s8963_s10  ;;  %4154 = vst.msk [vmem:[#allocation2 + $0x68] sm:$0xff] %vm4074_vm1, %v4051_v44  ;;  %v12837_v55 = vmax.f32 %v12835_v18, %v12836_v2  ;;  %v8776_v61 = vld [vmem:[%s12442_s3 + $0x150] sm:$0xff]  ;;  %v8775_v63 = vld [vmem:[%s12442_s3 + $0x148] sm:$0xff]  ;;  %v8774_v44 = vld [vmem:[%s12442_s3 + $0x140] sm:$0xff] }
 0x600   :  { %v4000_v4 = vadd.f32 %v11715_v62, %v3947_v43  ;;  %v4226_v48 = vld [vmem:[#allocation2 + $0x28] sm:$0xff]  ;;  %v8793_v2 = vld [vmem:[%s12442_s3 + $0x1d8] sm:$0xff] }
 0x601   :  { %v3950_v3 = vmax.f32 %v12831_v0, %v3901_v53  ;;  %v4251_v53 = vpack.c.bf16 %v4226_v48, %v4226_v48  ;;  %v8803_v56 = vld [vmem:[%s12442_s3 + $0x228] sm:$0xff]  ;;  %v8808_v48 = vld [vmem:[%s12442_s3 + $0x250] sm:$0xff] }
 0x602   :  { %5891 = vmatpush.bf16.msra.mxu3 %v8759_v58  ;;  %v4049_v57 = vmax.f32 %v4000_v4, 0.0  ;;  %v4064_v58 = vmax.f32 %v4015_v52, 0.0  ;;  %v8787_v4 = vld [vmem:[%s12442_s3 + $0x1a8] sm:$0xff]  ;;  %v8804_v52 = vld [vmem:[%s12442_s3 + $0x230] sm:$0xff] }
 0x603   :  { %v4003_v50 = vadd.f32 %v11715_v62, %v3950_v3  ;;  %v8784_v3 = vld [vmem:[%s12442_s3 + $0x190] sm:$0xff] }
 0x604   :  { %4162 = vrot.lane.b32.xlu2 %v4054_v8, %s8963_s10  ;;  %4148 = vst.msk [vmem:[#allocation2 + $0x60] sm:$0xff] %vm4074_vm1, %v4049_v57  ;;  %v3772_v41 = vpop.f32.mrf.mxu2  ;;  %v8783_v8 = vld [vmem:[%s12442_s3 + $0x188] sm:$0xff] }
 0x605   :  { %v3773_v25 = vadd.f32 %v3772_v41, %v3274_v6  ;;  %v4052_v5 = vmax.f32 %v4003_v50, 0.0  ;;  %v8797_v6 = vld [vmem:[%s12442_s3 + $0x1f8] sm:$0xff]  ;;  %v8796_v41 = vld [vmem:[%s12442_s3 + $0x1f0] sm:$0xff] }
 0x606   :  { %5892 = vmatpush.bf16.msra.mxu3 %v8758_v12  ;;  %v8789_v12 = vld [vmem:[%s12442_s3 + $0x1b8] sm:$0xff] }
 0x607   :  { %v3902_v20 = vmax.f32 %v12834_v17, %v3773_v25  ;;  %4156 = vrot.lane.b32.xlu1 %v4052_v5, %s8963_s10  ;;  %4186 = vrot.lane.b32.xlu0 %v4062_v38, %s8963_s10  ;;  %v8795_v17 = vld [vmem:[%s12442_s3 + $0x1e8] sm:$0xff] }
 0x609   :  { %5893 = vmatmul.bf16.vlgmr.msra.gmra.mxu3 %v4249_v27  ;;  %v3951_v26 = vmax.f32 %v12837_v55, %v3902_v20  ;;  %v8794_v20 = vld [vmem:[%s12442_s3 + $0x1e0] sm:$0xff] }
 0x60a   :  { %5898 = vmatpush.bf16.msrb.mxu3 %v8773_v35  ;;  %v8788_v35 = vld [vmem:[%s12442_s3 + $0x1b0] sm:$0xff] }
 0x60b   :  { %v4004_v60 = vadd.f32 %v11715_v62, %v3951_v26  ;;  %v8780_v62 = vld [vmem:[%s12442_s3 + $0x170] sm:$0xff] }
 0x60c   :  { %4180 = vrot.lane.b32.xlu2 %v4060_v30, %s8963_s10  ;;  %v8792_v26 = vld [vmem:[%s12442_s3 + $0x1d0] sm:$0xff] }
 0x60d   :  { %v4053_v45 = vmax.f32 %v4004_v60, 0.0 }
 0x60e   :  { %5899 = vmatpush.bf16.msrb.mxu3 %v8772_v54 }
 0x60f   :  { %4174 = vrot.lane.b32.xlu1 %v4058_v9, %s8963_s10  ;;  %4160 = vst.msk [vmem:[#allocation2 + $0x70] sm:$0xff] %vm4074_vm1, %v4053_v45  ;;  %4204 = vrot.lane.b32.xlu0 %v4068_v37, %s8963_s10  ;;  %v8790_v9 = vld [vmem:[%s12442_s3 + $0x1c0] sm:$0xff]  ;;  %v8805_v45 = vld [vmem:[%s12442_s3 + $0x238] sm:$0xff] }
 0x612   :  { %5900 = vmatpush.bf16.msrb.mxu3 %v8771_v32 }
 0x614   :  { %4198 = vrot.lane.b32.xlu2 %v4066_v31, %s8963_s10 }
 0x616   :  { %5901 = vmatpush.bf16.msrb.mxu3 %v8770_v23  ;;  %v8791_v23 = vld [vmem:[%s12442_s3 + $0x1c8] sm:$0xff] }
 0x617   :  { %4192 = vrot.lane.b32.xlu1 %v4064_v58, %s8963_s10 }
 0x61a   :  { %5902 = vmatpush.bf16.msrb.mxu3 %v8769_v28 }
 0x61c   :  { %4216 = vrot.lane.b32.xlu2 %v4072_v13, %s8963_s10 }
 0x61e   :  { %5903 = vmatpush.bf16.msrb.mxu3 %v8768_v33  ;;  %v4115_v24 = vpop.permute.xlu0 %4114 }
 0x61f   :  { %4117 = vst.msk [vmem:[#allocation2 + $0x30] sm:$0xff] %vm4080_vm2, %v4115_v24  ;;  %4210 = vrot.lane.b32.xlu1 %v4070_v15, %s8963_s10 }
 0x622   :  { %5904 = vmatpush.bf16.msrb.mxu3 %v8767_v19  ;;  %v8802_v19 = vld [vmem:[%s12442_s3 + $0x220] sm:$0xff] }
 0x626   :  { %5905 = vmatpush.bf16.msrb.mxu3 %v8766_v21  ;;  %v4127_v22 = vpop.permute.xlu2 %4126  ;;  %v4227_v27 = vld [vmem:[#allocation2 + $0x30] sm:$0xff]  ;;  %v8801_v21 = vld [vmem:[%s12442_s3 + $0x218] sm:$0xff] }
 0x627   :  { %4129 = vst.msk [vmem:[#allocation2 + $0x40] sm:$0xff] %vm4080_vm2, %v4127_v22  ;;  %v4252_v50 = vpack.c.bf16 %v4227_v27, %v4227_v27  ;;  %v8813_v22 = vld [vmem:[%s12442_s3 + $0x278] sm:$0xff] }
 0x629   :  { %5906 = vmatmul.bf16.vlgmr.msrb.gmra.mxu3 %v4250_v59  ;;  %v8799_v59 = vld [vmem:[%s12442_s3 + $0x208] sm:$0xff] }
 0x62a   :  { %5911 = vmatpush.bf16.msra.mxu3 %v8781_v40  ;;  %v8800_v40 = vld [vmem:[%s12442_s3 + $0x210] sm:$0xff] }
 0x62e   :  { %5912 = vmatpush.bf16.msra.mxu3 %v8780_v62  ;;  %v4121_v43 = vpop.permute.xlu1 %4120  ;;  %v8798_v62 = vld [vmem:[%s12442_s3 + $0x200] sm:$0xff] }
 0x62f   :  { %4123 = vst.msk [vmem:[#allocation2 + $0x38] sm:$0xff] %vm4080_vm2, %v4121_v43 }
 0x632   :  { %5913 = vmatpush.bf16.msra.mxu3 %v8779_v34 }
 0x636   :  { %5914 = vmatpush.bf16.msra.mxu3 %v8778_v10  ;;  %v4228_v37 = vld [vmem:[#allocation2 + $0x38] sm:$0xff] }
 0x637   :  { %v4253_v31 = vpack.c.bf16 %v4228_v37, %v4228_v37  ;;  %v8833_v37 = vld [vmem:[%s12442_s3 + $0x318] sm:$0xff] }
 0x63a   :  { %5915 = vmatpush.bf16.msra.mxu3 %v8777_v39  ;;  %v4229_v39 = vld [vmem:[#allocation2 + $0x40] sm:$0xff] }
 0x63b   :  { %v4254_v43 = vpack.c.bf16 %v4229_v39, %v4229_v39  ;;  %v8853_v39 = vld [vmem:[%s12442_s3 + $0x3b8] sm:$0xff] }
 0x63e   :  { %5916 = vmatpush.bf16.msra.mxu3 %v8776_v61  ;;  %v8812_v61 = vld [vmem:[%s12442_s3 + $0x270] sm:$0xff] }
 0x642   :  { %5917 = vmatpush.bf16.msra.mxu3 %v8775_v63  ;;  %v8811_v63 = vld [vmem:[%s12442_s3 + $0x268] sm:$0xff] }
 0x646   :  { %5918 = vmatpush.bf16.msra.mxu3 %v8774_v44  ;;  %v8810_v44 = vld [vmem:[%s12442_s3 + $0x260] sm:$0xff] }
 0x649   :  { %5919 = vmatmul.bf16.vlgmr.msra.gmra.mxu3 %v4251_v53 }
 0x64a   :  { %5924 = vmatpush.bf16.msrb.mxu3 %v8789_v12  ;;  %v8809_v12 = vld [vmem:[%s12442_s3 + $0x258] sm:$0xff] }
 0x64c   :  { %v5855_v16 = vpop.f32.mrf.mxu3 }
 0x64d   :  { %v5856_v54 = vadd.f32 %v8958_v7, %v5855_v16  ;;  %v8821_v16 = vld [vmem:[%s12442_s3 + $0x2b8] sm:$0xff]  ;;  %v8816_v7 = vld [vmem:[%s12442_s3 + $0x290] sm:$0xff] }
 0x64e   :  { %5925 = vmatpush.bf16.msrb.mxu3 %v8788_v35  ;;  %v4133_v0 = vpop.permute.xlu0 %4132 }
 0x64f   :  { %4135 = vst.msk [vmem:[#allocation2 + $0x48] sm:$0xff] %vm4080_vm2, %v4133_v0 }
 0x652   :  { %5926 = vmatpush.bf16.msrb.mxu3 %v8787_v4  ;;  %v8807_v4 = vld [vmem:[%s12442_s3 + $0x248] sm:$0xff] }
 0x654   :  { %v5857_v57 = vpop.f32.mrf.mxu3 }
 0x655   :  { %v8819_v57 = vld [vmem:[%s12442_s3 + $0x2a8] sm:$0xff] }
 0x656   :  { %5927 = vmatpush.bf16.msrb.mxu3 %v8786_v14  ;;  %v4145_v51 = vpop.permute.xlu2 %4144  ;;  %v8806_v14 = vld [vmem:[%s12442_s3 + $0x240] sm:$0xff]  ;;  %v4230_v0 = vld [vmem:[#allocation2 + $0x48] sm:$0xff] }
 0x657   :  { %4147 = vst.msk [vmem:[#allocation2 + $0x58] sm:$0xff] %vm4080_vm2, %v4145_v51  ;;  %v8818_v51 = vld [vmem:[%s12442_s3 + $0x2a0] sm:$0xff] }
 0x65a   :  { %5928 = vmatpush.bf16.msrb.mxu3 %v8785_v36 }
 0x65c   :  { %v5868_v25 = vpop.f32.mrf.mxu3 }
 0x65d   :  { %v5869_v5 = vadd.f32 %v5868_v25, %v5856_v54  ;;  %v8815_v54 = vld [vmem:[%s12442_s3 + $0x288] sm:$0xff]  ;;  %v8829_v25 = vld [vmem:[%s12442_s3 + $0x2f8] sm:$0xff] }
 0x65e   :  { %5929 = vmatpush.bf16.msrb.mxu3 %v8784_v3  ;;  %v4163_v42 = vpop.permute.xlu2 %4162  ;;  %v4139_v38 = vpop.permute.xlu1 %4138  ;;  %v4255_v3 = vpack.c.bf16 %v4230_v0, %v4230_v0  ;;  %v8861_v0 = vld [vmem:[%s12442_s3 + $0x3f8] sm:$0xff] }
 0x65f   :  { %4165 = vst.msk [vmem:[#allocation2 + $0x70] sm:$0xff] %vm4080_vm2, %v4163_v42 }
 0x660   :  { %4141 = vst.msk [vmem:[#allocation2 + $0x50] sm:$0xff] %vm4080_vm2, %v4139_v38  ;;  %v8828_v38 = vld [vmem:[%s12442_s3 + $0x2f0] sm:$0xff] }
 0x662   :  { %5930 = vmatpush.bf16.msrb.mxu3 %v8783_v8  ;;  %v8820_v8 = vld [vmem:[%s12442_s3 + $0x2b0] sm:$0xff] }
 0x664   :  { %v5870_v32 = vpop.f32.mrf.mxu3 }
 0x665   :  { %v8825_v32 = vld [vmem:[%s12442_s3 + $0x2d8] sm:$0xff] }
 0x666   :  { %5931 = vmatpush.bf16.msrb.mxu3 %v8782_v49  ;;  %v4181_v18 = vpop.permute.xlu2 %4180  ;;  %v8817_v49 = vld [vmem:[%s12442_s3 + $0x298] sm:$0xff] }
 0x667   :  { %4183 = vst.msk [vmem:[#allocation2 + $0x88] sm:$0xff] %vm4080_vm2, %v4181_v18  ;;  %v8824_v18 = vld [vmem:[%s12442_s3 + $0x2d0] sm:$0xff] }
 0x669   :  { %5932 = vmatmul.bf16.vlgmr.msrb.gmra.mxu3 %v4252_v50  ;;  %v4151_v55 = vpop.permute.xlu0 %4150  ;;  %v8814_v50 = vld [vmem:[%s12442_s3 + $0x280] sm:$0xff] }
 0x66a   :  { %5937 = vmatpush.bf16.msra.mxu3 %v8797_v6  ;;  %4153 = vst.msk [vmem:[#allocation2 + $0x60] sm:$0xff] %vm4080_vm2, %v4151_v55 }
 0x66c   :  { %v5881_v30 = vpop.f32.mrf.mxu3 }
 0x66d   :  { %v5882_v1 = vadd.f32 %v5881_v30, %v5869_v5  ;;  %v4231_v5 = vld [vmem:[#allocation2 + $0x50] sm:$0xff]  ;;  %v8822_v30 = vld [vmem:[%s12442_s3 + $0x2c0] sm:$0xff] }
 0x66e   :  { %5938 = vmatpush.bf16.msra.mxu3 %v8796_v41  ;;  %v4199_v29 = vpop.permute.xlu2 %4198  ;;  %v4256_v42 = vpack.c.bf16 %v4231_v5, %v4231_v5  ;;  %v8869_v5 = vld [vmem:[%s12442_s3 + $0x438] sm:$0xff] }
 0x66f   :  { %4201 = vst.msk [vmem:[#allocation2 + $0xa0] sm:$0xff] %vm4080_vm2, %v4199_v29  ;;  %v8837_v29 = vld [vmem:[%s12442_s3 + $0x338] sm:$0xff] }
 0x671   :  { %v4169_v60 = vpop.permute.xlu0 %4168 }
 0x672   :  { %5939 = vmatpush.bf16.msra.mxu3 %v8795_v17  ;;  %4171 = vst.msk [vmem:[#allocation2 + $0x78] sm:$0xff] %vm4080_vm2, %v4169_v60  ;;  %v8827_v17 = vld [vmem:[%s12442_s3 + $0x2e8] sm:$0xff] }
 0x674   :  { %v5883_v47 = vpop.f32.mrf.mxu3 }
 0x675   :  { %v8835_v47 = vld [vmem:[%s12442_s3 + $0x328] sm:$0xff] }
 0x676   :  { %5940 = vmatpush.bf16.msra.mxu3 %v8794_v20  ;;  %v4217_v28 = vpop.permute.xlu2 %4216  ;;  %v8826_v20 = vld [vmem:[%s12442_s3 + $0x2e0] sm:$0xff] }
 0x677   :  { %4219 = vst.msk [vmem:[#allocation2 + $0xb8] sm:$0xff] %vm4080_vm2, %v4217_v28  ;;  %v8832_v28 = vld [vmem:[%s12442_s3 + $0x310] sm:$0xff] }
 0x679   :  { %v4157_v33 = vpop.permute.xlu1 %4156  ;;  %v4187_v58 = vpop.permute.xlu0 %4186 }
 0x67a   :  { %5941 = vmatpush.bf16.msra.mxu3 %v8793_v2  ;;  %4159 = vst.msk [vmem:[#allocation2 + $0x68] sm:$0xff] %vm4080_vm2, %v4157_v33  ;;  %v8831_v33 = vld [vmem:[%s12442_s3 + $0x308] sm:$0xff] }
 0x67b   :  { %4189 = vst.msk [vmem:[#allocation2 + $0x90] sm:$0xff] %vm4080_vm2, %v4187_v58  ;;  %v8830_v58 = vld [vmem:[%s12442_s3 + $0x300] sm:$0xff] }
 0x67e   :  { %5942 = vmatpush.bf16.msra.mxu3 %v8792_v26  ;;  %v8823_v26 = vld [vmem:[%s12442_s3 + $0x2c8] sm:$0xff] }
 0x681   :  { %v4175_v13 = vpop.permute.xlu1 %4174  ;;  %v4205_v46 = vpop.permute.xlu0 %4204 }
 0x682   :  { %5943 = vmatpush.bf16.msra.mxu3 %v8791_v23  ;;  %4177 = vst.msk [vmem:[#allocation2 + $0x80] sm:$0xff] %vm4080_vm2, %v4175_v13  ;;  %v4232_v23 = vld [vmem:[#allocation2 + $0x58] sm:$0xff]  ;;  %v4233_v13 = vld [vmem:[#allocation2 + $0x60] sm:$0xff] }
 0x683   :  { %4207 = vst.msk [vmem:[#allocation2 + $0xa8] sm:$0xff] %vm4080_vm2, %v4205_v46  ;;  %v4257_v60 = vpack.c.bf16 %v4232_v23, %v4232_v23  ;;  %v4258_v46 = vpack.c.bf16 %v4233_v13, %v4233_v13  ;;  %v8877_v23 = vld [vmem:[%s12442_s3 + $0x478] sm:$0xff] }
 0x684   :  { %v8885_v13 = vld [vmem:[%s12442_s3 + $0x4b8] sm:$0xff] }
 0x686   :  { %5944 = vmatpush.bf16.msra.mxu3 %v8790_v9  ;;  %v8836_v9 = vld [vmem:[%s12442_s3 + $0x330] sm:$0xff] }
 0x689   :  { %5945 = vmatmul.bf16.vlgmr.msra.gmra.mxu3 %v4253_v31  ;;  %v4193_v11 = vpop.permute.xlu1 %4192 }
 0x68a   :  { %5950 = vmatpush.bf16.msrb.mxu3 %v8805_v45  ;;  %4195 = vst.msk [vmem:[#allocation2 + $0x98] sm:$0xff] %vm4080_vm2, %v4193_v11  ;;  %v8834_v45 = vld [vmem:[%s12442_s3 + $0x320] sm:$0xff]  ;;  %v8840_v11 = vld [vmem:[%s12442_s3 + $0x350] sm:$0xff] }
 0x68c   :  { %v5894_v24 = vpop.f32.mrf.mxu3 }
 0x68d   :  { %v5895_v15 = vadd.f32 %v5894_v24, %v5882_v1  ;;  %v8842_v24 = vld [vmem:[%s12442_s3 + $0x360] sm:$0xff] }
 0x68e   :  { %5951 = vmatpush.bf16.msrb.mxu3 %v8804_v52 }
 0x691   :  { %v4211_v10 = vpop.permute.xlu1 %4210 }
 0x692   :  { %5952 = vmatpush.bf16.msrb.mxu3 %v8803_v56  ;;  %4213 = vst.msk [vmem:[#allocation2 + $0xb0] sm:$0xff] %vm4080_vm2, %v4211_v10 }
 0x694   :  { %v5896_v34 = vpop.f32.mrf.mxu3 }
 0x695   :  { %v8839_v34 = vld [vmem:[%s12442_s3 + $0x348] sm:$0xff] }
 0x696   :  { %5953 = vmatpush.bf16.msrb.mxu3 %v8802_v19  ;;  %v8845_v19 = vld [vmem:[%s12442_s3 + $0x378] sm:$0xff] }
 0x69a   :  { %5954 = vmatpush.bf16.msrb.mxu3 %v8801_v21  ;;  %v8844_v21 = vld [vmem:[%s12442_s3 + $0x370] sm:$0xff] }
 0x69e   :  { %5955 = vmatpush.bf16.msrb.mxu3 %v8800_v40  ;;  %v8843_v40 = vld [vmem:[%s12442_s3 + $0x368] sm:$0xff] }
 0x6a2   :  { %5956 = vmatpush.bf16.msrb.mxu3 %v8799_v59 }
 0x6a6   :  { %5957 = vmatpush.bf16.msrb.mxu3 %v8798_v62 }
 0x6a9   :  { %5958 = vmatmul.bf16.vlgmr.msrb.gmra.mxu3 %v4254_v43  ;;  %v4234_v43 = vld [vmem:[#allocation2 + $0x68] sm:$0xff] }
 0x6aa   :  { %5963 = vmatpush.bf16.msra.mxu3 %v8813_v22  ;;  %v8838_v22 = vld [vmem:[%s12442_s3 + $0x340] sm:$0xff] }
 0x6ac   :  { %v5907_v53 = vpop.f32.mrf.mxu3 }
 0x6ad   :  { %v5908_v35 = vadd.f32 %v5907_v53, %v5895_v15  ;;  %v8841_v15 = vld [vmem:[%s12442_s3 + $0x358] sm:$0xff]  ;;  %v8848_v53 = vld [vmem:[%s12442_s3 + $0x390] sm:$0xff] }
 0x6ae   :  { %5964 = vmatpush.bf16.msra.mxu3 %v8812_v61  ;;  %v4259_v61 = vpack.c.bf16 %v4234_v43, %v4234_v43  ;;  %v8893_v43 = vld [vmem:[%s12442_s3 + $0x4f8] sm:$0xff] }
 0x6b2   :  { %5965 = vmatpush.bf16.msra.mxu3 %v8811_v63  ;;  %v8852_v63 = vld [vmem:[%s12442_s3 + $0x3b0] sm:$0xff] }
 0x6b4   :  { %v5909_v36 = vpop.f32.mrf.mxu3 }
 0x6b5   :  { %v8846_v36 = vld [vmem:[%s12442_s3 + $0x380] sm:$0xff] }
 0x6b6   :  { %5966 = vmatpush.bf16.msra.mxu3 %v8810_v44  ;;  %v8851_v44 = vld [vmem:[%s12442_s3 + $0x3a8] sm:$0xff] }
 0x6ba   :  { %5967 = vmatpush.bf16.msra.mxu3 %v8809_v12  ;;  %v8850_v12 = vld [vmem:[%s12442_s3 + $0x3a0] sm:$0xff] }
 0x6be   :  { %5968 = vmatpush.bf16.msra.mxu3 %v8808_v48  ;;  %v8849_v48 = vld [vmem:[%s12442_s3 + $0x398] sm:$0xff] }
 0x6c2   :  { %5969 = vmatpush.bf16.msra.mxu3 %v8807_v4 }
 0x6c6   :  { %5970 = vmatpush.bf16.msra.mxu3 %v8806_v14  ;;  %v8847_v14 = vld [vmem:[%s12442_s3 + $0x388] sm:$0xff] }
 0x6c9   :  { %5971 = vmatmul.bf16.vlgmr.msra.gmra.mxu3 %v4255_v3  ;;  %v4235_v3 = vld [vmem:[#allocation2 + $0x70] sm:$0xff] }
 0x6ca   :  { %5976 = vmatpush.bf16.msrb.mxu3 %v8821_v16 }
 0x6cc   :  { %v5920_v6 = vpop.f32.mrf.mxu3 }
 0x6cd   :  { %v5921_v27 = vadd.f32 %v5920_v6, %v5908_v35  ;;  %v8856_v6 = vld [vmem:[%s12442_s3 + $0x3d0] sm:$0xff] }
 0x6ce   :  { %5977 = vmatpush.bf16.msrb.mxu3 %v8820_v8  ;;  %v4260_v8 = vpack.c.bf16 %v4235_v3, %v4235_v3  ;;  %v8901_v3 = vld [vmem:[%s12442_s3 + $0x538] sm:$0xff] }
 0x6d2   :  { %5978 = vmatpush.bf16.msrb.mxu3 %v8819_v57  ;;  %v8860_v57 = vld [vmem:[%s12442_s3 + $0x3f0] sm:$0xff] }
 0x6d4   :  { %v5922_v41 = vpop.f32.mrf.mxu3 }
 0x6d5   :  { %v8854_v41 = vld [vmem:[%s12442_s3 + $0x3c0] sm:$0xff] }
 0x6d6   :  { %5979 = vmatpush.bf16.msrb.mxu3 %v8818_v51  ;;  %v8859_v51 = vld [vmem:[%s12442_s3 + $0x3e8] sm:$0xff] }
 0x6da   :  { %5980 = vmatpush.bf16.msrb.mxu3 %v8817_v49  ;;  %v8858_v49 = vld [vmem:[%s12442_s3 + $0x3e0] sm:$0xff] }
 0x6de   :  { %5981 = vmatpush.bf16.msrb.mxu3 %v8816_v7  ;;  %v8857_v7 = vld [vmem:[%s12442_s3 + $0x3d8] sm:$0xff] }
 0x6e2   :  { %5982 = vmatpush.bf16.msrb.mxu3 %v8815_v54 }
 0x6e6   :  { %5983 = vmatpush.bf16.msrb.mxu3 %v8814_v50  ;;  %v8855_v50 = vld [vmem:[%s12442_s3 + $0x3c8] sm:$0xff] }
 0x6e9   :  { %5984 = vmatmul.bf16.vlgmr.msrb.gmra.mxu3 %v4256_v42  ;;  %v4236_v42 = vld [vmem:[#allocation2 + $0x78] sm:$0xff] }
 0x6ea   :  { %5989 = vmatpush.bf16.msra.mxu3 %v8829_v25 }
 0x6ec   :  { %v5933_v2 = vpop.f32.mrf.mxu3 }
 0x6ed   :  { %v5934_v55 = vadd.f32 %v5933_v2, %v5921_v27  ;;  %v8864_v2 = vld [vmem:[%s12442_s3 + $0x410] sm:$0xff] }
 0x6ee   :  { %5990 = vmatpush.bf16.msra.mxu3 %v8828_v38  ;;  %v4261_v38 = vpack.c.bf16 %v4236_v42, %v4236_v42  ;;  %v8909_v42 = vld [vmem:[%s12442_s3 + $0x578] sm:$0xff] }
 0x6f2   :  { %5991 = vmatpush.bf16.msra.mxu3 %v8827_v17  ;;  %v8868_v17 = vld [vmem:[%s12442_s3 + $0x430] sm:$0xff] }
 0x6f4   :  { %v5935_v1 = vpop.f32.mrf.mxu3 }
 0x6f5   :  { %v8862_v1 = vld [vmem:[%s12442_s3 + $0x400] sm:$0xff] }
 0x6f6   :  { %5992 = vmatpush.bf16.msra.mxu3 %v8826_v20  ;;  %v8867_v20 = vld [vmem:[%s12442_s3 + $0x428] sm:$0xff] }
 0x6fa   :  { %5993 = vmatpush.bf16.msra.mxu3 %v8825_v32  ;;  %v8866_v32 = vld [vmem:[%s12442_s3 + $0x420] sm:$0xff] }
 0x6fe   :  { %5994 = vmatpush.bf16.msra.mxu3 %v8824_v18  ;;  %v8865_v18 = vld [vmem:[%s12442_s3 + $0x418] sm:$0xff] }
 0x702   :  { %5995 = vmatpush.bf16.msra.mxu3 %v8823_v26 }
 0x706   :  { %5996 = vmatpush.bf16.msra.mxu3 %v8822_v30  ;;  %v8863_v30 = vld [vmem:[%s12442_s3 + $0x408] sm:$0xff] }
 0x709   :  { %5997 = vmatmul.bf16.vlgmr.msra.gmra.mxu3 %v4257_v60  ;;  %v4237_v60 = vld [vmem:[#allocation2 + $0x80] sm:$0xff] }
 0x70a   :  { %6002 = vmatpush.bf16.msrb.mxu3 %v8837_v29 }
 0x70c   :  { %v5946_v31 = vpop.f32.mrf.mxu3 }
 0x70d   :  { %v5947_v52 = vadd.f32 %v5946_v31, %v5934_v55  ;;  %v8872_v31 = vld [vmem:[%s12442_s3 + $0x450] sm:$0xff] }
 0x70e   :  { %6003 = vmatpush.bf16.msrb.mxu3 %v8836_v9  ;;  %v4262_v9 = vpack.c.bf16 %v4237_v60, %v4237_v60  ;;  %v8917_v60 = vld [vmem:[%s12442_s3 + $0x5b8] sm:$0xff] }
 0x712   :  { %6004 = vmatpush.bf16.msrb.mxu3 %v8835_v47  ;;  %v8876_v47 = vld [vmem:[%s12442_s3 + $0x470] sm:$0xff] }
 0x714   :  { %v5948_v56 = vpop.f32.mrf.mxu3 }
 0x715   :  { %v8870_v56 = vld [vmem:[%s12442_s3 + $0x440] sm:$0xff] }
 0x716   :  { %6005 = vmatpush.bf16.msrb.mxu3 %v8834_v45  ;;  %v8875_v45 = vld [vmem:[%s12442_s3 + $0x468] sm:$0xff] }
 0x71a   :  { %6006 = vmatpush.bf16.msrb.mxu3 %v8833_v37  ;;  %v8874_v37 = vld [vmem:[%s12442_s3 + $0x460] sm:$0xff] }
 0x71e   :  { %6007 = vmatpush.bf16.msrb.mxu3 %v8832_v28  ;;  %v8873_v28 = vld [vmem:[%s12442_s3 + $0x458] sm:$0xff] }
 0x722   :  { %6008 = vmatpush.bf16.msrb.mxu3 %v8831_v33 }
 0x726   :  { %6009 = vmatpush.bf16.msrb.mxu3 %v8830_v58  ;;  %v8871_v58 = vld [vmem:[%s12442_s3 + $0x448] sm:$0xff] }
 0x729   :  { %6010 = vmatmul.bf16.vlgmr.msrb.gmra.mxu3 %v4258_v46  ;;  %v4238_v46 = vld [vmem:[#allocation2 + $0x88] sm:$0xff] }
 0x72a   :  { %6015 = vmatpush.bf16.msra.mxu3 %v8845_v19 }
 0x72c   :  { %v5959_v59 = vpop.f32.mrf.mxu3 }
 0x72d   :  { %v5960_v62 = vadd.f32 %v5959_v59, %v5947_v52  ;;  %v8880_v59 = vld [vmem:[%s12442_s3 + $0x490] sm:$0xff] }
 0x72e   :  { %6016 = vmatpush.bf16.msra.mxu3 %v8844_v21  ;;  %v4263_v21 = vpack.c.bf16 %v4238_v46, %v4238_v46  ;;  %v8925_v46 = vld [vmem:[%s12442_s3 + $0x5f8] sm:$0xff] }
 0x732   :  { %6017 = vmatpush.bf16.msra.mxu3 %v8843_v40  ;;  %v8884_v40 = vld [vmem:[%s12442_s3 + $0x4b0] sm:$0xff] }
 0x734   :  { %v5961_v10 = vpop.f32.mrf.mxu3 }
 0x735   :  { %v8878_v10 = vld [vmem:[%s12442_s3 + $0x480] sm:$0xff] }
 0x736   :  { %6018 = vmatpush.bf16.msra.mxu3 %v8842_v24  ;;  %v8883_v24 = vld [vmem:[%s12442_s3 + $0x4a8] sm:$0xff] }
 0x73a   :  { %6019 = vmatpush.bf16.msra.mxu3 %v8841_v15  ;;  %v8882_v15 = vld [vmem:[%s12442_s3 + $0x4a0] sm:$0xff] }
 0x73e   :  { %6020 = vmatpush.bf16.msra.mxu3 %v8840_v11  ;;  %v8881_v11 = vld [vmem:[%s12442_s3 + $0x498] sm:$0xff] }
 0x742   :  { %6021 = vmatpush.bf16.msra.mxu3 %v8839_v34 }
 0x746   :  { %6022 = vmatpush.bf16.msra.mxu3 %v8838_v22  ;;  %v8879_v22 = vld [vmem:[%s12442_s3 + $0x488] sm:$0xff] }
 0x749   :  { %6023 = vmatmul.bf16.vlgmr.msra.gmra.mxu3 %v4259_v61  ;;  %v4239_v61 = vld [vmem:[#allocation2 + $0x90] sm:$0xff] }
 0x74a   :  { %6028 = vmatpush.bf16.msrb.mxu3 %v8853_v39 }
 0x74c   :  { %v5972_v35 = vpop.f32.mrf.mxu3 }
 0x74d   :  { %v5973_v4 = vadd.f32 %v5972_v35, %v5960_v62  ;;  %v8888_v35 = vld [vmem:[%s12442_s3 + $0x4d0] sm:$0xff] }
 0x74e   :  { %6029 = vmatpush.bf16.msrb.mxu3 %v8852_v63  ;;  %v4264_v63 = vpack.c.bf16 %v4239_v61, %v4239_v61  ;;  %v8929_v61 = vld [vmem:[%s12442_s3 + $0x618] sm:$0xff] }
 0x752   :  { %6030 = vmatpush.bf16.msrb.mxu3 %v8851_v44  ;;  %v8892_v44 = vld [vmem:[%s12442_s3 + $0x4f0] sm:$0xff] }
 0x754   :  { %v5974_v16 = vpop.f32.mrf.mxu3 }
 0x755   :  { %v8886_v16 = vld [vmem:[%s12442_s3 + $0x4c0] sm:$0xff] }
 0x756   :  { %6031 = vmatpush.bf16.msrb.mxu3 %v8850_v12  ;;  %v8891_v12 = vld [vmem:[%s12442_s3 + $0x4e8] sm:$0xff] }
 0x75a   :  { %6032 = vmatpush.bf16.msrb.mxu3 %v8849_v48  ;;  %v8890_v48 = vld [vmem:[%s12442_s3 + $0x4e0] sm:$0xff] }
 0x75e   :  { %6033 = vmatpush.bf16.msrb.mxu3 %v8848_v53  ;;  %v8889_v53 = vld [vmem:[%s12442_s3 + $0x4d8] sm:$0xff] }
 0x762   :  { %6034 = vmatpush.bf16.msrb.mxu3 %v8847_v14 }
 0x766   :  { %6035 = vmatpush.bf16.msrb.mxu3 %v8846_v36  ;;  %v8887_v36 = vld [vmem:[%s12442_s3 + $0x4c8] sm:$0xff] }
 0x769   :  { %6036 = vmatmul.bf16.vlgmr.msrb.gmra.mxu3 %v4260_v8  ;;  %v4240_v8 = vld [vmem:[#allocation2 + $0x98] sm:$0xff] }
 0x76a   :  { %6041 = vmatpush.bf16.msra.mxu3 %v8861_v0 }
 0x76c   :  { %v5985_v27 = vpop.f32.mrf.mxu3 }
 0x76d   :  { %v5986_v54 = vadd.f32 %v5985_v27, %v5973_v4  ;;  %v8896_v27 = vld [vmem:[%s12442_s3 + $0x510] sm:$0xff] }
 0x76e   :  { %6042 = vmatpush.bf16.msra.mxu3 %v8860_v57  ;;  %v4265_v57 = vpack.c.bf16 %v4240_v8, %v4240_v8 }
 0x772   :  { %6043 = vmatpush.bf16.msra.mxu3 %v8859_v51  ;;  %v8900_v51 = vld [vmem:[%s12442_s3 + $0x530] sm:$0xff] }
 0x774   :  { %v5987_v25 = vpop.f32.mrf.mxu3 }
 0x775   :  { %v8894_v25 = vld [vmem:[%s12442_s3 + $0x500] sm:$0xff] }
 0x776   :  { %6044 = vmatpush.bf16.msra.mxu3 %v8858_v49  ;;  %v8899_v49 = vld [vmem:[%s12442_s3 + $0x528] sm:$0xff] }
 0x77a   :  { %6045 = vmatpush.bf16.msra.mxu3 %v8857_v7  ;;  %v8898_v7 = vld [vmem:[%s12442_s3 + $0x520] sm:$0xff] }
 0x77e   :  { %6046 = vmatpush.bf16.msra.mxu3 %v8856_v6  ;;  %v8897_v6 = vld [vmem:[%s12442_s3 + $0x518] sm:$0xff] }
 0x782   :  { %6047 = vmatpush.bf16.msra.mxu3 %v8855_v50 }
 0x786   :  { %6048 = vmatpush.bf16.msra.mxu3 %v8854_v41  ;;  %v8895_v41 = vld [vmem:[%s12442_s3 + $0x508] sm:$0xff] }
 0x789   :  { %6049 = vmatmul.bf16.vlgmr.msra.gmra.mxu3 %v4261_v38  ;;  %v4241_v38 = vld [vmem:[#allocation2 + $0xa0] sm:$0xff] }
 0x78a   :  { %6054 = vmatpush.bf16.msrb.mxu3 %v8869_v5 }
 0x78c   :  { %v5998_v55 = vpop.f32.mrf.mxu3 }
 0x78d   :  { %v5999_v26 = vadd.f32 %v5998_v55, %v5986_v54  ;;  %v8904_v55 = vld [vmem:[%s12442_s3 + $0x550] sm:$0xff] }
 0x78e   :  { %6055 = vmatpush.bf16.msrb.mxu3 %v8868_v17  ;;  %v4266_v17 = vpack.c.bf16 %v4241_v38, %v4241_v38  ;;  %v8930_v38 = vld [vmem:[%s12445_s5] sm:$0xff] }
 0x792   :  { %6056 = vmatpush.bf16.msrb.mxu3 %v8867_v20  ;;  %v8908_v20 = vld [vmem:[%s12442_s3 + $0x570] sm:$0xff] }
 0x794   :  { %v6000_v29 = vpop.f32.mrf.mxu3 }
 0x795   :  { %v8902_v29 = vld [vmem:[%s12442_s3 + $0x540] sm:$0xff] }
 0x796   :  { %6057 = vmatpush.bf16.msrb.mxu3 %v8866_v32  ;;  %v8907_v32 = vld [vmem:[%s12442_s3 + $0x568] sm:$0xff] }
 0x79a   :  { %6058 = vmatpush.bf16.msrb.mxu3 %v8865_v18  ;;  %v8906_v18 = vld [vmem:[%s12442_s3 + $0x560] sm:$0xff] }
 0x79e   :  { %6059 = vmatpush.bf16.msrb.mxu3 %v8864_v2  ;;  %v8905_v2 = vld [vmem:[%s12442_s3 + $0x558] sm:$0xff] }
 0x7a2   :  { %6060 = vmatpush.bf16.msrb.mxu3 %v8863_v30 }
 0x7a6   :  { %6061 = vmatpush.bf16.msrb.mxu3 %v8862_v1  ;;  %v8903_v1 = vld [vmem:[%s12442_s3 + $0x548] sm:$0xff] }
 0x7a9   :  { %6062 = vmatmul.bf16.vlgmr.msrb.gmra.mxu3 %v4262_v9  ;;  %v4242_v9 = vld [vmem:[#allocation2 + $0xa8] sm:$0xff] }
 0x7aa   :  { %6067 = vmatpush.bf16.msra.mxu3 %v8877_v23 }
 0x7ac   :  { %v6011_v52 = vpop.f32.mrf.mxu3 }
 0x7ad   :  { %v6012_v33 = vadd.f32 %v6011_v52, %v5999_v26  ;;  %v8912_v52 = vld [vmem:[%s12442_s3 + $0x590] sm:$0xff] }
 0x7ae   :  { %6068 = vmatpush.bf16.msra.mxu3 %v8876_v47  ;;  %v4267_v47 = vpack.c.bf16 %v4242_v9, %v4242_v9 }
 0x7b2   :  { %6069 = vmatpush.bf16.msra.mxu3 %v8875_v45  ;;  %v8916_v45 = vld [vmem:[%s12442_s3 + $0x5b0] sm:$0xff] }
 0x7b4   :  { %v6013_v19 = vpop.f32.mrf.mxu3 }
 0x7b5   :  { %v8910_v19 = vld [vmem:[%s12442_s3 + $0x580] sm:$0xff] }
 0x7b6   :  { %6070 = vmatpush.bf16.msra.mxu3 %v8874_v37  ;;  %v8915_v37 = vld [vmem:[%s12442_s3 + $0x5a8] sm:$0xff] }
 0x7ba   :  { %6071 = vmatpush.bf16.msra.mxu3 %v8873_v28  ;;  %v8914_v28 = vld [vmem:[%s12442_s3 + $0x5a0] sm:$0xff] }
 0x7be   :  { %6072 = vmatpush.bf16.msra.mxu3 %v8872_v31  ;;  %v8913_v31 = vld [vmem:[%s12442_s3 + $0x598] sm:$0xff] }
 0x7c2   :  { %6073 = vmatpush.bf16.msra.mxu3 %v8871_v58 }
 0x7c6   :  { %6074 = vmatpush.bf16.msra.mxu3 %v8870_v56  ;;  %v8911_v56 = vld [vmem:[%s12442_s3 + $0x588] sm:$0xff] }
 0x7c9   :  { %6075 = vmatmul.bf16.vlgmr.msra.gmra.mxu3 %v4263_v21  ;;  %v4243_v21 = vld [vmem:[#allocation2 + $0xb0] sm:$0xff] }
 0x7ca   :  { %6080 = vmatpush.bf16.msrb.mxu3 %v8885_v13 }
 0x7cc   :  { %v6024_v62 = vpop.f32.mrf.mxu3 }
 0x7cd   :  { %v6025_v34 = vadd.f32 %v6024_v62, %v6012_v33  ;;  %v8920_v62 = vld [vmem:[%s12442_s3 + $0x5d0] sm:$0xff] }
 0x7ce   :  { %6081 = vmatpush.bf16.msrb.mxu3 %v8884_v40  ;;  %v4268_v40 = vpack.c.bf16 %v4243_v21, %v4243_v21 }
 0x7d2   :  { %6082 = vmatpush.bf16.msrb.mxu3 %v8883_v24  ;;  %v8924_v24 = vld [vmem:[%s12442_s3 + $0x5f0] sm:$0xff] }
 0x7d4   :  { %v6026_v39 = vpop.f32.mrf.mxu3 }
 0x7d5   :  { %v8918_v39 = vld [vmem:[%s12442_s3 + $0x5c0] sm:$0xff] }
 0x7d6   :  { %6083 = vmatpush.bf16.msrb.mxu3 %v8882_v15  ;;  %v8923_v15 = vld [vmem:[%s12442_s3 + $0x5e8] sm:$0xff] }
 0x7da   :  { %6084 = vmatpush.bf16.msrb.mxu3 %v8881_v11  ;;  %v8922_v11 = vld [vmem:[%s12442_s3 + $0x5e0] sm:$0xff] }
 0x7de   :  { %6085 = vmatpush.bf16.msrb.mxu3 %v8880_v59  ;;  %v8921_v59 = vld [vmem:[%s12442_s3 + $0x5d8] sm:$0xff] }
 0x7e2   :  { %6086 = vmatpush.bf16.msrb.mxu3 %v8879_v22 }
 0x7e6   :  { %6087 = vmatpush.bf16.msrb.mxu3 %v8878_v10  ;;  %v8919_v10 = vld [vmem:[%s12442_s3 + $0x5c8] sm:$0xff] }
 0x7e9   :  { %6088 = vmatmul.bf16.vlgmr.msrb.gmra.mxu3 %v4264_v63  ;;  %v4244_v63 = vld [vmem:[#allocation2 + $0xb8] sm:$0xff] }
 0x7ea   :  { %6093 = vmatpush.bf16.msra.mxu3 %v8893_v43 }
 0x7ec   :  { %v6037_v4 = vpop.f32.mrf.mxu3 }
 0x7ed   :  { %v6038_v14 = vadd.f32 %v6037_v4, %v6025_v34 }
 0x7ee   :  { %6094 = vmatpush.bf16.msra.mxu3 %v8892_v44  ;;  %v4269_v44 = vpack.c.bf16 %v4244_v63, %v4244_v63 }
 0x7f2   :  { %6095 = vmatpush.bf16.msra.mxu3 %v8891_v12  ;;  %v8928_v12 = vld [vmem:[%s12442_s3 + $0x610] sm:$0xff] }
 0x7f4   :  { %v6039_v0 = vpop.f32.mrf.mxu3 }
 0x7f6   :  { %6096 = vmatpush.bf16.msra.mxu3 %v8890_v48  ;;  %v8927_v48 = vld [vmem:[%s12442_s3 + $0x608] sm:$0xff] }
 0x7fa   :  { %6097 = vmatpush.bf16.msra.mxu3 %v8889_v53  ;;  %v8926_v53 = vld [vmem:[%s12442_s3 + $0x600] sm:$0xff] }
 0x7fe   :  { %6098 = vmatpush.bf16.msra.mxu3 %v8888_v35  ;;  %v4245_v35 = vld [vmem:[#allocation2 + $0xc0] sm:$0xff] }
 0x7ff   :  { %v4270_v4 = vpack.c.bf16 %v4245_v35, %v4245_v35 }
 0x802   :  { %6099 = vmatpush.bf16.msra.mxu3 %v8887_v36 }
 0x806   :  { %6100 = vmatpush.bf16.msra.mxu3 %v8886_v16 }
 0x809   :  { %6101 = vmatmul.bf16.vlgmr.msra.gmra.mxu3 %v4265_v57 }
 0x80a   :  { %6106 = vmatpush.bf16.msrb.mxu3 %v8901_v3 }
 0x80c   :  { %v6050_v54 = vpop.f32.mrf.mxu3 }
 0x80d   :  { %v6051_v50 = vadd.f32 %v6050_v54, %v6038_v14  ;;  %v8934_v54 = vld [vmem:[%s12445_s5 + $0x20] sm:$0xff] }
 0x80e   :  { %6107 = vmatpush.bf16.msrb.mxu3 %v8900_v51 }
 0x812   :  { %6108 = vmatpush.bf16.msrb.mxu3 %v8899_v49  ;;  %v8937_v49 = vld [vmem:[%s12445_s5 + $0x38] sm:$0xff] }
 0x814   :  { %v6052_v5 = vpop.f32.mrf.mxu3 }
 0x816   :  { %6109 = vmatpush.bf16.msrb.mxu3 %v8898_v7  ;;  %v8936_v7 = vld [vmem:[%s12445_s5 + $0x30] sm:$0xff] }
 0x81a   :  { %6110 = vmatpush.bf16.msrb.mxu3 %v8897_v6 }
 0x81e   :  { %6111 = vmatpush.bf16.msrb.mxu3 %v8896_v27  ;;  %v8935_v27 = vld [vmem:[%s12445_s5 + $0x28] sm:$0xff] }
 0x822   :  { %6112 = vmatpush.bf16.msrb.mxu3 %v8895_v41  ;;  %v8933_v41 = vld [vmem:[%s12445_s5 + $0x18] sm:$0xff] }
 0x826   :  { %6113 = vmatpush.bf16.msrb.mxu3 %v8894_v25  ;;  %v8932_v25 = vld [vmem:[%s12445_s5 + $0x10] sm:$0xff] }
 0x829   :  { %6114 = vmatmul.bf16.vlgmr.msrb.gmra.mxu3 %v4266_v17 }
 0x82a   :  { %6119 = vmatpush.bf16.msra.mxu3 %v8909_v42  ;;  %v8931_v42 = vld [vmem:[%s12445_s5 + $0x8] sm:$0xff] }
 0x82c   :  { %v6063_v26 = vpop.f32.mrf.mxu3 }
 0x82d   :  { %v6064_v30 = vadd.f32 %v6063_v26, %v6051_v50 }
 0x82e   :  { %6120 = vmatpush.bf16.msra.mxu3 %v8908_v20 }
 0x832   :  { %6121 = vmatpush.bf16.msra.mxu3 %v8907_v32 }
 0x834   :  { %v6065_v23 = vpop.f32.mrf.mxu3 }
 0x836   :  { %6122 = vmatpush.bf16.msra.mxu3 %v8906_v18 }
 0x83a   :  { %6123 = vmatpush.bf16.msra.mxu3 %v8905_v2 }
 0x83e   :  { %6124 = vmatpush.bf16.msra.mxu3 %v8904_v55 }
 0x842   :  { %6125 = vmatpush.bf16.msra.mxu3 %v8903_v1 }
 0x846   :  { %6126 = vmatpush.bf16.msra.mxu3 %v8902_v29  ;;  %v8959_v29 = vld [vmem:[%s12444_s6] ss:$0 sm:$0xff] }
 0x849   :  { %6127 = vmatmul.bf16.vlgmr.msra.gmra.mxu3 %v4267_v47 }
 0x84a   :  { %6132 = vmatpush.bf16.msrb.mxu3 %v8917_v60 }
 0x84c   :  { %v6076_v33 = vpop.f32.mrf.mxu3 }
 0x84d   :  { %v6077_v58 = vadd.f32 %v6076_v33, %v6064_v30 }
 0x84e   :  { %6133 = vmatpush.bf16.msrb.mxu3 %v8916_v45 }
 0x852   :  { %6134 = vmatpush.bf16.msrb.mxu3 %v8915_v37 }
 0x854   :  { %v6078_v13 = vpop.f32.mrf.mxu3 }
 0x856   :  { %6135 = vmatpush.bf16.msrb.mxu3 %v8914_v28 }
 0x85a   :  { %6136 = vmatpush.bf16.msrb.mxu3 %v8913_v31 }
 0x85e   :  { %6137 = vmatpush.bf16.msrb.mxu3 %v8912_v52 }
 0x862   :  { %6138 = vmatpush.bf16.msrb.mxu3 %v8911_v56 }
 0x866   :  { %6139 = vmatpush.bf16.msrb.mxu3 %v8910_v19 }
 0x869   :  { %6140 = vmatmul.bf16.vlgmr.msrb.gmra.mxu3 %v4268_v40 }
 0x86a   :  { %6145 = vmatpush.bf16.msra.mxu3 %v8925_v46 }
 0x86c   :  { %v6089_v34 = vpop.f32.mrf.mxu3 }
 0x86d   :  { %v6090_v22 = vadd.f32 %v6089_v34, %v6077_v58 }
 0x86e   :  { %6146 = vmatpush.bf16.msra.mxu3 %v8924_v24 }
 0x872   :  { %6147 = vmatpush.bf16.msra.mxu3 %v8923_v15 }
 0x874   :  { %v6091_v43 = vpop.f32.mrf.mxu3 }
 0x876   :  { %6148 = vmatpush.bf16.msra.mxu3 %v8922_v11 }
 0x87a   :  { %6149 = vmatpush.bf16.msra.mxu3 %v8921_v59 }
 0x87e   :  { %6150 = vmatpush.bf16.msra.mxu3 %v8920_v62 }
 0x882   :  { %6151 = vmatpush.bf16.msra.mxu3 %v8919_v10 }
 0x886   :  { %6152 = vmatpush.bf16.msra.mxu3 %v8918_v39 }
 0x889   :  { %6153 = vmatmul.bf16.vlgmr.msra.gmra.mxu3 %v4269_v44 }
 0x88a   :  { %6162 = vmatpush.bf16.msrb.mxu3 %v8929_v61 }
 0x88c   :  { %v6102_v14 = vpop.f32.mrf.mxu3 }
 0x88d   :  { %v6103_v36 = vadd.f32 %v6102_v14, %v6090_v22 }
 0x88e   :  { %6163 = vmatpush.bf16.msrb.mxu3 %v8928_v12 }
 0x892   :  { %6164 = vmatpush.bf16.msrb.mxu3 %v8927_v48 }
 0x894   :  { %v6104_v16 = vpop.f32.mrf.mxu3 }
 0x896   :  { %6165 = vmatpush.bf16.msrb.mxu3 %v8926_v53 }
 0x899   :  { %8389 = vmatmul.msk.bf16.vlgmr.msrb.gmra.mxu3 %vm4074_vm1, %v4270_v4 }
 0x89a   :  { %6241 = vmatpush.bf16.msra.mxu3 %v8937_v49 }
 0x89e   :  { %6242 = vmatpush.bf16.msra.mxu3 %v8936_v7 }
 0x8a2   :  { %6243 = vmatpush.bf16.msra.mxu3 %v8935_v27 }
 0x8a6   :  { %6244 = vmatpush.bf16.msra.mxu3 %v8934_v54 }
 0x8aa   :  { %6245 = vmatpush.bf16.msra.mxu3 %v8933_v41 }
 0x8ac   :  { %v6115_v0 = vpop.f32.mrf.mxu3 }
 0x8ad   :  { %v6116_v3 = vadd.f32 %v6115_v0, %v6103_v36 }
 0x8ae   :  { %6246 = vmatpush.bf16.msra.mxu3 %v8932_v25 }
 0x8b2   :  { %6247 = vmatpush.bf16.msra.mxu3 %v8931_v42 }
 0x8b4   :  { %v6117_v8 = vpop.f32.mrf.mxu3 }
 0x8b6   :  { %6248 = vmatpush.bf16.msra.mxu3 %v8930_v38 }
 0x8cc   :  { %v6128_v57 = vpop.f32.mrf.mxu3 }
 0x8cd   :  { %v6129_v51 = vadd.f32 %v6128_v57, %v6116_v3 }
 0x8d4   :  { %v6130_v6 = vpop.f32.mrf.mxu3 }
 0x8ec   :  { %v6141_v50 = vpop.f32.mrf.mxu3 }
 0x8ed   :  { %v6142_v32 = vadd.f32 %v6141_v50, %v6129_v51 }
 0x8f4   :  { %v6143_v5 = vpop.f32.mrf.mxu3 }
 0x90c   :  { %v6154_v17 = vpop.f32.mrf.mxu3 }
 0x90d   :  { %v6155_v18 = vadd.f32 %v6154_v17, %v6142_v32 }
 0x914   :  { %v6156_v20 = vpop.f32.mrf.mxu3 }
 0x91c   :  { %v6167_v2 = vpop.f32.mrf.mxu3 }
 0x91d   :  { %v6168_v55 = vadd.f32 %v6167_v2, %v6155_v18 }
 0x91f   :  { %v6171_v26 = vmax.f32 %v6168_v55, 0.0 }
 0x921   :  { %v6172_v30 = vpack.c.bf16 %v6171_v26, %v6171_v26 }
 0x923   :  { %6249 = vmatmul.bf16.vlgmr.msra.gmra.mxu3 %v6172_v30 }
 0x924   :  { %v6169_v1 = vpop.f32.mrf.mxu3 }
 0x9a6   :  { %v6250_v23 = vpop.f32.mrf.mxu3 }
 0x9a7   :  { %v6251_v60 = vadd.f32 %v8959_v29, %v6250_v23 }
 0x9a9   :  { %6254 = vst [vmem:[%s12446_s7] sm:$0xff] %v6251_v60 }
 0x9ae   :  { %v6252_v9 = vpop.f32.mrf.mxu3 }

</bundles_post_ra>
